<compile_context>
chip_gen: v5e
topology: v5e:2x2
jax: 0.10.0
libtpu: 0.0.40
codegen_flags: <defaults>
</compile_context>

<pallas_src>
import numpy as np
import jax
import jax.numpy as jnp
from jax import lax
from jax.experimental import pallas as pl
from jax.experimental.pallas import tpu as pltpu


# ~48 MiB: safely under v7x's 64 MiB physical VMEM, well above the 16 MiB
# scoped default on v5e (v5e/v6e could go higher, but this is safe everywhere).
VMEM_LIMIT_BYTES = 48 * 1024 * 1024


# ----------------------------------------------------------------------------
# Kernel 1: fused conv tower (conv3x3 -> ReLU -> conv3x3 -> ReLU)
# ----------------------------------------------------------------------------
def tower_kernel(x_ref, w1_ref, b1_ref, w2_ref, b2_ref, h2_ref,
                 xpad_ref, h1pad_ref):
    # x_ref    : (1, B, H, W, 1)    raw single-channel grid (no channel pad)
    # w1_ref   : (1, 9, 32)         conv1 taps, tap-major (dy, dx)
    # b1_ref   : (1, 1, 32)
    # w2_ref   : (1, 9, 32, 64)     conv2 taps, tap-major
    # b2_ref   : (1, 1, 64)
    # h2_ref   : (1, B*H*W, 64)     bf16 output, rows ordered b*H*W + h*W + w
    # xpad_ref : (B, H+2, W+2, 1)   f32 halo scratch for conv1
    # h1pad_ref: (B, H+2, W+2, 32)  f32 halo scratch for conv2
    f32 = jnp.float32
    B, Hp, Wp, _ = xpad_ref.shape
    H, W = Hp - 2, Wp - 2
    C1 = h1pad_ref.shape[-1]
    C2 = h2_ref.shape[-1]
    BHW = B * H * W
    taps = [(dy, dx) for dy in range(3) for dx in range(3)]

    # ---- conv1: 9 VPU broadcast-FMAs (no MXU, no channel pad, no slab) -----
    # zero only the 1-pixel halo border; the interior is overwritten below.
    xpad_ref[:, 0:1, :, :] = jnp.zeros((B, 1, Wp, 1), f32)
    xpad_ref[:, Hp - 1:Hp, :, :] = jnp.zeros((B, 1, Wp, 1), f32)
    xpad_ref[:, :, 0:1, :] = jnp.zeros((B, Hp, 1, 1), f32)
    xpad_ref[:, :, Wp - 1:Wp, :] = jnp.zeros((B, Hp, 1, 1), f32)
    xpad_ref[:, 1:H + 1, 1:W + 1, :] = x_ref[0]

    h1 = jnp.zeros((B, H, W, C1), f32) + b1_ref[0, 0]
    for t, (dy, dx) in enumerate(taps):
        # (B,H,W,1) shifted window * (32,) tap weights -> (B,H,W,32) FMA
        h1 = h1 + xpad_ref[:, dy:dy + H, dx:dx + W, :] * w1_ref[0, t]
    h1 = jnp.maximum(h1, 0.0)

    # ---- conv2: 9 accumulated (BHW,32)x(32,64) MXU matmuls -----------------
    h1pad_ref[:, 0:1, :, :] = jnp.zeros((B, 1, Wp, C1), f32)
    h1pad_ref[:, Hp - 1:Hp, :, :] = jnp.zeros((B, 1, Wp, C1), f32)
    h1pad_ref[:, :, 0:1, :] = jnp.zeros((B, Hp, 1, C1), f32)
    h1pad_ref[:, :, Wp - 1:Wp, :] = jnp.zeros((B, Hp, 1, C1), f32)
    h1pad_ref[:, 1:H + 1, 1:W + 1, :] = h1

    acc = jnp.zeros((BHW, C2), f32)
    # TODO(synk): switch to lax.fori_loop(..., unroll=True) over taps if BHW
    # ever grows large enough for live-range / register-pressure issues.
    for t, (dy, dx) in enumerate(taps):
        win = h1pad_ref[:, dy:dy + H, dx:dx + W, :].reshape(BHW, C1)
        acc = acc + jnp.dot(win, w2_ref[0, t], preferred_element_type=f32)
    h2 = jnp.maximum(acc + b2_ref[0], 0.0)
    # bf16 writeback halves the HBM round trip to the flatten-FC kernel.
    h2_ref[0] = h2.astype(h2_ref.dtype)


def conv_towers(x, w1, b1, w2, b2):
    _, B, H, W, _ = x.shape
    BHW = B * H * W
    return pl.pallas_call(
        tower_kernel,
        out_shape=jax.ShapeDtypeStruct((2, BHW, 64), jnp.bfloat16),
        grid=(2,),
        in_specs=[
            pl.BlockSpec((1, B, H, W, 1), lambda t: (t, 0, 0, 0, 0)),
            pl.BlockSpec((1, 9, 32), lambda t: (t, 0, 0)),
            pl.BlockSpec((1, 1, 32), lambda t: (t, 0, 0)),
            pl.BlockSpec((1, 9, 32, 64), lambda t: (t, 0, 0, 0)),
            pl.BlockSpec((1, 1, 64), lambda t: (t, 0, 0)),
        ],
        out_specs=pl.BlockSpec((1, BHW, 64), lambda t: (t, 0, 0)),
        scratch_shapes=[
            pltpu.VMEM((B, H + 2, W + 2, 1), jnp.float32),
            pltpu.VMEM((B, H + 2, W + 2, 32), jnp.float32),
        ],
        compiler_params=pltpu.CompilerParams(
            dimension_semantics=("parallel",),
            vmem_limit_bytes=VMEM_LIMIT_BYTES),
    )(x, w1, b1, w2, b2)


# ----------------------------------------------------------------------------
# Kernel 2: K-tiled flatten-FC of each tower  feats = relu(h2_flat @ Wf + bf)
# ----------------------------------------------------------------------------
def flatten_fc_kernel(h2f_ref, wf_ref, bf_ref, o_ref):
    # h2f_ref: (1, B, TK)   bf16 K-tile of the flattened tower activations
    # wf_ref : (1, TK, 256) bf16 matching K-tile of the (pre-permuted) weight
    # bf_ref : (1, 1, 256)  f32
    # o_ref  : (1, B, 256)  f32, resident accumulator across the K axis
    k = pl.program_id(1)

    @pl.when(k == 0)
    def _():
        o_ref[...] = jnp.zeros_like(o_ref)

    o_ref[0] += jnp.dot(h2f_ref[0], wf_ref[0],
                        preferred_element_type=jnp.float32)

    @pl.when(k == pl.num_programs(1) - 1)
    def _():
        o_ref[0] = jnp.maximum(o_ref[0] + bf_ref[0], 0.0)


def _choose_ktile(k_total, max_tile=2048):
    """Largest multiple-of-128 divisor of k_total (<= max_tile); falls back to
    the full K (single tile) when none exists (e.g. odd H*W)."""
    start = min(max_tile, k_total) // 128 * 128
    for tk in range(start, 127, -128):
        if k_total % tk == 0:
            return tk
    return k_total


def flatten_fc(h2f, wf, bf):
    _, B, K = h2f.shape
    tk = _choose_ktile(K)
    nk = K // tk
    return pl.pallas_call(
        flatten_fc_kernel,
        out_shape=jax.ShapeDtypeStruct((2, B, 256), jnp.float32),
        grid=(2, nk),
        in_specs=[
            pl.BlockSpec((1, B, tk), lambda t, k: (t, 0, k)),
            pl.BlockSpec((1, tk, 256), lambda t, k: (t, k, 0)),
            pl.BlockSpec((1, 1, 256), lambda t, k: (t, 0, 0)),
        ],
        out_specs=pl.BlockSpec((1, B, 256), lambda t, k: (t, 0, 0)),
        compiler_params=pltpu.CompilerParams(
            dimension_semantics=("parallel", "arbitrary"),
            vmem_limit_bytes=VMEM_LIMIT_BYTES),
    )(h2f, wf, bf)


# ----------------------------------------------------------------------------
# Kernel 3: MLP tail (position net, shared net, fused actor+critic head)
# ----------------------------------------------------------------------------
def tail_kernel(feat_ref, pos_ref, wp1_ref, bp1_ref, wp2_ref, bp2_ref,
                ws1_ref, bs1_ref, ws2_ref, bs2_ref, wh_ref, bh_ref, o_ref):
    f32 = jnp.float32
    cov = feat_ref[0]                       # (B, 256)
    wal = feat_ref[1]                       # (B, 256)
    F = cov.shape[-1]

    # position net: K=3 first layer on the VPU (no pad, no tiny matmul)
    p = bp1_ref[...]
    for c in range(pos_ref.shape[1]):
        p = p + pos_ref[:, c:c + 1] * wp1_ref[c:c + 1, :]
    p = jnp.maximum(p, 0.0)
    p = jnp.maximum(
        jnp.dot(p, wp2_ref[...], preferred_element_type=f32) + bp2_ref[...],
        0.0)                                # (B, 128)
    P = p.shape[-1]

    # shared fc1 as three row-block matmuls (replaces the concat); bf16
    # weights upcast on load, activations & accumulation stay f32.
    s = (jnp.dot(cov, ws1_ref[0:F, :].astype(f32), preferred_element_type=f32)
         + jnp.dot(wal, ws1_ref[F:2 * F, :].astype(f32),
                   preferred_element_type=f32)
         + jnp.dot(p, ws1_ref[2 * F:2 * F + P, :].astype(f32),
                   preferred_element_type=f32)
         + bs1_ref[...])
    s = jnp.maximum(s, 0.0)                 # (B, 512)
    s = jnp.maximum(
        jnp.dot(s, ws2_ref[...].astype(f32), preferred_element_type=f32)
        + bs2_ref[...], 0.0)                # (B, 256)

    # fused actor(cols 0:2) + critic(col 2) head; lane-dense 128-wide output
    o_ref[...] = jnp.dot(s, wh_ref[...], preferred_element_type=f32) + bh_ref[...]


def mlp_tail(feats, position, kp):
    B = position.shape[0]
    return pl.pallas_call(
        tail_kernel,
        out_shape=jax.ShapeDtypeStruct((B, 128), jnp.float32),
        compiler_params=pltpu.CompilerParams(
            vmem_limit_bytes=VMEM_LIMIT_BYTES),
    )(feats, position, kp["pos1_w"], kp["pos1_b"], kp["pos2_w"], kp["pos2_b"],
      kp["sh1_w"], kp["sh1_b"], kp["sh2_w"], kp["sh2_b"],
      kp["head_w"], kp["head_b"])


# ----------------------------------------------------------------------------
# Forward pass
# ----------------------------------------------------------------------------
def _actor_critic_forward(kp, coverage, walls, position):
    if coverage.ndim == 4:
        coverage = coverage[:, 0]
    if walls.ndim == 4:
        walls = walls[:, 0]
    B, H, W = coverage.shape

    x = jnp.stack([coverage, walls], axis=0)[..., None]       # (2, B, H, W, 1)

    h2 = conv_towers(x, kp["conv1_w"], kp["conv1_b"],
                     kp["conv2_w"], kp["conv2_b"])             # (2, BHW, 64) bf16
    h2f = h2.reshape(2, B, H * W * 64)                         # free bitcast

    feats = flatten_fc(h2f, kp["fc_w"], kp["fc_b"])            # (2, B, 256) f32
    out = mlp_tail(feats, position, kp)                        # (B, 128)

    mean = out[:, 0:2]
    value = jnp.squeeze(out[:, 2:3])                           # matches .squeeze()
    std = jnp.exp(kp["log_std"]) * jnp.ones_like(mean)
    return mean, std, value


actor_critic_forward = jax.jit(_actor_critic_forward)


# ----------------------------------------------------------------------------
# Parameter init (torch-like layouts) + init-time preprocessing for the kernels
# ----------------------------------------------------------------------------
def init_raw_params(key, gx, gy):
    ks = jax.random.split(key, 12)

    def dense_p(k, fin, fout):
        k1, k2 = jax.random.split(k)
        s = 1.0 / np.sqrt(fin)
        return (jax.random.uniform(k1, (fin, fout), jnp.float32, -s, s),
                jax.random.uniform(k2, (fout,), jnp.float32, -s, s))

    def conv_p(k, cin, cout):
        k1, k2 = jax.random.split(k)
        s = 1.0 / np.sqrt(cin * 9)
        return (jax.random.uniform(k1, (3, 3, cin, cout), jnp.float32, -s, s),
                jax.random.uniform(k2, (cout,), jnp.float32, -s, s))

    return {
        "cov_conv1": conv_p(ks[0], 1, 32),
        "cov_conv2": conv_p(ks[1], 32, 64),
        "cov_fc":    dense_p(ks[2], 64 * gx * gy, 256),
        "wall_conv1": conv_p(ks[3], 1, 32),
        "wall_conv2": conv_p(ks[4], 32, 64),
        "wall_fc":    dense_p(ks[5], 64 * gx * gy, 256),
        "pos_fc1": dense_p(ks[6], 3, 128),
        "pos_fc2": dense_p(ks[7], 128, 128),
        "shared_fc1": dense_p(ks[8], 256 + 256 + 128, 512),
        "shared_fc2": dense_p(ks[9], 512, 256),
        "actor":  dense_p(ks[10], 256, 2),
        "critic": dense_p(ks[11], 256, 1),
        "log_std": jnp.zeros((2,), jnp.float32),
    }


def preprocess_params(raw, gx, gy):
    """Fold all layout work (tap-major conv weights, NCHW-flatten permutation,
    actor/critic fusion, per-tower stacking, bf16 storage) into init time."""
    HW = gx * gy

    def fc_perm(w):                           # torch NCHW-flatten -> NHWC order
        j = np.arange(HW * 64)
        perm = (j % 64) * HW + (j // 64)      # new row j <- old row c*HW + p
        return w[perm]

    wa, ba = raw["actor"]
    wc, bc = raw["critic"]
    head_w = jnp.zeros((256, 128), jnp.float32)
    head_w = head_w.at[:, 0:2].set(wa).at[:, 2:3].set(wc)
    head_b = jnp.zeros((128,), jnp.float32)
    head_b = head_b.at[0:2].set(ba).at[2:3].set(bc)

    return {
        "conv1_w": jnp.stack([raw["cov_conv1"][0].reshape(9, 32),
                              raw["wall_conv1"][0].reshape(9, 32)]),
        "conv1_b": jnp.stack([raw["cov_conv1"][1].reshape(1, 32),
                              raw["wall_conv1"][1].reshape(1, 32)]),
        "conv2_w": jnp.stack([raw["cov_conv2"][0].reshape(9, 32, 64),
                              raw["wall_conv2"][0].reshape(9, 32, 64)]),
        "conv2_b": jnp.stack([raw["cov_conv2"][1].reshape(1, 64),
                              raw["wall_conv2"][1].reshape(1, 64)]),
        # large streaming weights stored bf16 (f32 accumulation in-kernel)
        "fc_w": jnp.stack([fc_perm(raw["cov_fc"][0]),
                           fc_perm(raw["wall_fc"][0])]).astype(jnp.bfloat16),
        "fc_b": jnp.stack([raw["cov_fc"][1].reshape(1, 256),
                           raw["wall_fc"][1].reshape(1, 256)]),
        "pos1_w": raw["pos_fc1"][0],                      # (3, 128)
        "pos1_b": raw["pos_fc1"][1].reshape(1, 128),
        "pos2_w": raw["pos_fc2"][0],                      # (128, 128)
        "pos2_b": raw["pos_fc2"][1].reshape(1, 128),
        "sh1_w": raw["shared_fc1"][0].astype(jnp.bfloat16),   # (640, 512)
        "sh1_b": raw["shared_fc1"][1].reshape(1, 512),
        "sh2_w": raw["shared_fc2"][0].astype(jnp.bfloat16),   # (512, 256)
        "sh2_b": raw["shared_fc2"][1].reshape(1, 256),
        "head_w": head_w,                                 # (256, 128)
        "head_b": head_b.reshape(1, 128),
        "log_std": raw["log_std"],
    }


# ----------------------------------------------------------------------------
# Pure-JAX reference (torch-equivalent math).  bf16_weights=True mirrors the
# kernels' deliberate bf16 storage of fc/sh weights and the bf16 tower
# writeback, so the strict check isolates kernel-math correctness.
# ----------------------------------------------------------------------------
def reference_forward(raw, coverage, walls, position, *, bf16_weights=False):
    def q(w):
        return (w.astype(jnp.bfloat16).astype(jnp.float32)
                if bf16_weights else w)

    def tower(x, p1, p2, pf):
        (w1, b1), (w2, b2), (wf, bf) = p1, p2, pf
        y = x[..., None]
        y = lax.conv_general_dilated(
            y, w1, (1, 1), "SAME", dimension_numbers=("NHWC", "HWIO", "NHWC"))
        y = jax.nn.relu(y + b1)
        y = lax.conv_general_dilated(
            y, w2, (1, 1), "SAME", dimension_numbers=("NHWC", "HWIO", "NHWC"))
        y = jax.nn.relu(y + b2)
        flat = jnp.transpose(y, (0, 3, 1, 2)).reshape(x.shape[0], -1)  # NCHW flat
        if bf16_weights:   # kernel 1 writes tower activations back in bf16
            flat = flat.astype(jnp.bfloat16).astype(jnp.float32)
        return jax.nn.relu(flat @ q(wf) + bf)

    cov = tower(coverage, raw["cov_conv1"], raw["cov_conv2"], raw["cov_fc"])
    wal = tower(walls, raw["wall_conv1"], raw["wall_conv2"], raw["wall_fc"])
    p = jax.nn.relu(position @ raw["pos_fc1"][0] + raw["pos_fc1"][1])
    p = jax.nn.relu(p @ raw["pos_fc2"][0] + raw["pos_fc2"][1])
    c = jnp.concatenate([cov, wal, p], axis=-1)
    s = jax.nn.relu(c @ q(raw["shared_fc1"][0]) + raw["shared_fc1"][1])
    s = jax.nn.relu(s @ q(raw["shared_fc2"][0]) + raw["shared_fc2"][1])
    mean = s @ raw["actor"][0] + raw["actor"][1]
    std = jnp.exp(raw["log_std"]) * jnp.ones_like(mean)
    value = jnp.squeeze(s @ raw["critic"][0] + raw["critic"][1])
    return mean, std, value


# ----------------------------------------------------------------------------
if __name__ == "__main__":
    B, gx, gy = 2, 8, 8          # small grid (module is parametric in grid size)
    key = jax.random.PRNGKey(0)
    pk, ck, wk, posk = jax.random.split(key, 4)

    raw = init_raw_params(pk, gx, gy)
    kparams = preprocess_params(raw, gx, gy)

    coverage = jax.random.uniform(ck, (B, gx, gy), jnp.float32)
    walls = jax.random.uniform(wk, (B, gx, gy), jnp.float32)
    position = jax.random.uniform(posk, (B, 3), jnp.float32)

    mean, std, value = jax.block_until_ready(
        actor_critic_forward(kparams, coverage, walls, position))

    assert mean.shape == (B, 2) and std.shape == (B, 2) and value.shape == (B,)

    # strict check vs the bf16-storage-matched reference (diff = accum order)
    qmean, qstd, qvalue = reference_forward(raw, coverage, walls, position,
                                            bf16_weights=True)
    np.testing.assert_allclose(np.asarray(mean), np.asarray(qmean),
                               rtol=2e-3, atol=2e-3)
    np.testing.assert_allclose(np.asarray(std), np.asarray(qstd),
                               rtol=2e-3, atol=2e-3)
    np.testing.assert_allclose(np.asarray(value), np.asarray(qvalue),
                               rtol=2e-3, atol=2e-3)

    # sanity check vs the full-f32 reference (bounds the deliberate bf16 error)
    fmean, fstd, fvalue = reference_forward(raw, coverage, walls, position)
    np.testing.assert_allclose(np.asarray(mean), np.asarray(fmean),
                               rtol=2e-2, atol=2e-2)
    np.testing.assert_allclose(np.asarray(value), np.asarray(fvalue),
                               rtol=2e-2, atol=2e-2)

    print("KERNEL_OK")
</pallas_src>

<mosaic_0001>
module attributes {stable_mosaic.version = 11 : i64} {
  func.func @tail_kernel(%arg0: memref<2x2x256xf32, #tpu.memory_space<vmem>>, %arg1: memref<2x3xf32, #tpu.memory_space<vmem>>, %arg2: memref<3x128xf32, #tpu.memory_space<vmem>>, %arg3: memref<1x128xf32, #tpu.memory_space<vmem>>, %arg4: memref<128x128xf32, #tpu.memory_space<vmem>>, %arg5: memref<1x128xf32, #tpu.memory_space<vmem>>, %arg6: memref<640x512xbf16, #tpu.memory_space<vmem>>, %arg7: memref<1x512xf32, #tpu.memory_space<vmem>>, %arg8: memref<512x256xbf16, #tpu.memory_space<vmem>>, %arg9: memref<1x256xf32, #tpu.memory_space<vmem>>, %arg10: memref<256x128xf32, #tpu.memory_space<vmem>>, %arg11: memref<1x128xf32, #tpu.memory_space<vmem>>, %arg12: memref<2x128xf32, #tpu.memory_space<vmem>>) attributes {dimension_semantics = [], scalar_prefetch = 0 : i64, scratch_operands = 0 : i64, tpu.core_type = #tpu.core_type<tc>} {
    %c0 = arith.constant 0 : index
    %c0_0 = arith.constant 0 : index
    %c0_1 = arith.constant 0 : index
    %0 = vector.load %arg0[%c0, %c0_0, %c0_1] : memref<2x2x256xf32, #tpu.memory_space<vmem>>, vector<1x2x256xf32>
    %1 = vector.shape_cast %0 : vector<1x2x256xf32> to vector<2x256xf32>
    %c1 = arith.constant 1 : index
    %c0_2 = arith.constant 0 : index
    %c0_3 = arith.constant 0 : index
    %2 = vector.load %arg0[%c1, %c0_2, %c0_3] : memref<2x2x256xf32, #tpu.memory_space<vmem>>, vector<1x2x256xf32>
    %3 = vector.shape_cast %2 : vector<1x2x256xf32> to vector<2x256xf32>
    %c0_4 = arith.constant 0 : index
    %c0_5 = arith.constant 0 : index
    %4 = vector.load %arg3[%c0_4, %c0_5] : memref<1x128xf32, #tpu.memory_space<vmem>>, vector<1x128xf32>
    %c0_6 = arith.constant 0 : index
    %c0_7 = arith.constant 0 : index
    %5 = vector.load %arg1[%c0_6, %c0_7] : memref<2x3xf32, #tpu.memory_space<vmem>>, vector<2x1xf32>
    %c0_8 = arith.constant 0 : index
    %c0_9 = arith.constant 0 : index
    %6 = vector.load %arg2[%c0_8, %c0_9] : memref<3x128xf32, #tpu.memory_space<vmem>>, vector<1x128xf32>
    %7 = vector.broadcast %5 : vector<2x1xf32> to vector<2x128xf32>
    %8 = vector.broadcast %6 : vector<1x128xf32> to vector<2x128xf32>
    %9 = arith.mulf %7, %8 : vector<2x128xf32>
    %10 = vector.broadcast %4 : vector<1x128xf32> to vector<2x128xf32>
    %11 = arith.addf %10, %9 : vector<2x128xf32>
    %c0_10 = arith.constant 0 : index
    %c1_11 = arith.constant 1 : index
    %12 = vector.load %arg1[%c0_10, %c1_11] : memref<2x3xf32, #tpu.memory_space<vmem>>, vector<2x1xf32>
    %c1_12 = arith.constant 1 : index
    %c0_13 = arith.constant 0 : index
    %13 = vector.load %arg2[%c1_12, %c0_13] : memref<3x128xf32, #tpu.memory_space<vmem>>, vector<1x128xf32>
    %14 = vector.broadcast %12 : vector<2x1xf32> to vector<2x128xf32>
    %15 = vector.broadcast %13 : vector<1x128xf32> to vector<2x128xf32>
    %16 = arith.mulf %14, %15 : vector<2x128xf32>
    %17 = arith.addf %11, %16 : vector<2x128xf32>
    %c0_14 = arith.constant 0 : index
    %c2 = arith.constant 2 : index
    %18 = vector.load %arg1[%c0_14, %c2] : memref<2x3xf32, #tpu.memory_space<vmem>>, vector<2x1xf32>
    %c2_15 = arith.constant 2 : index
    %c0_16 = arith.constant 0 : index
    %19 = vector.load %arg2[%c2_15, %c0_16] : memref<3x128xf32, #tpu.memory_space<vmem>>, vector<1x128xf32>
    %20 = vector.broadcast %18 : vector<2x1xf32> to vector<2x128xf32>
    %21 = vector.broadcast %19 : vector<1x128xf32> to vector<2x128xf32>
    %22 = arith.mulf %20, %21 : vector<2x128xf32>
    %23 = arith.addf %17, %22 : vector<2x128xf32>
    %cst = arith.constant 0.000000e+00 : f32
    %24 = vector.broadcast %cst : f32 to vector<2x128xf32>
    %25 = arith.maximumf %23, %24 : vector<2x128xf32>
    %c0_17 = arith.constant 0 : index
    %c0_18 = arith.constant 0 : index
    %26 = vector.load %arg4[%c0_17, %c0_18] : memref<128x128xf32, #tpu.memory_space<vmem>>, vector<128x128xf32>
    %cst_19 = arith.constant dense<0.000000e+00> : vector<2x128xf32>
    %27 = tpu.matmul %25, %26, %cst_19 {dimension_numbers = #tpu.dot_dimension_numbers<[1], [0], [0], [1], [0, 0, 1, 1], [], []>} : vector<2x128xf32>, vector<128x128xf32>, vector<2x128xf32> -> vector<2x128xf32>
    %c0_20 = arith.constant 0 : index
    %c0_21 = arith.constant 0 : index
    %28 = vector.load %arg5[%c0_20, %c0_21] : memref<1x128xf32, #tpu.memory_space<vmem>>, vector<1x128xf32>
    %29 = vector.broadcast %28 : vector<1x128xf32> to vector<2x128xf32>
    %30 = arith.addf %27, %29 : vector<2x128xf32>
    %cst_22 = arith.constant 0.000000e+00 : f32
    %31 = vector.broadcast %cst_22 : f32 to vector<2x128xf32>
    %32 = arith.maximumf %30, %31 : vector<2x128xf32>
    %c0_23 = arith.constant 0 : index
    %c0_24 = arith.constant 0 : index
    %33 = vector.load %arg6[%c0_23, %c0_24] : memref<640x512xbf16, #tpu.memory_space<vmem>>, vector<256x512xbf16>
    %34 = arith.extf %33 : vector<256x512xbf16> to vector<256x512xf32>
    %cst_25 = arith.constant dense<0.000000e+00> : vector<2x512xf32>
    %35 = tpu.matmul %1, %34, %cst_25 {dimension_numbers = #tpu.dot_dimension_numbers<[1], [0], [0], [1], [0, 0, 1, 1], [], []>} : vector<2x256xf32>, vector<256x512xf32>, vector<2x512xf32> -> vector<2x512xf32>
    %c256 = arith.constant 256 : index
    %c0_26 = arith.constant 0 : index
    %36 = vector.load %arg6[%c256, %c0_26] : memref<640x512xbf16, #tpu.memory_space<vmem>>, vector<256x512xbf16>
    %37 = arith.extf %36 : vector<256x512xbf16> to vector<256x512xf32>
    %cst_27 = arith.constant dense<0.000000e+00> : vector<2x512xf32>
    %38 = tpu.matmul %3, %37, %cst_27 {dimension_numbers = #tpu.dot_dimension_numbers<[1], [0], [0], [1], [0, 0, 1, 1], [], []>} : vector<2x256xf32>, vector<256x512xf32>, vector<2x512xf32> -> vector<2x512xf32>
    %39 = arith.addf %35, %38 : vector<2x512xf32>
    %c512 = arith.constant 512 : index
    %c0_28 = arith.constant 0 : index
    %40 = vector.load %arg6[%c512, %c0_28] : memref<640x512xbf16, #tpu.memory_space<vmem>>, vector<128x512xbf16>
    %41 = arith.extf %40 : vector<128x512xbf16> to vector<128x512xf32>
    %cst_29 = arith.constant dense<0.000000e+00> : vector<2x512xf32>
    %42 = tpu.matmul %32, %41, %cst_29 {dimension_numbers = #tpu.dot_dimension_numbers<[1], [0], [0], [1], [0, 0, 1, 1], [], []>} : vector<2x128xf32>, vector<128x512xf32>, vector<2x512xf32> -> vector<2x512xf32>
    %43 = arith.addf %39, %42 : vector<2x512xf32>
    %c0_30 = arith.constant 0 : index
    %c0_31 = arith.constant 0 : index
    %44 = vector.load %arg7[%c0_30, %c0_31] : memref<1x512xf32, #tpu.memory_space<vmem>>, vector<1x512xf32>
    %45 = vector.broadcast %44 : vector<1x512xf32> to vector<2x512xf32>
    %46 = arith.addf %43, %45 : vector<2x512xf32>
    %cst_32 = arith.constant 0.000000e+00 : f32
    %47 = vector.broadcast %cst_32 : f32 to vector<2x512xf32>
    %48 = arith.maximumf %46, %47 : vector<2x512xf32>
    %c0_33 = arith.constant 0 : index
    %c0_34 = arith.constant 0 : index
    %49 = vector.load %arg8[%c0_33, %c0_34] : memref<512x256xbf16, #tpu.memory_space<vmem>>, vector<512x256xbf16>
    %50 = arith.extf %49 : vector<512x256xbf16> to vector<512x256xf32>
    %cst_35 = arith.constant dense<0.000000e+00> : vector<2x256xf32>
    %51 = tpu.matmul %48, %50, %cst_35 {dimension_numbers = #tpu.dot_dimension_numbers<[1], [0], [0], [1], [0, 0, 1, 1], [], []>} : vector<2x512xf32>, vector<512x256xf32>, vector<2x256xf32> -> vector<2x256xf32>
    %c0_36 = arith.constant 0 : index
    %c0_37 = arith.constant 0 : index
    %52 = vector.load %arg9[%c0_36, %c0_37] : memref<1x256xf32, #tpu.memory_space<vmem>>, vector<1x256xf32>
    %53 = vector.broadcast %52 : vector<1x256xf32> to vector<2x256xf32>
    %54 = arith.addf %51, %53 : vector<2x256xf32>
    %cst_38 = arith.constant 0.000000e+00 : f32
    %55 = vector.broadcast %cst_38 : f32 to vector<2x256xf32>
    %56 = arith.maximumf %54, %55 : vector<2x256xf32>
    %c0_39 = arith.constant 0 : index
    %c0_40 = arith.constant 0 : index
    %57 = vector.load %arg10[%c0_39, %c0_40] : memref<256x128xf32, #tpu.memory_space<vmem>>, vector<256x128xf32>
    %cst_41 = arith.constant dense<0.000000e+00> : vector<2x128xf32>
    %58 = tpu.matmul %56, %57, %cst_41 {dimension_numbers = #tpu.dot_dimension_numbers<[1], [0], [0], [1], [0, 0, 1, 1], [], []>} : vector<2x256xf32>, vector<256x128xf32>, vector<2x128xf32> -> vector<2x128xf32>
    %c0_42 = arith.constant 0 : index
    %c0_43 = arith.constant 0 : index
    %59 = vector.load %arg11[%c0_42, %c0_43] : memref<1x128xf32, #tpu.memory_space<vmem>>, vector<1x128xf32>
    %60 = vector.broadcast %59 : vector<1x128xf32> to vector<2x128xf32>
    %61 = arith.addf %58, %60 : vector<2x128xf32>
    %c0_44 = arith.constant 0 : index
    %c0_45 = arith.constant 0 : index
    %62 = vector.load %arg12[%c0_44, %c0_45] : memref<2x128xf32, #tpu.memory_space<vmem>>, vector<2x128xf32>
    tpu.vector_store %arg12[%c0_44, %c0_45], %61 {strides = array<i32>} : memref<2x128xf32, #tpu.memory_space<vmem>>, vector<2x128xf32>,
    return
  }
}

module attributes {stable_mosaic.version = 11 : i64} {
  func.func @tower_kernel(%arg0: i32, %arg1: memref<1x2x8x8x1xf32, #tpu.memory_space<vmem>>, %arg2: memref<1x9x32xf32, #tpu.memory_space<vmem>>, %arg3: memref<1x1x32xf32, #tpu.memory_space<vmem>>, %arg4: memref<1x9x32x64xf32, #tpu.memory_space<vmem>>, %arg5: memref<1x1x64xf32, #tpu.memory_space<vmem>>, %arg6: memref<1x128x64xbf16, #tpu.memory_space<vmem>>, %arg7: memref<2x10x10x1xf32, #tpu.memory_space<vmem>>, %arg8: memref<2x10x10x32xf32, #tpu.memory_space<vmem>>) attributes {dimension_semantics = [#tpu.dimension_semantics<parallel>], iteration_bounds = array<i64: 2>, scalar_prefetch = 0 : i64, scratch_operands = 2 : i64, tpu.core_type = #tpu.core_type<tc>, window_params = [{transform_indices = @transform_0, window_bounds = array<i64: 1, 2, 8, 8, 1>}, {transform_indices = @transform_1, window_bounds = array<i64: 1, 9, 32>}, {transform_indices = @transform_2, window_bounds = array<i64: 1, 1, 32>}, {transform_indices = @transform_3, window_bounds = array<i64: 1, 9, 32, 64>}, {transform_indices = @transform_4, window_bounds = array<i64: 1, 1, 64>}, {transform_indices = @transform_5, window_bounds = array<i64: 1, 128, 64>}]} {
    %cst = arith.constant 0.000000e+00 : f32
    %0 = vector.broadcast %cst : f32 to vector<2x1x10x1xf32>
    %c0 = arith.constant 0 : index
    %c0_0 = arith.constant 0 : index
    %c0_1 = arith.constant 0 : index
    %c0_2 = arith.constant 0 : index
    %1 = vector.load %arg7[%c0, %c0_0, %c0_1, %c0_2] : memref<2x10x10x1xf32, #tpu.memory_space<vmem>>, vector<2x1x10x1xf32>
    tpu.vector_store %arg7[%c0, %c0_0, %c0_1, %c0_2], %0 {strides = array<i32>} : memref<2x10x10x1xf32, #tpu.memory_space<vmem>>, vector<2x1x10x1xf32>,
    %cst_3 = arith.constant 0.000000e+00 : f32
    %2 = vector.broadcast %cst_3 : f32 to vector<2x1x10x1xf32>
    %c0_4 = arith.constant 0 : index
    %c9 = arith.constant 9 : index
    %c0_5 = arith.constant 0 : index
    %c0_6 = arith.constant 0 : index
    %3 = vector.load %arg7[%c0_4, %c9, %c0_5, %c0_6] : memref<2x10x10x1xf32, #tpu.memory_space<vmem>>, vector<2x1x10x1xf32>
    tpu.vector_store %arg7[%c0_4, %c9, %c0_5, %c0_6], %2 {strides = array<i32>} : memref<2x10x10x1xf32, #tpu.memory_space<vmem>>, vector<2x1x10x1xf32>,
    %cst_7 = arith.constant 0.000000e+00 : f32
    %4 = vector.broadcast %cst_7 : f32 to vector<2x10x1x1xf32>
    %c0_8 = arith.constant 0 : index
    %c0_9 = arith.constant 0 : index
    %c0_10 = arith.constant 0 : index
    %c0_11 = arith.constant 0 : index
    %5 = vector.load %arg7[%c0_8, %c0_9, %c0_10, %c0_11] : memref<2x10x10x1xf32, #tpu.memory_space<vmem>>, vector<2x10x1x1xf32>
    tpu.vector_store %arg7[%c0_8, %c0_9, %c0_10, %c0_11], %4 {strides = array<i32>} : memref<2x10x10x1xf32, #tpu.memory_space<vmem>>, vector<2x10x1x1xf32>,
    %cst_12 = arith.constant 0.000000e+00 : f32
    %6 = vector.broadcast %cst_12 : f32 to vector<2x10x1x1xf32>
    %c0_13 = arith.constant 0 : index
    %c0_14 = arith.constant 0 : index
    %c9_15 = arith.constant 9 : index
    %c0_16 = arith.constant 0 : index
    %7 = vector.load %arg7[%c0_13, %c0_14, %c9_15, %c0_16] : memref<2x10x10x1xf32, #tpu.memory_space<vmem>>, vector<2x10x1x1xf32>
    tpu.vector_store %arg7[%c0_13, %c0_14, %c9_15, %c0_16], %6 {strides = array<i32>} : memref<2x10x10x1xf32, #tpu.memory_space<vmem>>, vector<2x10x1x1xf32>,
    %c0_17 = arith.constant 0 : index
    %c0_18 = arith.constant 0 : index
    %c0_19 = arith.constant 0 : index
    %c0_20 = arith.constant 0 : index
    %c0_21 = arith.constant 0 : index
    %8 = vector.load %arg1[%c0_17, %c0_18, %c0_19, %c0_20, %c0_21] : memref<1x2x8x8x1xf32, #tpu.memory_space<vmem>>, vector<1x2x8x8x1xf32>
    %9 = vector.shape_cast %8 : vector<1x2x8x8x1xf32> to vector<2x8x8x1xf32>
    %c0_22 = arith.constant 0 : index
    %c1 = arith.constant 1 : index
    %c1_23 = arith.constant 1 : index
    %c0_24 = arith.constant 0 : index
    %10 = vector.load %arg7[%c0_22, %c1, %c1_23, %c0_24] : memref<2x10x10x1xf32, #tpu.memory_space<vmem>>, vector<2x8x8x1xf32>
    tpu.vector_store %arg7[%c0_22, %c1, %c1_23, %c0_24], %9 {strides = array<i32>} : memref<2x10x10x1xf32, #tpu.memory_space<vmem>>, vector<2x8x8x1xf32>,
    %cst_25 = arith.constant 0.000000e+00 : f32
    %11 = vector.broadcast %cst_25 : f32 to vector<2x8x8x32xf32>
    %c0_26 = arith.constant 0 : index
    %c0_27 = arith.constant 0 : index
    %c0_28 = arith.constant 0 : index
    %12 = vector.load %arg3[%c0_26, %c0_27, %c0_28] : memref<1x1x32xf32, #tpu.memory_space<vmem>>, vector<1x1x32xf32>
    %13 = vector.shape_cast %12 : vector<1x1x32xf32> to vector<32xf32>
    %14 = vector.shape_cast %13 : vector<32xf32> to vector<1x1x1x32xf32>
    %15 = vector.broadcast %14 : vector<1x1x1x32xf32> to vector<2x8x8x32xf32>
    %16 = arith.addf %11, %15 : vector<2x8x8x32xf32>
    %c0_29 = arith.constant 0 : index
    %c0_30 = arith.constant 0 : index
    %c0_31 = arith.constant 0 : index
    %c0_32 = arith.constant 0 : index
    %17 = vector.load %arg7[%c0_29, %c0_30, %c0_31, %c0_32] : memref<2x10x10x1xf32, #tpu.memory_space<vmem>>, vector<2x8x8x1xf32>
    %c0_33 = arith.constant 0 : index
    %c0_34 = arith.constant 0 : index
    %c0_35 = arith.constant 0 : index
    %18 = vector.load %arg2[%c0_33, %c0_34, %c0_35] : memref<1x9x32xf32, #tpu.memory_space<vmem>>, vector<1x1x32xf32>
    %19 = vector.shape_cast %18 : vector<1x1x32xf32> to vector<32xf32>
    %20 = vector.shape_cast %19 : vector<32xf32> to vector<1x1x1x32xf32>
    %21 = vector.broadcast %17 : vector<2x8x8x1xf32> to vector<2x8x8x32xf32>
    %22 = vector.broadcast %20 : vector<1x1x1x32xf32> to vector<2x8x8x32xf32>
    %23 = arith.mulf %21, %22 : vector<2x8x8x32xf32>
    %24 = arith.addf %16, %23 : vector<2x8x8x32xf32>
    %c0_36 = arith.constant 0 : index
    %c0_37 = arith.constant 0 : index
    %c1_38 = arith.constant 1 : index
    %c0_39 = arith.constant 0 : index
    %25 = vector.load %arg7[%c0_36, %c0_37, %c1_38, %c0_39] : memref<2x10x10x1xf32, #tpu.memory_space<vmem>>, vector<2x8x8x1xf32>
    %c0_40 = arith.constant 0 : index
    %c1_41 = arith.constant 1 : index
    %c0_42 = arith.constant 0 : index
    %26 = vector.load %arg2[%c0_40, %c1_41, %c0_42] : memref<1x9x32xf32, #tpu.memory_space<vmem>>, vector<1x1x32xf32>
    %27 = vector.shape_cast %26 : vector<1x1x32xf32> to vector<32xf32>
    %28 = vector.shape_cast %27 : vector<32xf32> to vector<1x1x1x32xf32>
    %29 = vector.broadcast %25 : vector<2x8x8x1xf32> to vector<2x8x8x32xf32>
    %30 = vector.broadcast %28 : vector<1x1x1x32xf32> to vector<2x8x8x32xf32>
    %31 = arith.mulf %29, %30 : vector<2x8x8x32xf32>
    %32 = arith.addf %24, %31 : vector<2x8x8x32xf32>
    %c0_43 = arith.constant 0 : index
    %c0_44 = arith.constant 0 : index
    %c2 = arith.constant 2 : index
    %c0_45 = arith.constant 0 : index
    %33 = vector.load %arg7[%c0_43, %c0_44, %c2, %c0_45] : memref<2x10x10x1xf32, #tpu.memory_space<vmem>>, vector<2x8x8x1xf32>
    %c0_46 = arith.constant 0 : index
    %c2_47 = arith.constant 2 : index
    %c0_48 = arith.constant 0 : index
    %34 = vector.load %arg2[%c0_46, %c2_47, %c0_48] : memref<1x9x32xf32, #tpu.memory_space<vmem>>, vector<1x1x32xf32>
    %35 = vector.shape_cast %34 : vector<1x1x32xf32> to vector<32xf32>
    %36 = vector.shape_cast %35 : vector<32xf32> to vector<1x1x1x32xf32>
    %37 = vector.broadcast %33 : vector<2x8x8x1xf32> to vector<2x8x8x32xf32>
    %38 = vector.broadcast %36 : vector<1x1x1x32xf32> to vector<2x8x8x32xf32>
    %39 = arith.mulf %37, %38 : vector<2x8x8x32xf32>
    %40 = arith.addf %32, %39 : vector<2x8x8x32xf32>
    %c0_49 = arith.constant 0 : index
    %c1_50 = arith.constant 1 : index
    %c0_51 = arith.constant 0 : index
    %c0_52 = arith.constant 0 : index
    %41 = vector.load %arg7[%c0_49, %c1_50, %c0_51, %c0_52] : memref<2x10x10x1xf32, #tpu.memory_space<vmem>>, vector<2x8x8x1xf32>
    %c0_53 = arith.constant 0 : index
    %c3 = arith.constant 3 : index
    %c0_54 = arith.constant 0 : index
    %42 = vector.load %arg2[%c0_53, %c3, %c0_54] : memref<1x9x32xf32, #tpu.memory_space<vmem>>, vector<1x1x32xf32>
    %43 = vector.shape_cast %42 : vector<1x1x32xf32> to vector<32xf32>
    %44 = vector.shape_cast %43 : vector<32xf32> to vector<1x1x1x32xf32>
    %45 = vector.broadcast %41 : vector<2x8x8x1xf32> to vector<2x8x8x32xf32>
    %46 = vector.broadcast %44 : vector<1x1x1x32xf32> to vector<2x8x8x32xf32>
    %47 = arith.mulf %45, %46 : vector<2x8x8x32xf32>
    %48 = arith.addf %40, %47 : vector<2x8x8x32xf32>
    %c0_55 = arith.constant 0 : index
    %c1_56 = arith.constant 1 : index
    %c1_57 = arith.constant 1 : index
    %c0_58 = arith.constant 0 : index
    %49 = vector.load %arg7[%c0_55, %c1_56, %c1_57, %c0_58] : memref<2x10x10x1xf32, #tpu.memory_space<vmem>>, vector<2x8x8x1xf32>
    %c0_59 = arith.constant 0 : index
    %c4 = arith.constant 4 : index
    %c0_60 = arith.constant 0 : index
    %50 = vector.load %arg2[%c0_59, %c4, %c0_60] : memref<1x9x32xf32, #tpu.memory_space<vmem>>, vector<1x1x32xf32>
    %51 = vector.shape_cast %50 : vector<1x1x32xf32> to vector<32xf32>
    %52 = vector.shape_cast %51 : vector<32xf32> to vector<1x1x1x32xf32>
    %53 = vector.broadcast %49 : vector<2x8x8x1xf32> to vector<2x8x8x32xf32>
    %54 = vector.broadcast %52 : vector<1x1x1x32xf32> to vector<2x8x8x32xf32>
    %55 = arith.mulf %53, %54 : vector<2x8x8x32xf32>
    %56 = arith.addf %48, %55 : vector<2x8x8x32xf32>
    %c0_61 = arith.constant 0 : index
    %c1_62 = arith.constant 1 : index
    %c2_63 = arith.constant 2 : index
    %c0_64 = arith.constant 0 : index
    %57 = vector.load %arg7[%c0_61, %c1_62, %c2_63, %c0_64] : memref<2x10x10x1xf32, #tpu.memory_space<vmem>>, vector<2x8x8x1xf32>
    %c0_65 = arith.constant 0 : index
    %c5 = arith.constant 5 : index
    %c0_66 = arith.constant 0 : index
    %58 = vector.load %arg2[%c0_65, %c5, %c0_66] : memref<1x9x32xf32, #tpu.memory_space<vmem>>, vector<1x1x32xf32>
    %59 = vector.shape_cast %58 : vector<1x1x32xf32> to vector<32xf32>
    %60 = vector.shape_cast %59 : vector<32xf32> to vector<1x1x1x32xf32>
    %61 = vector.broadcast %57 : vector<2x8x8x1xf32> to vector<2x8x8x32xf32>
    %62 = vector.broadcast %60 : vector<1x1x1x32xf32> to vector<2x8x8x32xf32>
    %63 = arith.mulf %61, %62 : vector<2x8x8x32xf32>
    %64 = arith.addf %56, %63 : vector<2x8x8x32xf32>
    %c0_67 = arith.constant 0 : index
    %c2_68 = arith.constant 2 : index
    %c0_69 = arith.constant 0 : index
    %c0_70 = arith.constant 0 : index
    %65 = vector.load %arg7[%c0_67, %c2_68, %c0_69, %c0_70] : memref<2x10x10x1xf32, #tpu.memory_space<vmem>>, vector<2x8x8x1xf32>
    %c0_71 = arith.constant 0 : index
    %c6 = arith.constant 6 : index
    %c0_72 = arith.constant 0 : index
    %66 = vector.load %arg2[%c0_71, %c6, %c0_72] : memref<1x9x32xf32, #tpu.memory_space<vmem>>, vector<1x1x32xf32>
    %67 = vector.shape_cast %66 : vector<1x1x32xf32> to vector<32xf32>
    %68 = vector.shape_cast %67 : vector<32xf32> to vector<1x1x1x32xf32>
    %69 = vector.broadcast %65 : vector<2x8x8x1xf32> to vector<2x8x8x32xf32>
    %70 = vector.broadcast %68 : vector<1x1x1x32xf32> to vector<2x8x8x32xf32>
    %71 = arith.mulf %69, %70 : vector<2x8x8x32xf32>
    %72 = arith.addf %64, %71 : vector<2x8x8x32xf32>
    %c0_73 = arith.constant 0 : index
    %c2_74 = arith.constant 2 : index
    %c1_75 = arith.constant 1 : index
    %c0_76 = arith.constant 0 : index
    %73 = vector.load %arg7[%c0_73, %c2_74, %c1_75, %c0_76] : memref<2x10x10x1xf32, #tpu.memory_space<vmem>>, vector<2x8x8x1xf32>
    %c0_77 = arith.constant 0 : index
    %c7 = arith.constant 7 : index
    %c0_78 = arith.constant 0 : index
    %74 = vector.load %arg2[%c0_77, %c7, %c0_78] : memref<1x9x32xf32, #tpu.memory_space<vmem>>, vector<1x1x32xf32>
    %75 = vector.shape_cast %74 : vector<1x1x32xf32> to vector<32xf32>
    %76 = vector.shape_cast %75 : vector<32xf32> to vector<1x1x1x32xf32>
    %77 = vector.broadcast %73 : vector<2x8x8x1xf32> to vector<2x8x8x32xf32>
    %78 = vector.broadcast %76 : vector<1x1x1x32xf32> to vector<2x8x8x32xf32>
    %79 = arith.mulf %77, %78 : vector<2x8x8x32xf32>
    %80 = arith.addf %72, %79 : vector<2x8x8x32xf32>
    %c0_79 = arith.constant 0 : index
    %c2_80 = arith.constant 2 : index
    %c2_81 = arith.constant 2 : index
    %c0_82 = arith.constant 0 : index
    %81 = vector.load %arg7[%c0_79, %c2_80, %c2_81, %c0_82] : memref<2x10x10x1xf32, #tpu.memory_space<vmem>>, vector<2x8x8x1xf32>
    %c0_83 = arith.constant 0 : index
    %c8 = arith.constant 8 : index
    %c0_84 = arith.constant 0 : index
    %82 = vector.load %arg2[%c0_83, %c8, %c0_84] : memref<1x9x32xf32, #tpu.memory_space<vmem>>, vector<1x1x32xf32>
    %83 = vector.shape_cast %82 : vector<1x1x32xf32> to vector<32xf32>
    %84 = vector.shape_cast %83 : vector<32xf32> to vector<1x1x1x32xf32>
    %85 = vector.broadcast %81 : vector<2x8x8x1xf32> to vector<2x8x8x32xf32>
    %86 = vector.broadcast %84 : vector<1x1x1x32xf32> to vector<2x8x8x32xf32>
    %87 = arith.mulf %85, %86 : vector<2x8x8x32xf32>
    %88 = arith.addf %80, %87 : vector<2x8x8x32xf32>
    %cst_85 = arith.constant 0.000000e+00 : f32
    %89 = vector.broadcast %cst_85 : f32 to vector<2x8x8x32xf32>
    %90 = arith.maximumf %88, %89 : vector<2x8x8x32xf32>
    %cst_86 = arith.constant 0.000000e+00 : f32
    %91 = vector.broadcast %cst_86 : f32 to vector<2x1x10x32xf32>
    %c0_87 = arith.constant 0 : index
    %c0_88 = arith.constant 0 : index
    %c0_89 = arith.constant 0 : index
    %c0_90 = arith.constant 0 : index
    %92 = vector.load %arg8[%c0_87, %c0_88, %c0_89, %c0_90] : memref<2x10x10x32xf32, #tpu.memory_space<vmem>>, vector<2x1x10x32xf32>
    tpu.vector_store %arg8[%c0_87, %c0_88, %c0_89, %c0_90], %91 {strides = array<i32>} : memref<2x10x10x32xf32, #tpu.memory_space<vmem>>, vector<2x1x10x32xf32>,
    %cst_91 = arith.constant 0.000000e+00 : f32
    %93 = vector.broadcast %cst_91 : f32 to vector<2x1x10x32xf32>
    %c0_92 = arith.constant 0 : index
    %c9_93 = arith.constant 9 : index
    %c0_94 = arith.constant 0 : index
    %c0_95 = arith.constant 0 : index
    %94 = vector.load %arg8[%c0_92, %c9_93, %c0_94, %c0_95] : memref<2x10x10x32xf32, #tpu.memory_space<vmem>>, vector<2x1x10x32xf32>
    tpu.vector_store %arg8[%c0_92, %c9_93, %c0_94, %c0_95], %93 {strides = array<i32>} : memref<2x10x10x32xf32, #tpu.memory_space<vmem>>, vector<2x1x10x32xf32>,
    %cst_96 = arith.constant 0.000000e+00 : f32
    %95 = vector.broadcast %cst_96 : f32 to vector<2x10x1x32xf32>
    %c0_97 = arith.constant 0 : index
    %c0_98 = arith.constant 0 : index
    %c0_99 = arith.constant 0 : index
    %c0_100 = arith.constant 0 : index
    %96 = vector.load %arg8[%c0_97, %c0_98, %c0_99, %c0_100] : memref<2x10x10x32xf32, #tpu.memory_space<vmem>>, vector<2x10x1x32xf32>
    tpu.vector_store %arg8[%c0_97, %c0_98, %c0_99, %c0_100], %95 {strides = array<i32>} : memref<2x10x10x32xf32, #tpu.memory_space<vmem>>, vector<2x10x1x32xf32>,
    %cst_101 = arith.constant 0.000000e+00 : f32
    %97 = vector.broadcast %cst_101 : f32 to vector<2x10x1x32xf32>
    %c0_102 = arith.constant 0 : index
    %c0_103 = arith.constant 0 : index
    %c9_104 = arith.constant 9 : index
    %c0_105 = arith.constant 0 : index
    %98 = vector.load %arg8[%c0_102, %c0_103, %c9_104, %c0_105] : memref<2x10x10x32xf32, #tpu.memory_space<vmem>>, vector<2x10x1x32xf32>
    tpu.vector_store %arg8[%c0_102, %c0_103, %c9_104, %c0_105], %97 {strides = array<i32>} : memref<2x10x10x32xf32, #tpu.memory_space<vmem>>, vector<2x10x1x32xf32>,
    %c0_106 = arith.constant 0 : index
    %c1_107 = arith.constant 1 : index
    %c1_108 = arith.constant 1 : index
    %c0_109 = arith.constant 0 : index
    %99 = vector.load %arg8[%c0_106, %c1_107, %c1_108, %c0_109] : memref<2x10x10x32xf32, #tpu.memory_space<vmem>>, vector<2x8x8x32xf32>
    tpu.vector_store %arg8[%c0_106, %c1_107, %c1_108, %c0_109], %90 {strides = array<i32>} : memref<2x10x10x32xf32, #tpu.memory_space<vmem>>, vector<2x8x8x32xf32>,
    %cst_110 = arith.constant 0.000000e+00 : f32
    %100 = vector.broadcast %cst_110 : f32 to vector<128x64xf32>
    %c0_111 = arith.constant 0 : index
    %c0_112 = arith.constant 0 : index
    %c0_113 = arith.constant 0 : index
    %c0_114 = arith.constant 0 : index
    %101 = vector.load %arg8[%c0_111, %c0_112, %c0_113, %c0_114] : memref<2x10x10x32xf32, #tpu.memory_space<vmem>>, vector<2x8x8x32xf32>
    %102 = vector.shape_cast %101 : vector<2x8x8x32xf32> to vector<128x32xf32>
    %c0_115 = arith.constant 0 : index
    %c0_116 = arith.constant 0 : index
    %c0_117 = arith.constant 0 : index
    %c0_118 = arith.constant 0 : index
    %103 = vector.load %arg4[%c0_115, %c0_116, %c0_117, %c0_118] : memref<1x9x32x64xf32, #tpu.memory_space<vmem>>, vector<1x1x32x64xf32>
    %104 = vector.shape_cast %103 : vector<1x1x32x64xf32> to vector<32x64xf32>
    %cst_119 = arith.constant dense<0.000000e+00> : vector<128x64xf32>
    %105 = tpu.matmul %102, %104, %cst_119 {dimension_numbers = #tpu.dot_dimension_numbers<[1], [0], [0], [1], [0, 0, 1, 1], [], []>} : vector<128x32xf32>, vector<32x64xf32>, vector<128x64xf32> -> vector<128x64xf32>
    %106 = arith.addf %100, %105 : vector<128x64xf32>
    %c0_120 = arith.constant 0 : index
    %c0_121 = arith.constant 0 : index
    %c1_122 = arith.constant 1 : index
    %c0_123 = arith.constant 0 : index
    %107 = vector.load %arg8[%c0_120, %c0_121, %c1_122, %c0_123] : memref<2x10x10x32xf32, #tpu.memory_space<vmem>>, vector<2x8x8x32xf32>
    %108 = vector.shape_cast %107 : vector<2x8x8x32xf32> to vector<128x32xf32>
    %c0_124 = arith.constant 0 : index
    %c1_125 = arith.constant 1 : index
    %c0_126 = arith.constant 0 : index
    %c0_127 = arith.constant 0 : index
    %109 = vector.load %arg4[%c0_124, %c1_125, %c0_126, %c0_127] : memref<1x9x32x64xf32, #tpu.memory_space<vmem>>, vector<1x1x32x64xf32>
    %110 = vector.shape_cast %109 : vector<1x1x32x64xf32> to vector<32x64xf32>
    %cst_128 = arith.constant dense<0.000000e+00> : vector<128x64xf32>
    %111 = tpu.matmul %108, %110, %cst_128 {dimension_numbers = #tpu.dot_dimension_numbers<[1], [0], [0], [1], [0, 0, 1, 1], [], []>} : vector<128x32xf32>, vector<32x64xf32>, vector<128x64xf32> -> vector<128x64xf32>
    %112 = arith.addf %106, %111 : vector<128x64xf32>
    %c0_129 = arith.constant 0 : index
    %c0_130 = arith.constant 0 : index
    %c2_131 = arith.constant 2 : index
    %c0_132 = arith.constant 0 : index
    %113 = vector.load %arg8[%c0_129, %c0_130, %c2_131, %c0_132] : memref<2x10x10x32xf32, #tpu.memory_space<vmem>>, vector<2x8x8x32xf32>
    %114 = vector.shape_cast %113 : vector<2x8x8x32xf32> to vector<128x32xf32>
    %c0_133 = arith.constant 0 : index
    %c2_134 = arith.constant 2 : index
    %c0_135 = arith.constant 0 : index
    %c0_136 = arith.constant 0 : index
    %115 = vector.load %arg4[%c0_133, %c2_134, %c0_135, %c0_136] : memref<1x9x32x64xf32, #tpu.memory_space<vmem>>, vector<1x1x32x64xf32>
    %116 = vector.shape_cast %115 : vector<1x1x32x64xf32> to vector<32x64xf32>
    %cst_137 = arith.constant dense<0.000000e+00> : vector<128x64xf32>
    %117 = tpu.matmul %114, %116, %cst_137 {dimension_numbers = #tpu.dot_dimension_numbers<[1], [0], [0], [1], [0, 0, 1, 1], [], []>} : vector<128x32xf32>, vector<32x64xf32>, vector<128x64xf32> -> vector<128x64xf32>
    %118 = arith.addf %112, %117 : vector<128x64xf32>
    %c0_138 = arith.constant 0 : index
    %c1_139 = arith.constant 1 : index
    %c0_140 = arith.constant 0 : index
    %c0_141 = arith.constant 0 : index
    %119 = vector.load %arg8[%c0_138, %c1_139, %c0_140, %c0_141] : memref<2x10x10x32xf32, #tpu.memory_space<vmem>>, vector<2x8x8x32xf32>
    %120 = vector.shape_cast %119 : vector<2x8x8x32xf32> to vector<128x32xf32>
    %c0_142 = arith.constant 0 : index
    %c3_143 = arith.constant 3 : index
    %c0_144 = arith.constant 0 : index
    %c0_145 = arith.constant 0 : index
    %121 = vector.load %arg4[%c0_142, %c3_143, %c0_144, %c0_145] : memref<1x9x32x64xf32, #tpu.memory_space<vmem>>, vector<1x1x32x64xf32>
    %122 = vector.shape_cast %121 : vector<1x1x32x64xf32> to vector<32x64xf32>
    %cst_146 = arith.constant dense<0.000000e+00> : vector<128x64xf32>
    %123 = tpu.matmul %120, %122, %cst_146 {dimension_numbers = #tpu.dot_dimension_numbers<[1], [0], [0], [1], [0, 0, 1, 1], [], []>} : vector<128x32xf32>, vector<32x64xf32>, vector<128x64xf32> -> vector<128x64xf32>
    %124 = arith.addf %118, %123 : vector<128x64xf32>
    %c0_147 = arith.constant 0 : index
    %c1_148 = arith.constant 1 : index
    %c1_149 = arith.constant 1 : index
    %c0_150 = arith.constant 0 : index
    %125 = vector.load %arg8[%c0_147, %c1_148, %c1_149, %c0_150] : memref<2x10x10x32xf32, #tpu.memory_space<vmem>>, vector<2x8x8x32xf32>
    %126 = vector.shape_cast %125 : vector<2x8x8x32xf32> to vector<128x32xf32>
    %c0_151 = arith.constant 0 : index
    %c4_152 = arith.constant 4 : index
    %c0_153 = arith.constant 0 : index
    %c0_154 = arith.constant 0 : index
    %127 = vector.load %arg4[%c0_151, %c4_152, %c0_153, %c0_154] : memref<1x9x32x64xf32, #tpu.memory_space<vmem>>, vector<1x1x32x64xf32>
    %128 = vector.shape_cast %127 : vector<1x1x32x64xf32> to vector<32x64xf32>
    %cst_155 = arith.constant dense<0.000000e+00> : vector<128x64xf32>
    %129 = tpu.matmul %126, %128, %cst_155 {dimension_numbers = #tpu.dot_dimension_numbers<[1], [0], [0], [1], [0, 0, 1, 1], [], []>} : vector<128x32xf32>, vector<32x64xf32>, vector<128x64xf32> -> vector<128x64xf32>
    %130 = arith.addf %124, %129 : vector<128x64xf32>
    %c0_156 = arith.constant 0 : index
    %c1_157 = arith.constant 1 : index
    %c2_158 = arith.constant 2 : index
    %c0_159 = arith.constant 0 : index
    %131 = vector.load %arg8[%c0_156, %c1_157, %c2_158, %c0_159] : memref<2x10x10x32xf32, #tpu.memory_space<vmem>>, vector<2x8x8x32xf32>
    %132 = vector.shape_cast %131 : vector<2x8x8x32xf32> to vector<128x32xf32>
    %c0_160 = arith.constant 0 : index
    %c5_161 = arith.constant 5 : index
    %c0_162 = arith.constant 0 : index
    %c0_163 = arith.constant 0 : index
    %133 = vector.load %arg4[%c0_160, %c5_161, %c0_162, %c0_163] : memref<1x9x32x64xf32, #tpu.memory_space<vmem>>, vector<1x1x32x64xf32>
    %134 = vector.shape_cast %133 : vector<1x1x32x64xf32> to vector<32x64xf32>
    %cst_164 = arith.constant dense<0.000000e+00> : vector<128x64xf32>
    %135 = tpu.matmul %132, %134, %cst_164 {dimension_numbers = #tpu.dot_dimension_numbers<[1], [0], [0], [1], [0, 0, 1, 1], [], []>} : vector<128x32xf32>, vector<32x64xf32>, vector<128x64xf32> -> vector<128x64xf32>
    %136 = arith.addf %130, %135 : vector<128x64xf32>
    %c0_165 = arith.constant 0 : index
    %c2_166 = arith.constant 2 : index
    %c0_167 = arith.constant 0 : index
    %c0_168 = arith.constant 0 : index
    %137 = vector.load %arg8[%c0_165, %c2_166, %c0_167, %c0_168] : memref<2x10x10x32xf32, #tpu.memory_space<vmem>>, vector<2x8x8x32xf32>
    %138 = vector.shape_cast %137 : vector<2x8x8x32xf32> to vector<128x32xf32>
    %c0_169 = arith.constant 0 : index
    %c6_170 = arith.constant 6 : index
    %c0_171 = arith.constant 0 : index
    %c0_172 = arith.constant 0 : index
    %139 = vector.load %arg4[%c0_169, %c6_170, %c0_171, %c0_172] : memref<1x9x32x64xf32, #tpu.memory_space<vmem>>, vector<1x1x32x64xf32>
    %140 = vector.shape_cast %139 : vector<1x1x32x64xf32> to vector<32x64xf32>
    %cst_173 = arith.constant dense<0.000000e+00> : vector<128x64xf32>
    %141 = tpu.matmul %138, %140, %cst_173 {dimension_numbers = #tpu.dot_dimension_numbers<[1], [0], [0], [1], [0, 0, 1, 1], [], []>} : vector<128x32xf32>, vector<32x64xf32>, vector<128x64xf32> -> vector<128x64xf32>
    %142 = arith.addf %136, %141 : vector<128x64xf32>
    %c0_174 = arith.constant 0 : index
    %c2_175 = arith.constant 2 : index
    %c1_176 = arith.constant 1 : index
    %c0_177 = arith.constant 0 : index
    %143 = vector.load %arg8[%c0_174, %c2_175, %c1_176, %c0_177] : memref<2x10x10x32xf32, #tpu.memory_space<vmem>>, vector<2x8x8x32xf32>
    %144 = vector.shape_cast %143 : vector<2x8x8x32xf32> to vector<128x32xf32>
    %c0_178 = arith.constant 0 : index
    %c7_179 = arith.constant 7 : index
    %c0_180 = arith.constant 0 : index
    %c0_181 = arith.constant 0 : index
    %145 = vector.load %arg4[%c0_178, %c7_179, %c0_180, %c0_181] : memref<1x9x32x64xf32, #tpu.memory_space<vmem>>, vector<1x1x32x64xf32>
    %146 = vector.shape_cast %145 : vector<1x1x32x64xf32> to vector<32x64xf32>
    %cst_182 = arith.constant dense<0.000000e+00> : vector<128x64xf32>
    %147 = tpu.matmul %144, %146, %cst_182 {dimension_numbers = #tpu.dot_dimension_numbers<[1], [0], [0], [1], [0, 0, 1, 1], [], []>} : vector<128x32xf32>, vector<32x64xf32>, vector<128x64xf32> -> vector<128x64xf32>
    %148 = arith.addf %142, %147 : vector<128x64xf32>
    %c0_183 = arith.constant 0 : index
    %c2_184 = arith.constant 2 : index
    %c2_185 = arith.constant 2 : index
    %c0_186 = arith.constant 0 : index
    %149 = vector.load %arg8[%c0_183, %c2_184, %c2_185, %c0_186] : memref<2x10x10x32xf32, #tpu.memory_space<vmem>>, vector<2x8x8x32xf32>
    %150 = vector.shape_cast %149 : vector<2x8x8x32xf32> to vector<128x32xf32>
    %c0_187 = arith.constant 0 : index
    %c8_188 = arith.constant 8 : index
    %c0_189 = arith.constant 0 : index
    %c0_190 = arith.constant 0 : index
    %151 = vector.load %arg4[%c0_187, %c8_188, %c0_189, %c0_190] : memref<1x9x32x64xf32, #tpu.memory_space<vmem>>, vector<1x1x32x64xf32>
    %152 = vector.shape_cast %151 : vector<1x1x32x64xf32> to vector<32x64xf32>
    %cst_191 = arith.constant dense<0.000000e+00> : vector<128x64xf32>
    %153 = tpu.matmul %150, %152, %cst_191 {dimension_numbers = #tpu.dot_dimension_numbers<[1], [0], [0], [1], [0, 0, 1, 1], [], []>} : vector<128x32xf32>, vector<32x64xf32>, vector<128x64xf32> -> vector<128x64xf32>
    %154 = arith.addf %148, %153 : vector<128x64xf32>
    %c0_192 = arith.constant 0 : index
    %c0_193 = arith.constant 0 : index
    %c0_194 = arith.constant 0 : index
    %155 = vector.load %arg5[%c0_192, %c0_193, %c0_194] : memref<1x1x64xf32, #tpu.memory_space<vmem>>, vector<1x1x64xf32>
    %156 = vector.shape_cast %155 : vector<1x1x64xf32> to vector<1x64xf32>
    %157 = vector.broadcast %156 : vector<1x64xf32> to vector<128x64xf32>
    %158 = arith.addf %154, %157 : vector<128x64xf32>
    %cst_195 = arith.constant 0.000000e+00 : f32
    %159 = vector.broadcast %cst_195 : f32 to vector<128x64xf32>
    %160 = arith.maximumf %158, %159 : vector<128x64xf32>
    %161 = arith.truncf %160 : vector<128x64xf32> to vector<128x64xbf16>
    %c0_196 = arith.constant 0 : index
    %c0_197 = arith.constant 0 : index
    %c0_198 = arith.constant 0 : index
    %162 = vector.load %arg6[%c0_196, %c0_197, %c0_198] : memref<1x128x64xbf16, #tpu.memory_space<vmem>>, vector<1x128x64xbf16>
    %163 = vector.shape_cast %162 : vector<1x128x64xbf16> to vector<128x64xbf16>
    %164 = vector.shape_cast %161 : vector<128x64xbf16> to vector<1x128x64xbf16>
    tpu.vector_store %arg6[%c0_196, %c0_197, %c0_198], %164 {strides = array<i32>} : memref<1x128x64xbf16, #tpu.memory_space<vmem>>, vector<1x128x64xbf16>,
    return
  }
  func.func @transform_0(%arg0: i32) -> (i32, i32, i32, i32, i32) {
    %c0_i32 = arith.constant 0 : i32
    %c0_i32_0 = arith.constant 0 : i32
    %c0_i32_1 = arith.constant 0 : i32
    %c0_i32_2 = arith.constant 0 : i32
    %c0_i32_3 = arith.constant 0 : i32
    return %arg0, %c0_i32, %c0_i32_0, %c0_i32_1, %c0_i32_2 : i32, i32, i32, i32, i32
  }
  func.func @transform_1(%arg0: i32) -> (i32, i32, i32) {
    %c0_i32 = arith.constant 0 : i32
    %c0_i32_0 = arith.constant 0 : i32
    %c0_i32_1 = arith.constant 0 : i32
    return %arg0, %c0_i32, %c0_i32_0 : i32, i32, i32
  }
  func.func @transform_2(%arg0: i32) -> (i32, i32, i32) {
    %c0_i32 = arith.constant 0 : i32
    %c0_i32_0 = arith.constant 0 : i32
    %c0_i32_1 = arith.constant 0 : i32
    return %arg0, %c0_i32, %c0_i32_0 : i32, i32, i32
  }
  func.func @transform_3(%arg0: i32) -> (i32, i32, i32, i32) {
    %c0_i32 = arith.constant 0 : i32
    %c0_i32_0 = arith.constant 0 : i32
    %c0_i32_1 = arith.constant 0 : i32
    %c0_i32_2 = arith.constant 0 : i32
    return %arg0, %c0_i32, %c0_i32_0, %c0_i32_1 : i32, i32, i32, i32
  }
  func.func @transform_4(%arg0: i32) -> (i32, i32, i32) {
    %c0_i32 = arith.constant 0 : i32
    %c0_i32_0 = arith.constant 0 : i32
    %c0_i32_1 = arith.constant 0 : i32
    return %arg0, %c0_i32, %c0_i32_0 : i32, i32, i32
  }
  func.func @transform_5(%arg0: i32) -> (i32, i32, i32) {
    %c0_i32 = arith.constant 0 : i32
    %c0_i32_0 = arith.constant 0 : i32
    %c0_i32_1 = arith.constant 0 : i32
    return %arg0, %c0_i32, %c0_i32_0 : i32, i32, i32
  }
}

module attributes {stable_mosaic.version = 11 : i64} {
  func.func @flatten_fc_kernel(%arg0: i32, %arg1: i32, %arg2: memref<1x2x2048xbf16, #tpu.memory_space<vmem>>, %arg3: memref<1x2048x256xbf16, #tpu.memory_space<vmem>>, %arg4: memref<1x1x256xf32, #tpu.memory_space<vmem>>, %arg5: memref<1x2x256xf32, #tpu.memory_space<vmem>>) attributes {dimension_semantics = [#tpu.dimension_semantics<parallel>, #tpu.dimension_semantics<arbitrary>], iteration_bounds = array<i64: 2, 2>, scalar_prefetch = 0 : i64, scratch_operands = 0 : i64, tpu.core_type = #tpu.core_type<tc>, window_params = [{transform_indices = @transform_0, window_bounds = array<i64: 1, 2, 2048>}, {transform_indices = @transform_1, window_bounds = array<i64: 1, 2048, 256>}, {transform_indices = @transform_2, window_bounds = array<i64: 1, 1, 256>}, {transform_indices = @transform_3, window_bounds = array<i64: 1, 2, 256>}]} {
    %c0_i32 = arith.constant 0 : i32
    %0 = arith.cmpi eq, %arg1, %c0_i32 : i32
    %1 = arith.extui %0 : i1 to i32
    %c0_i32_0 = arith.constant 0 : i32
    %2 = arith.cmpi ne, %1, %c0_i32_0 : i32
    scf.if %2 {
      %cst_13 = arith.constant 0.000000e+00 : f32
      %17 = vector.broadcast %cst_13 : f32 to vector<1x2x256xf32>
      %c0_14 = arith.constant 0 : index
      %c0_15 = arith.constant 0 : index
      %c0_16 = arith.constant 0 : index
      %18 = vector.load %arg5[%c0_14, %c0_15, %c0_16] : memref<1x2x256xf32, #tpu.memory_space<vmem>>, vector<1x2x256xf32>
      tpu.vector_store %arg5[%c0_14, %c0_15, %c0_16], %17 {strides = array<i32>} : memref<1x2x256xf32, #tpu.memory_space<vmem>>, vector<1x2x256xf32>,
    } else {
    }
    %c0 = arith.constant 0 : index
    %c0_1 = arith.constant 0 : index
    %c0_2 = arith.constant 0 : index
    %3 = vector.load %arg5[%c0, %c0_1, %c0_2] : memref<1x2x256xf32, #tpu.memory_space<vmem>>, vector<1x2x256xf32>
    %4 = vector.shape_cast %3 : vector<1x2x256xf32> to vector<2x256xf32>
    %c0_3 = arith.constant 0 : index
    %c0_4 = arith.constant 0 : index
    %c0_5 = arith.constant 0 : index
    %5 = vector.load %arg2[%c0_3, %c0_4, %c0_5] : memref<1x2x2048xbf16, #tpu.memory_space<vmem>>, vector<1x2x2048xbf16>
    %6 = vector.shape_cast %5 : vector<1x2x2048xbf16> to vector<2x2048xbf16>
    %c0_6 = arith.constant 0 : index
    %c0_7 = arith.constant 0 : index
    %c0_8 = arith.constant 0 : index
    %7 = vector.load %arg3[%c0_6, %c0_7, %c0_8] : memref<1x2048x256xbf16, #tpu.memory_space<vmem>>, vector<1x2048x256xbf16>
    %8 = vector.shape_cast %7 : vector<1x2048x256xbf16> to vector<2048x256xbf16>
    %cst = arith.constant dense<0.000000e+00> : vector<2x256xf32>
    %9 = tpu.matmul %6, %8, %cst {dimension_numbers = #tpu.dot_dimension_numbers<[1], [0], [0], [1], [0, 0, 1, 1], [], []>} : vector<2x2048xbf16>, vector<2048x256xbf16>, vector<2x256xf32> -> vector<2x256xf32>
    %10 = arith.addf %4, %9 : vector<2x256xf32>
    %c0_9 = arith.constant 0 : index
    %c0_10 = arith.constant 0 : index
    %c0_11 = arith.constant 0 : index
    %11 = vector.load %arg5[%c0_9, %c0_10, %c0_11] : memref<1x2x256xf32, #tpu.memory_space<vmem>>, vector<1x2x256xf32>
    %12 = vector.shape_cast %11 : vector<1x2x256xf32> to vector<2x256xf32>
    %13 = vector.shape_cast %10 : vector<2x256xf32> to vector<1x2x256xf32>
    tpu.vector_store %arg5[%c0_9, %c0_10, %c0_11], %13 {strides = array<i32>} : memref<1x2x256xf32, #tpu.memory_space<vmem>>, vector<1x2x256xf32>,
    %c1_i32 = arith.constant 1 : i32
    %14 = arith.cmpi eq, %arg1, %c1_i32 : i32
    %15 = arith.extui %14 : i1 to i32
    %c0_i32_12 = arith.constant 0 : i32
    %16 = arith.cmpi ne, %15, %c0_i32_12 : i32
    scf.if %16 {
      %c0_13 = arith.constant 0 : index
      %c0_14 = arith.constant 0 : index
      %c0_15 = arith.constant 0 : index
      %17 = vector.load %arg5[%c0_13, %c0_14, %c0_15] : memref<1x2x256xf32, #tpu.memory_space<vmem>>, vector<1x2x256xf32>
      %18 = vector.shape_cast %17 : vector<1x2x256xf32> to vector<2x256xf32>
      %c0_16 = arith.constant 0 : index
      %c0_17 = arith.constant 0 : index
      %c0_18 = arith.constant 0 : index
      %19 = vector.load %arg4[%c0_16, %c0_17, %c0_18] : memref<1x1x256xf32, #tpu.memory_space<vmem>>, vector<1x1x256xf32>
      %20 = vector.shape_cast %19 : vector<1x1x256xf32> to vector<1x256xf32>
      %21 = vector.broadcast %20 : vector<1x256xf32> to vector<2x256xf32>
      %22 = arith.addf %18, %21 : vector<2x256xf32>
      %cst_19 = arith.constant 0.000000e+00 : f32
      %23 = vector.broadcast %cst_19 : f32 to vector<2x256xf32>
      %24 = arith.maximumf %22, %23 : vector<2x256xf32>
      %c0_20 = arith.constant 0 : index
      %c0_21 = arith.constant 0 : index
      %c0_22 = arith.constant 0 : index
      %25 = vector.load %arg5[%c0_20, %c0_21, %c0_22] : memref<1x2x256xf32, #tpu.memory_space<vmem>>, vector<1x2x256xf32>
      %26 = vector.shape_cast %25 : vector<1x2x256xf32> to vector<2x256xf32>
      %27 = vector.shape_cast %24 : vector<2x256xf32> to vector<1x2x256xf32>
      tpu.vector_store %arg5[%c0_20, %c0_21, %c0_22], %27 {strides = array<i32>} : memref<1x2x256xf32, #tpu.memory_space<vmem>>, vector<1x2x256xf32>,
    } else {
    }
    return
  }
  func.func @transform_0(%arg0: i32, %arg1: i32) -> (i32, i32, i32) {
    %c0_i32 = arith.constant 0 : i32
    %c0_i32_0 = arith.constant 0 : i32
    return %arg0, %c0_i32, %arg1 : i32, i32, i32
  }
  func.func @transform_1(%arg0: i32, %arg1: i32) -> (i32, i32, i32) {
    %c0_i32 = arith.constant 0 : i32
    %c0_i32_0 = arith.constant 0 : i32
    return %arg0, %arg1, %c0_i32 : i32, i32, i32
  }
  func.func @transform_2(%arg0: i32, %arg1: i32) -> (i32, i32, i32) {
    %c0_i32 = arith.constant 0 : i32
    %c0_i32_0 = arith.constant 0 : i32
    %c0_i32_1 = arith.constant 0 : i32
    return %arg0, %c0_i32, %c0_i32_0 : i32, i32, i32
  }
  func.func @transform_3(%arg0: i32, %arg1: i32) -> (i32, i32, i32) {
    %c0_i32 = arith.constant 0 : i32
    %c0_i32_0 = arith.constant 0 : i32
    %c0_i32_1 = arith.constant 0 : i32
    return %arg0, %c0_i32, %c0_i32_0 : i32, i32, i32
  }
}

</mosaic_0001>

<bundles_post_ra>
// kernel: mul.5
= control target key start
LH: loop header
LB: loop body
LE: loop exit
PB: predicated region body
PF: predicated region fallthrough
CT: control target
= control target key end

     0   :  { %2 = vsyncpa [#allocation1], 0  ;;  %s46_s9 = smov [#allocation0]   ;;  %s63_s0 = inlined_call_operand.vmem [shape: f32[2], index: 0, kind: input, shape index: {}]   ;;  %s64_s1 = inlined_call_operand.hbm [shape: f32[2,2], index: 1, kind: output, shape index: {}]  }
   0x1   :  { %v5_v0 = vld [vmem:[%s63_s0] ss:$0 sm:$0xff]  ;;  %s12_s1 = sshll.u32 %s64_s1, 4  ;;  %s10_s10 = sshll.u32 %s46_s9, 4  ;;  %s13_s1 = int_to_ptr.hbm [resolvable:$true] %s12_s1  ;;  %s11_s10 = int_to_ptr.vmem [resolvable:$true] %s10_s10 }
   0x2   :  { %6 = vst [vmem:[#allocation0] sm:$0x3] %v5_v0 }
   0x3   :  { %15 = dma.vmem_to_hbm [thread:$0]  %s11_s10, 32, %s13_s1, [#allocation1]  }
   0x4   :  { %44 = dma.done.wait [#allocation1], 32  }
   0x5   :  { %45 = vsyncadd [#allocation1], 4294967264 }
   0x6   :  { %18 = vsyncpa [#allocation1], 1 }

// kernel: _actor_critic_forward.5
= control target key start
LH: loop header
LB: loop body
LE: loop exit
PB: predicated region body
PF: predicated region fallthrough
CT: control target
= control target key end

     0   :  { %17 = vsyncpa [#allocation3], 0  ;;  %s2669_s0 = inlined_call_operand.vmem [shape: f32[2,2,256], index: 0, kind: input, shape index: {}]   ;;  %s2670_s1 = inlined_call_operand.hbm [shape: f32[2,3], index: 1, kind: input, shape index: {}]   ;;  %s2671_s2 = inlined_call_operand.hbm [shape: f32[3,128], index: 2, kind: input, shape index: {}]   ;;  %s2672_s3 = inlined_call_operand.hbm [shape: f32[1,128], index: 3, kind: input, shape index: {}]   ;;  %s2673_s4 = inlined_call_operand.hbm [shape: f32[128,128], index: 4, kind: input, shape index: {}]   ;;  %s2674_s5 = inlined_call_operand.hbm [shape: f32[1,128], index: 5, kind: input, shape index: {}]   ;;  %s2675_s6 = inlined_call_operand.hbm [shape: bf16[640,512], index: 6, kind: input, shape index: {}]   ;;  %s2676_s7 = inlined_call_operand.hbm [shape: f32[1,512], index: 7, kind: input, shape index: {}]   ;;  %s2677_s8 = inlined_call_operand.hbm [shape: bf16[512,256], index: 8, kind: input, shape index: {}]   ;;  %s2678_s9 = inlined_call_operand.hbm [shape: f32[1,256], index: 9, kind: input, shape index: {}]   ;;  %s2679_s10 = inlined_call_operand.hbm [shape: f32[256,128], index: 10, kind: input, shape index: {}]   ;;  %s2680_s11 = inlined_call_operand.hbm [shape: f32[1,128], index: 11, kind: input, shape index: {}]   ;;  %s2681_s12 = inlined_call_operand.vmem [shape: f32[2,128], index: 12, kind: output, shape index: {}]  }
   0x1   :  { %18 = vsyncpa [#allocation5], 0 }
   0x2   :  { %19 = vsyncpa [#allocation8], 0 }
   0x3   :  { %20 = vsyncpa [#allocation11], 0 }
   0x4   :  { %21 = vsyncpa [#allocation14], 0  ;;  %s41_s23 = sshll.u32 %s2671_s2, 4  ;;  %s42_s23 = int_to_ptr.hbm [resolvable:$true] %s41_s23 }
   0x5   :  { %22 = vsyncpa [#allocation17], 0  ;;  %s1939_s24 = smov [#allocation4]   ;;  %s62_s28 = sshll.u32 %s2673_s4, 4  ;;  %s63_s28 = int_to_ptr.hbm [resolvable:$true] %s62_s28 }
   0x6   :  { %s43_s25 = sshll.u32 %s1939_s24, 4  ;;  %s1940_s29 = smov [#allocation7]   ;;  %s44_s25 = int_to_ptr.vmem [resolvable:$true] %s43_s25 }
   0x7   :  { %46 = dma.hbm_to_vmem [thread:$0]  %s42_s23, 64, %s44_s25, [#allocation5]  }
   0x8   :  { %s64_s30 = sshll.u32 %s1940_s29, 4  ;;  %s1941_s13 = smov 128   ;;  %s65_s30 = int_to_ptr.vmem [resolvable:$true] %s64_s30 }
   0x9   :  { %s1942_s14 = smov 8   ;;  %s86_s2 = sshll.u32 %s2675_s6, 4  ;;  %s87_s2 = int_to_ptr.hbm [resolvable:$true] %s86_s2 }
   0xa   :  { %70 = dma.hbm_to_vmem [thread:$0]  %s63_s28, 2048, %s65_s30, [#allocation8], %s1941_s13, %s1941_s13, %s1942_s14  }
   0xb   :  { %s1943_s17 = smov [#allocation10]   ;;  %s110_s4 = sshll.u32 %s2677_s8, 4  ;;  %s111_s4 = int_to_ptr.hbm [resolvable:$true] %s110_s4 }
   0xc   :  { %s88_s18 = sshll.u32 %s1943_s17, 4  ;;  %s1944_s21 = smov 256   ;;  %s89_s18 = int_to_ptr.vmem [resolvable:$true] %s88_s18 }
   0xd   :  { %s1945_s22 = smov 16   ;;  %s1946_s23 = smov [#allocation13]  }
   0xe   :  { %94 = dma.hbm_to_vmem [thread:$0]  %s87_s2, 20480, %s89_s18, [#allocation11], %s1944_s21, %s1944_s21, %s1945_s22  }
   0xf   :  { %s112_s24 = sshll.u32 %s1946_s23, 4  ;;  %s134_s27 = sshll.u32 %s2679_s10, 4  ;;  %s113_s24 = int_to_ptr.vmem [resolvable:$true] %s112_s24  ;;  %s135_s27 = int_to_ptr.hbm [resolvable:$true] %s134_s27 }
  0x10   :  { %118 = dma.hbm_to_vmem [thread:$0]  %s111_s4, 8192, %s113_s24, [#allocation14], %s1941_s13, %s1941_s13, %s1942_s14  }
  0x11   :  { %s30_s29 = sshll.u32 %s2670_s1, 4  ;;  %s1947_s30 = smov [#allocation16]   ;;  %s31_s29 = int_to_ptr.hbm [resolvable:$true] %s30_s29 }
  0x12   :  { %s136_s15 = sshll.u32 %s1947_s30, 4  ;;  %s1948_s8 = smov [#allocation2]   ;;  %s137_s15 = int_to_ptr.vmem [resolvable:$true] %s136_s15 }
  0x13   :  { %142 = dma.hbm_to_vmem [thread:$0]  %s135_s27, 4096, %s137_s15, [#allocation17], %s1941_s13, %s1941_s13, %s1942_s14  }
  0x14   :  { %s32_s16 = sshll.u32 %s1948_s8, 4  ;;  %s52_s18 = sshll.u32 %s2672_s3, 4  ;;  %s33_s16 = int_to_ptr.vmem [resolvable:$true] %s32_s16  ;;  %s53_s18 = int_to_ptr.hbm [resolvable:$true] %s52_s18 }
  0x15   :  { %35 = dma.hbm_to_vmem [thread:$0]  %s31_s29, 32, %s33_s16, [#allocation3]  }
  0x16   :  { %s76_s20 = sshll.u32 %s2674_s5, 4  ;;  %s1949_s4 = smov [#allocation6]   ;;  %s77_s20 = int_to_ptr.hbm [resolvable:$true] %s76_s20 }
  0x17   :  { %s54_s1 = sshll.u32 %s1949_s4, 4  ;;  %s1950_s21 = smov [#allocation9]   ;;  %s55_s1 = int_to_ptr.vmem [resolvable:$true] %s54_s1 }
  0x18   :  { %57 = dma.hbm_to_vmem [thread:$0]  %s53_s18, 16, %s55_s1, [#allocation5]  }
  0x19   :  { %s78_s13 = sshll.u32 %s1950_s21, 4  ;;  %s100_s23 = sshll.u32 %s2676_s7, 4  ;;  %s79_s13 = int_to_ptr.vmem [resolvable:$true] %s78_s13  ;;  %s101_s23 = int_to_ptr.hbm [resolvable:$true] %s100_s23 }
  0x1a   :  { %81 = dma.hbm_to_vmem [thread:$0]  %s77_s20, 16, %s79_s13, [#allocation8]  }
  0x1b   :  { %s124_s25 = sshll.u32 %s2678_s9, 4  ;;  %s1951_s26 = smov [#allocation12]   ;;  %s125_s25 = int_to_ptr.hbm [resolvable:$true] %s124_s25 }
  0x1c   :  { %s102_s5 = sshll.u32 %s1951_s26, 4  ;;  %s1952_s27 = smov [#allocation15]   ;;  %s103_s5 = int_to_ptr.vmem [resolvable:$true] %s102_s5 }
  0x1d   :  { %105 = dma.hbm_to_vmem [thread:$0]  %s101_s23, 64, %s103_s5, [#allocation11]  }
  0x1e   :  { %s126_s6 = sshll.u32 %s1952_s27, 4  ;;  %s148_s30 = sshll.u32 %s2680_s11, 4  ;;  %s127_s6 = int_to_ptr.vmem [resolvable:$true] %s126_s6  ;;  %s149_s30 = int_to_ptr.hbm [resolvable:$true] %s148_s30 }
  0x1f   :  { %129 = dma.hbm_to_vmem [thread:$0]  %s125_s25, 32, %s127_s6, [#allocation14]  }
  0x20   :  { %s1953_s7 = smov [#allocation18]  }
  0x21   :  { %s150_s15 = sshll.u32 %s1953_s7, 4  ;;  %s151_s15 = int_to_ptr.vmem [resolvable:$true] %s150_s15 }
  0x22   :  { %153 = dma.hbm_to_vmem [thread:$0]  %s149_s30, 16, %s151_s15, [#allocation17]  }
  0x23   :  { %1927 = dma.done.wait [#allocation3], 32  }
  0x24   :  { %1928 = vsyncadd [#allocation3], 4294967264 }
  0x25   :  { %1929 = dma.done.wait [#allocation5], 80  }
  0x26   :  { %1930 = vsyncadd [#allocation5], 4294967216 }
  0x27   :  { %1931 = dma.done.wait [#allocation8], 2064  }
  0x28   :  { %1932 = vsyncadd [#allocation8], 4294965232 }
  0x29   :  { %1933 = dma.done.wait [#allocation11], 20544  }
  0x2a   :  { %1934 = vsyncadd [#allocation11], 4294946752 }
  0x2b   :  { %1935 = dma.done.wait [#allocation14], 8224  }
  0x2c   :  { %1936 = vsyncadd [#allocation14], 4294959072 }
  0x2d   :  { %1937 = dma.done.wait [#allocation17], 4112  }
  0x2e   :  { %1938 = vsyncadd [#allocation17], 4294963184  ;;  %v1954_v0 = vmov 0   ;;  %v1955_v1 = vmov 2   ;;  %v202_v2 = vld [vmem:[#allocation2] sm:$0x3] }
  0x2f   :  { %1653 = vset.pattern.permute.xlu0 %v1954_v0  ;;  %1655 = vset.pattern.permute.xlu1 %v1955_v1  ;;  %v247_v3 = vld [vmem:[#allocation7 + $0x78] sm:$0xff]  ;;  %v246_v4 = vld [vmem:[#allocation7 + $0x70] sm:$0xff]  ;;  %v245_v7 = vld [vmem:[#allocation7 + $0x68] sm:$0xff]  ;;  %v1956_v29 = vmov 1  }
  0x30   :  { %206 = vperm.xlu0 %1653, %v202_v2   ;;  %225 = vperm.xlu1 %1655, %v202_v2   ;;  %v2056_v5 = vld [vmem:[#allocation10 + $0x3f0] sm:$0xff]  ;;  %v2059_v10 = vld [vmem:[#allocation10 + $0x3e0] sm:$0xff] }
  0x31   :  { %252 = vmatpush.msra.mxu0 %v247_v3  ;;  %v495_v6 = vld [vmem:[#allocation10 + $0x2f0] sm:$0xff]  ;;  %v653_v8 = vunpack.c.l.bf16 %v2056_v5  ;;  %v493_v11 = vld [vmem:[#allocation10 + $0x2e0] sm:$0xff]  ;;  %v649_v13 = vunpack.c.l.bf16 %v2059_v10 }
  0x32   :  { %v590_v9 = vunpack.c.h.bf16 %v495_v6  ;;  %v589_v12 = vunpack.c.l.bf16 %v495_v6  ;;  %v586_v14 = vunpack.c.h.bf16 %v493_v11  ;;  %v2062_v15 = vld [vmem:[#allocation10 + $0x3d0] sm:$0xff]  ;;  %v585_v17 = vunpack.c.l.bf16 %v493_v11  ;;  %v244_v18 = vld [vmem:[#allocation7 + $0x60] sm:$0xff]  ;;  %v241_v36 = vld [vmem:[#allocation7 + $0x48] sm:$0xff] }
  0x33   :  { %253 = vmatpush.msra.mxu0 %v246_v4  ;;  %v491_v16 = vld [vmem:[#allocation10 + $0x2d0] sm:$0xff]  ;;  %683 = vmatpush.msra.mxu2 %v653_v8  ;;  %v645_v19 = vunpack.c.l.bf16 %v2062_v15  ;;  %v2065_v20 = vld [vmem:[#allocation10 + $0x3c0] sm:$0xff] }
  0x34   :  { %703 = vmatpush.msra.mxu3 %v590_v9  ;;  %663 = vmatpush.msra.mxu1 %v589_v12  ;;  %v489_v21 = vld [vmem:[#allocation10 + $0x2c0] sm:$0xff]  ;;  %v2067_v22 = vld [vmem:[#allocation10 + $0x3b0] sm:$0xff]  ;;  %v582_v24 = vunpack.c.h.bf16 %v491_v16  ;;  %v641_v25 = vunpack.c.l.bf16 %v2065_v20  ;;  %v581_v26 = vunpack.c.l.bf16 %v491_v16 }
  0x35   :  { %254 = vmatpush.msra.mxu0 %v245_v7  ;;  %v243_v23 = vld [vmem:[#allocation7 + $0x58] sm:$0xff]  ;;  %684 = vmatpush.msra.mxu2 %v649_v13  ;;  %v2070_v28 = vld [vmem:[#allocation10 + $0x3a0] sm:$0xff]  ;;  %v242_v30 = vld [vmem:[#allocation7 + $0x50] sm:$0xff]  ;;  %v578_v31 = vunpack.c.h.bf16 %v489_v21  ;;  %v637_v32 = vunpack.c.l.bf16 %v2067_v22  ;;  %v577_v33 = vunpack.c.l.bf16 %v489_v21 }
  0x36   :  { %704 = vmatpush.msra.mxu3 %v586_v14  ;;  %664 = vmatpush.msra.mxu1 %v585_v17  ;;  %v487_v27 = vld [vmem:[#allocation10 + $0x2b0] sm:$0xff]  ;;  %v485_v34 = vld [vmem:[#allocation10 + $0x2a0] sm:$0xff]  ;;  %v633_v38 = vunpack.c.l.bf16 %v2070_v28 }
  0x37   :  { %255 = vmatpush.msra.mxu0 %v244_v18  ;;  %685 = vmatpush.msra.mxu2 %v645_v19  ;;  %v2073_v35 = vld [vmem:[#allocation10 + $0x390] sm:$0xff]  ;;  %v574_v37 = vunpack.c.h.bf16 %v487_v27  ;;  %v573_v39 = vunpack.c.l.bf16 %v487_v27  ;;  %v2076_v41 = vld [vmem:[#allocation10 + $0x380] sm:$0xff]  ;;  %v570_v43 = vunpack.c.h.bf16 %v485_v34  ;;  %v569_v45 = vunpack.c.l.bf16 %v485_v34 }
  0x38   :  { %1654 = vset.pattern.permute.xlu0 %v1956_v29  ;;  %705 = vmatpush.msra.mxu3 %v582_v24  ;;  %v483_v40 = vld [vmem:[#allocation10 + $0x290] sm:$0xff]  ;;  %v240_v42 = vld [vmem:[#allocation7 + $0x40] sm:$0xff]  ;;  %v629_v44 = vunpack.c.l.bf16 %v2073_v35  ;;  %v625_v50 = vunpack.c.l.bf16 %v2076_v41  ;;  %v237_v55 = vld [vmem:[#allocation7 + $0x28] sm:$0xff] }
  0x39   :  { %217 = vperm.xlu0 %1654, %v202_v2   ;;  %256 = vmatpush.msra.mxu0 %v243_v23  ;;  %v481_v46 = vld [vmem:[#allocation10 + $0x280] sm:$0xff]  ;;  %v2079_v47 = vld [vmem:[#allocation10 + $0x370] sm:$0xff]  ;;  %v566_v49 = vunpack.c.h.bf16 %v483_v40  ;;  %v565_v52 = vunpack.c.l.bf16 %v483_v40  ;;  %v650_v40 = vunpack.c.h.bf16 %v2059_v10 }
  0x3a   :  { %686 = vmatpush.msra.mxu2 %v641_v25  ;;  %665 = vmatpush.msra.mxu1 %v581_v26  ;;  %v239_v48 = vld [vmem:[#allocation7 + $0x38] sm:$0xff]  ;;  %v238_v51 = vld [vmem:[#allocation7 + $0x30] sm:$0xff]  ;;  %v2082_v54 = vld [vmem:[#allocation10 + $0x360] sm:$0xff]  ;;  %v562_v56 = vunpack.c.h.bf16 %v481_v46  ;;  %v621_v57 = vunpack.c.l.bf16 %v2079_v47  ;;  %v561_v59 = vunpack.c.l.bf16 %v481_v46  ;;  %v646_v46 = vunpack.c.h.bf16 %v2062_v15 }
  0x3b   :  { %257 = vmatpush.msra.mxu0 %v242_v30  ;;  %706 = vmatpush.msra.mxu3 %v578_v31  ;;  %v479_v53 = vld [vmem:[#allocation10 + $0x270] sm:$0xff]  ;;  %v477_v58 = vld [vmem:[#allocation10 + $0x260] sm:$0xff]  ;;  %v617_v62 = vunpack.c.l.bf16 %v2082_v54 }
  0x3c   :  { %687 = vmatpush.msra.mxu2 %v637_v32  ;;  %666 = vmatpush.msra.mxu1 %v577_v33  ;;  %v2085_v60 = vld [vmem:[#allocation10 + $0x350] sm:$0xff]  ;;  %v558_v61 = vunpack.c.h.bf16 %v479_v53  ;;  %v557_v63 = vunpack.c.l.bf16 %v479_v53  ;;  %v2088_v2 = vld [vmem:[#allocation10 + $0x340] sm:$0xff]  ;;  %v554_v4 = vunpack.c.h.bf16 %v477_v58  ;;  %v553_v7 = vunpack.c.l.bf16 %v477_v58  ;;  %v2118_v58 = vld [vmem:[#allocation10 + $0x3d8] sm:$0xff] }
  0x3d   :  { %258 = vmatpush.msra.mxu0 %v241_v36  ;;  %707 = vmatpush.msra.mxu3 %v574_v37  ;;  %v475_v0 = vld [vmem:[#allocation10 + $0x250] sm:$0xff]  ;;  %v236_v3 = vld [vmem:[#allocation7 + $0x20] sm:$0xff]  ;;  %v613_v6 = vunpack.c.l.bf16 %v2085_v60  ;;  %v609_v13 = vunpack.c.l.bf16 %v2088_v2  ;;  %v233_v25 = vld [vmem:[#allocation7 + $0x8] sm:$0xff]  ;;  %v654_v33 = vunpack.c.h.bf16 %v2056_v5 }
  0x3e   :  { %688 = vmatpush.msra.mxu2 %v633_v38  ;;  %667 = vmatpush.msra.mxu1 %v573_v39  ;;  %v473_v8 = vld [vmem:[#allocation10 + $0x240] sm:$0xff]  ;;  %v2091_v9 = vld [vmem:[#allocation10 + $0x330] sm:$0xff]  ;;  %v550_v12 = vunpack.c.h.bf16 %v475_v0  ;;  %v549_v14 = vunpack.c.l.bf16 %v475_v0  ;;  %v490_v0 = vld [vmem:[#allocation10 + $0x2c8] sm:$0xff] }
  0x3f   :  { %259 = vmatpush.msra.mxu0 %v240_v42  ;;  %708 = vmatpush.msra.mxu3 %v570_v43  ;;  %v235_v11 = vld [vmem:[#allocation7 + $0x18] sm:$0xff]  ;;  %v2094_v17 = vld [vmem:[#allocation10 + $0x320] sm:$0xff]  ;;  %v234_v18 = vld [vmem:[#allocation7 + $0x10] sm:$0xff]  ;;  %v546_v19 = vunpack.c.h.bf16 %v473_v8  ;;  %v605_v21 = vunpack.c.l.bf16 %v2091_v9  ;;  %v545_v23 = vunpack.c.l.bf16 %v473_v8 }
  0x40   :  { %689 = vmatpush.msra.mxu2 %v629_v44  ;;  %668 = vmatpush.msra.mxu1 %v569_v45  ;;  %v471_v16 = vld [vmem:[#allocation10 + $0x230] sm:$0xff]  ;;  %v469_v24 = vld [vmem:[#allocation10 + $0x220] sm:$0xff]  ;;  %v601_v27 = vunpack.c.l.bf16 %v2094_v17  ;;  %v2105_v43 = vld [vmem:[#allocation10 + $0x3f8] sm:$0xff] }
  0x41   :  { %260 = vmatpush.msra.mxu0 %v239_v48  ;;  %709 = vmatpush.msra.mxu3 %v566_v49  ;;  %v542_v26 = vunpack.c.h.bf16 %v471_v16  ;;  %v2098_v29 = vld [vmem:[#allocation10 + $0x310] sm:$0xff]  ;;  %v541_v30 = vunpack.c.l.bf16 %v471_v16  ;;  %v232_v32 = vld [vmem:[#allocation7] sm:$0xff]  ;;  %v538_v34 = vunpack.c.h.bf16 %v469_v24  ;;  %v537_v38 = vunpack.c.l.bf16 %v469_v24  ;;  %v2109_v49 = vld [vmem:[#allocation10 + $0x3e8] sm:$0xff] }
  0x42   :  { %690 = vmatpush.msra.mxu2 %v625_v50  ;;  %669 = vmatpush.msra.mxu1 %v565_v52  ;;  %v467_v31 = vld [vmem:[#allocation10 + $0x210] sm:$0xff]  ;;  %v2101_v36 = vld [vmem:[#allocation10 + $0x300] sm:$0xff]  ;;  %v597_v37 = vunpack.c.l.bf16 %v2098_v29  ;;  %v496_v44 = vld [vmem:[#allocation10 + $0x2f8] sm:$0xff]  ;;  %v655_v10 = vunpack.c.l.bf16 %v2105_v43  ;;  %v642_v52 = vunpack.c.h.bf16 %v2065_v20  ;;  %v630_v20 = vunpack.c.h.bf16 %v2073_v35 }
  0x43   :  { %261 = vmatpush.msra.mxu0 %v238_v51  ;;  %710 = vmatpush.msra.mxu3 %v562_v56  ;;  %v465_v39 = vld [vmem:[#allocation10 + $0x200] sm:$0xff]  ;;  %v534_v42 = vunpack.c.h.bf16 %v467_v31  ;;  %v593_v5 = vunpack.c.l.bf16 %v2101_v36  ;;  %v533_v45 = vunpack.c.l.bf16 %v467_v31  ;;  %v494_v50 = vld [vmem:[#allocation10 + $0x2e8] sm:$0xff]  ;;  %v592_v51 = vunpack.c.h.bf16 %v496_v44 }
  0x44   :  { %691 = vmatpush.msra.mxu2 %v621_v57  ;;  %670 = vmatpush.msra.mxu1 %v561_v59  ;;  %v530_v48 = vunpack.c.h.bf16 %v465_v39  ;;  %v529_v53 = vunpack.c.l.bf16 %v465_v39  ;;  %v588_v15 = vunpack.c.h.bf16 %v494_v50  ;;  %v638_v56 = vunpack.c.h.bf16 %v2067_v22  ;;  %v492_v59 = vld [vmem:[#allocation10 + $0x2d8] sm:$0xff] }
  0x45   :  { %262 = vmatpush.msra.mxu0 %v237_v55  ;;  %711 = vmatpush.msra.mxu3 %v558_v61  ;;  %v651_v55 = vunpack.c.l.bf16 %v2109_v49  ;;  %v634_v57 = vunpack.c.h.bf16 %v2070_v28  ;;  %v626_v22 = vunpack.c.h.bf16 %v2076_v41  ;;  %v591_v61 = vunpack.c.l.bf16 %v496_v44  ;;  %v2122_v28 = vld [vmem:[#allocation10 + $0x3c8] sm:$0xff]  ;;  %v488_v41 = vld [vmem:[#allocation10 + $0x2b8] sm:$0xff] }
  0x46   :  { %692 = vmatpush.msra.mxu2 %v617_v62  ;;  %671 = vmatpush.msra.mxu1 %v557_v63  ;;  %v647_v62 = vunpack.c.l.bf16 %v2118_v58  ;;  %v584_v63 = vunpack.c.h.bf16 %v492_v59  ;;  %v622_v35 = vunpack.c.h.bf16 %v2079_v47  ;;  %v583_v8 = vunpack.c.l.bf16 %v492_v59  ;;  %v2147_v44 = vld [vmem:[#allocation10 + $0x368] sm:$0xff] }
  0x47   :  { %263 = vmatpush.msra.mxu0 %v236_v3  ;;  %712 = vmatpush.msra.mxu3 %v554_v4  ;;  %v587_v3 = vunpack.c.l.bf16 %v494_v50  ;;  %v580_v4 = vunpack.c.h.bf16 %v490_v0  ;;  %v614_v16 = vunpack.c.h.bf16 %v2085_v60  ;;  %v575_v24 = vunpack.c.l.bf16 %v488_v41  ;;  %v2138_v60 = vld [vmem:[#allocation10 + $0x388] sm:$0xff]  ;;  %v476_v50 = vld [vmem:[#allocation10 + $0x258] sm:$0xff] }
  0x48   :  { %693 = vmatpush.msra.mxu2 %v613_v6  ;;  %672 = vmatpush.msra.mxu1 %v553_v7  ;;  %v2126_v6 = vld [vmem:[#allocation10 + $0x3b8] sm:$0xff]  ;;  %v618_v7 = vunpack.c.h.bf16 %v2082_v54 }
  0x49   :  { %264 = vmatpush.msra.mxu0 %v235_v11  ;;  %713 = vmatpush.msra.mxu3 %v550_v12  ;;  %v2129_v11 = vld [vmem:[#allocation10 + $0x3a8] sm:$0xff]  ;;  %v639_v47 = vunpack.c.l.bf16 %v2126_v6 }
  0x4a   :  { %694 = vmatpush.msra.mxu2 %v609_v13  ;;  %673 = vmatpush.msra.mxu1 %v549_v14  ;;  %v486_v12 = vld [vmem:[#allocation10 + $0x2a8] sm:$0xff]  ;;  %v2131_v13 = vld [vmem:[#allocation10 + $0x398] sm:$0xff]  ;;  %v576_v14 = vunpack.c.h.bf16 %v488_v41 }
  0x4b   :  { %265 = vmatpush.msra.mxu0 %v234_v18  ;;  %714 = vmatpush.msra.mxu3 %v546_v19  ;;  %v484_v18 = vld [vmem:[#allocation10 + $0x298] sm:$0xff]  ;;  %v579_v19 = vunpack.c.l.bf16 %v490_v0  ;;  %v572_v54 = vunpack.c.h.bf16 %v486_v12  ;;  %v571_v31 = vunpack.c.l.bf16 %v486_v12  ;;  %v2169_v12 = vld [vmem:[#allocation10 + $0x308] sm:$0xff] }
  0x4c   :  { %695 = vmatpush.msra.mxu2 %v605_v21  ;;  %674 = vmatpush.msra.mxu1 %v545_v23  ;;  %v635_v21 = vunpack.c.l.bf16 %v2129_v11  ;;  %v610_v23 = vunpack.c.h.bf16 %v2088_v2  ;;  %v2142_v2 = vld [vmem:[#allocation10 + $0x378] sm:$0xff] }
  0x4d   :  { %266 = vmatpush.msra.mxu0 %v233_v25  ;;  %715 = vmatpush.msra.mxu3 %v542_v26  ;;  %v631_v25 = vunpack.c.l.bf16 %v2131_v13  ;;  %v568_v26 = vunpack.c.h.bf16 %v484_v18  ;;  %v623_v39 = vunpack.c.l.bf16 %v2142_v2 }
  0x4e   :  { %696 = vmatpush.msra.mxu2 %v601_v27  ;;  %675 = vmatpush.msra.mxu1 %v541_v30  ;;  %v482_v27 = vld [vmem:[#allocation10 + $0x288] sm:$0xff]  ;;  %v606_v30 = vunpack.c.h.bf16 %v2091_v9  ;;  %v598_v9 = vunpack.c.h.bf16 %v2098_v29  ;;  %v552_v29 = vunpack.c.h.bf16 %v476_v50 }
  0x4f   :  { %267 = vmatpush.msra.mxu0 %v232_v32  ;;  %716 = vmatpush.msra.mxu3 %v538_v34  ;;  %v627_v32 = vunpack.c.l.bf16 %v2138_v60  ;;  %v480_v34 = vld [vmem:[#allocation10 + $0x278] sm:$0xff] }
  0x50   :  { %697 = vmatpush.msra.mxu2 %v597_v37  ;;  %676 = vmatpush.msra.mxu1 %v537_v38  ;;  %v602_v37 = vunpack.c.h.bf16 %v2094_v17  ;;  %v567_v38 = vunpack.c.l.bf16 %v484_v18  ;;  %v594_v17 = vunpack.c.h.bf16 %v2101_v36 }
  0x51   :  { %723 = vmatpush.msrb.mxu0 %v654_v33  ;;  %717 = vmatpush.msra.mxu3 %v534_v42  ;;  %v564_v33 = vunpack.c.h.bf16 %v482_v27  ;;  %v563_v42 = vunpack.c.l.bf16 %v482_v27 }
  0x52   :  { %698 = vmatpush.msra.mxu2 %v593_v5  ;;  %677 = vmatpush.msra.mxu1 %v533_v45  ;;  %v478_v5 = vld [vmem:[#allocation10 + $0x268] sm:$0xff]  ;;  %v2149_v45 = vld [vmem:[#allocation10 + $0x358] sm:$0xff] }
  0x53   :  { %724 = vmatpush.msrb.mxu0 %v650_v40  ;;  %718 = vmatpush.msra.mxu3 %v530_v48  ;;  %v560_v40 = vunpack.c.h.bf16 %v480_v34  ;;  %v556_v48 = vunpack.c.h.bf16 %v478_v5 }
  0x54   :  { %763 = vmatpush.msrb.mxu2 %v655_v10  ;;  %678 = vmatpush.msra.mxu1 %v529_v53  ;;  %v559_v10 = vunpack.c.l.bf16 %v480_v34  ;;  %v474_v53 = vld [vmem:[#allocation10 + $0x248] sm:$0xff] }
  0x55   :  { %725 = vmatpush.msrb.mxu0 %v646_v46  ;;  %783 = vmatpush.msrb.mxu3 %v592_v51  ;;  %v619_v46 = vunpack.c.l.bf16 %v2147_v44  ;;  %v615_v51 = vunpack.c.l.bf16 %v2149_v45  ;;  %v547_v0 = vunpack.c.l.bf16 %v474_v53 }
  0x56   :  { %764 = vmatpush.msrb.mxu2 %v651_v55  ;;  %1656 = vset.pattern.permute.xlu0 %v1955_v1  ;;  %v643_v1 = vunpack.c.l.bf16 %v2122_v28  ;;  %v555_v55 = vunpack.c.l.bf16 %v478_v5  ;;  %v2191_v5 = vld [vmem:[#allocation10 + $0x1c0] sm:$0xff] }
  0x57   :  { %726 = vmatpush.msrb.mxu0 %v642_v52  ;;  %784 = vmatpush.msrb.mxu3 %v588_v15  ;;  %v2154_v52 = vld [vmem:[#allocation10 + $0x348] sm:$0xff]  ;;  %v548_v15 = vunpack.c.h.bf16 %v474_v53 }
  0x58   :  { %743 = vmatpush.msrb.mxu1 %v591_v61  ;;  %765 = vmatpush.msrb.mxu2 %v647_v62  ;;  %v611_v36 = vunpack.c.l.bf16 %v2154_v52  ;;  %v1634_v61 = vld [vmem:[%s2669_s0 + $0x4] sm:$0xf]  ;;  %v2163_v62 = vld [vmem:[#allocation10 + $0x328] sm:$0xff] }
  0x59   :  { %727 = vmatpush.msrb.mxu0 %v638_v56  ;;  %785 = vmatpush.msrb.mxu3 %v584_v63  ;;  %v2157_v56 = vld [vmem:[#allocation10 + $0x338] sm:$0xff]  ;;  %v470_v63 = vld [vmem:[#allocation10 + $0x228] sm:$0xff]  ;;  %658 = vst [vmem:[#allocation1] ss:$4 sm:$0xff] %v1634_v61 }
  0x5a   :  { %744 = vmatpush.msrb.mxu1 %v587_v3  ;;  %766 = vmatpush.msrb.mxu2 %v643_v1  ;;  %v607_v59 = vunpack.c.l.bf16 %v2157_v56  ;;  %v540_v3 = vunpack.c.h.bf16 %v470_v63  ;;  %v2166_v1 = vld [vmem:[#allocation10 + $0x318] sm:$0xff] }
  0x5b   :  { %728 = vmatpush.msrb.mxu0 %v634_v57  ;;  %786 = vmatpush.msrb.mxu3 %v580_v4  ;;  %v472_v57 = vld [vmem:[#allocation10 + $0x238] sm:$0xff] }
  0x5c   :  { %745 = vmatpush.msrb.mxu1 %v583_v8  ;;  %767 = vmatpush.msrb.mxu2 %v639_v47  ;;  %v468_v4 = vld [vmem:[#allocation10 + $0x218] sm:$0xff]  ;;  %v543_v41 = vunpack.c.l.bf16 %v472_v57  ;;  %v466_v47 = vld [vmem:[#allocation10 + $0x208] sm:$0xff] }
  0x5d   :  { %729 = vmatpush.msrb.mxu0 %v630_v20  ;;  %787 = vmatpush.msrb.mxu3 %v576_v14  ;;  %v551_v20 = vunpack.c.l.bf16 %v476_v50  ;;  %v536_v8 = vunpack.c.h.bf16 %v468_v4  ;;  %v539_v14 = vunpack.c.l.bf16 %v470_v63  ;;  %v532_v18 = vunpack.c.h.bf16 %v466_v47  ;;  %v1657_v50 = vld [vmem:[#allocation4] ss:$0 sm:$0xff] }
  0x5e   :  { %746 = vmatpush.msrb.mxu1 %v579_v19  ;;  %768 = vmatpush.msrb.mxu2 %v635_v21  ;;  %v2172_v19 = vld [vmem:[#allocation10 + $0x1f0] sm:$0xff]  ;;  %v535_v27 = vunpack.c.l.bf16 %v468_v4  ;;  %v531_v34 = vunpack.c.l.bf16 %v466_v47 }
  0x5f   :  { %730 = vmatpush.msrb.mxu0 %v626_v22  ;;  %788 = vmatpush.msrb.mxu3 %v572_v54  ;;  %v544_v22 = vunpack.c.h.bf16 %v472_v57  ;;  %v303_v21 = vld [vmem:[#allocation10 + $0xf0] sm:$0xff]  ;;  %v293_v57 = vld [vmem:[#allocation10 + $0xa0] sm:$0xff] }
  0x60   :  { %747 = vmatpush.msrb.mxu1 %v575_v24  ;;  %769 = vmatpush.msrb.mxu2 %v631_v25  ;;  %v198_v54 = vld [vmem:[%s2669_s0] sm:$0xf]  ;;  %v398_v24 = vunpack.c.h.bf16 %v303_v21  ;;  %v2178_v25 = vld.sshfl [vmem:[#allocation1 + $0x8] sm:$0xff pattern:$0x73625140]  ;;  %v378_v63 = vunpack.c.h.bf16 %v293_v57 }
  0x61   :  { %731 = vmatpush.msrb.mxu0 %v622_v35  ;;  %789 = vmatpush.msrb.mxu3 %v568_v26  ;;  %v603_v35 = vunpack.c.l.bf16 %v2163_v62  ;;  %v2180_v26 = vld.sshfl [vmem:[#allocation1] sm:$0xff pattern:$0x73625140] }
  0x62   :  { %748 = vmatpush.msrb.mxu1 %v571_v31  ;;  %770 = vmatpush.msrb.mxu2 %v627_v32  ;;  %824 = vst [vmem:[#allocation1] ss:$4 sm:$0xff] %v198_v54  ;;  %v301_v31 = vld [vmem:[#allocation10 + $0xe0] sm:$0xff]  ;;  %v291_v4 = vld [vmem:[#allocation10 + $0x90] sm:$0xff] }
  0x63   :  { %732 = vmatpush.msrb.mxu0 %v618_v7  ;;  %790 = vmatpush.msrb.mxu3 %v564_v33  ;;  %v599_v7 = vunpack.c.l.bf16 %v2166_v1  ;;  %v394_v33 = vunpack.c.h.bf16 %v301_v31  ;;  %v374_v47 = vunpack.c.h.bf16 %v291_v4 }
  0x64   :  { %749 = vmatpush.msrb.mxu1 %v567_v38  ;;  %771 = vmatpush.msrb.mxu2 %v623_v39  ;;  %v299_v38 = vld [vmem:[#allocation10 + $0xd0] sm:$0xff]  ;;  %v397_v39 = vunpack.c.l.bf16 %v303_v21  ;;  %v377_v21 = vunpack.c.l.bf16 %v293_v57 }
  0x65   :  { %733 = vmatpush.msrb.mxu0 %v614_v16  ;;  %791 = vmatpush.msrb.mxu3 %v560_v40  ;;  %v595_v16 = vunpack.c.l.bf16 %v2169_v12  ;;  %v389_v53 = vunpack.c.l.bf16 %v299_v38 }
  0x66   :  { %750 = vmatpush.msrb.mxu1 %v563_v42  ;;  %772 = vmatpush.msrb.mxu2 %v619_v46  ;;  %v297_v46 = vld [vmem:[#allocation10 + $0xc0] sm:$0xff] }
  0x67   :  { %734 = vmatpush.msrb.mxu0 %v610_v23  ;;  %792 = vmatpush.msrb.mxu3 %v556_v48  ;;  %v461_v23 = vunpack.c.l.bf16 %v2172_v19  ;;  %v393_v48 = vunpack.c.l.bf16 %v301_v31 }
  0x68   :  { %751 = vmatpush.msrb.mxu1 %v559_v10  ;;  %773 = vmatpush.msrb.mxu2 %v615_v51  ;;  %v386_v10 = vunpack.c.h.bf16 %v297_v46  ;;  %v2194_v51 = vld [vmem:[#allocation10 + $0x1b0] sm:$0xff] }
  0x69   :  { %735 = vmatpush.msrb.mxu0 %v606_v30  ;;  %793 = vmatpush.msrb.mxu3 %v552_v29  ;;  %v2183_v30 = vld [vmem:[#allocation10 + $0x1e0] sm:$0xff]  ;;  %v295_v29 = vld [vmem:[#allocation10 + $0xb0] sm:$0xff] }
  0x6a   :  { %752 = vmatpush.msrb.mxu1 %v555_v55  ;;  %774 = vmatpush.msrb.mxu2 %v611_v36  ;;  %v457_v32 = vunpack.c.l.bf16 %v2183_v30  ;;  %v445_v55 = vunpack.c.l.bf16 %v2194_v51  ;;  %v382_v36 = vunpack.c.h.bf16 %v295_v29 }
  0x6b   :  { %736 = vmatpush.msrb.mxu0 %v602_v37  ;;  %794 = vmatpush.msrb.mxu3 %v548_v15  ;;  %v2187_v37 = vld [vmem:[#allocation10 + $0x1d0] sm:$0xff]  ;;  %v2197_v15 = vld [vmem:[#allocation10 + $0x1a0] sm:$0xff] }
  0x6c   :  { %753 = vmatpush.msrb.mxu1 %v551_v20  ;;  %775 = vmatpush.msrb.mxu2 %v607_v59  ;;  %v453_v40 = vunpack.c.l.bf16 %v2187_v37  ;;  %v1658_v20 = vld [vmem:[#allocation6] ss:$0 sm:$0xff]  ;;  %v1659_v59 = vld [vmem:[#allocation4 + $0x1] ss:$0 sm:$0xff]  ;;  %v441_v61 = vunpack.c.l.bf16 %v2197_v15 }
  0x6d   :  { %737 = vmatpush.msrb.mxu0 %v598_v9  ;;  %795 = vmatpush.msrb.mxu3 %v544_v22  ;;  %v390_v9 = vunpack.c.h.bf16 %v299_v38  ;;  %v385_v22 = vunpack.c.l.bf16 %v297_v46 }
  0x6e   :  { %754 = vmatpush.msrb.mxu1 %v547_v0  ;;  %776 = vmatpush.msrb.mxu2 %v603_v35  ;;  %v1660_v35 = vld [vmem:[#allocation4 + $0x2] ss:$0 sm:$0xff] }
  0x6f   :  { %738 = vmatpush.msrb.mxu0 %v594_v17  ;;  %796 = vmatpush.msrb.mxu3 %v540_v3  ;;  %v449_v17 = vunpack.c.l.bf16 %v2191_v5  ;;  %v2201_v3 = vld [vmem:[#allocation10 + $0x190] sm:$0xff] }
  0x70   :  { %755 = vmatpush.msrb.mxu1 %v543_v41  ;;  %777 = vmatpush.msrb.mxu2 %v599_v7  ;;  %v381_v7 = vunpack.c.l.bf16 %v295_v29  ;;  %v283_v29 = vld [vmem:[#allocation10 + $0x50] sm:$0xff] }
  0x71   :  { %797 = vmatpush.msrb.mxu3 %v536_v8  ;;  %699 = vmatmul.f32.vlgmr.msra.gmra.mxu2 %v2178_v25  ;;  %v437_v8 = vunpack.c.l.bf16 %v2201_v3 }
  0x72   :  { %756 = vmatpush.msrb.mxu1 %v539_v14  ;;  %778 = vmatpush.msrb.mxu2 %v595_v16  ;;  %v2204_v14 = vld [vmem:[#allocation10 + $0x180] sm:$0xff] }
  0x73   :  { %798 = vmatpush.msrb.mxu3 %v532_v18  ;;  %679 = vmatmul.f32.vlgmr.msra.gmra.mxu1 %v2180_v26  ;;  %v289_v16 = vld [vmem:[#allocation10 + $0x80] sm:$0xff]  ;;  %v433_v54 = vunpack.c.l.bf16 %v2204_v14 }
  0x74   :  { %719 = vmatmul.f32.vlgmr.msra.gmra.mxu3 %v2180_v26  ;;  %849 = vmatpush.msra.mxu2 %v461_v23  ;;  %v370_v23 = vunpack.c.h.bf16 %v289_v16  ;;  %v369_v46 = vunpack.c.l.bf16 %v289_v16  ;;  %v277_v16 = vld [vmem:[#allocation10 + $0x20] sm:$0xff] }
  0x75   :  { %869 = vmatpush.msra.mxu3 %v398_v24  ;;  %757 = vmatpush.msrb.mxu1 %v535_v27 }
  0x76   :  { %850 = vmatpush.msra.mxu2 %v457_v32  ;;  %v2208_v32 = vld [vmem:[#allocation10 + $0x170] sm:$0xff] }
  0x77   :  { %870 = vmatpush.msra.mxu3 %v394_v33  ;;  %758 = vmatpush.msrb.mxu1 %v531_v34  ;;  %v287_v33 = vld [vmem:[#allocation10 + $0x70] sm:$0xff]  ;;  %v373_v34 = vunpack.c.l.bf16 %v291_v4  ;;  %v429_v38 = vunpack.c.l.bf16 %v2208_v32 }
  0x78   :  { %851 = vmatpush.msra.mxu2 %v453_v40  ;;  %v279_v4 = vld [vmem:[#allocation10 + $0x30] sm:$0xff] }
  0x79   :  { %829 = vmatpush.msra.mxu1 %v397_v39  ;;  %871 = vmatpush.msra.mxu3 %v390_v9  ;;  %v366_v39 = vunpack.c.h.bf16 %v287_v33  ;;  %v2211_v9 = vld [vmem:[#allocation10 + $0x160] sm:$0xff] }
  0x7a   :  { %852 = vmatpush.msra.mxu2 %v449_v17 }
  0x7b   :  { %830 = vmatpush.msra.mxu1 %v393_v48  ;;  %872 = vmatpush.msra.mxu3 %v386_v10  ;;  %v425_v48 = vunpack.c.l.bf16 %v2211_v9  ;;  %v2214_v10 = vld [vmem:[#allocation10 + $0x150] sm:$0xff] }
  0x7c   :  { %779 = vmatmul.f32.vlgmr.msrb.gmra.mxu2 %v2178_v25  ;;  %759 = vmatmul.f32.vlgmr.msrb.gmra.mxu1 %v2180_v26 }
  0x7d   :  { %831 = vmatpush.msra.mxu1 %v389_v53  ;;  %853 = vmatpush.msra.mxu2 %v445_v55  ;;  %v656_v53 = vunpack.c.h.bf16 %v2105_v43  ;;  %v365_v55 = vunpack.c.l.bf16 %v287_v33  ;;  %v2235_v33 = vld [vmem:[#allocation10 + $0x100] sm:$0xff] }
  0x7e   :  { %873 = vmatpush.msra.mxu3 %v382_v36  ;;  %v421_v36 = vunpack.c.l.bf16 %v2214_v10 }
  0x7f   :  { %832 = vmatpush.msra.mxu1 %v385_v22  ;;  %854 = vmatpush.msra.mxu2 %v441_v61  ;;  %v281_v22 = vld [vmem:[#allocation10 + $0x40] sm:$0xff]  ;;  %v652_v61 = vunpack.c.h.bf16 %v2109_v49  ;;  %v350_v49 = vunpack.c.h.bf16 %v279_v4 }
  0x80   :  { %874 = vmatpush.msra.mxu3 %v378_v63  ;;  %v354_v43 = vunpack.c.h.bf16 %v281_v22 }
  0x81   :  { %833 = vmatpush.msra.mxu1 %v381_v7  ;;  %855 = vmatpush.msra.mxu2 %v437_v8  ;;  %v357_v7 = vunpack.c.l.bf16 %v283_v29 }
  0x82   :  { %875 = vmatpush.msra.mxu3 %v374_v47  ;;  %v2226_v47 = vld [vmem:[#allocation10 + $0x120] sm:$0xff] }
  0x83   :  { %834 = vmatpush.msra.mxu1 %v377_v21  ;;  %856 = vmatpush.msra.mxu2 %v433_v54  ;;  %v353_v21 = vunpack.c.l.bf16 %v281_v22  ;;  %v2230_v54 = vld [vmem:[#allocation10 + $0x110] sm:$0xff]  ;;  %v2253_v22 = vld [vmem:[#allocation10 + $0x1d8] sm:$0xff] }
  0x84   :  { %876 = vmatpush.msra.mxu3 %v370_v23  ;;  %v275_v23 = vld [vmem:[#allocation10 + $0x10] sm:$0xff] }
  0x85   :  { %835 = vmatpush.msra.mxu1 %v373_v34  ;;  %857 = vmatpush.msra.mxu2 %v429_v38  ;;  %v273_v34 = vld [vmem:[#allocation10] sm:$0xff]  ;;  %v636_v38 = vunpack.c.h.bf16 %v2129_v11  ;;  %v2243_v11 = vld.sshfl [vmem:[#allocation1 + $0x8] sm:$0xff pattern:$0x73625140] }
  0x86   :  { %877 = vmatpush.msra.mxu3 %v366_v39  ;;  %v342_v39 = vunpack.c.h.bf16 %v275_v23 }
  0x87   :  { %836 = vmatpush.msra.mxu1 %v369_v46  ;;  %858 = vmatpush.msra.mxu2 %v425_v48  ;;  %v338_v46 = vunpack.c.h.bf16 %v273_v34  ;;  %v304_v48 = vld [vmem:[#allocation10 + $0xf8] sm:$0xff] }
  0x88   :  { %799 = vmatmul.f32.vlgmr.msrb.gmra.mxu3 %v2180_v26  ;;  %v401_v26 = vunpack.c.l.bf16 %v2235_v33 }
  0x89   :  { %837 = vmatpush.msra.mxu1 %v365_v55  ;;  %859 = vmatpush.msra.mxu2 %v421_v36  ;;  %v302_v55 = vld [vmem:[#allocation10 + $0xe8] sm:$0xff]  ;;  %v341_v36 = vunpack.c.l.bf16 %v275_v23 }
  0x8a   :  { %v2267_v23 = vld [vmem:[#allocation10 + $0x1a8] sm:$0xff] }
  0xa2   :  { %v207_v42 = vpop.permute.xlu0 %206  ;;  %v226_v41 = vpop.permute.xlu1 %225 }
  0xa3   :  { %v210_v0 = vmul.f32 %v1657_v50, %v207_v42  ;;  %v229_v31 = vmul.f32 %v1660_v35, %v226_v41  ;;  %v285_v42 = vld [vmem:[#allocation10 + $0x60] sm:$0xff]  ;;  %v2222_v35 = vld [vmem:[#allocation10 + $0x130] sm:$0xff]  ;;  %v648_v41 = vunpack.c.h.bf16 %v2118_v58  ;;  %v409_v58 = vunpack.c.l.bf16 %v2226_v47 }
  0xa4   :  { %v362_v17 = vunpack.c.h.bf16 %v285_v42  ;;  %v361_v63 = vunpack.c.l.bf16 %v285_v42  ;;  %v413_v8 = vunpack.c.l.bf16 %v2222_v35  ;;  %v632_v42 = vunpack.c.h.bf16 %v2131_v13 }
  0xa5   :  { %v214_v24 = vadd.f32 %v1658_v20, %v210_v0  ;;  %v358_v20 = vunpack.c.h.bf16 %v283_v29  ;;  %v2248_v29 = vld.sshfl [vmem:[#allocation1] sm:$0xff pattern:$0x73625140]  ;;  %v400_v13 = vunpack.c.h.bf16 %v304_v48 }
  0xa6   :  { %878 = vmatpush.msra.mxu3 %v362_v17  ;;  %838 = vmatpush.msra.mxu1 %v361_v63  ;;  %v2245_v17 = vld [vmem:[#allocation10 + $0x1e8] sm:$0xff]  ;;  %v300_v63 = vld [vmem:[#allocation10 + $0xd8] sm:$0xff] }
  0xa8   :  { %879 = vmatpush.msra.mxu3 %v358_v20  ;;  %839 = vmatpush.msra.mxu1 %v357_v7  ;;  %v459_v20 = vunpack.c.l.bf16 %v2245_v17  ;;  %v616_v7 = vunpack.c.h.bf16 %v2149_v45  ;;  %v391_v45 = vunpack.c.l.bf16 %v300_v63 }
  0xaa   :  { %880 = vmatpush.msra.mxu3 %v354_v43  ;;  %840 = vmatpush.msra.mxu1 %v353_v21  ;;  %v2258_v43 = vld [vmem:[#allocation10 + $0x1c8] sm:$0xff]  ;;  %v612_v21 = vunpack.c.h.bf16 %v2154_v52 }
  0xab   :  { %v218_v18 = vpop.permute.xlu0 %217 }
  0xac   :  { %v221_v27 = vmul.f32 %v1659_v59, %v218_v18  ;;  %v2218_v59 = vld [vmem:[#allocation10 + $0x140] sm:$0xff]  ;;  %v644_v18 = vunpack.c.h.bf16 %v2122_v28  ;;  %881 = vmatpush.msra.mxu3 %v350_v49  ;;  %v405_v28 = vunpack.c.l.bf16 %v2230_v54  ;;  %v2262_v49 = vld [vmem:[#allocation10 + $0x1b8] sm:$0xff] }
  0xad   :  { %v417_v0 = vunpack.c.l.bf16 %v2218_v59 }
  0xae   :  { %v222_v40 = vadd.f32 %v221_v27, %v214_v24  ;;  %v640_v24 = vunpack.c.h.bf16 %v2126_v6  ;;  %v346_v27 = vunpack.c.h.bf16 %v277_v16  ;;  %v345_v6 = vunpack.c.l.bf16 %v277_v16 }
  0xaf   :  { %860 = vmatpush.msra.mxu2 %v417_v0  ;;  %v620_v0 = vunpack.c.h.bf16 %v2147_v44  ;;  %v395_v44 = vunpack.c.l.bf16 %v302_v55  ;;  %v451_v16 = vunpack.c.l.bf16 %v2258_v43 }
  0xb0   :  { %v230_v50 = vadd.f32 %v229_v31, %v222_v40  ;;  %v349_v31 = vunpack.c.l.bf16 %v279_v4  ;;  %v2240_v40 = vld [vmem:[#allocation10 + $0x1f8] sm:$0xff]  ;;  %882 = vmatpush.msra.mxu3 %v346_v27  ;;  %v455_v4 = vunpack.c.l.bf16 %v2253_v22  ;;  %v294_v27 = vld [vmem:[#allocation10 + $0xa8] sm:$0xff] }
  0xb1   :  { %861 = vmatpush.msra.mxu2 %v413_v8  ;;  %v392_v8 = vunpack.c.h.bf16 %v300_v63 }
  0xb2   :  { %v231_v57 = vmax.f32 %v230_v50, 0.0  ;;  %841 = vmatpush.msra.mxu1 %v349_v31  ;;  %v628_v50 = vunpack.c.h.bf16 %v2138_v60  ;;  %883 = vmatpush.msra.mxu3 %v342_v39  ;;  %v396_v60 = vunpack.c.h.bf16 %v302_v55  ;;  %v608_v31 = vunpack.c.h.bf16 %v2157_v56  ;;  %v292_v39 = vld [vmem:[#allocation10 + $0x98] sm:$0xff] }
  0xb3   :  { %862 = vmatpush.msra.mxu2 %v409_v58  ;;  %v379_v55 = vunpack.c.l.bf16 %v294_v27 }
  0xb4   :  { %268 = vmatmul.f32.vlgmr.msra.gmra.mxu0 %v231_v57  ;;  %842 = vmatpush.msra.mxu1 %v345_v6  ;;  %v624_v57 = vunpack.c.h.bf16 %v2142_v2  ;;  %v399_v2 = vunpack.c.l.bf16 %v304_v48  ;;  %v604_v6 = vunpack.c.h.bf16 %v2163_v62  ;;  %v290_v48 = vld [vmem:[#allocation10 + $0x88] sm:$0xff] }
  0xb5   :  { %803 = vmatpush.msra.mxu0 %v656_v53  ;;  %863 = vmatpush.msra.mxu2 %v405_v28  ;;  %v463_v53 = vunpack.c.l.bf16 %v2240_v40 }
  0xb6   :  { %884 = vmatpush.msra.mxu3 %v338_v46  ;;  %843 = vmatpush.msra.mxu1 %v341_v36  ;;  %v596_v36 = vunpack.c.h.bf16 %v2169_v12 }
  0xb7   :  { %804 = vmatpush.msra.mxu0 %v652_v61  ;;  %864 = vmatpush.msra.mxu2 %v401_v26  ;;  %v337_v61 = vunpack.c.l.bf16 %v273_v34  ;;  %v2271_v34 = vld [vmem:[#allocation10 + $0x198] sm:$0xff]  ;;  %v380_v26 = vunpack.c.h.bf16 %v294_v27 }
  0xb8   :  { %865 = vmatmul.f32.vlgmr.msra.gmra.mxu2 %v2243_v11  ;;  %885 = vmatmul.f32.vlgmr.msra.gmra.mxu3 %v2248_v29  ;;  %v439_v46 = vunpack.c.l.bf16 %v2271_v34 }
  0xb9   :  { %805 = vmatpush.msra.mxu0 %v648_v41  ;;  %929 = vmatpush.msrb.mxu2 %v463_v53  ;;  %v298_v41 = vld [vmem:[#allocation10 + $0xc8] sm:$0xff]  ;;  %v376_v53 = vunpack.c.h.bf16 %v292_v39 }
  0xba   :  { %949 = vmatpush.msrb.mxu3 %v400_v13  ;;  %844 = vmatpush.msra.mxu1 %v337_v61  ;;  %v388_v58 = vunpack.c.h.bf16 %v298_v41  ;;  %v387_v52 = vunpack.c.l.bf16 %v298_v41  ;;  %v2280_v13 = vld [vmem:[#allocation10 + $0x178] sm:$0xff]  ;;  %v2284_v61 = vld [vmem:[#allocation10 + $0x168] sm:$0xff] }
  0xbb   :  { %806 = vmatpush.msra.mxu0 %v644_v18  ;;  %930 = vmatpush.msrb.mxu2 %v459_v20  ;;  %v296_v18 = vld [vmem:[#allocation10 + $0xb8] sm:$0xff]  ;;  %v431_v63 = vunpack.c.l.bf16 %v2280_v13  ;;  %v427_v41 = vunpack.c.l.bf16 %v2284_v61 }
  0xbc   :  { %739 = vmatmul.f32.vlgmr.msrb.gmra.mxu0 %v2178_v25  ;;  %950 = vmatpush.msrb.mxu3 %v396_v60  ;;  %v384_v28 = vunpack.c.h.bf16 %v296_v18  ;;  %v383_v56 = vunpack.c.l.bf16 %v296_v18  ;;  %v288_v20 = vld [vmem:[#allocation10 + $0x78] sm:$0xff]  ;;  %v462_v60 = vunpack.c.h.bf16 %v2172_v19  ;;  %v371_v19 = vunpack.c.l.bf16 %v290_v48 }
  0xbd   :  { %807 = vmatpush.msra.mxu0 %v640_v24  ;;  %845 = vmatmul.f32.vlgmr.msra.gmra.mxu1 %v2248_v29  ;;  %v447_v24 = vunpack.c.l.bf16 %v2262_v49  ;;  %v368_v12 = vunpack.c.h.bf16 %v288_v20 }
  0xbe   :  { %909 = vmatpush.msrb.mxu1 %v399_v2  ;;  %931 = vmatpush.msrb.mxu2 %v455_v4  ;;  %v458_v2 = vunpack.c.h.bf16 %v2183_v30  ;;  %v2288_v4 = vld [vmem:[#allocation10 + $0x158] sm:$0xff]  ;;  %v367_v30 = vunpack.c.l.bf16 %v288_v20 }
  0xbf   :  { %808 = vmatpush.msra.mxu0 %v636_v38  ;;  %951 = vmatpush.msrb.mxu3 %v392_v8  ;;  %v443_v38 = vunpack.c.l.bf16 %v2267_v23  ;;  %v454_v8 = vunpack.c.h.bf16 %v2187_v37  ;;  %v423_v18 = vunpack.c.l.bf16 %v2288_v4 }
  0xc0   :  { %910 = vmatpush.msrb.mxu1 %v395_v44  ;;  %932 = vmatpush.msrb.mxu2 %v451_v16  ;;  %v2292_v16 = vld [vmem:[#allocation10 + $0x148] sm:$0xff] }
  0xc1   :  { %809 = vmatpush.msra.mxu0 %v632_v42  ;;  %952 = vmatpush.msrb.mxu3 %v388_v58  ;;  %v2275_v42 = vld [vmem:[#allocation10 + $0x188] sm:$0xff]  ;;  %v450_v58 = vunpack.c.h.bf16 %v2191_v5  ;;  %v419_v27 = vunpack.c.l.bf16 %v2292_v16 }
  0xc2   :  { %911 = vmatpush.msrb.mxu1 %v391_v45  ;;  %933 = vmatpush.msrb.mxu2 %v447_v24  ;;  %v435_v62 = vunpack.c.l.bf16 %v2275_v42  ;;  %v2297_v24 = vld [vmem:[#allocation10 + $0x138] sm:$0xff] }
  0xc3   :  { %810 = vmatpush.msra.mxu0 %v628_v50  ;;  %v600_v50 = vunpack.c.h.bf16 %v2166_v1  ;;  %953 = vmatpush.msrb.mxu3 %v384_v28  ;;  %v375_v1 = vunpack.c.l.bf16 %v292_v39  ;;  %v278_v39 = vld [vmem:[#allocation10 + $0x28] sm:$0xff] }
  0xc4   :  { %912 = vmatpush.msrb.mxu1 %v387_v52  ;;  %934 = vmatpush.msrb.mxu2 %v443_v38  ;;  %v2301_v52 = vld [vmem:[#allocation10 + $0x128] sm:$0xff]  ;;  %v415_v38 = vunpack.c.l.bf16 %v2297_v24 }
  0xc5   :  { %811 = vmatpush.msra.mxu0 %v624_v57  ;;  %954 = vmatpush.msrb.mxu3 %v380_v26  ;;  %v372_v57 = vunpack.c.h.bf16 %v290_v48  ;;  %v276_v48 = vld [vmem:[#allocation10 + $0x18] sm:$0xff] }
  0xc6   :  { %913 = vmatpush.msrb.mxu1 %v383_v56  ;;  %935 = vmatpush.msrb.mxu2 %v439_v46  ;;  %v2305_v56 = vld [vmem:[#allocation10 + $0x118] sm:$0xff]  ;;  %v411_v46 = vunpack.c.l.bf16 %v2301_v52  ;;  %v344_v20 = vunpack.c.h.bf16 %v276_v48 }
  0xc7   :  { %812 = vmatpush.msra.mxu0 %v620_v0  ;;  %955 = vmatpush.msrb.mxu3 %v376_v53  ;;  %v286_v0 = vld [vmem:[#allocation10 + $0x68] sm:$0xff]  ;;  %v348_v53 = vunpack.c.h.bf16 %v278_v39 }
  0xc8   :  { %914 = vmatpush.msrb.mxu1 %v379_v55  ;;  %936 = vmatpush.msrb.mxu2 %v435_v62  ;;  %v364_v44 = vunpack.c.h.bf16 %v286_v0  ;;  %v363_v37 = vunpack.c.l.bf16 %v286_v0  ;;  %v2309_v55 = vld [vmem:[#allocation10 + $0x108] sm:$0xff]  ;;  %v407_v62 = vunpack.c.l.bf16 %v2305_v56  ;;  %v426_v0 = vunpack.c.h.bf16 %v2211_v9 }
  0xc9   :  { %813 = vmatpush.msra.mxu0 %v616_v7  ;;  %956 = vmatpush.msrb.mxu3 %v372_v57  ;;  %v284_v7 = vld [vmem:[#allocation10 + $0x58] sm:$0xff]  ;;  %v434_v57 = vunpack.c.h.bf16 %v2204_v14  ;;  %v422_v14 = vunpack.c.h.bf16 %v2214_v10  ;;  %v414_v9 = vunpack.c.h.bf16 %v2222_v35  ;;  %v406_v10 = vunpack.c.h.bf16 %v2230_v54  ;;  %v1019_v35 = vld [vmem:[#allocation10 + $0x4f0] sm:$0xff] }
  0xca   :  { %915 = vmatpush.msrb.mxu1 %v375_v1  ;;  %937 = vmatpush.msrb.mxu2 %v431_v63  ;;  %v360_v45 = vunpack.c.h.bf16 %v284_v7  ;;  %v359_v5 = vunpack.c.l.bf16 %v284_v7  ;;  %v430_v1 = vunpack.c.h.bf16 %v2208_v32  ;;  %v418_v32 = vunpack.c.h.bf16 %v2218_v59 }
  0xcb   :  { %814 = vmatpush.msra.mxu0 %v612_v21  ;;  %v282_v21 = vld [vmem:[#allocation10 + $0x48] sm:$0xff]  ;;  %957 = vmatpush.msrb.mxu3 %v368_v12  ;;  %v464_v7 = vunpack.c.h.bf16 %v2240_v40  ;;  %v460_v59 = vunpack.c.h.bf16 %v2245_v17  ;;  %v452_v17 = vunpack.c.h.bf16 %v2258_v43 }
  0xcc   :  { %916 = vmatpush.msrb.mxu1 %v371_v19  ;;  %938 = vmatpush.msrb.mxu2 %v427_v41  ;;  %v356_v28 = vunpack.c.h.bf16 %v282_v21  ;;  %v410_v19 = vunpack.c.h.bf16 %v2226_v47  ;;  %v402_v41 = vunpack.c.h.bf16 %v2235_v33  ;;  %v456_v47 = vunpack.c.h.bf16 %v2253_v22  ;;  %v2332_v33 = vld [vmem:[#allocation10 + $0x4e8] sm:$0xff] }
  0xcd   :  { %815 = vmatpush.msra.mxu0 %v608_v31  ;;  %v280_v31 = vld [vmem:[#allocation10 + $0x38] sm:$0xff]  ;;  %958 = vmatpush.msrb.mxu3 %v364_v44  ;;  %v1082_v44 = vunpack.c.h.bf16 %v1019_v35 }
  0xce   :  { %917 = vmatpush.msrb.mxu1 %v367_v30  ;;  %939 = vmatpush.msrb.mxu2 %v423_v18  ;;  %v352_v26 = vunpack.c.h.bf16 %v280_v31  ;;  %v1017_v30 = vld [vmem:[#allocation10 + $0x4e0] sm:$0xff] }
  0xcf   :  { %816 = vmatpush.msra.mxu0 %v604_v6  ;;  %v442_v6 = vunpack.c.h.bf16 %v2197_v15  ;;  %959 = vmatpush.msrb.mxu3 %v360_v45  ;;  %v351_v15 = vunpack.c.l.bf16 %v280_v31  ;;  %v1077_v18 = vunpack.c.l.bf16 %v1017_v30  ;;  %v1078_v40 = vunpack.c.h.bf16 %v1017_v30  ;;  %v2336_v45 = vld [vmem:[#allocation10 + $0x4d8] sm:$0xff] }
  0xd0   :  { %918 = vmatpush.msrb.mxu1 %v363_v37  ;;  %940 = vmatpush.msrb.mxu2 %v419_v27  ;;  %v1075_v27 = vunpack.c.l.bf16 %v2336_v45  ;;  %v448_v31 = vunpack.c.h.bf16 %v2262_v49 }
  0xd1   :  { %817 = vmatpush.msra.mxu0 %v600_v50  ;;  %v438_v50 = vunpack.c.h.bf16 %v2201_v3  ;;  %960 = vmatpush.msrb.mxu3 %v356_v28  ;;  %v403_v3 = vunpack.c.l.bf16 %v2309_v55  ;;  %v2340_v28 = vld [vmem:[#allocation10 + $0x4c8] sm:$0xff] }
  0xd2   :  { %919 = vmatpush.msrb.mxu1 %v359_v5  ;;  %941 = vmatpush.msrb.mxu2 %v415_v38  ;;  %v1071_v38 = vunpack.c.l.bf16 %v2340_v28 }
  0xd3   :  { %818 = vmatpush.msra.mxu0 %v596_v36  ;;  %v274_v36 = vld [vmem:[#allocation10 + $0x8] sm:$0xff]  ;;  %961 = vmatpush.msrb.mxu3 %v352_v26  ;;  %v2344_v26 = vld [vmem:[#allocation10 + $0x4b8] sm:$0xff] }
  0xd4   :  { %819 = vmatmul.f32.vlgmr.msra.gmra.mxu0 %v2178_v25  ;;  %v446_v25 = vunpack.c.h.bf16 %v2194_v51  ;;  %v355_v51 = vunpack.c.l.bf16 %v282_v21  ;;  %942 = vmatpush.msrb.mxu2 %v411_v46  ;;  %v340_v63 = vunpack.c.h.bf16 %v274_v36  ;;  %v339_v12 = vunpack.c.l.bf16 %v274_v36 }
  0xd5   :  { %889 = vmatpush.msrb.mxu0 %v462_v60  ;;  %v347_v60 = vunpack.c.l.bf16 %v278_v39  ;;  %962 = vmatpush.msrb.mxu3 %v348_v53  ;;  %v1079_v21 = vunpack.c.l.bf16 %v2332_v33  ;;  %v444_v39 = vunpack.c.h.bf16 %v2267_v23  ;;  %v1067_v46 = vunpack.c.l.bf16 %v2344_v26  ;;  %v2348_v53 = vld [vmem:[#allocation10 + $0x4a8] sm:$0xff] }
  0xd6   :  { %920 = vmatpush.msrb.mxu1 %v355_v51  ;;  %943 = vmatpush.msrb.mxu2 %v407_v62  ;;  %v1063_v62 = vunpack.c.l.bf16 %v2348_v53  ;;  %v436_v36 = vunpack.c.h.bf16 %v2275_v42 }
  0xd7   :  { %890 = vmatpush.msrb.mxu0 %v458_v2  ;;  %963 = vmatpush.msrb.mxu3 %v344_v20  ;;  %v343_v2 = vunpack.c.l.bf16 %v276_v48  ;;  %v440_v48 = vunpack.c.h.bf16 %v2271_v34  ;;  %v2352_v20 = vld [vmem:[#allocation10 + $0x498] sm:$0xff] }
  0xd8   :  { %921 = vmatpush.msrb.mxu1 %v351_v15  ;;  %944 = vmatpush.msrb.mxu2 %v403_v3  ;;  %v1059_v3 = vunpack.c.l.bf16 %v2352_v20 }
  0xd9   :  { %891 = vmatpush.msrb.mxu0 %v454_v8  ;;  %964 = vmatpush.msrb.mxu3 %v340_v63  ;;  %v2328_v8 = vld [vmem:[#allocation10 + $0x4f8] sm:$0xff]  ;;  %v1005_v63 = vld [vmem:[#allocation10 + $0x480] sm:$0xff] }
  0xda   :  { %922 = vmatpush.msrb.mxu1 %v347_v60  ;;  %945 = vmatmul.f32.vlgmr.msrb.gmra.mxu2 %v2243_v11  ;;  %v1083_v54 = vunpack.c.l.bf16 %v2328_v8  ;;  %v1053_v42 = vunpack.c.l.bf16 %v1005_v63 }
  0xdb   :  { %892 = vmatpush.msrb.mxu0 %v450_v58  ;;  %965 = vmatmul.f32.vlgmr.msrb.gmra.mxu3 %v2248_v29  ;;  %v1015_v58 = vld [vmem:[#allocation10 + $0x4d0] sm:$0xff] }
  0xdc   :  { %923 = vmatpush.msrb.mxu1 %v343_v2  ;;  %1105 = vmatpush.msra.mxu2 %v1082_v44  ;;  %v1073_v22 = vunpack.c.l.bf16 %v1015_v58  ;;  %v1074_v37 = vunpack.c.h.bf16 %v1015_v58  ;;  %v1054_v2 = vunpack.c.h.bf16 %v1005_v63  ;;  %v999_v44 = vld [vmem:[#allocation10 + $0x450] sm:$0xff] }
  0xdd   :  { %893 = vmatpush.msrb.mxu0 %v446_v25  ;;  %1125 = vmatpush.msra.mxu3 %v1083_v54  ;;  %v1013_v25 = vld [vmem:[#allocation10 + $0x4c0] sm:$0xff]  ;;  %v2368_v54 = vld [vmem:[#allocation10 + $0x458] sm:$0xff]  ;;  %v1042_v30 = vunpack.c.h.bf16 %v999_v44 }
  0xde   :  { %924 = vmatpush.msrb.mxu1 %v339_v12  ;;  %1106 = vmatpush.msra.mxu2 %v1078_v40  ;;  %v1069_v43 = vunpack.c.l.bf16 %v1013_v25  ;;  %v1070_v5 = vunpack.c.h.bf16 %v1013_v25  ;;  %v428_v12 = vunpack.c.h.bf16 %v2284_v61  ;;  %v416_v40 = vunpack.c.h.bf16 %v2297_v24 }
  0xdf   :  { %894 = vmatpush.msrb.mxu0 %v442_v6  ;;  %925 = vmatmul.f32.vlgmr.msrb.gmra.mxu1 %v2248_v29  ;;  %v1081_v29 = vunpack.c.l.bf16 %v1019_v35  ;;  %v1011_v6 = vld [vmem:[#allocation10 + $0x4b0] sm:$0xff] }
  0xe0   :  { %1126 = vmatpush.msra.mxu3 %v1079_v21  ;;  %1107 = vmatpush.msra.mxu2 %v1074_v37  ;;  %v1065_v49 = vunpack.c.l.bf16 %v1011_v6  ;;  %v1066_v51 = vunpack.c.h.bf16 %v1011_v6  ;;  %v997_v21 = vld [vmem:[#allocation10 + $0x440] sm:$0xff]  ;;  %v412_v37 = vunpack.c.h.bf16 %v2301_v52  ;;  %v1084_v52 = vunpack.c.h.bf16 %v2328_v8  ;;  %v994_v6 = vld [vmem:[#allocation10 + $0x428] sm:$0xff] }
  0xe1   :  { %895 = vmatpush.msrb.mxu0 %v438_v50  ;;  %1085 = vmatpush.msra.mxu1 %v1081_v29  ;;  %v1009_v50 = vld [vmem:[#allocation10 + $0x4a0] sm:$0xff]  ;;  %v420_v29 = vunpack.c.h.bf16 %v2292_v16  ;;  %v1037_v16 = vunpack.c.l.bf16 %v997_v21  ;;  %v1038_v58 = vunpack.c.h.bf16 %v997_v21 }
  0xe2   :  { %1127 = vmatpush.msra.mxu3 %v1075_v27  ;;  %1108 = vmatpush.msra.mxu2 %v1070_v5  ;;  %v1061_v23 = vunpack.c.l.bf16 %v1009_v50  ;;  %v1062_v15 = vunpack.c.h.bf16 %v1009_v50  ;;  %v995_v27 = vld [vmem:[#allocation10 + $0x430] sm:$0xff]  ;;  %v408_v5 = vunpack.c.h.bf16 %v2305_v56  ;;  %v1080_v56 = vunpack.c.h.bf16 %v2332_v33  ;;  %v992_v50 = vld [vmem:[#allocation10 + $0x418] sm:$0xff]  ;;  %v989_v8 = vld [vmem:[#allocation10 + $0x400] sm:$0xff] }
  0xe3   :  { %896 = vmatpush.msrb.mxu0 %v434_v57  ;;  %1086 = vmatpush.msra.mxu1 %v1077_v18  ;;  %v1007_v57 = vld [vmem:[#allocation10 + $0x490] sm:$0xff]  ;;  %v1043_v18 = vunpack.c.l.bf16 %v2368_v54  ;;  %v1033_v24 = vunpack.c.l.bf16 %v995_v27  ;;  %v1034_v25 = vunpack.c.h.bf16 %v995_v27  ;;  %v1072_v33 = vunpack.c.h.bf16 %v2340_v28  ;;  %v2430_v27 = vld [vmem:[#allocation13 + $0x1d8] sm:$0xff] }
  0xe4   :  { %1128 = vmatpush.msra.mxu3 %v1071_v38  ;;  %1109 = vmatpush.msra.mxu2 %v1066_v51  ;;  %v1057_v34 = vunpack.c.l.bf16 %v1007_v57  ;;  %v1058_v60 = vunpack.c.h.bf16 %v1007_v57  ;;  %v404_v38 = vunpack.c.h.bf16 %v2309_v55  ;;  %v1021_v57 = vunpack.c.l.bf16 %v989_v8 }
  0xe5   :  { %897 = vmatpush.msrb.mxu0 %v430_v1  ;;  %1087 = vmatpush.msra.mxu1 %v1073_v22  ;;  %v432_v1 = vunpack.c.h.bf16 %v2280_v13 }
  0xe6   :  { %1129 = vmatpush.msra.mxu3 %v1067_v46  ;;  %1110 = vmatpush.msra.mxu2 %v1062_v15  ;;  %v1031_v46 = vunpack.c.l.bf16 %v994_v6  ;;  %v1027_v15 = vunpack.c.l.bf16 %v992_v50 }
  0xe7   :  { %898 = vmatpush.msrb.mxu0 %v426_v0  ;;  %1088 = vmatpush.msra.mxu1 %v1069_v43  ;;  %v2356_v0 = vld [vmem:[#allocation10 + $0x488] sm:$0xff] }
  0xe8   :  { %1130 = vmatpush.msra.mxu3 %v1063_v62  ;;  %1111 = vmatpush.msra.mxu2 %v1058_v60  ;;  %v1076_v62 = vunpack.c.h.bf16 %v2336_v45  ;;  %v1064_v45 = vunpack.c.h.bf16 %v2348_v53 }
  0xe9   :  { %899 = vmatpush.msrb.mxu0 %v422_v14  ;;  %1089 = vmatpush.msra.mxu1 %v1065_v49  ;;  %v1055_v14 = vunpack.c.l.bf16 %v2356_v0 }
  0xea   :  { %1131 = vmatpush.msra.mxu3 %v1059_v3  ;;  %1112 = vmatpush.msra.mxu2 %v1054_v2  ;;  %v1060_v3 = vunpack.c.h.bf16 %v2352_v20  ;;  %v1032_v20 = vunpack.c.h.bf16 %v994_v6  ;;  %v1028_v2 = vunpack.c.h.bf16 %v992_v50  ;;  %v2451_v50 = vld [vmem:[#allocation13 + $0xe0] sm:$0xff] }
  0xeb   :  { %900 = vmatpush.msrb.mxu0 %v418_v32  ;;  %1090 = vmatpush.msra.mxu1 %v1061_v23  ;;  %v1003_v32 = vld [vmem:[#allocation10 + $0x470] sm:$0xff] }
  0xec   :  { %v1049_v13 = vunpack.c.l.bf16 %v1003_v32  ;;  %1132 = vmatpush.msra.mxu3 %v1055_v14 }
  0xed   :  { %901 = vmatpush.msrb.mxu0 %v414_v9  ;;  %1091 = vmatpush.msra.mxu1 %v1057_v34  ;;  %v2360_v9 = vld [vmem:[#allocation10 + $0x478] sm:$0xff]  ;;  %v1022_v34 = vunpack.c.h.bf16 %v989_v8  ;;  %v2458_v8 = vld [vmem:[#allocation13 + $0x1c8] sm:$0xff] }
  0xee   :  { %v1052_v28 = vunpack.c.h.bf16 %v2360_v9 }
  0xef   :  { %902 = vmatpush.msrb.mxu0 %v410_v19  ;;  %v1050_v19 = vunpack.c.h.bf16 %v1003_v32  ;;  %1092 = vmatpush.msra.mxu1 %v1053_v42 }
  0xf1   :  { %903 = vmatpush.msrb.mxu0 %v406_v10  ;;  %v1051_v10 = vunpack.c.l.bf16 %v2360_v9  ;;  %1093 = vmatpush.msra.mxu1 %v1049_v13  ;;  %v2395_v13 = vld [vmem:[#allocation13 + $0x78] sm:$0xff] }
  0xf2   :  { %1113 = vmatpush.msra.mxu2 %v1050_v19  ;;  %v2397_v19 = vld [vmem:[#allocation13 + $0x1f8] sm:$0xff] }
  0xf3   :  { %904 = vmatpush.msrb.mxu0 %v402_v41  ;;  %v424_v41 = vunpack.c.h.bf16 %v2288_v4  ;;  %1133 = vmatpush.msra.mxu3 %v1051_v10  ;;  %v1041_v4 = vunpack.c.l.bf16 %v999_v44  ;;  %v2399_v10 = vld [vmem:[#allocation13 + $0x70] sm:$0xff]  ;;  %v2411_v44 = vld [vmem:[#allocation13 + $0x60] sm:$0xff] }
  0xf4   :  { %905 = vmatmul.f32.vlgmr.msrb.gmra.mxu0 %v2243_v11 }
  0xf5   :  { %969 = vmatpush.msra.mxu0 %v464_v7  ;;  %v1001_v7 = vld [vmem:[#allocation10 + $0x460] sm:$0xff] }
  0xf6   :  { %v1045_v61 = vunpack.c.l.bf16 %v1001_v7  ;;  %v1046_v35 = vunpack.c.h.bf16 %v1001_v7  ;;  %v1377_v7 = vunpack.c.l.bf16 %v2397_v19 }
  0xf7   :  { %970 = vmatpush.msra.mxu0 %v460_v59  ;;  %v2364_v59 = vld [vmem:[#allocation10 + $0x468] sm:$0xff] }
  0xf8   :  { %1094 = vmatpush.msra.mxu1 %v1045_v61  ;;  %1114 = vmatpush.msra.mxu2 %v1046_v35  ;;  %v1048_v63 = vunpack.c.h.bf16 %v2364_v59  ;;  %v2404_v61 = vld [vmem:[#allocation13 + $0x1f0] sm:$0xff]  ;;  %v2406_v35 = vld [vmem:[#allocation13 + $0x68] sm:$0xff] }
  0xf9   :  { %971 = vmatpush.msra.mxu0 %v456_v47  ;;  %v1047_v47 = vunpack.c.l.bf16 %v2364_v59  ;;  %v1279_v59 = vunpack.c.l.bf16 %v2399_v10 }
  0xfa   :  { %1095 = vmatpush.msra.mxu1 %v1041_v4  ;;  %1115 = vmatpush.msra.mxu2 %v1042_v30  ;;  %v2415_v4 = vld [vmem:[#allocation13 + $0x178] sm:$0xff]  ;;  %v1277_v30 = vunpack.c.l.bf16 %v2406_v35 }
  0xfb   :  { %972 = vmatpush.msra.mxu0 %v452_v17  ;;  %v2372_v17 = vld [vmem:[#allocation10 + $0x448] sm:$0xff]  ;;  %1134 = vmatpush.msra.mxu3 %v1047_v47  ;;  %v1345_v21 = vunpack.c.l.bf16 %v2415_v4 }
  0xfc   :  { %v1039_v22 = vunpack.c.l.bf16 %v2372_v17  ;;  %1096 = vmatpush.msra.mxu1 %v1037_v16  ;;  %1116 = vmatpush.msra.mxu2 %v1038_v58  ;;  %v1040_v42 = vunpack.c.h.bf16 %v2372_v17  ;;  %v2408_v47 = vld [vmem:[#allocation13 + $0x1e8] sm:$0xff]  ;;  %v2421_v17 = vld [vmem:[#allocation13 + $0x1e0] sm:$0xff]  ;;  %v2423_v16 = vld [vmem:[#allocation13 + $0xf0] sm:$0xff] }
  0xfd   :  { %973 = vmatpush.msra.mxu0 %v448_v31  ;;  %v2376_v31 = vld [vmem:[#allocation10 + $0x438] sm:$0xff]  ;;  %1135 = vmatpush.msra.mxu3 %v1043_v18  ;;  %v1373_v18 = vunpack.c.l.bf16 %v2408_v47 }
  0xfe   :  { %v1035_v43 = vunpack.c.l.bf16 %v2376_v31  ;;  %1097 = vmatpush.msra.mxu1 %v1033_v24  ;;  %1117 = vmatpush.msra.mxu2 %v1034_v25  ;;  %v1036_v53 = vunpack.c.h.bf16 %v2376_v31  ;;  %v2425_v58 = vld [vmem:[#allocation13 + $0x58] sm:$0xff]  ;;  %v1275_v31 = vunpack.c.l.bf16 %v2411_v44  ;;  %v1371_v24 = vunpack.c.l.bf16 %v2421_v17 }
  0xff   :  { %974 = vmatpush.msra.mxu0 %v444_v39  ;;  %1136 = vmatpush.msra.mxu3 %v1039_v22  ;;  %v993_v39 = vld [vmem:[#allocation10 + $0x420] sm:$0xff]  ;;  %v1311_v22 = vunpack.c.l.bf16 %v2423_v16 }
 0x100   :  { %v1029_v49 = vunpack.c.l.bf16 %v993_v39  ;;  %v1030_v51 = vunpack.c.h.bf16 %v993_v39  ;;  %v2441_v39 = vld [vmem:[#allocation13 + $0x168] sm:$0xff] }
 0x101   :  { %975 = vmatpush.msra.mxu0 %v440_v48  ;;  %1137 = vmatpush.msra.mxu3 %v1035_v43  ;;  %v991_v48 = vld [vmem:[#allocation10 + $0x410] sm:$0xff]  ;;  %v1273_v43 = vunpack.c.l.bf16 %v2425_v58 }
 0x102   :  { %1098 = vmatpush.msra.mxu1 %v1029_v49  ;;  %v1025_v55 = vunpack.c.l.bf16 %v991_v48  ;;  %v1026_v23 = vunpack.c.h.bf16 %v991_v48  ;;  %1118 = vmatpush.msra.mxu2 %v1030_v51  ;;  %v1341_v51 = vunpack.c.l.bf16 %v2441_v39  ;;  %v2449_v48 = vld [vmem:[#allocation13 + $0x48] sm:$0xff] }
 0x103   :  { %976 = vmatpush.msra.mxu0 %v436_v36  ;;  %v990_v36 = vld [vmem:[#allocation10 + $0x408] sm:$0xff]  ;;  %1138 = vmatpush.msra.mxu3 %v1031_v46  ;;  %v2446_v46 = vld [vmem:[#allocation13 + $0x1d0] sm:$0xff] }
 0x104   :  { %1099 = vmatpush.msra.mxu1 %v1025_v55  ;;  %v1023_v60 = vunpack.c.l.bf16 %v990_v36  ;;  %1119 = vmatpush.msra.mxu2 %v1026_v23  ;;  %v1024_v14 = vunpack.c.h.bf16 %v990_v36  ;;  %v2453_v55 = vld [vmem:[#allocation13 + $0x160] sm:$0xff]  ;;  %v1269_v23 = vunpack.c.l.bf16 %v2449_v48  ;;  %v1365_v36 = vunpack.c.l.bf16 %v2458_v8 }
 0x105   :  { %977 = vmatpush.msra.mxu0 %v432_v1  ;;  %1139 = vmatpush.msra.mxu3 %v1027_v15  ;;  %v1056_v1 = vunpack.c.h.bf16 %v2356_v0  ;;  %v1661_v0 = vld [vmem:[#allocation9] ss:$0 sm:$0xff]  ;;  %v1307_v15 = vunpack.c.l.bf16 %v2451_v50 }
 0x106   :  { %1100 = vmatpush.msra.mxu1 %v1021_v57  ;;  %1120 = vmatpush.msra.mxu2 %v1022_v34  ;;  %v2461_v57 = vld [vmem:[#allocation13 + $0x40] sm:$0xff]  ;;  %v2463_v34 = vld [vmem:[#allocation13 + $0xd8] sm:$0xff] }
 0x107   :  { %978 = vmatpush.msra.mxu0 %v428_v12  ;;  %1140 = vmatpush.msra.mxu3 %v1023_v60  ;;  %v2465_v60 = vld [vmem:[#allocation13 + $0x158] sm:$0xff] }
 0x109   :  { %979 = vmatpush.msra.mxu0 %v424_v41  ;;  %v1281_v41 = vunpack.c.l.bf16 %v2395_v13  ;;  %1425 = vmatpush.msrb.mxu3 %v1345_v21 }
 0x10b   :  { %980 = vmatpush.msra.mxu0 %v420_v29  ;;  %v1375_v29 = vunpack.c.l.bf16 %v2404_v61  ;;  %1385 = vmatpush.msrb.mxu1 %v1281_v41  ;;  %v2492_v41 = vld [vmem:[#allocation13 + $0x1b0] sm:$0xff] }
 0x10d   :  { %981 = vmatpush.msra.mxu0 %v416_v40  ;;  %1386 = vmatpush.msrb.mxu1 %v1279_v59 }
 0x10f   :  { %982 = vmatpush.msra.mxu0 %v412_v37  ;;  %v2428_v37 = vld [vmem:[#allocation13 + $0x170] sm:$0xff]  ;;  %1387 = vmatpush.msrb.mxu1 %v1277_v30  ;;  %v2497_v30 = vld [vmem:[#allocation13 + $0x28] sm:$0xff] }
 0x110   :  { %v1343_v25 = vunpack.c.l.bf16 %v2428_v37  ;;  %v1261_v21 = vunpack.c.l.bf16 %v2497_v30 }
 0x111   :  { %983 = vmatpush.msra.mxu0 %v408_v5  ;;  %v1369_v5 = vunpack.c.l.bf16 %v2430_v27  ;;  %1388 = vmatpush.msrb.mxu1 %v1275_v31  ;;  %v2505_v31 = vld [vmem:[#allocation13 + $0x1a8] sm:$0xff] }
 0x112   :  { %1426 = vmatpush.msrb.mxu3 %v1343_v25  ;;  %v2509_v25 = vld [vmem:[#allocation13 + $0xb8] sm:$0xff] }
 0x113   :  { %984 = vmatpush.msra.mxu0 %v404_v38  ;;  %1389 = vmatpush.msrb.mxu1 %v1273_v43  ;;  %v2437_v38 = vld [vmem:[#allocation13 + $0x50] sm:$0xff] }
 0x114   :  { %985 = vmatmul.f32.vlgmr.msra.gmra.mxu0 %v2243_v11  ;;  %v1068_v11 = vunpack.c.h.bf16 %v2344_v26  ;;  %v1044_v26 = vunpack.c.h.bf16 %v2368_v54  ;;  %v2413_v54 = vld [vmem:[#allocation13 + $0xf8] sm:$0xff]  ;;  %v1271_v6 = vunpack.c.l.bf16 %v2437_v38  ;;  %1427 = vmatpush.msrb.mxu3 %v1341_v51 }
 0x115   :  { %1145 = vmatpush.msrb.mxu0 %v1084_v52  ;;  %v1313_v40 = vunpack.c.l.bf16 %v2413_v54  ;;  %v2439_v52 = vld [vmem:[#allocation13 + $0xe8] sm:$0xff]  ;;  %v2517_v51 = vld [vmem:[#allocation13 + $0x18] sm:$0xff] }
 0x116   :  { %v1309_v49 = vunpack.c.l.bf16 %v2439_v52  ;;  %1390 = vmatpush.msrb.mxu1 %v1271_v6  ;;  %v2513_v6 = vld [vmem:[#allocation13 + $0x138] sm:$0xff]  ;;  %2693 = vst [vmem:[#allocation25_spill] sm:$0xff] %v2517_v51 }
 0x117   :  { %1146 = vmatpush.msrb.mxu0 %v1080_v56  ;;  %1405 = vmatpush.msrb.mxu2 %v1313_v40  ;;  %v1367_v56 = vunpack.c.l.bf16 %v2446_v46  ;;  %v2501_v40 = vld [vmem:[#allocation13 + $0x140] sm:$0xff] }
 0x118   :  { %1391 = vmatpush.msrb.mxu1 %v1269_v23  ;;  %v1331_v43 = vunpack.c.l.bf16 %v2501_v40  ;;  %v1297_v23 = vunpack.c.l.bf16 %v2509_v25 }
 0x119   :  { %1147 = vmatpush.msrb.mxu0 %v1076_v62  ;;  %1406 = vmatpush.msrb.mxu2 %v1311_v22  ;;  %v1339_v62 = vunpack.c.l.bf16 %v2453_v55 }
 0x11b   :  { %1148 = vmatpush.msrb.mxu0 %v1072_v33  ;;  %1407 = vmatpush.msrb.mxu2 %v1309_v49  ;;  %v1267_v33 = vunpack.c.l.bf16 %v2461_v57  ;;  %v2515_v49 = vld [vmem:[#allocation13 + $0x1a0] sm:$0xff] }
 0x11c   :  { %1428 = vmatpush.msrb.mxu3 %v1339_v62  ;;  %v2523_v62 = vld [vmem:[#allocation13 + $0x130] sm:$0xff] }
 0x11d   :  { %1149 = vmatpush.msrb.mxu0 %v1068_v11  ;;  %1408 = vmatpush.msrb.mxu2 %v1307_v15  ;;  %v1305_v11 = vunpack.c.l.bf16 %v2463_v34  ;;  %v2521_v15 = vld [vmem:[#allocation13 + $0xb0] sm:$0xff]  ;;  %2695 = vst [vmem:[#allocation27_spill] sm:$0xff] %v2523_v62 }
 0x11e   :  { %1392 = vmatpush.msrb.mxu1 %v1267_v33  ;;  %2694 = vst [vmem:[#allocation26_spill] sm:$0xff] %v2521_v15  ;;  %v1329_v33 = vunpack.c.l.bf16 %v2513_v6 }
 0x11f   :  { %1150 = vmatpush.msrb.mxu0 %v1064_v45  ;;  %v1337_v45 = vunpack.c.l.bf16 %v2465_v60  ;;  %1409 = vmatpush.msrb.mxu2 %v1305_v11  ;;  %v1355_v11 = vunpack.c.l.bf16 %v2515_v49 }
 0x121   :  { %1151 = vmatpush.msrb.mxu0 %v1060_v3  ;;  %v2470_v3 = vld [vmem:[#allocation13 + $0x1c0] sm:$0xff]  ;;  %1429 = vmatpush.msrb.mxu3 %v1337_v45  ;;  %v2529_v45 = vld [vmem:[#allocation13 + $0x10] sm:$0xff] }
 0x122   :  { %2697 = vst [vmem:[#allocation29_spill] sm:$0xff] %v2529_v45 }
 0x123   :  { %1152 = vmatpush.msrb.mxu0 %v1056_v1  ;;  %v2472_v1 = vld [vmem:[#allocation13 + $0x38] sm:$0xff] }
 0x125   :  { %1153 = vmatpush.msrb.mxu0 %v1052_v28  ;;  %v2474_v28 = vld [vmem:[#allocation13 + $0xd0] sm:$0xff] }
 0x127   :  { %1154 = vmatpush.msrb.mxu0 %v1048_v63  ;;  %v1363_v63 = vunpack.c.l.bf16 %v2470_v3 }
 0x129   :  { %1155 = vmatpush.msrb.mxu0 %v1044_v26  ;;  %v1265_v26 = vunpack.c.l.bf16 %v2472_v1 }
 0x12b   :  { %1156 = vmatpush.msrb.mxu0 %v1040_v42  ;;  %v1303_v42 = vunpack.c.l.bf16 %v2474_v28  ;;  %1393 = vmatpush.msrb.mxu1 %v1265_v26  ;;  %v1257_v26 = vunpack.c.l.bf16 %v2517_v51  ;;  %v2549_v51 = vld [vmem:[#allocation13 + $0x188] sm:$0xff] }
 0x12d   :  { %1157 = vmatpush.msrb.mxu0 %v1036_v53  ;;  %v2479_v53 = vld [vmem:[#allocation13 + $0x150] sm:$0xff]  ;;  %1410 = vmatpush.msrb.mxu2 %v1303_v42  ;;  %v1295_v42 = vunpack.c.l.bf16 %v2521_v15  ;;  %v2547_v15 = vld [vmem:[#allocation13 + $0x120] sm:$0xff] }
 0x12f   :  { %1158 = vmatpush.msrb.mxu0 %v1032_v20  ;;  %v2481_v20 = vld [vmem:[#allocation13 + $0x1b8] sm:$0xff] }
 0x131   :  { %1159 = vmatpush.msrb.mxu0 %v1028_v2  ;;  %v269_v12 = vpop.f32.mrf.mxu0  ;;  %v2483_v2 = vld [vmem:[#allocation13 + $0x30] sm:$0xff] }
 0x132   :  { %v270_v32 = vadd.f32 %v1661_v0, %v269_v12  ;;  %v1335_v0 = vunpack.c.l.bf16 %v2479_v53  ;;  %v1263_v12 = vunpack.c.l.bf16 %v2483_v2 }
 0x133   :  { %1160 = vmatpush.msrb.mxu0 %v1024_v14  ;;  %v1361_v14 = vunpack.c.l.bf16 %v2481_v20 }
 0x134   :  { %v272_v9 = vmax.f32 %v270_v32, 0.0  ;;  %v2488_v32 = vld [vmem:[#allocation13 + $0xc8] sm:$0xff]  ;;  %1430 = vmatpush.msrb.mxu3 %v1335_v0  ;;  %1394 = vmatpush.msrb.mxu1 %v1263_v12  ;;  %v1327_v12 = vunpack.c.l.bf16 %v2523_v62  ;;  %v2555_v62 = vld [vmem:[#allocation13 + $0x98] sm:$0xff] }
 0x135   :  { %1445 = vmatpush.msra.mxu0 %v1377_v7  ;;  %v1301_v7 = vunpack.c.l.bf16 %v2488_v32  ;;  %v2535_v0 = vld [vmem:[#allocation13 + $0x128] sm:$0xff]  ;;  %2703 = vst [vmem:[#allocation35_spill] sm:$0xff] %v2555_v62 }
 0x136   :  { %1101 = vmatmul.f32.vlgmr.msra.gmra.mxu1 %v272_v9  ;;  %1121 = vmatmul.f32.vlgmr.msra.gmra.mxu2 %v272_v9 }
 0x137   :  { %1141 = vmatmul.f32.vlgmr.msra.gmra.mxu3 %v272_v9  ;;  %1161 = vmatmul.f32.vlgmr.msrb.gmra.mxu0 %v272_v9  ;;  %v2490_v9 = vld [vmem:[#allocation13 + $0x148] sm:$0xff] }
 0x138   :  { %1446 = vmatpush.msra.mxu0 %v1375_v29  ;;  %v1333_v59 = vunpack.c.l.bf16 %v2490_v9  ;;  %v1359_v29 = vunpack.c.l.bf16 %v2492_v41  ;;  %1411 = vmatpush.msrb.mxu2 %v1301_v7 }
 0x139   :  { %1395 = vmatpush.msrb.mxu1 %v1261_v21  ;;  %v1255_v21 = vunpack.c.l.bf16 %v2529_v45  ;;  %v2561_v45 = vld [vmem:[#allocation13 + $0x180] sm:$0xff] }
 0x13a   :  { %1447 = vmatpush.msra.mxu0 %v1373_v18  ;;  %v2499_v18 = vld [vmem:[#allocation13 + $0xc0] sm:$0xff]  ;;  %1431 = vmatpush.msrb.mxu3 %v1333_v59  ;;  %v2541_v59 = vld [vmem:[#allocation13 + $0x8] sm:$0xff] }
 0x13b   :  { %v1299_v22 = vunpack.c.l.bf16 %v2499_v18  ;;  %2700 = vst [vmem:[#allocation32_spill] sm:$0xff] %v2541_v59 }
 0x13c   :  { %1448 = vmatpush.msra.mxu0 %v1371_v24  ;;  %v2507_v24 = vld [vmem:[#allocation13 + $0x20] sm:$0xff]  ;;  %1432 = vmatpush.msrb.mxu3 %v1331_v43  ;;  %v1325_v43 = vunpack.c.l.bf16 %v2535_v0 }
 0x13d   :  { %1412 = vmatpush.msrb.mxu2 %v1299_v22 }
 0x13e   :  { %1449 = vmatpush.msra.mxu0 %v1369_v5  ;;  %v1357_v5 = vunpack.c.l.bf16 %v2505_v31  ;;  %1433 = vmatpush.msrb.mxu3 %v1329_v33  ;;  %v1323_v33 = vunpack.c.l.bf16 %v2547_v15 }
 0x13f   :  { %1413 = vmatpush.msrb.mxu2 %v1297_v23 }
 0x140   :  { %1450 = vmatpush.msra.mxu0 %v1367_v56  ;;  %v1259_v56 = vunpack.c.l.bf16 %v2507_v24  ;;  %1434 = vmatpush.msrb.mxu3 %v1327_v12  ;;  %v1347_v12 = vunpack.c.l.bf16 %v2561_v45 }
 0x141   :  { %1414 = vmatpush.msrb.mxu2 %v1295_v42  ;;  %v2567_v42 = vld [vmem:[#allocation13 + $0x90] sm:$0xff] }
 0x142   :  { %1451 = vmatpush.msra.mxu0 %v1365_v36  ;;  %v2525_v36 = vld [vmem:[#allocation13 + $0x198] sm:$0xff]  ;;  %1396 = vmatpush.msrb.mxu1 %v1259_v56  ;;  %v1253_v56 = vunpack.c.l.bf16 %v2541_v59  ;;  %v2569_v59 = vld [vmem:[#allocation13 + $0x110] sm:$0xff] }
 0x143   :  { %2696 = vst [vmem:[#allocation28_spill] sm:$0xff] %v2525_v36  ;;  %v1353_v7 = vunpack.c.l.bf16 %v2525_v36  ;;  %v2553_v36 = vld [vmem:[#allocation13] sm:$0xff]  ;;  %1435 = vmatpush.msrb.mxu3 %v1325_v43  ;;  %v1319_v43 = vunpack.c.l.bf16 %v2569_v59 }
 0x144   :  { %1452 = vmatpush.msra.mxu0 %v1363_v63  ;;  %v2531_v63 = vld [vmem:[#allocation13 + $0xa8] sm:$0xff]  ;;  %2702 = vst [vmem:[#allocation34_spill] sm:$0xff] %v2553_v36  ;;  %1397 = vmatpush.msrb.mxu1 %v1257_v26  ;;  %v1289_v26 = vunpack.c.l.bf16 %v2555_v62  ;;  %v1287_v62 = vunpack.c.l.bf16 %v2567_v42 }
 0x145   :  { %2698 = vst [vmem:[#allocation30_spill] sm:$0xff] %v2531_v63  ;;  %v1293_v22 = vunpack.c.l.bf16 %v2531_v63  ;;  %v2559_v63 = vld [vmem:[#allocation13 + $0x118] sm:$0xff]  ;;  %1436 = vmatpush.msrb.mxu3 %v1323_v33 }
 0x146   :  { %1453 = vmatpush.msra.mxu0 %v1361_v14  ;;  %v2537_v14 = vld [vmem:[#allocation13 + $0x190] sm:$0xff]  ;;  %1398 = vmatpush.msrb.mxu1 %v1255_v21  ;;  %v1378_v21 = vunpack.c.h.bf16 %v2397_v19 }
 0x147   :  { %2699 = vst [vmem:[#allocation31_spill] sm:$0xff] %v2537_v14  ;;  %1415 = vmatpush.msrb.mxu2 %v1293_v22  ;;  %v2575_v22 = vld [vmem:[#allocation13 + $0x88] sm:$0xff] }
 0x148   :  { %1454 = vmatpush.msra.mxu0 %v1359_v29  ;;  %v2543_v29 = vld [vmem:[#allocation13 + $0xa0] sm:$0xff]  ;;  %1399 = vmatpush.msrb.mxu1 %v1253_v56  ;;  %v1376_v56 = vunpack.c.h.bf16 %v2404_v61  ;;  %v1285_v19 = vunpack.c.l.bf16 %v2575_v22 }
 0x149   :  { %2701 = vst [vmem:[#allocation33_spill] sm:$0xff] %v2543_v29  ;;  %v1291_v23 = vunpack.c.l.bf16 %v2543_v29  ;;  %v1321_v29 = vunpack.c.l.bf16 %v2559_v63 }
 0x14a   :  { %1455 = vmatpush.msra.mxu0 %v1357_v5  ;;  %v1351_v5 = vunpack.c.l.bf16 %v2537_v14  ;;  %v1251_v14 = vunpack.c.l.bf16 %v2553_v36  ;;  %v2577_v36 = vld [vmem:[#allocation13 + $0x108] sm:$0xff] }
 0x14b   :  { %1416 = vmatpush.msrb.mxu2 %v1291_v23  ;;  %v2583_v23 = vld [vmem:[#allocation13 + $0x80] sm:$0xff]  ;;  %1437 = vmatpush.msrb.mxu3 %v1321_v29  ;;  %v1317_v33 = vunpack.c.l.bf16 %v2577_v36  ;;  %v1276_v29 = vunpack.c.h.bf16 %v2411_v44  ;;  %v1370_v44 = vunpack.c.h.bf16 %v2430_v27  ;;  %v1340_v27 = vunpack.c.h.bf16 %v2453_v55 }
 0x14c   :  { %1456 = vmatpush.msra.mxu0 %v1355_v11  ;;  %v1349_v11 = vunpack.c.l.bf16 %v2549_v51  ;;  %1400 = vmatpush.msrb.mxu1 %v1251_v14  ;;  %v1374_v14 = vunpack.c.h.bf16 %v2408_v47  ;;  %v1274_v47 = vunpack.c.h.bf16 %v2425_v58  ;;  %v1368_v58 = vunpack.c.h.bf16 %v2446_v46 }
 0x14d   :  { %1417 = vmatpush.msrb.mxu2 %v1289_v26  ;;  %1438 = vmatpush.msrb.mxu3 %v1319_v43  ;;  %v1314_v26 = vunpack.c.h.bf16 %v2413_v54  ;;  %v1272_v54 = vunpack.c.h.bf16 %v2437_v38  ;;  %v1366_v38 = vunpack.c.h.bf16 %v2458_v8  ;;  %v1306_v46 = vunpack.c.h.bf16 %v2463_v34  ;;  %v2617_v43 = vpop.f32.mrf.mxu3 }
 0x14e   :  { %1457 = vmatpush.msra.mxu0 %v1353_v7  ;;  %v1282_v7 = vunpack.c.h.bf16 %v2395_v13  ;;  %v2585_v13 = vld [vmem:[#allocation13 + $0x100] sm:$0xff]  ;;  %v1266_v55 = vunpack.c.h.bf16 %v2472_v1  ;;  %v1304_v8 = vunpack.c.h.bf16 %v2474_v28  ;;  %v1362_v34 = vunpack.c.h.bf16 %v2481_v20 }
 0x14f   :  { %1418 = vmatpush.msrb.mxu2 %v1287_v62  ;;  %v1315_v61 = vunpack.c.l.bf16 %v2585_v13  ;;  %1439 = vmatpush.msrb.mxu3 %v1317_v33  ;;  %v1312_v62 = vunpack.c.h.bf16 %v2423_v16  ;;  %v1270_v16 = vunpack.c.h.bf16 %v2449_v48  ;;  %v1338_v48 = vunpack.c.h.bf16 %v2465_v60 }
 0x150   :  { %1458 = vmatpush.msra.mxu0 %v1351_v5  ;;  %v1280_v5 = vunpack.c.h.bf16 %v2399_v10  ;;  %1465 = vmatpush.msra.mxu1 %v1282_v7  ;;  %v1283_v10 = vunpack.c.l.bf16 %v2583_v23  ;;  %v1344_v7 = vunpack.c.h.bf16 %v2428_v37  ;;  %v1308_v37 = vunpack.c.h.bf16 %v2451_v50 }
 0x151   :  { %1419 = vmatpush.msrb.mxu2 %v1285_v19  ;;  %1440 = vmatpush.msrb.mxu3 %v1315_v61  ;;  %v1364_v50 = vunpack.c.h.bf16 %v2470_v3  ;;  %v1264_v60 = vunpack.c.h.bf16 %v2483_v2  ;;  %v1302_v3 = vunpack.c.h.bf16 %v2488_v32  ;;  %v1360_v1 = vunpack.c.h.bf16 %v2492_v41  ;;  %v2707_v61 = vld [vmem:[#allocation28_spill] sm:$0xff] }
 0x152   :  { %1459 = vmatpush.msra.mxu0 %v1349_v11  ;;  %v1278_v11 = vunpack.c.h.bf16 %v2406_v35  ;;  %1466 = vmatpush.msra.mxu1 %v1280_v5  ;;  %v1372_v35 = vunpack.c.h.bf16 %v2421_v17  ;;  %v1342_v17 = vunpack.c.h.bf16 %v2441_v39  ;;  %v1268_v39 = vunpack.c.h.bf16 %v2461_v57  ;;  %v2623_v5 = vpop.f32.mrf.mxu2 }
 0x153   :  { %1420 = vmatpush.msrb.mxu2 %v1283_v10  ;;  %v1336_v57 = vunpack.c.h.bf16 %v2479_v53  ;;  %v1262_v28 = vunpack.c.h.bf16 %v2497_v30  ;;  %v1300_v53 = vunpack.c.h.bf16 %v2499_v18  ;;  %v1332_v20 = vunpack.c.h.bf16 %v2501_v40  ;;  %v2704_v18 = vld [vmem:[#allocation25_spill] sm:$0xff] }
 0x154   :  { %1460 = vmatpush.msra.mxu0 %v1347_v12  ;;  %v1346_v12 = vunpack.c.h.bf16 %v2415_v4  ;;  %1467 = vmatpush.msra.mxu1 %v1278_v11  ;;  %v1310_v4 = vunpack.c.h.bf16 %v2439_v52  ;;  %v2611_v52 = vpop.f32.mrf.mxu0  ;;  %v1358_v19 = vunpack.c.h.bf16 %v2505_v31  ;;  %v1260_v32 = vunpack.c.h.bf16 %v2507_v24  ;;  %v2705_v31 = vld [vmem:[#allocation26_spill] sm:$0xff] }
 0x155   :  { %1485 = vmatpush.msra.mxu2 %v1314_v26  ;;  %v1330_v41 = vunpack.c.h.bf16 %v2513_v6  ;;  %v1356_v30 = vunpack.c.h.bf16 %v2515_v49  ;;  %v1258_v40 = vunpack.c.h.bf16 %v2704_v18  ;;  %v1296_v11 = vunpack.c.h.bf16 %v2705_v31  ;;  %v800_v24 = vpop.f32.mrf.mxu3  ;;  %v2709_v49 = vld [vmem:[#allocation30_spill] sm:$0xff] }
 0x156   :  { %1525 = vmatpush.msrb.mxu0 %v1378_v21  ;;  %1468 = vmatpush.msra.mxu1 %v1276_v29  ;;  %v2607_v21 = vpop.f32.mrf.mxu1  ;;  %v1354_v29 = vunpack.c.h.bf16 %v2707_v61  ;;  %v1294_v26 = vunpack.c.h.bf16 %v2709_v49  ;;  %v1560_v49 = vld [vmem:[#allocation16 + $0x68] sm:$0xff] }
 0x157   :  { %1505 = vmatpush.msra.mxu3 %v1346_v12  ;;  %1486 = vmatpush.msra.mxu2 %v1312_v62  ;;  %v1326_v12 = vunpack.c.h.bf16 %v2535_v0  ;;  %v2713_v0 = vld [vmem:[#allocation34_spill] sm:$0xff] }
 0x158   :  { %1526 = vmatpush.msrb.mxu0 %v1376_v56  ;;  %1469 = vmatpush.msra.mxu1 %v1274_v47  ;;  %v1334_v56 = vunpack.c.h.bf16 %v2490_v9  ;;  %v1298_v9 = vunpack.c.h.bf16 %v2509_v25  ;;  %v2708_v25 = vld [vmem:[#allocation29_spill] sm:$0xff] }
 0x159   :  { %1506 = vmatpush.msra.mxu3 %v1344_v7  ;;  %1487 = vmatpush.msra.mxu2 %v1310_v4  ;;  %v1256_v6 = vunpack.c.h.bf16 %v2708_v25  ;;  %v2711_v7 = vld [vmem:[#allocation32_spill] sm:$0xff] }
 0x15a   :  { %1527 = vmatpush.msrb.mxu0 %v1374_v14  ;;  %1470 = vmatpush.msra.mxu1 %v1272_v54  ;;  %v2706_v14 = vld [vmem:[#allocation27_spill] sm:$0xff]  ;;  %v780_v62 = vpop.f32.mrf.mxu2  ;;  %v2712_v54 = vld [vmem:[#allocation33_spill] sm:$0xff] }
 0x15b   :  { %1507 = vmatpush.msra.mxu3 %v1342_v17  ;;  %1488 = vmatpush.msra.mxu2 %v1308_v37  ;;  %v1328_v10 = vunpack.c.h.bf16 %v2706_v14  ;;  %v1292_v4 = vunpack.c.h.bf16 %v2712_v54  ;;  %v1324_v17 = vunpack.c.h.bf16 %v2547_v15  ;;  %v2714_v37 = vld [vmem:[#allocation35_spill] sm:$0xff]  ;;  %v1288_v15 = vunpack.c.h.bf16 %v2567_v42 }
 0x15c   :  { %1528 = vmatpush.msrb.mxu0 %v1372_v35  ;;  %1471 = vmatpush.msra.mxu1 %v1270_v16  ;;  %v820_v33 = vpop.f32.mrf.mxu0  ;;  %v2710_v35 = vld [vmem:[#allocation31_spill] sm:$0xff]  ;;  %v1252_v16 = vunpack.c.h.bf16 %v2713_v0  ;;  %v1575_v0 = vld [vmem:[#allocation16 + $0xe0] sm:$0xff] }
 0x15d   :  { %1508 = vmatpush.msra.mxu3 %v1340_v27  ;;  %1489 = vmatpush.msra.mxu2 %v1306_v46  ;;  %v1352_v47 = vunpack.c.h.bf16 %v2710_v35  ;;  %v1290_v27 = vunpack.c.h.bf16 %v2714_v37  ;;  %v1559_v35 = vld [vmem:[#allocation16 + $0x60] sm:$0xff]  ;;  %v1577_v54 = vld [vmem:[#allocation16 + $0xf0] sm:$0xff]  ;;  %v1574_v37 = vld [vmem:[#allocation16 + $0xd8] sm:$0xff] }
 0x15e   :  { %1529 = vmatpush.msrb.mxu0 %v1370_v44  ;;  %1472 = vmatpush.msra.mxu1 %v1268_v39  ;;  %v2633_v2 = vpop.f32.mrf.mxu1  ;;  %v1254_v44 = vunpack.c.h.bf16 %v2711_v7  ;;  %v1348_v39 = vunpack.c.h.bf16 %v2561_v45  ;;  %v1284_v45 = vunpack.c.h.bf16 %v2583_v23  ;;  %v1558_v7 = vld [vmem:[#allocation16 + $0x58] sm:$0xff] }
 0x15f   :  { %1509 = vmatpush.msra.mxu3 %v1338_v48  ;;  %1490 = vmatpush.msra.mxu2 %v1304_v8  ;;  %v1316_v8 = vunpack.c.h.bf16 %v2585_v13  ;;  %v741_v13 = vadd.f32 %v2611_v52, %v2617_v43 }
 0x160   :  { %1530 = vmatpush.msrb.mxu0 %v1368_v58  ;;  %1473 = vmatpush.msra.mxu1 %v1266_v55  ;;  %v1350_v58 = vunpack.c.h.bf16 %v2549_v51  ;;  %v1320_v51 = vunpack.c.h.bf16 %v2569_v59  ;;  %v886_v55 = vpop.f32.mrf.mxu3  ;;  %v701_v59 = vadd.f32 %v2623_v5, %v2607_v21 }
 0x161   :  { %1510 = vmatpush.msra.mxu3 %v1336_v57  ;;  %1491 = vmatpush.msra.mxu2 %v1302_v3  ;;  %v1169_v3 = vld [vmem:[#allocation12] sm:$0xf] }
 0x162   :  { %1531 = vmatpush.msrb.mxu0 %v1366_v38  ;;  %1474 = vmatpush.msra.mxu1 %v1264_v60  ;;  %v1322_v38 = vunpack.c.h.bf16 %v2559_v63  ;;  %v1318_v63 = vunpack.c.h.bf16 %v2577_v36  ;;  %v866_v42 = vpop.f32.mrf.mxu2  ;;  %v1174_v21 = vperm.slane %v1169_v3, 3  ;;  %v1173_v52 = vperm.slane %v1169_v3, 2 }
 0x163   :  { %1511 = vmatpush.msra.mxu3 %v1334_v56  ;;  %1492 = vmatpush.msra.mxu2 %v1300_v53  ;;  %v781_v56 = vadd.f32 %v780_v62, %v2633_v2  ;;  %v1171_v53 = vperm.slane %v1169_v3, 0  ;;  %v1172_v2 = vperm.slane %v1169_v3, 1  ;;  %v1578_v62 = vld [vmem:[#allocation16 + $0xf8] sm:$0xff] }
 0x164   :  { %1532 = vmatpush.msrb.mxu0 %v1364_v50  ;;  %1475 = vmatpush.msra.mxu1 %v1262_v28  ;;  %v1286_v50 = vunpack.c.h.bf16 %v2575_v22 }
 0x165   :  { %1512 = vmatpush.msra.mxu3 %v1332_v20  ;;  %1493 = vmatpush.msra.mxu2 %v1298_v9 }
 0x166   :  { %1533 = vmatpush.msrb.mxu0 %v1362_v34  ;;  %1476 = vmatpush.msra.mxu1 %v1260_v32  ;;  %v846_v46 = vpop.f32.mrf.mxu1  ;;  %v821_v34 = vadd.f32 %v820_v33, %v800_v24  ;;  %v1561_v24 = vld [vmem:[#allocation16 + $0x70] sm:$0xff] }
 0x167   :  { %1513 = vmatpush.msra.mxu3 %v1330_v41  ;;  %1494 = vmatpush.msra.mxu2 %v1296_v11  ;;  %v847_v60 = vadd.f32 %v846_v46, %v701_v59  ;;  %v1562_v11 = vld [vmem:[#allocation16 + $0x78] sm:$0xff]  ;;  %v1572_v46 = vld [vmem:[#allocation16 + $0xc8] sm:$0xff]  ;;  %v1567_v59 = vld [vmem:[#allocation16 + $0xa0] sm:$0xff] }
 0x168   :  { %1534 = vmatpush.msrb.mxu0 %v1360_v1  ;;  %1477 = vmatpush.msra.mxu1 %v1258_v40  ;;  %v966_v36 = vpop.f32.mrf.mxu3 }
 0x169   :  { %1514 = vmatpush.msra.mxu3 %v1328_v10  ;;  %1495 = vmatpush.msra.mxu2 %v1294_v26  ;;  %v967_v1 = vadd.f32 %v966_v36, %v821_v34  ;;  %v867_v28 = vadd.f32 %v866_v42, %v847_v60  ;;  %v1547_v42 = vld [vmem:[#allocation16] sm:$0xff]  ;;  %v1564_v34 = vld [vmem:[#allocation16 + $0x88] sm:$0xff]  ;;  %v1379_v36 = vld [vmem:[#allocation15] sm:$0x3] }
 0x16a   :  { %1535 = vmatpush.msrb.mxu0 %v1358_v19  ;;  %1478 = vmatpush.msra.mxu1 %v1256_v6  ;;  %v946_v23 = vpop.f32.mrf.mxu2  ;;  %v1563_v60 = vld [vmem:[#allocation16 + $0x80] sm:$0xff] }
 0x16b   :  { %1515 = vmatpush.msra.mxu3 %v1326_v12  ;;  %1496 = vmatpush.msra.mxu2 %v1292_v4  ;;  %v1556_v4 = vld [vmem:[#allocation16 + $0x48] sm:$0xff] }
 0x16c   :  { %1536 = vmatpush.msrb.mxu0 %v1356_v30  ;;  %1479 = vmatpush.msra.mxu1 %v1254_v44  ;;  %v887_v30 = vadd.f32 %v886_v55, %v741_v13  ;;  %v1557_v44 = vld [vmem:[#allocation16 + $0x50] sm:$0xff] }
 0x16d   :  { %1516 = vmatpush.msra.mxu3 %v1324_v17  ;;  %1497 = vmatpush.msra.mxu2 %v1290_v27  ;;  %v1576_v17 = vld [vmem:[#allocation16 + $0xe8] sm:$0xff]  ;;  %v1553_v27 = vld [vmem:[#allocation16 + $0x30] sm:$0xff] }
 0x16e   :  { %1537 = vmatpush.msrb.mxu0 %v1354_v29  ;;  %1480 = vmatpush.msra.mxu1 %v1252_v16  ;;  %v926_v57 = vpop.f32.mrf.mxu1  ;;  %v1554_v16 = vld [vmem:[#allocation16 + $0x38] sm:$0xff]  ;;  %v1569_v55 = vld [vmem:[#allocation16 + $0xb0] sm:$0xff] }
 0x16f   :  { %1517 = vmatpush.msra.mxu3 %v1322_v38  ;;  %1498 = vmatpush.msra.mxu2 %v1288_v15  ;;  %v927_v9 = vadd.f32 %v926_v57, %v781_v56  ;;  %v1573_v38 = vld [vmem:[#allocation16 + $0xd0] sm:$0xff]  ;;  %v1551_v15 = vld [vmem:[#allocation16 + $0x20] sm:$0xff]  ;;  %v1566_v57 = vld [vmem:[#allocation16 + $0x98] sm:$0xff]  ;;  %v1381_v56 = vperm.slane %v1379_v36, 0 }
 0x170   :  { %1538 = vmatpush.msrb.mxu0 %v1352_v47 }
 0x171   :  { %v906_v48 = vpop.f32.mrf.mxu0  ;;  %1518 = vmatpush.msra.mxu3 %v1320_v51  ;;  %1499 = vmatpush.msra.mxu2 %v1286_v50  ;;  %v947_v14 = vadd.f32 %v946_v23, %v927_v9  ;;  %v1571_v51 = vld [vmem:[#allocation16 + $0xc0] sm:$0xff]  ;;  %v1570_v50 = vld [vmem:[#allocation16 + $0xb8] sm:$0xff] }
 0x172   :  { %1539 = vmatpush.msrb.mxu0 %v1350_v58  ;;  %v907_v40 = vadd.f32 %v906_v48, %v887_v30  ;;  %v1555_v58 = vld [vmem:[#allocation16 + $0x40] sm:$0xff]  ;;  %v1550_v48 = vld [vmem:[#allocation16 + $0x18] sm:$0xff] }
 0x173   :  { %1519 = vmatpush.msra.mxu3 %v1318_v63  ;;  %1500 = vmatpush.msra.mxu2 %v1284_v45  ;;  %v1549_v63 = vld [vmem:[#allocation16 + $0x10] sm:$0xff]  ;;  %v1548_v45 = vld [vmem:[#allocation16 + $0x8] sm:$0xff] }
 0x174   :  { %1540 = vmatpush.msrb.mxu0 %v1348_v39  ;;  %v1552_v39 = vld [vmem:[#allocation16 + $0x28] sm:$0xff] }
 0x175   :  { %1520 = vmatpush.msra.mxu3 %v1316_v8  ;;  %v1568_v8 = vld [vmem:[#allocation16 + $0xa8] sm:$0xff] }
 0x191   :  { %v986_v22 = vpop.f32.mrf.mxu0 }
 0x192   :  { %v987_v20 = vadd.f32 %v986_v22, %v967_v1  ;;  %v1565_v22 = vld [vmem:[#allocation16 + $0x90] sm:$0xff] }
 0x1b3   :  { %v1102_v19 = vpop.f32.mrf.mxu1 }
 0x1b4   :  { %v1165_v5 = vadd.f32 %v1102_v19, %v867_v28  ;;  %v1162_v32 = vpop.f32.mrf.mxu0 }
 0x1b5   :  { %v1168_v41 = vadd.f32 %v1162_v32, %v987_v20  ;;  %v1382_v20 = vperm.slane %v1379_v36, 1 }
 0x1b6   :  { %v1179_v33 = vadd.f32 %v1171_v53, %v1165_v5 }
 0x1b7   :  { %v1182_v18 = vadd.f32 %v1174_v21, %v1168_v41 }
 0x1b8   :  { %v1183_v31 = vmax.f32 %v1179_v33, 0.0 }
 0x1b9   :  { %v1186_v10 = vmax.f32 %v1182_v18, 0.0  ;;  %v1122_v61 = vpop.f32.mrf.mxu2 }
 0x1ba   :  { %v1166_v43 = vadd.f32 %v1122_v61, %v907_v40  ;;  %v1142_v29 = vpop.f32.mrf.mxu3  ;;  %1401 = vmatmul.f32.vlgmr.msrb.gmra.mxu1 %v1183_v31 }
 0x1bb   :  { %v1167_v25 = vadd.f32 %v1142_v29, %v947_v14  ;;  %1461 = vmatmul.f32.vlgmr.msra.gmra.mxu0 %v1186_v10  ;;  %1583 = vmatpush.msrb.mxu1 %v1562_v11  ;;  %v1662_v11 = vld [vmem:[#allocation18] ss:$0 sm:$0xff] }
 0x1bc   :  { %v1180_v6 = vadd.f32 %v1172_v2, %v1166_v43 }
 0x1bd   :  { %v1181_v26 = vadd.f32 %v1173_v52, %v1167_v25  ;;  %1584 = vmatpush.msrb.mxu1 %v1561_v24 }
 0x1be   :  { %v1184_v12 = vmax.f32 %v1180_v6, 0.0 }
 0x1bf   :  { %v1185_v47 = vmax.f32 %v1181_v26, 0.0  ;;  %1585 = vmatpush.msrb.mxu1 %v1560_v49 }
 0x1c0   :  { %1421 = vmatmul.f32.vlgmr.msrb.gmra.mxu2 %v1184_v12 }
 0x1c1   :  { %1441 = vmatmul.f32.vlgmr.msrb.gmra.mxu3 %v1185_v47  ;;  %1586 = vmatpush.msrb.mxu1 %v1559_v35 }
 0x1c2   :  { %1481 = vmatmul.f32.vlgmr.msra.gmra.mxu1 %v1183_v31  ;;  %1603 = vmatpush.msrb.mxu2 %v1578_v62 }
 0x1c3   :  { %1541 = vmatmul.f32.vlgmr.msrb.gmra.mxu0 %v1186_v10  ;;  %1587 = vmatpush.msrb.mxu1 %v1558_v7 }
 0x1c4   :  { %1604 = vmatpush.msrb.mxu2 %v1577_v54 }
 0x1c5   :  { %1588 = vmatpush.msrb.mxu1 %v1557_v44 }
 0x1c6   :  { %1605 = vmatpush.msrb.mxu2 %v1576_v17 }
 0x1c7   :  { %1589 = vmatpush.msrb.mxu1 %v1556_v4 }
 0x1c8   :  { %1501 = vmatmul.f32.vlgmr.msra.gmra.mxu2 %v1184_v12 }
 0x1c9   :  { %1521 = vmatmul.f32.vlgmr.msra.gmra.mxu3 %v1185_v47  ;;  %1590 = vmatpush.msrb.mxu1 %v1555_v58 }
 0x1ca   :  { %1606 = vmatpush.msrb.mxu2 %v1575_v0 }
 0x1cb   :  { %1591 = vmatpush.msrb.mxu1 %v1554_v16 }
 0x1cc   :  { %1607 = vmatpush.msrb.mxu2 %v1574_v37 }
 0x1cd   :  { %1592 = vmatpush.msrb.mxu1 %v1553_v27 }
 0x1ce   :  { %1608 = vmatpush.msrb.mxu2 %v1573_v38 }
 0x1cf   :  { %1593 = vmatpush.msrb.mxu1 %v1552_v39 }
 0x1d0   :  { %1609 = vmatpush.msrb.mxu2 %v1572_v46 }
 0x1d1   :  { %1594 = vmatpush.msrb.mxu1 %v1551_v15 }
 0x1d2   :  { %1610 = vmatpush.msrb.mxu2 %v1571_v51 }
 0x1d3   :  { %1595 = vmatpush.msrb.mxu1 %v1550_v48 }
 0x1d4   :  { %1611 = vmatpush.msrb.mxu2 %v1570_v50 }
 0x1d5   :  { %1596 = vmatpush.msrb.mxu1 %v1549_v63 }
 0x1d6   :  { %1612 = vmatpush.msrb.mxu2 %v1569_v55 }
 0x1d7   :  { %1597 = vmatpush.msrb.mxu1 %v1548_v45 }
 0x1d8   :  { %1613 = vmatpush.msrb.mxu2 %v1568_v8 }
 0x1d9   :  { %1598 = vmatpush.msrb.mxu1 %v1547_v42 }
 0x1da   :  { %1614 = vmatpush.msrb.mxu2 %v1567_v59 }
 0x1dc   :  { %1615 = vmatpush.msrb.mxu2 %v1566_v57 }
 0x1de   :  { %1616 = vmatpush.msrb.mxu2 %v1565_v22 }
 0x1e0   :  { %1617 = vmatpush.msrb.mxu2 %v1564_v34 }
 0x1e2   :  { %1618 = vmatpush.msrb.mxu2 %v1563_v60 }
 0x237   :  { %v1402_v3 = vpop.f32.mrf.mxu1 }
 0x238   :  { %v1403_v23 = vadd.f32 %v1402_v3, %v1381_v56  ;;  %v1462_v53 = vpop.f32.mrf.mxu0 }
 0x23f   :  { %v1482_v21 = vpop.f32.mrf.mxu1 }
 0x240   :  { %v1483_v32 = vadd.f32 %v1482_v21, %v1382_v20  ;;  %v1542_v40 = vpop.f32.mrf.mxu0 }
 0x243   :  { %v1422_v1 = vpop.f32.mrf.mxu2 }
 0x244   :  { %v1423_v13 = vadd.f32 %v1422_v1, %v1403_v23  ;;  %v1442_v28 = vpop.f32.mrf.mxu3 }
 0x246   :  { %v1443_v19 = vadd.f32 %v1442_v28, %v1423_v13 }
 0x248   :  { %v1463_v5 = vadd.f32 %v1462_v53, %v1443_v19 }
 0x24a   :  { %v1545_v9 = vmax.f32 %v1463_v5, 0.0 }
 0x24b   :  { %v1502_v41 = vpop.f32.mrf.mxu2 }
 0x24c   :  { %v1503_v30 = vadd.f32 %v1502_v41, %v1483_v32  ;;  %1599 = vmatmul.f32.vlgmr.msrb.gmra.mxu1 %v1545_v9  ;;  %v1522_v33 = vpop.f32.mrf.mxu3 }
 0x24e   :  { %v1523_v18 = vadd.f32 %v1522_v33, %v1503_v30 }
 0x250   :  { %v1543_v31 = vadd.f32 %v1542_v40, %v1523_v18 }
 0x252   :  { %v1546_v2 = vmax.f32 %v1543_v31, 0.0 }
 0x254   :  { %1619 = vmatmul.f32.vlgmr.msrb.gmra.mxu2 %v1546_v2 }
 0x2c9   :  { %v1600_v14 = vpop.f32.mrf.mxu1 }
 0x2ca   :  { %v1601_v10 = vadd.f32 %v1662_v11, %v1600_v14 }
 0x2d7   :  { %v1620_v61 = vpop.f32.mrf.mxu2 }
 0x2d8   :  { %v1621_v52 = vadd.f32 %v1620_v61, %v1601_v10 }
 0x2da   :  { %1623 = vst [vmem:[%s2681_s12] sm:$0x3] %v1621_v52 }
 0x2db   :  { %1628 = vsyncpa [#allocation3], 1 }
 0x2dc   :  { %1629 = vsyncpa [#allocation5], 1 }
 0x2dd   :  { %1630 = vsyncpa [#allocation8], 1 }
 0x2de   :  { %1631 = vsyncpa [#allocation11], 1 }
 0x2df   :  { %1632 = vsyncpa [#allocation14], 1 }
 0x2e0   :  { %1633 = vsyncpa [#allocation17], 1 }

// kernel: _actor_critic_forward.4
= control target key start
LH: loop header
LB: loop body
LE: loop exit
PB: predicated region body
PF: predicated region fallthrough
CT: control target
= control target key end

     0   :  { %s4770_s0 = inlined_call_operand.vmem [shape: bf16[2,2,4096], index: 0, kind: input, shape index: {}]   ;;  %s4771_s1 = inlined_call_operand.hbm [shape: bf16[2,4096,256], index: 1, kind: input, shape index: {}]   ;;  %s4772_s2 = inlined_call_operand.hbm [shape: f32[2,1,256], index: 2, kind: input, shape index: {}]   ;;  %s4773_s3 = inlined_call_operand.vmem [shape: f32[2,2,256], index: 3, kind: output, shape index: {}]  }
   0x1   :  { %4776 = sst [smem:[#allocation10_spill]] %s4771_s1 }
   0x2   :  { %8 = vsyncpa [#allocation3], 0 }
   0x3   :  { %10 = vsyncpa [#allocation3 + $0x1], 0 }
   0x4   :  { %11 = vsyncpa [#allocation5], 0 }
   0x5   :  { %13 = vsyncpa [#allocation5 + $0x1], 0  ;;  %s4015_s12 = smov 0   ;;  %s4017_s13 = smov 0  }
   0x6   :  { %s4019_s14 = smov 0   ;;  %s4021_s15 = smov 0  }
   0x7   :  { %s4023_s16 = smov 0   ;;  %s4025_s17 = smov 0  }
   0x8   :  { %s4027_s18 = smov 0   ;;  %s4029_s19 = smov 0  }
   0x9   :  { %s4031_s20 = smov 0   ;;  %s4033_s21 = smov 0  }
   0xa   :  { %s4035_s22 = smov 0  }
   0xb LB: > { %s28_s23 = sadd.s32 1, %s3982_s20  ;;  %s31_s24 = sadd.s32 1, %s3986_s21  ;;  %s3990_s22 = sphi %s4035_s22, %s19_s22   ;;  %s3986_s21 = sphi %s4033_s21, %s4795_s21   ;;  %s3982_s20 = sphi %s4031_s20, %s4794_s20   ;;  %s3978_s19 = sphi %s4029_s19, %s4793_s19   ;;  %s3974_s18 = sphi %s4027_s18, %s4792_s18   ;;  %s3970_s17 = sphi %s4025_s17, %s4791_s17   ;;  %s3966_s16 = sphi %s4023_s16, %s4790_s16   ;;  %s3962_s15 = sphi %s4021_s15, %s4789_s15   ;;  %s3958_s14 = sphi %s4019_s14, %s4788_s14   ;;  %s3954_s13 = sphi %s4017_s13, %s4787_s13   ;;  %s3950_s12 = sphi %s4015_s12, %s4786_s12  }
   0xc   : > { %p29_p0 = scmp.ge.s32.totalorder %s28_s23, 2  ;;  %s68_s25 = sadd.s32 1, %s3970_s17 }
   0xd   : > { %p75_p1 = scmp.ne.s32.totalorder %s3970_s17, %s3966_s16  ;;  %p76_p2 = scmp.eq.s32.totalorder %s3990_s22, 0 }
   0xe   : > { %s4797_s23 = smov (%p29_p0, %s28_s23), 0  ;;  %s4799_s24 = smov (!%p29_p0, %s31_s24), %s3986_s21 }
   0xf   : > { %4777 = sst [smem:[#allocation8_spill]] %s4797_s23  ;;  %s64_s26 = ssub.s32 %s3982_s20, %s4797_s23 }
  0x10   : > { %p4083_p3 = por %p76_p2, %p75_p1  ;;  %p33_p4 = scmp.ge.s32.totalorder %s4799_s24, 2 }
  0x11   : > { %p81_p5 = scmp.ne.s32.totalorder %s3966_s16, %s3962_s15  ;;  %p3736_p6 = scmp.lt.s32.totalorder %s3990_s22, 4 }
  0x12   : > { %s4801_s24 = smov (%p33_p4, %s4799_s24), 0  ;;  %s169_s28 = sand.u32 1, %s3970_s17  }
  0x13   : > { %4779 = sst [smem:[#allocation9_spill]] %s4801_s24  ;;  %s3467_s29 = sshll.u32 %s3982_s20, 9 }
  0x14   : > { %s4096_s30 = ssub.s32 %s3986_s21, %s4801_s24  ;;  %s2425_s5 = sshll.u32 %s169_s28, 11 }
  0x15   : > { %s65_s4 = sor.u32 %s64_s26, %s4096_s30  ;;  %s2428_s6 = sshll.u32 %s3986_s21, 10 }
  0x16   : > { %p66_p7 = scmp.eq.s32.totalorder %s65_s4, 0  ;;  %s173_s7 = scalar_lea.vmem [#allocation2], %s2425_s5 }
  0x17   : > { %s184_s8 = sshll.u32 %s173_s7, 4  ;;  %s179_s10 = sadd.s32 %s3467_s29, %s2428_s6  ;;  %s185_s8 = int_to_ptr.vmem [resolvable:$true] %s184_s8 }
  0x18   : > { %s4101_s9 = scalar_select %p66_p7, %s3970_s17, %s68_s25  }
  0x19   : > { %s2429_s11 = sshll.u32 %s179_s10, 2  ;;  %p3730_p8 = pnand %p3736_p6, %p4083_p3 }
  0x1a   : > { %s4780_s1 = sld [smem:[#allocation10_spill]]  ;;  %s170_s29 = scalar_lea.sflag [#allocation3], %s169_s28 }
  0x1b   : > { %s3992_s6 = smov 128   ;;  %s3993_s27 = smov 8  }
  0x1c   : > { %p2432_p9 = scmp.ge.s32.totalorder %s3990_s22, 1  ;;  %p211_p10 = scmp.lt.s32.totalorder %s3990_s22, 5 }
  0x1d   : > { %s2421_s10 = sadd.s32 4294967295, %s3990_s22   ;;  %p92_p13 = scmp.eq.s32.totalorder %s4096_s30, 0 }
  0x1e   : > { %p4112_p11 = pnand %p2432_p9, %p211_p10  ;;  %p82_p12 = scmp.eq.s32.totalorder %s2421_s10, 0 }
  0x1f   : > { %p101_p0 = scmp.ne.s32.totalorder %s3958_s14, %s3954_s13  ;;  %p107_p3 = scmp.ne.s32.totalorder %s3954_s13, %s3950_s12 }
  0x20   : > { %s181_s5 = scalar_lea.hbm %s4780_s1, %s2429_s11  ;;  %s94_s11 = sadd.s32 1, %s3958_s14 }
  0x21   : > { %s182_s25 = sshll.u32 %s181_s5, 4  ;;  %p4124_p1 = por %p82_p12, %p81_p5  ;;  %s183_s25 = int_to_ptr.hbm [resolvable:$true] %s182_s25 }
  0x22   : > { %3732 = dma.hbm_to_vmem [thread:$0]  (!%p3730_p8), %s183_s25, 32768, %s185_s8, %s170_s29, %s3992_s6, %s3992_s6, %s3993_s27  }
  0x23   : > { %s4131_s26 = scalar_select %p92_p13, %s3958_s14, %s94_s11  }
  0x24   : > { %p4133_p4 = por %p107_p3, %p82_p12  ;;  %s194_s4 = sand.u32 1, %s3958_s14  }
  0x25   : > { %s2431_s5 = sshll.u32 %s3986_s21, 1  ;;  %p103_p7 = por %p101_p0, %p76_p2 }
  0x26   : > { %s2430_s30 = sshll.u32 %s194_s4, 1  ;;  %s202_s15 = scalar_lea.hbm %s4772_s2, %s2431_s5 }
  0x27   : > { %s204_s6 = sshll.u32 %s202_s15, 4  ;;  %s198_s27 = scalar_lea.vmem [#allocation4], %s2430_s30  ;;  %s205_s6 = int_to_ptr.hbm [resolvable:$true] %s204_s6 }
  0x28   : > { %s206_s10 = sshll.u32 %s198_s27, 4  ;;  %p3733_p5 = pnand %p3736_p6, %p103_p7  ;;  %s207_s10 = int_to_ptr.vmem [resolvable:$true] %s206_s10 }
  0x29   : > { %s195_s12 = scalar_lea.sflag [#allocation5], %s194_s4  ;;  %215 = sbr.rel (%p4112_p11) target bundleno = 478 (0x1de), region = 32 }
  0x2a   : > { %3735 = dma.hbm_to_vmem [thread:$0]  (!%p3733_p5), %s205_s6, 32, %s207_s10, %s195_s12  }
  0x2b   : > { %s217_s11 = sand.u32 (!%p4112_p11), 1, %s3966_s16  }
  0x2c   : > { %s2433_s1 = sshll.u32 (!%p4112_p11), %s217_s11, 11  ;;  %s218_s24 = scalar_lea.sflag (!%p4112_p11), [#allocation3], %s217_s11 }
  0x2d   : > { %s4149_s23 = scalar_lea.vmem (!%p4112_p11), [#allocation2], %s2433_s1 }
  0x2e   : > { %3941 = dma.done.wait (%p4124_p1), %s218_s24, 32768  }
  0x2f   : > { %3943 = vsyncadd (%p4124_p1), %s218_s24, 4294934528  ;;  %s227_s5 = sand.u32 1, %s3954_s13  }
  0x30   : > { %s4156_s4 = sshll.u32 %s227_s5, 1  ;;  %s228_s7 = scalar_lea.sflag [#allocation5], %s227_s5 }
  0x31   : > { %s231_s30 = scalar_lea.vmem [#allocation4], %s4156_s4 }
  0x32   : > { %3945 = dma.done.wait (%p4133_p4), %s228_s7, 32  }
  0x33   : > { %3947 = vsyncadd (%p4133_p4), %s228_s7, 4294967264  ;;  %s2435_s1 = sshll.u32 %s3974_s18, 4  ;;  %p269_p2 = scmp.lt.s32.totalorder %s3978_s19, 1 }
  0x34   : > { %p271_p6 = scmp.lt.s32.totalorder %s2435_s1, 31  ;;  %p2439_p8 = scmp.ne.s32.totalorder %s3974_s18, 0 }
  0x35   : > { %s4803_s19 = smov (!%p269_p2, %s3978_s19), 1 }
  0x36   : > { %s4805_s1 = smov (!%p271_p6, %s2435_s1), 31  ;;  %s2436_s24 = sshll.u32 %s4803_s19, 5 }
  0x37   : > { %s3468_s28 = sshll.u32 %s4803_s19, 2  ;;  %s274_s25 = sadd.s32 %s2436_s24, %s4805_s1 }
  0x38   : > { %s4169_s6 = scalar_lea.vmem %s4773_s3, %s3468_s28  ;;  %s4174_s8 = scalar_lea.vmem %s4770_s0, %s274_s25 }
  0x39   : > { %286 = sbr.rel (%p2439_p8) target bundleno = 64 (0x40), region = 44 }
  0x3e   : > { %v3994_v0 = vmov 0.0  }
  0x3f   : > { %287 = vst [vmem:[%s4169_s6] sm:$0xf] %v3994_v0 }
  0x40 PF: > { %v2498_v1 = vld [vmem:[%s4149_s23 + $0x70] sm:$0xf]  ;;  %v3484_v2 = vld [vmem:[%s4149_s23 + $0x74] sm:$0xf0]  ;;  %v2490_v12 = vld [vmem:[%s4149_s23 + $0x60] sm:$0xf] }
  0x41   : > { %v2562_v3 = vld [vmem:[%s4149_s23 + $0xf0] sm:$0xf]  ;;  %v2499_v4 = vor.u32 %v3484_v2, %v2498_v1  ;;  %v3500_v5 = vld [vmem:[%s4149_s23 + $0xf4] sm:$0xf0]  ;;  %v3482_v14 = vld [vmem:[%s4149_s23 + $0x64] sm:$0xf0] }
  0x42   : > { %v2626_v6 = vld [vmem:[%s4149_s23 + $0x170] sm:$0xf]  ;;  %v3516_v7 = vld [vmem:[%s4149_s23 + $0x174] sm:$0xf0]  ;;  %v2563_v8 = vor.u32 %v3500_v5, %v2562_v3  ;;  %v2554_v15 = vld [vmem:[%s4149_s23 + $0xe0] sm:$0xf]  ;;  %v2491_v17 = vor.u32 %v3482_v14, %v2490_v12 }
  0x43   : > { %v2627_v9 = vor.u32 %v3516_v7, %v2626_v6  ;;  %v2690_v10 = vld [vmem:[%s4149_s23 + $0x1f0] sm:$0xf]  ;;  %v3532_v11 = vld [vmem:[%s4149_s23 + $0x1f4] sm:$0xf0]  ;;  %1863 = vmatpush.bf16.msra.mxu0 %v2499_v4  ;;  %v3498_v16 = vld [vmem:[%s4149_s23 + $0xe4] sm:$0xf0] }
  0x44   : > { %v2691_v13 = vor.u32 %v3532_v11, %v2690_v10  ;;  %1876 = vmatpush.bf16.msra.mxu1 %v2563_v8  ;;  %v2555_v18 = vor.u32 %v3498_v16, %v2554_v15  ;;  %v2618_v19 = vld [vmem:[%s4149_s23 + $0x160] sm:$0xf]  ;;  %v3514_v20 = vld [vmem:[%s4149_s23 + $0x164] sm:$0xf0]  ;;  %v2482_v24 = vld [vmem:[%s4149_s23 + $0x50] sm:$0xf] }
  0x45   : > { %1889 = vmatpush.bf16.msra.mxu2 %v2627_v9  ;;  %v2682_v21 = vld [vmem:[%s4149_s23 + $0x1e0] sm:$0xf]  ;;  %v2619_v22 = vor.u32 %v3514_v20, %v2618_v19  ;;  %v3530_v23 = vld [vmem:[%s4149_s23 + $0x1e4] sm:$0xf0]  ;;  %v3480_v25 = vld [vmem:[%s4149_s23 + $0x54] sm:$0xf0] }
  0x46   : > { %1902 = vmatpush.bf16.msra.mxu3 %v2691_v13  ;;  %v2683_v26 = vor.u32 %v3530_v23, %v2682_v21  ;;  %v2546_v27 = vld [vmem:[%s4149_s23 + $0xd0] sm:$0xf]  ;;  %v3496_v28 = vld [vmem:[%s4149_s23 + $0xd4] sm:$0xf0]  ;;  %v2483_v30 = vor.u32 %v3480_v25, %v2482_v24  ;;  %v2474_v36 = vld [vmem:[%s4149_s23 + $0x40] sm:$0xf] }
  0x47   : > { %v2610_v29 = vld [vmem:[%s4149_s23 + $0x150] sm:$0xf]  ;;  %1864 = vmatpush.bf16.msra.mxu0 %v2491_v17  ;;  %v3512_v31 = vld [vmem:[%s4149_s23 + $0x154] sm:$0xf0]  ;;  %v2547_v34 = vor.u32 %v3496_v28, %v2546_v27  ;;  %v3478_v37 = vld [vmem:[%s4149_s23 + $0x44] sm:$0xf0] }
  0x48   : > { %v2674_v32 = vld [vmem:[%s4149_s23 + $0x1d0] sm:$0xf]  ;;  %v3528_v33 = vld [vmem:[%s4149_s23 + $0x1d4] sm:$0xf0]  ;;  %1877 = vmatpush.bf16.msra.mxu1 %v2555_v18  ;;  %v2611_v35 = vor.u32 %v3512_v31, %v2610_v29  ;;  %v2538_v38 = vld [vmem:[%s4149_s23 + $0xc0] sm:$0xf]  ;;  %v2475_v45 = vor.u32 %v3478_v37, %v2474_v36 }
  0x49   : > { %1890 = vmatpush.bf16.msra.mxu2 %v2619_v22  ;;  %v2675_v39 = vor.u32 %v3528_v33, %v2674_v32  ;;  %v3494_v40 = vld [vmem:[%s4149_s23 + $0xc4] sm:$0xf0]  ;;  %v2602_v41 = vld [vmem:[%s4149_s23 + $0x140] sm:$0xf]  ;;  %v2466_v48 = vld [vmem:[%s4149_s23 + $0x30] sm:$0xf] }
  0x4a   : > { %1903 = vmatpush.bf16.msra.mxu3 %v2683_v26  ;;  %v3510_v42 = vld [vmem:[%s4149_s23 + $0x144] sm:$0xf0]  ;;  %v2666_v43 = vld [vmem:[%s4149_s23 + $0x1c0] sm:$0xf]  ;;  %v2539_v46 = vor.u32 %v3494_v40, %v2538_v38  ;;  %v3476_v49 = vld [vmem:[%s4149_s23 + $0x34] sm:$0xf0] }
  0x4b   : > { %v3526_v44 = vld [vmem:[%s4149_s23 + $0x1c4] sm:$0xf0]  ;;  %1865 = vmatpush.bf16.msra.mxu0 %v2483_v30  ;;  %v2603_v47 = vor.u32 %v3510_v42, %v2602_v41  ;;  %v2530_v50 = vld [vmem:[%s4149_s23 + $0xb0] sm:$0xf]  ;;  %v3492_v52 = vld [vmem:[%s4149_s23 + $0xb4] sm:$0xf0]  ;;  %v2467_v57 = vor.u32 %v3476_v49, %v2466_v48 }
  0x4c   : > { %1878 = vmatpush.bf16.msra.mxu1 %v2547_v34  ;;  %v2667_v51 = vor.u32 %v3526_v44, %v2666_v43  ;;  %v2594_v53 = vld [vmem:[%s4149_s23 + $0x130] sm:$0xf]  ;;  %v3508_v54 = vld [vmem:[%s4149_s23 + $0x134] sm:$0xf0]  ;;  %v2531_v58 = vor.u32 %v3492_v52, %v2530_v50  ;;  %v2458_v60 = vld [vmem:[%s4149_s23 + $0x20] sm:$0xf] }
  0x4d   : > { %1891 = vmatpush.bf16.msra.mxu2 %v2611_v35  ;;  %v2658_v55 = vld [vmem:[%s4149_s23 + $0x1b0] sm:$0xf]  ;;  %v3524_v56 = vld [vmem:[%s4149_s23 + $0x1b4] sm:$0xf0]  ;;  %v2595_v59 = vor.u32 %v3508_v54, %v2594_v53  ;;  %v3474_v61 = vld [vmem:[%s4149_s23 + $0x24] sm:$0xf0] }
  0x4e   : > { %1904 = vmatpush.bf16.msra.mxu3 %v2675_v39  ;;  %v2522_v62 = vld [vmem:[%s4149_s23 + $0xa0] sm:$0xf]  ;;  %v2659_v63 = vor.u32 %v3524_v56, %v2658_v55  ;;  %v3490_v0 = vld [vmem:[%s4149_s23 + $0xa4] sm:$0xf0]  ;;  %v2459_v5 = vor.u32 %v3474_v61, %v2458_v60  ;;  %v2450_v8 = vld [vmem:[%s4149_s23 + $0x10] sm:$0xf] }
  0x4f   : > { %1866 = vmatpush.bf16.msra.mxu0 %v2475_v45  ;;  %v2586_v1 = vld [vmem:[%s4149_s23 + $0x120] sm:$0xf]  ;;  %v3506_v2 = vld [vmem:[%s4149_s23 + $0x124] sm:$0xf0]  ;;  %v2523_v6 = vor.u32 %v3490_v0, %v2522_v62  ;;  %v3472_v9 = vld [vmem:[%s4149_s23 + $0x14] sm:$0xf0] }
  0x50   : > { %1879 = vmatpush.bf16.msra.mxu1 %v2539_v46  ;;  %v2650_v3 = vld [vmem:[%s4149_s23 + $0x1a0] sm:$0xf]  ;;  %v3522_v4 = vld [vmem:[%s4149_s23 + $0x1a4] sm:$0xf0]  ;;  %v2587_v7 = vor.u32 %v3506_v2, %v2586_v1  ;;  %v2514_v10 = vld [vmem:[%s4149_s23 + $0x90] sm:$0xf]  ;;  %v2451_v17 = vor.u32 %v3472_v9, %v2450_v8 }
  0x51   : > { %1892 = vmatpush.bf16.msra.mxu2 %v2603_v47  ;;  %v2651_v11 = vor.u32 %v3522_v4, %v2650_v3  ;;  %v3488_v12 = vld [vmem:[%s4149_s23 + $0x94] sm:$0xf0]  ;;  %v2578_v13 = vld [vmem:[%s4149_s23 + $0x110] sm:$0xf]  ;;  %v2442_v18 = vld [vmem:[%s4149_s23] sm:$0xf] }
  0x52   : > { %1905 = vmatpush.bf16.msra.mxu3 %v2667_v51  ;;  %v3504_v14 = vld [vmem:[%s4149_s23 + $0x114] sm:$0xf0]  ;;  %v2642_v15 = vld [vmem:[%s4149_s23 + $0x190] sm:$0xf]  ;;  %v3470_v19 = vld [vmem:[%s4149_s23 + $0x4] sm:$0xf0]  ;;  %v2515_v20 = vor.u32 %v3488_v12, %v2514_v10 }
  0x53   : > { %1867 = vmatpush.bf16.msra.mxu0 %v2467_v57  ;;  %v3520_v16 = vld [vmem:[%s4149_s23 + $0x194] sm:$0xf0]  ;;  %v2579_v21 = vor.u32 %v3504_v14, %v2578_v13  ;;  %v2506_v22 = vld [vmem:[%s4149_s23 + $0x80] sm:$0xf]  ;;  %v3486_v23 = vld [vmem:[%s4149_s23 + $0x84] sm:$0xf0]  ;;  %v2443_v32 = vor.u32 %v3470_v19, %v2442_v18 }
  0x54   : > { %1880 = vmatpush.bf16.msra.mxu1 %v2531_v58  ;;  %v2570_v24 = vld [vmem:[%s4149_s23 + $0x100] sm:$0xf]  ;;  %v2643_v25 = vor.u32 %v3520_v16, %v2642_v15  ;;  %v3502_v26 = vld [vmem:[%s4149_s23 + $0x104] sm:$0xf0]  ;;  %v2754_v29 = vld [vmem:[%s4149_s23 + $0x270] sm:$0xf]  ;;  %v2507_v36 = vor.u32 %v3486_v23, %v2506_v22 }
  0x55   : > { %1893 = vmatpush.bf16.msra.mxu2 %v2595_v59  ;;  %v2634_v27 = vld [vmem:[%s4149_s23 + $0x180] sm:$0xf]  ;;  %v3518_v28 = vld [vmem:[%s4149_s23 + $0x184] sm:$0xf0]  ;;  %v3548_v30 = vld [vmem:[%s4149_s23 + $0x274] sm:$0xf0]  ;;  %v2571_v37 = vor.u32 %v3502_v26, %v2570_v24 }
  0x56   : > { %1906 = vmatpush.bf16.msra.mxu3 %v2659_v63  ;;  %v2818_v31 = vld [vmem:[%s4149_s23 + $0x2f0] sm:$0xf]  ;;  %v3564_v33 = vld [vmem:[%s4149_s23 + $0x2f4] sm:$0xf0]  ;;  %v2635_v40 = vor.u32 %v3518_v28, %v2634_v27  ;;  %v2755_v41 = vor.u32 %v3548_v30, %v2754_v29  ;;  %v2746_v44 = vld [vmem:[%s4149_s23 + $0x260] sm:$0xf] }
  0x57   : > { %1868 = vmatpush.bf16.msra.mxu0 %v2459_v5  ;;  %v2882_v34 = vld [vmem:[%s4149_s23 + $0x370] sm:$0xf]  ;;  %v3580_v35 = vld [vmem:[%s4149_s23 + $0x374] sm:$0xf0]  ;;  %v2819_v42 = vor.u32 %v3564_v33, %v2818_v31  ;;  %v3546_v45 = vld [vmem:[%s4149_s23 + $0x264] sm:$0xf0] }
  0x58   : > { %1881 = vmatpush.bf16.msra.mxu1 %v2523_v6  ;;  %v2946_v38 = vld [vmem:[%s4149_s23 + $0x3f0] sm:$0xf]  ;;  %v3596_v39 = vld [vmem:[%s4149_s23 + $0x3f4] sm:$0xf0]  ;;  %v2883_v43 = vor.u32 %v3580_v35, %v2882_v34  ;;  %v2810_v46 = vld [vmem:[%s4149_s23 + $0x2e0] sm:$0xf]  ;;  %v2747_v53 = vor.u32 %v3546_v45, %v2746_v44 }
  0x59   : > { %1894 = vmatpush.bf16.msra.mxu2 %v2587_v7  ;;  %v2947_v47 = vor.u32 %v3596_v39, %v2946_v38  ;;  %v3562_v48 = vld [vmem:[%s4149_s23 + $0x2e4] sm:$0xf0]  ;;  %v2874_v49 = vld [vmem:[%s4149_s23 + $0x360] sm:$0xf]  ;;  %v2738_v54 = vld [vmem:[%s4149_s23 + $0x250] sm:$0xf] }
  0x5a   : > { %1907 = vmatpush.bf16.msra.mxu3 %v2651_v11  ;;  %v3578_v50 = vld [vmem:[%s4149_s23 + $0x364] sm:$0xf0]  ;;  %v2938_v51 = vld [vmem:[%s4149_s23 + $0x3e0] sm:$0xf]  ;;  %v3544_v55 = vld [vmem:[%s4149_s23 + $0x254] sm:$0xf0]  ;;  %v2811_v56 = vor.u32 %v3562_v48, %v2810_v46 }
  0x5b   : > { %1869 = vmatpush.bf16.msra.mxu0 %v2451_v17  ;;  %v3594_v52 = vld [vmem:[%s4149_s23 + $0x3e4] sm:$0xf0]  ;;  %v2875_v57 = vor.u32 %v3578_v50, %v2874_v49  ;;  %v2802_v58 = vld [vmem:[%s4149_s23 + $0x2d0] sm:$0xf]  ;;  %v3560_v59 = vld [vmem:[%s4149_s23 + $0x2d4] sm:$0xf0]  ;;  %v2739_v2 = vor.u32 %v3544_v55, %v2738_v54 }
  0x5c   : > { %1882 = vmatpush.bf16.msra.mxu1 %v2515_v20  ;;  %v289_v60 = vld [vmem:[%s4174_s8] sm:$0xff]  ;;  %v2939_v61 = vor.u32 %v3594_v52, %v2938_v51  ;;  %v2866_v62 = vld [vmem:[%s4149_s23 + $0x350] sm:$0xf]  ;;  %v2803_v3 = vor.u32 %v3560_v59, %v2802_v58  ;;  %v2730_v5 = vld [vmem:[%s4149_s23 + $0x240] sm:$0xf]  ;;  %vm2282_vm0 = vcmask 1041408  }
  0x5d   : > { %1895 = vmatpush.bf16.msra.mxu2 %v2579_v21  ;;  %v3576_v63 = vld [vmem:[%s4149_s23 + $0x354] sm:$0xf0]  ;;  %548 = vst [vmem:[#allocation1] ss:$9 sm:$0xff] %v289_v60  ;;  %v2930_v0 = vld [vmem:[%s4149_s23 + $0x3d0] sm:$0xf] }
  0x5e   : > { %1908 = vmatpush.bf16.msra.mxu3 %v2643_v25  ;;  %v3592_v1 = vld [vmem:[%s4149_s23 + $0x3d4] sm:$0xf0]  ;;  %v2867_v4 = vor.u32 %v3576_v63, %v2866_v62  ;;  %v3542_v6 = vld [vmem:[%s4149_s23 + $0x244] sm:$0xf0]  ;;  %v2794_v7 = vld [vmem:[%s4149_s23 + $0x2c0] sm:$0xf] }
  0x5f   : > { %1870 = vmatpush.bf16.msra.mxu0 %v2443_v32  ;;  %v2931_v8 = vor.u32 %v3592_v1, %v2930_v0  ;;  %v3558_v9 = vld [vmem:[%s4149_s23 + $0x2c4] sm:$0xf0]  ;;  %v2858_v10 = vld [vmem:[%s4149_s23 + $0x340] sm:$0xf]  ;;  %v2722_v14 = vld [vmem:[%s4149_s23 + $0x230] sm:$0xf]  ;;  %v2731_v15 = vor.u32 %v3542_v6, %v2730_v5 }
  0x60   : > { %1883 = vmatpush.bf16.msra.mxu1 %v2507_v36  ;;  %v3574_v11 = vld [vmem:[%s4149_s23 + $0x344] sm:$0xf0]  ;;  %v2922_v12 = vld [vmem:[%s4149_s23 + $0x3c0] sm:$0xf]  ;;  %v3540_v16 = vld [vmem:[%s4149_s23 + $0x234] sm:$0xf0]  ;;  %v2795_v19 = vor.u32 %v3558_v9, %v2794_v7 }
  0x61   : > { %1896 = vmatpush.bf16.msra.mxu2 %v2571_v37  ;;  %v3590_v13 = vld [vmem:[%s4149_s23 + $0x3c4] sm:$0xf0]  ;;  %v2786_v17 = vld [vmem:[%s4149_s23 + $0x2b0] sm:$0xf]  ;;  %v3556_v18 = vld [vmem:[%s4149_s23 + $0x2b4] sm:$0xf0]  ;;  %v2859_v20 = vor.u32 %v3574_v11, %v2858_v10  ;;  %v2723_v30 = vor.u32 %v3540_v16, %v2722_v14 }
  0x62   : > { %1909 = vmatpush.bf16.msra.mxu3 %v2635_v40  ;;  %v2923_v24 = vor.u32 %v3590_v13, %v2922_v12  ;;  %v2850_v25 = vld [vmem:[%s4149_s23 + $0x330] sm:$0xf]  ;;  %v3572_v26 = vld [vmem:[%s4149_s23 + $0x334] sm:$0xf0]  ;;  %v2787_v31 = vor.u32 %v3556_v18, %v2786_v17  ;;  %v2714_v33 = vld [vmem:[%s4149_s23 + $0x220] sm:$0xf] }
  0x63   : > { %1915 = vmatpush.bf16.msrb.mxu0 %v2755_v41  ;;  %v2914_v28 = vld [vmem:[%s4149_s23 + $0x3b0] sm:$0xf]  ;;  %v3588_v29 = vld [vmem:[%s4149_s23 + $0x3b4] sm:$0xf0]  ;;  %v2851_v32 = vor.u32 %v3572_v26, %v2850_v25  ;;  %v3538_v34 = vld [vmem:[%s4149_s23 + $0x224] sm:$0xf0] }
  0x64   : > { %1928 = vmatpush.bf16.msrb.mxu1 %v2819_v42  ;;  %v4279_v21 = vld [vmem:[#allocation1 + $0x12] sm:$0xff]  ;;  %v4281_v22 = vld [vmem:[#allocation1] sm:$0xff]  ;;  %v4288_v27 = vld [vmem:[#allocation1 + $0x9] sm:$0xff]  ;;  %v2915_v36 = vor.u32 %v3588_v29, %v2914_v28  ;;  %v2715_v42 = vor.u32 %v3538_v34, %v2714_v33  ;;  %p3464_p9 = scmp.ne.s32.totalorder %s3974_s18, 1 }
  0x65   : > { %1941 = vmatpush.bf16.msrb.mxu2 %v2883_v43  ;;  %v4283_v23 = vld [vmem:[#allocation1 + $0x1b] sm:$0xff]  ;;  %1871 = vmatmul.bf16.vlgmr.msra.gmra.mxu0 %v4281_v22  ;;  %v2778_v35 = vld [vmem:[%s4149_s23 + $0x2a0] sm:$0xf]  ;;  %v3554_v37 = vld [vmem:[%s4149_s23 + $0x2a4] sm:$0xf0] }
  0x66   : > { %1954 = vmatpush.bf16.msrb.mxu3 %v2947_v47  ;;  %1897 = vmatmul.bf16.vlgmr.msra.gmra.mxu2 %v4279_v21  ;;  %v2842_v38 = vld [vmem:[%s4149_s23 + $0x320] sm:$0xf]  ;;  %v3570_v39 = vld [vmem:[%s4149_s23 + $0x324] sm:$0xf0]  ;;  %v2706_v43 = vld [vmem:[%s4149_s23 + $0x210] sm:$0xf]  ;;  %v2779_v44 = vor.u32 %v3554_v37, %v2778_v35 }
  0x67   : > { %1916 = vmatpush.bf16.msrb.mxu0 %v2747_v53  ;;  %1910 = vmatmul.bf16.vlgmr.msra.gmra.mxu3 %v4283_v23  ;;  %v2906_v40 = vld [vmem:[%s4149_s23 + $0x3a0] sm:$0xf]  ;;  %v3586_v41 = vld [vmem:[%s4149_s23 + $0x3a4] sm:$0xf0]  ;;  %v2843_v45 = vor.u32 %v3570_v39, %v2842_v38  ;;  %v3536_v46 = vld [vmem:[%s4149_s23 + $0x214] sm:$0xf0] }
  0x68   : > { %1929 = vmatpush.bf16.msrb.mxu1 %v2811_v56  ;;  %v2770_v47 = vld [vmem:[%s4149_s23 + $0x290] sm:$0xf]  ;;  %v3552_v48 = vld [vmem:[%s4149_s23 + $0x294] sm:$0xf0]  ;;  %v2907_v49 = vor.u32 %v3586_v41, %v2906_v40  ;;  %v2698_v54 = vld [vmem:[%s4149_s23 + $0x200] sm:$0xf]  ;;  %v2707_v56 = vor.u32 %v3536_v46, %v2706_v43 }
  0x69   : > { %1942 = vmatpush.bf16.msrb.mxu2 %v2875_v57  ;;  %1884 = vmatmul.bf16.vlgmr.msra.gmra.mxu1 %v4288_v27  ;;  %v2834_v50 = vld [vmem:[%s4149_s23 + $0x310] sm:$0xf]  ;;  %v3568_v51 = vld [vmem:[%s4149_s23 + $0x314] sm:$0xf0]  ;;  %v3534_v55 = vld [vmem:[%s4149_s23 + $0x204] sm:$0xf0]  ;;  %v2771_v63 = vor.u32 %v3552_v48, %v2770_v47 }
  0x6a   : > { %1955 = vmatpush.bf16.msrb.mxu3 %v2939_v61  ;;  %v2898_v52 = vld [vmem:[%s4149_s23 + $0x390] sm:$0xf]  ;;  %v3584_v53 = vld [vmem:[%s4149_s23 + $0x394] sm:$0xf0]  ;;  %v2762_v57 = vld [vmem:[%s4149_s23 + $0x280] sm:$0xf]  ;;  %v2835_v0 = vor.u32 %v3568_v51, %v2834_v50  ;;  %v2699_v10 = vor.u32 %v3534_v55, %v2698_v54 }
  0x6b   : > { %1917 = vmatpush.bf16.msrb.mxu0 %v2739_v2  ;;  %v3550_v58 = vld [vmem:[%s4149_s23 + $0x284] sm:$0xf0]  ;;  %v2826_v59 = vld [vmem:[%s4149_s23 + $0x300] sm:$0xf]  ;;  %v4317_v61 = vld [vmem:[#allocation1 + $0x36] sm:$0xff] }
  0x6c   : > { %1930 = vmatpush.bf16.msrb.mxu1 %v2803_v3  ;;  %v3566_v60 = vld [vmem:[%s4149_s23 + $0x304] sm:$0xf0]  ;;  %v290_v62 = vld [vmem:[%s4174_s8 + $0x8] sm:$0xff]  ;;  %v4322_v2 = vld [vmem:[#allocation1 + $0x3f] sm:$0xff]  ;;  %v2763_v14 = vor.u32 %v3550_v58, %v2762_v57 }
  0x6d   : > { %1943 = vmatpush.bf16.msrb.mxu2 %v2867_v4  ;;  %v4320_v1 = vld [vmem:[#allocation1 + $0x24] sm:$0xff]  ;;  %v4324_v3 = vld [vmem:[#allocation1 + $0x2d] sm:$0xff]  ;;  %v2899_v4 = vor.u32 %v3584_v53, %v2898_v52  ;;  %v3010_v7 = vld [vmem:[%s4149_s23 + $0x470] sm:$0xf] }
  0x6e   : > { %1956 = vmatpush.bf16.msrb.mxu3 %v2931_v8  ;;  %v2890_v5 = vld [vmem:[%s4149_s23 + $0x380] sm:$0xf]  ;;  %v3582_v6 = vld [vmem:[%s4149_s23 + $0x384] sm:$0xf0]  ;;  %558 = vst [vmem:[#allocation1] ss:$9 sm:$0xff] %v290_v62 }
  0x6f   : > { %1918 = vmatpush.bf16.msrb.mxu0 %v2731_v15  ;;  %v3612_v8 = vld [vmem:[%s4149_s23 + $0x474] sm:$0xf0]  ;;  %v3074_v9 = vld [vmem:[%s4149_s23 + $0x4f0] sm:$0xf]  ;;  %v2827_v15 = vor.u32 %v3566_v60, %v2826_v59  ;;  %v2891_v18 = vor.u32 %v3582_v6, %v2890_v5  ;;  %v3002_v25 = vld [vmem:[%s4149_s23 + $0x460] sm:$0xf] }
  0x70   : > { %1931 = vmatpush.bf16.msrb.mxu1 %v2795_v19  ;;  %v3628_v11 = vld [vmem:[%s4149_s23 + $0x4f4] sm:$0xf0]  ;;  %v3138_v12 = vld [vmem:[%s4149_s23 + $0x570] sm:$0xf]  ;;  %v3011_v19 = vor.u32 %v3612_v8, %v3010_v7  ;;  %v3610_v26 = vld [vmem:[%s4149_s23 + $0x464] sm:$0xf0] }
  0x71   : > { %1944 = vmatpush.bf16.msrb.mxu2 %v2859_v20  ;;  %v3644_v13 = vld [vmem:[%s4149_s23 + $0x574] sm:$0xf0]  ;;  %v3202_v16 = vld [vmem:[%s4149_s23 + $0x5f0] sm:$0xf]  ;;  %v3075_v20 = vor.u32 %v3628_v11, %v3074_v9  ;;  %v3066_v28 = vld [vmem:[%s4149_s23 + $0x4e0] sm:$0xf]  ;;  %v3003_v35 = vor.u32 %v3610_v26, %v3002_v25 }
  0x72   : > { %1957 = vmatpush.bf16.msrb.mxu3 %v2923_v24  ;;  %v3660_v17 = vld [vmem:[%s4149_s23 + $0x5f4] sm:$0xf0]  ;;  %v3139_v24 = vor.u32 %v3644_v13, %v3138_v12  ;;  %v3194_v33 = vld [vmem:[%s4149_s23 + $0x5e0] sm:$0xf]  ;;  %v3658_v34 = vld [vmem:[%s4149_s23 + $0x5e4] sm:$0xf0] }
  0x73   : > { %1919 = vmatpush.bf16.msrb.mxu0 %v2723_v30  ;;  %v3203_v29 = vor.u32 %v3660_v17, %v3202_v16  ;;  %v3626_v30 = vld [vmem:[%s4149_s23 + $0x4e4] sm:$0xf0]  ;;  %v2994_v38 = vld [vmem:[%s4149_s23 + $0x450] sm:$0xf]  ;;  %v3608_v39 = vld [vmem:[%s4149_s23 + $0x454] sm:$0xf0]  ;;  %v3195_v41 = vor.u32 %v3658_v34, %v3194_v33 }
  0x74   : > { %1932 = vmatpush.bf16.msrb.mxu1 %v2787_v31  ;;  %v3130_v31 = vld [vmem:[%s4149_s23 + $0x560] sm:$0xf]  ;;  %v3058_v40 = vld [vmem:[%s4149_s23 + $0x4d0] sm:$0xf]  ;;  %v3656_v46 = vld [vmem:[%s4149_s23 + $0x5d4] sm:$0xf0]  ;;  %v2995_v47 = vor.u32 %v3608_v39, %v2994_v38 }
  0x75   : > { %1945 = vmatpush.bf16.msrb.mxu2 %v2851_v32  ;;  %v3642_v32 = vld [vmem:[%s4149_s23 + $0x564] sm:$0xf0]  ;;  %v3122_v43 = vld [vmem:[%s4149_s23 + $0x550] sm:$0xf]  ;;  %v2986_v50 = vld [vmem:[%s4149_s23 + $0x440] sm:$0xf] }
  0x76   : > { %1958 = vmatpush.bf16.msrb.mxu3 %v2915_v36  ;;  %v3067_v36 = vor.u32 %v3626_v30, %v3066_v28  ;;  %v3131_v37 = vor.u32 %v3642_v32, %v3130_v31  ;;  %v3606_v51 = vld [vmem:[%s4149_s23 + $0x444] sm:$0xf0]  ;;  %v3050_v52 = vld [vmem:[%s4149_s23 + $0x4c0] sm:$0xf]  ;;  %v3620_v6 = vld [vmem:[%s4149_s23 + $0x4b4] sm:$0xf0] }
  0x77   : > { %1920 = vmatpush.bf16.msrb.mxu0 %v2715_v42  ;;  %v3624_v42 = vld [vmem:[%s4149_s23 + $0x4d4] sm:$0xf0]  ;;  %v3622_v54 = vld [vmem:[%s4149_s23 + $0x4c4] sm:$0xf0]  ;;  %v3114_v55 = vld [vmem:[%s4149_s23 + $0x540] sm:$0xf]  ;;  %v2987_v59 = vor.u32 %v3606_v51, %v2986_v50 }
  0x78   : > { %1933 = vmatpush.bf16.msrb.mxu1 %v2779_v44  ;;  %v3640_v44 = vld [vmem:[%s4149_s23 + $0x554] sm:$0xf0]  ;;  %v3059_v48 = vor.u32 %v3624_v42, %v3058_v40  ;;  %v3178_v57 = vld [vmem:[%s4149_s23 + $0x5c0] sm:$0xf]  ;;  %v3654_v58 = vld [vmem:[%s4149_s23 + $0x5c4] sm:$0xf0]  ;;  %v3051_v60 = vor.u32 %v3622_v54, %v3050_v52 }
  0x79   : > { %1946 = vmatpush.bf16.msrb.mxu2 %v2843_v45  ;;  %v3186_v45 = vld [vmem:[%s4149_s23 + $0x5d0] sm:$0xf]  ;;  %v3179_v5 = vor.u32 %v3654_v58, %v3178_v57  ;;  %v3636_v8 = vld [vmem:[%s4149_s23 + $0x534] sm:$0xf0]  ;;  %v3034_v16 = vld [vmem:[%s4149_s23 + $0x4a0] sm:$0xf] }
  0x7a   : > { %1959 = vmatpush.bf16.msrb.mxu3 %v2907_v49  ;;  %v3123_v49 = vor.u32 %v3640_v44, %v3122_v43  ;;  %v3187_v53 = vor.u32 %v3656_v46, %v3186_v45  ;;  %v3106_v7 = vld [vmem:[%s4149_s23 + $0x530] sm:$0xf]  ;;  %v3650_v25 = vld [vmem:[%s4149_s23 + $0x5a4] sm:$0xf0]  ;;  %v3600_v31 = vld [vmem:[%s4149_s23 + $0x414] sm:$0xf0] }
  0x7b   : > { %1921 = vmatpush.bf16.msrb.mxu0 %v2707_v56  ;;  %v3638_v56 = vld [vmem:[%s4149_s23 + $0x544] sm:$0xf0]  ;;  %v3170_v9 = vld [vmem:[%s4149_s23 + $0x5b0] sm:$0xf]  ;;  %v3107_v13 = vor.u32 %v3636_v8, %v3106_v7  ;;  %v3616_v34 = vld [vmem:[%s4149_s23 + $0x494] sm:$0xf0] }
  0x7c   : > { %1934 = vmatpush.bf16.msrb.mxu1 %v2771_v63  ;;  %v3115_v62 = vor.u32 %v3638_v56, %v3114_v55  ;;  %v2978_v63 = vld [vmem:[%s4149_s23 + $0x430] sm:$0xf]  ;;  %v3648_v38 = vld [vmem:[%s4149_s23 + $0x594] sm:$0xf0]  ;;  %v2954_v40 = vld [vmem:[%s4149_s23 + $0x400] sm:$0xf] }
  0x7d   : > { %1947 = vmatpush.bf16.msrb.mxu2 %v2835_v0  ;;  %v3604_v0 = vld [vmem:[%s4149_s23 + $0x434] sm:$0xf0]  ;;  %v2962_v30 = vld [vmem:[%s4149_s23 + $0x410] sm:$0xf]  ;;  %v3018_v44 = vld [vmem:[%s4149_s23 + $0x480] sm:$0xf] }
  0x7e   : > { %1960 = vmatpush.bf16.msrb.mxu3 %v2899_v4  ;;  %v3042_v4 = vld [vmem:[%s4149_s23 + $0x4b0] sm:$0xf]  ;;  %v2979_v11 = vor.u32 %v3604_v0, %v2978_v63  ;;  %v2963_v39 = vor.u32 %v3600_v31, %v2962_v30  ;;  %v3614_v45 = vld [vmem:[%s4149_s23 + $0x484] sm:$0xf0]  ;;  %v3082_v46 = vld [vmem:[%s4149_s23 + $0x500] sm:$0xf] }
  0x7f   : > { %1922 = vmatpush.bf16.msrb.mxu0 %v2699_v10  ;;  %v3652_v10 = vld [vmem:[%s4149_s23 + $0x5b4] sm:$0xf0]  ;;  %v3043_v12 = vor.u32 %v3620_v6, %v3042_v4  ;;  %v3026_v32 = vld [vmem:[%s4149_s23 + $0x490] sm:$0xf]  ;;  %v3646_v50 = vld [vmem:[%s4149_s23 + $0x584] sm:$0xf0]  ;;  %v3019_v58 = vor.u32 %v3614_v45, %v3018_v44 }
  0x80   : > { %1935 = vmatpush.bf16.msrb.mxu1 %v2763_v14  ;;  %v2970_v14 = vld [vmem:[%s4149_s23 + $0x420] sm:$0xf]  ;;  %v3171_v17 = vor.u32 %v3652_v10, %v3170_v9  ;;  %v3027_v42 = vor.u32 %v3616_v34, %v3026_v32  ;;  %v3266_v51 = vld [vmem:[%s4149_s23 + $0x670] sm:$0xf]  ;;  %v3676_v52 = vld [vmem:[%s4149_s23 + $0x674] sm:$0xf0] }
  0x81   : > { %1948 = vmatpush.bf16.msrb.mxu2 %v2827_v15  ;;  %v3602_v15 = vld [vmem:[%s4149_s23 + $0x424] sm:$0xf0]  ;;  %v3692_v55 = vld [vmem:[%s4149_s23 + $0x6f4] sm:$0xf0]  ;;  %v3394_v56 = vld [vmem:[%s4149_s23 + $0x770] sm:$0xf]  ;;  %v3267_v0 = vor.u32 %v3676_v52, %v3266_v51 }
  0x82   : > { %1961 = vmatpush.bf16.msrb.mxu3 %v2891_v18  ;;  %1923 = vmatmul.bf16.vlgmr.msrb.gmra.mxu0 %v4320_v1  ;;  %v3618_v18 = vld [vmem:[%s4149_s23 + $0x4a4] sm:$0xf0]  ;;  %v2971_v26 = vor.u32 %v3602_v15, %v2970_v14  ;;  %v3708_v57 = vld [vmem:[%s4149_s23 + $0x774] sm:$0xf0]  ;;  %v3258_v6 = vld [vmem:[%s4149_s23 + $0x660] sm:$0xf] }
  0x83   : > { %1967 = vmatpush.bf16.msra.mxu0 %v3011_v19  ;;  %1936 = vmatmul.bf16.vlgmr.msrb.gmra.mxu1 %v4324_v3  ;;  %v3098_v19 = vld [vmem:[%s4149_s23 + $0x520] sm:$0xf]  ;;  %v3035_v28 = vor.u32 %v3618_v18, %v3034_v16  ;;  %v3674_v7 = vld [vmem:[%s4149_s23 + $0x664] sm:$0xf0]  ;;  %v562_v18 = vld [vmem:[#allocation1 + $0x1b] sm:$0xff] }
  0x84   : > { %1980 = vmatpush.bf16.msra.mxu1 %v3075_v20  ;;  %1949 = vmatmul.bf16.vlgmr.msrb.gmra.mxu2 %v4317_v61  ;;  %v3634_v20 = vld [vmem:[%s4149_s23 + $0x524] sm:$0xf0]  ;;  %v3322_v8 = vld [vmem:[%s4149_s23 + $0x6e0] sm:$0xf]  ;;  %v3688_v30 = vld [vmem:[%s4149_s23 + $0x6d4] sm:$0xf0] }
  0x85   : > { %1993 = vmatpush.bf16.msra.mxu2 %v3139_v24  ;;  %1962 = vmatmul.bf16.vlgmr.msrb.gmra.mxu3 %v4322_v2  ;;  %v3162_v24 = vld [vmem:[%s4149_s23 + $0x5a0] sm:$0xf]  ;;  %v3690_v10 = vld [vmem:[%s4149_s23 + $0x6e4] sm:$0xf0]  ;;  %v3378_v31 = vld [vmem:[%s4149_s23 + $0x750] sm:$0xf] }
  0x86   : > { %2006 = vmatpush.bf16.msra.mxu3 %v3203_v29  ;;  %v3099_v29 = vor.u32 %v3634_v20, %v3098_v19  ;;  %v3163_v33 = vor.u32 %v3650_v25, %v3162_v24  ;;  %v3450_v14 = vld [vmem:[%s4149_s23 + $0x7e0] sm:$0xf]  ;;  %v3722_v15 = vld [vmem:[%s4149_s23 + $0x7e4] sm:$0xf0]  ;;  %v3259_v19 = vor.u32 %v3674_v7, %v3258_v6  ;;  %v3323_v20 = vor.u32 %v3690_v10, %v3322_v8  ;;  %v3250_v25 = vld [vmem:[%s4149_s23 + $0x650] sm:$0xf] }
  0x87   : > { %1968 = vmatpush.bf16.msra.mxu0 %v3003_v35  ;;  %v3090_v35 = vld [vmem:[%s4149_s23 + $0x510] sm:$0xf]  ;;  %v3704_v32 = vld [vmem:[%s4149_s23 + $0x754] sm:$0xf0]  ;;  %v3702_v44 = vld [vmem:[%s4149_s23 + $0x744] sm:$0xf0] }
  0x88   : > { %1981 = vmatpush.bf16.msra.mxu1 %v3067_v36  ;;  %v3632_v36 = vld [vmem:[%s4149_s23 + $0x514] sm:$0xf0]  ;;  %v561_v16 = vld [vmem:[#allocation1 + $0x12] sm:$0xff]  ;;  %v3434_v45 = vld [vmem:[%s4149_s23 + $0x7c0] sm:$0xf] }
  0x89   : > { %1994 = vmatpush.bf16.msra.mxu2 %v3131_v37  ;;  %v3154_v37 = vld [vmem:[%s4149_s23 + $0x590] sm:$0xf]  ;;  %v3091_v43 = vor.u32 %v3632_v36, %v3090_v35  ;;  %v3720_v34 = vld [vmem:[%s4149_s23 + $0x7d4] sm:$0xf0]  ;;  %v3682_v6 = vld [vmem:[%s4149_s23 + $0x6a4] sm:$0xf0] }
  0x8a   : > { %2007 = vmatpush.bf16.msra.mxu3 %v3195_v41  ;;  %v3598_v41 = vld [vmem:[%s4149_s23 + $0x404] sm:$0xf0]  ;;  %v3668_v51 = vld [vmem:[%s4149_s23 + $0x634] sm:$0xf0]  ;;  %v3298_v52 = vld [vmem:[%s4149_s23 + $0x6b0] sm:$0xf] }
  0x8b   : > { %1969 = vmatpush.bf16.msra.mxu0 %v2995_v47  ;;  %v3155_v47 = vor.u32 %v3648_v38, %v3154_v37  ;;  %v2955_v54 = vor.u32 %v3598_v41, %v2954_v40  ;;  %v3379_v37 = vor.u32 %v3704_v32, %v3378_v31  ;;  %v3242_v38 = vld [vmem:[%s4149_s23 + $0x640] sm:$0xf]  ;;  %v3698_v8 = vld [vmem:[%s4149_s23 + $0x724] sm:$0xf0] }
  0x8c   : > { %1982 = vmatpush.bf16.msra.mxu1 %v3059_v48  ;;  %v3630_v48 = vld [vmem:[%s4149_s23 + $0x504] sm:$0xf0]  ;;  %v3306_v40 = vld [vmem:[%s4149_s23 + $0x6c0] sm:$0xf] }
  0x8d   : > { %1995 = vmatpush.bf16.msra.mxu2 %v3123_v49  ;;  %v3146_v49 = vld [vmem:[%s4149_s23 + $0x580] sm:$0xf]  ;;  %v3714_v10 = vld [vmem:[%s4149_s23 + $0x7a4] sm:$0xf0] }
  0x8e   : > { %2008 = vmatpush.bf16.msra.mxu3 %v3187_v53  ;;  %v3330_v53 = vld [vmem:[%s4149_s23 + $0x6f0] sm:$0xf]  ;;  %v3147_v63 = vor.u32 %v3646_v50, %v3146_v49  ;;  %v3354_v7 = vld [vmem:[%s4149_s23 + $0x720] sm:$0xf] }
  0x8f   : > { %1970 = vmatpush.bf16.msra.mxu0 %v2987_v59  ;;  %v3083_v59 = vor.u32 %v3630_v48, %v3082_v46  ;;  %v3331_v4 = vor.u32 %v3692_v55, %v3330_v53  ;;  %v3718_v46 = vld [vmem:[%s4149_s23 + $0x7c4] sm:$0xf0]  ;;  %v3234_v50 = vld [vmem:[%s4149_s23 + $0x630] sm:$0xf]  ;;  %v3274_v32 = vld [vmem:[%s4149_s23 + $0x680] sm:$0xf] }
  0x90   : > { %1983 = vmatpush.bf16.msra.mxu1 %v3051_v60  ;;  %v3458_v60 = vld [vmem:[%s4149_s23 + $0x7f0] sm:$0xf]  ;;  %v3435_v53 = vor.u32 %v3718_v46, %v3434_v45  ;;  %v2628_v45 = vld [vmem:[%s4149_s23 + $0x178] sm:$0xf0] }
  0x91   : > { %1996 = vmatpush.bf16.msra.mxu2 %v3115_v62  ;;  %v3724_v62 = vld [vmem:[%s4149_s23 + $0x7f4] sm:$0xf0]  ;;  %v3362_v55 = vld [vmem:[%s4149_s23 + $0x730] sm:$0xf] }
  0x92   : > { %2009 = vmatpush.bf16.msra.mxu3 %v3179_v5  ;;  %v3395_v5 = vor.u32 %v3708_v57, %v3394_v56  ;;  %v3459_v9 = vor.u32 %v3724_v62, %v3458_v60  ;;  %v3700_v56 = vld [vmem:[%s4149_s23 + $0x734] sm:$0xf0]  ;;  %v3426_v57 = vld [vmem:[%s4149_s23 + $0x7b0] sm:$0xf] }
  0x93   : > { %1971 = vmatpush.bf16.msra.mxu0 %v2979_v11  ;;  %v3386_v11 = vld [vmem:[%s4149_s23 + $0x760] sm:$0xf]  ;;  %v3363_v62 = vor.u32 %v3700_v56, %v3362_v55  ;;  %v2492_v55 = vld [vmem:[%s4149_s23 + $0x68] sm:$0xf0]  ;;  %v3497_v56 = vld [vmem:[%s4149_s23 + $0xe4] sm:$0xf] }
  0x94   : > { %1984 = vmatpush.bf16.msra.mxu1 %v3043_v12  ;;  %v3706_v12 = vld [vmem:[%s4149_s23 + $0x764] sm:$0xf0] }
  0x95   : > { %1997 = vmatpush.bf16.msra.mxu2 %v3107_v13  ;;  %v559_v13 = vld [vmem:[#allocation1] sm:$0xff]  ;;  %v3387_v24 = vor.u32 %v3706_v12, %v3386_v11 }
  0x96   : > { %2010 = vmatpush.bf16.msra.mxu3 %v3171_v17  ;;  %v560_v17 = vld [vmem:[#allocation1 + $0x9] sm:$0xff] }
  0x97   : > { %1972 = vmatpush.bf16.msra.mxu0 %v2971_v26  ;;  %v3672_v26 = vld [vmem:[%s4149_s23 + $0x654] sm:$0xf0] }
  0x98   : > { %1985 = vmatpush.bf16.msra.mxu1 %v3035_v28  ;;  %v3314_v28 = vld [vmem:[%s4149_s23 + $0x6d0] sm:$0xf]  ;;  %v3251_v35 = vor.u32 %v3672_v26, %v3250_v25  ;;  %v3712_v25 = vld [vmem:[%s4149_s23 + $0x794] sm:$0xf0] }
  0x99   : > { %1998 = vmatpush.bf16.msra.mxu2 %v3099_v29  ;;  %v3451_v29 = vor.u32 %v3722_v15, %v3450_v14  ;;  %v3315_v36 = vor.u32 %v3688_v30, %v3314_v28  ;;  %v3218_v14 = vld [vmem:[%s4149_s23 + $0x610] sm:$0xf]  ;;  %v3664_v15 = vld [vmem:[%s4149_s23 + $0x614] sm:$0xf0]  ;;  %v3210_v28 = vld [vmem:[%s4149_s23 + $0x600] sm:$0xf] }
  0x9a   : > { %2011 = vmatpush.bf16.msra.mxu3 %v3163_v33  ;;  %v3442_v33 = vld [vmem:[%s4149_s23 + $0x7d0] sm:$0xf]  ;;  %v3219_v26 = vor.u32 %v3664_v15, %v3218_v14  ;;  %v2548_v14 = vld [vmem:[%s4149_s23 + $0xd8] sm:$0xf0]  ;;  %v3511_v15 = vld [vmem:[%s4149_s23 + $0x154] sm:$0xf] }
  0x9b   : > { %1973 = vmatpush.bf16.msra.mxu0 %v2963_v39  ;;  %v3670_v39 = vld [vmem:[%s4149_s23 + $0x644] sm:$0xf0]  ;;  %v3443_v41 = vor.u32 %v3720_v34, %v3442_v33  ;;  %v3338_v34 = vld [vmem:[%s4149_s23 + $0x700] sm:$0xf] }
  0x9c   : > { %1986 = vmatpush.bf16.msra.mxu1 %v3027_v42  ;;  %v3686_v42 = vld [vmem:[%s4149_s23 + $0x6c4] sm:$0xf0] }
  0x9d   : > { %1999 = vmatpush.bf16.msra.mxu2 %v3091_v43  ;;  %v3370_v43 = vld [vmem:[%s4149_s23 + $0x740] sm:$0xf]  ;;  %v3307_v48 = vor.u32 %v3686_v42, %v3306_v40  ;;  %v3678_v33 = vld [vmem:[%s4149_s23 + $0x684] sm:$0xf0]  ;;  %v2500_v40 = vld [vmem:[%s4149_s23 + $0x78] sm:$0xf0] }
  0x9e   : > { %2012 = vmatpush.bf16.msra.mxu3 %v3155_v47  ;;  %v3243_v47 = vor.u32 %v3670_v39, %v3242_v38  ;;  %v3371_v49 = vor.u32 %v3702_v44, %v3370_v43  ;;  %v3710_v38 = vld [vmem:[%s4149_s23 + $0x784] sm:$0xf0]  ;;  %v3483_v39 = vld [vmem:[%s4149_s23 + $0x74] sm:$0xf]  ;;  %v2564_v43 = vld [vmem:[%s4149_s23 + $0xf8] sm:$0xf0]  ;;  %v3275_v46 = vor.u32 %v3678_v33, %v3274_v32 }
  0x9f   : > { %1974 = vmatpush.bf16.msra.mxu0 %v2955_v54  ;;  %v3684_v54 = vld [vmem:[%s4149_s23 + $0x6b4] sm:$0xf0]  ;;  %v3515_v44 = vld [vmem:[%s4149_s23 + $0x174] sm:$0xf]  ;;  %v2604_v32 = vld [vmem:[%s4149_s23 + $0x148] sm:$0xf0] }
  0xa0   : > { %1987 = vmatpush.bf16.msra.mxu1 %v3019_v58  ;;  %v3716_v58 = vld [vmem:[%s4149_s23 + $0x7b4] sm:$0xf0]  ;;  %v3299_v60 = vor.u32 %v3684_v54, %v3298_v52  ;;  %v3481_v54 = vld [vmem:[%s4149_s23 + $0x64] sm:$0xf] }
  0xa1   : > { %2000 = vmatpush.bf16.msra.mxu2 %v3083_v59  ;;  %v3235_v59 = vor.u32 %v3668_v51, %v3234_v50  ;;  %v2503_v51 = vor.u32 %v3483_v39, %v2500_v40  ;;  %v3525_v33 = vld [vmem:[%s4149_s23 + $0x1c4] sm:$0xf]  ;;  %v2468_v39 = vld [vmem:[%s4149_s23 + $0x38] sm:$0xf0]  ;;  %v3491_v40 = vld [vmem:[%s4149_s23 + $0xb4] sm:$0xf] }
  0xa2   : > { %2013 = vmatpush.bf16.msra.mxu3 %v3147_v63  ;;  %1975 = vmatmul.bf16.vlgmr.msra.gmra.mxu0 %v559_v13  ;;  %v3226_v63 = vld [vmem:[%s4149_s23 + $0x620] sm:$0xf]  ;;  %v3355_v13 = vor.u32 %v3698_v8, %v3354_v7  ;;  %v2495_v7 = vor.u32 %v3481_v54, %v2492_v55  ;;  %v2524_v54 = vld [vmem:[%s4149_s23 + $0xa8] sm:$0xf0]  ;;  %v3505_v55 = vld [vmem:[%s4149_s23 + $0x124] sm:$0xf] }
  0xa3   : > { %2019 = vmatpush.bf16.msrb.mxu0 %v3267_v0  ;;  %1988 = vmatmul.bf16.vlgmr.msra.gmra.mxu1 %v560_v17  ;;  %v3666_v0 = vld [vmem:[%s4149_s23 + $0x624] sm:$0xf0] }
  0xa4   : > { %2032 = vmatpush.bf16.msrb.mxu1 %v3331_v4  ;;  %2001 = vmatmul.bf16.vlgmr.msra.gmra.mxu2 %v561_v16  ;;  %v3290_v4 = vld [vmem:[%s4149_s23 + $0x6a0] sm:$0xf]  ;;  %v3227_v11 = vor.u32 %v3666_v0, %v3226_v63  ;;  %v3282_v16 = vld [vmem:[%s4149_s23 + $0x690] sm:$0xf]  ;;  %v3529_v63 = vld [vmem:[%s4149_s23 + $0x1e4] sm:$0xf] }
  0xa5   : > { %2045 = vmatpush.bf16.msrb.mxu2 %v3395_v5  ;;  %2014 = vmatmul.bf16.vlgmr.msra.gmra.mxu3 %v562_v18  ;;  %v3427_v5 = vor.u32 %v3716_v58, %v3426_v57  ;;  %v3291_v12 = vor.u32 %v3682_v6, %v3290_v4  ;;  %v3680_v18 = vld [vmem:[%s4149_s23 + $0x694] sm:$0xf0]  ;;  %v2556_v58 = vld [vmem:[%s4149_s23 + $0xe8] sm:$0xf0] }
  0xa6   : > { %2058 = vmatpush.bf16.msrb.mxu3 %v3459_v9  ;;  %v3418_v9 = vld [vmem:[%s4149_s23 + $0x7a0] sm:$0xf]  ;;  %v3283_v30 = vor.u32 %v3680_v18, %v3282_v16  ;;  %v2684_v0 = vld [vmem:[%s4149_s23 + $0x1e8] sm:$0xf0]  ;;  %v566_v6 = vld [vmem:[#allocation1 + $0x3f] sm:$0xff]  ;;  %v2559_v8 = vor.u32 %v3497_v56, %v2556_v58 }
  0xa7   : > { %2020 = vmatpush.bf16.msrb.mxu0 %v3259_v19  ;;  %v3419_v17 = vor.u32 %v3714_v10, %v3418_v9  ;;  %v3346_v19 = vld [vmem:[%s4149_s23 + $0x710] sm:$0xf]  ;;  %v3479_v10 = vld [vmem:[%s4149_s23 + $0x54] sm:$0xf]  ;;  %v2612_v16 = vld [vmem:[%s4149_s23 + $0x158] sm:$0xf0] }
  0xa8   : > { %2033 = vmatpush.bf16.msrb.mxu1 %v3323_v20  ;;  %v3696_v20 = vld [vmem:[%s4149_s23 + $0x714] sm:$0xf0]  ;;  %v565_v4 = vld [vmem:[#allocation1 + $0x36] sm:$0xff]  ;;  %v2676_v18 = vld [vmem:[%s4149_s23 + $0x1d8] sm:$0xf0] }
  0xa9   : > { %2046 = vmatpush.bf16.msrb.mxu2 %v3387_v24  ;;  %v3410_v24 = vld [vmem:[%s4149_s23 + $0x790] sm:$0xf]  ;;  %v3347_v31 = vor.u32 %v3696_v20, %v3346_v19  ;;  %v2588_v56 = vld [vmem:[%s4149_s23 + $0x128] sm:$0xf0] }
  0xaa   : > { %2059 = vmatpush.bf16.msrb.mxu3 %v3451_v29  ;;  %v3662_v29 = vld [vmem:[%s4149_s23 + $0x604] sm:$0xf0]  ;;  %v2652_v58 = vld [vmem:[%s4149_s23 + $0x1a8] sm:$0xf0] }
  0xab   : > { %2021 = vmatpush.bf16.msrb.mxu0 %v3251_v35  ;;  %v3411_v35 = vor.u32 %v3712_v25, %v3410_v24  ;;  %v3211_v42 = vor.u32 %v3662_v29, %v3210_v28  ;;  %v2615_v24 = vor.u32 %v3511_v15, %v2612_v16  ;;  %v3477_v25 = vld [vmem:[%s4149_s23 + $0x44] sm:$0xf] }
  0xac   : > { %2034 = vmatpush.bf16.msrb.mxu1 %v3315_v36  ;;  %v3694_v36 = vld [vmem:[%s4149_s23 + $0x704] sm:$0xf0]  ;;  %v3493_v28 = vld [vmem:[%s4149_s23 + $0xc4] sm:$0xf] }
  0xad   : > { %2047 = vmatpush.bf16.msrb.mxu2 %v3379_v37  ;;  %v3402_v37 = vld [vmem:[%s4149_s23 + $0x780] sm:$0xf]  ;;  %v3485_v16 = vld [vmem:[%s4149_s23 + $0x84] sm:$0xf] }
  0xae   : > { %2060 = vmatpush.bf16.msrb.mxu3 %v3443_v41  ;;  %v3499_v41 = vld [vmem:[%s4149_s23 + $0xf4] sm:$0xf]  ;;  %v3403_v50 = vor.u32 %v3710_v38, %v3402_v37 }
  0xaf   : > { %2022 = vmatpush.bf16.msrb.mxu0 %v3243_v47  ;;  %v3339_v47 = vor.u32 %v3694_v36, %v3338_v34  ;;  %v2567_v52 = vor.u32 %v3499_v41, %v2564_v43  ;;  %v2668_v34 = vld [vmem:[%s4149_s23 + $0x1c8] sm:$0xf0]  ;;  %v3475_v38 = vld [vmem:[%s4149_s23 + $0x34] sm:$0xf] }
  0xb0   : > { %2035 = vmatpush.bf16.msrb.mxu1 %v3307_v48  ;;  %v3531_v48 = vld [vmem:[%s4149_s23 + $0x1f4] sm:$0xf]  ;;  %v2671_v41 = vor.u32 %v3525_v33, %v2668_v34  ;;  %v2884_v33 = vld [vmem:[%s4149_s23 + $0x378] sm:$0xf0] }
  0xb1   : > { %2048 = vmatpush.bf16.msrb.mxu2 %v3371_v49  ;;  %v2692_v49 = vld [vmem:[%s4149_s23 + $0x1f8] sm:$0xf0]  ;;  %v3507_v43 = vld [vmem:[%s4149_s23 + $0x134] sm:$0xf] }
  0xb2   : > { %2061 = vmatpush.bf16.msrb.mxu3 %v3435_v53  ;;  %v2631_v53 = vor.u32 %v3515_v44, %v2628_v45  ;;  %v2695_v57 = vor.u32 %v3531_v48, %v2692_v49  ;;  %v2596_v44 = vld [vmem:[%s4149_s23 + $0x138] sm:$0xf0]  ;;  %v3523_v45 = vld [vmem:[%s4149_s23 + $0x1b4] sm:$0xf] }
  0xb3   : > { %2023 = vmatpush.bf16.msrb.mxu0 %v3235_v59  ;;  %v3513_v59 = vld [vmem:[%s4149_s23 + $0x164] sm:$0xf]  ;;  %v2599_v49 = vor.u32 %v3507_v43, %v2596_v44  ;;  %v2748_v43 = vld [vmem:[%s4149_s23 + $0x268] sm:$0xf0] }
  0xb4   : > { %2036 = vmatpush.bf16.msrb.mxu1 %v3299_v60  ;;  %v2620_v60 = vld [vmem:[%s4149_s23 + $0x168] sm:$0xf0]  ;;  %v3561_v44 = vld [vmem:[%s4149_s23 + $0x2e4] sm:$0xf] }
  0xb5   : > { %2049 = vmatpush.bf16.msrb.mxu2 %v3363_v62  ;;  %v563_v62 = vld [vmem:[#allocation1 + $0x24] sm:$0xff]  ;;  %v2623_v9 = vor.u32 %v3513_v59, %v2620_v60 }
  0xb6   : > { %2062 = vmatpush.bf16.msrb.mxu3 %v3427_v5  ;;  %v564_v5 = vld [vmem:[#allocation1 + $0x2d] sm:$0xff] }
  0xb7   : > { %2024 = vmatpush.bf16.msrb.mxu0 %v3227_v11  ;;  %v2484_v11 = vld [vmem:[%s4149_s23 + $0x58] sm:$0xf0] }
  0xb8   : > { %2037 = vmatpush.bf16.msrb.mxu1 %v3291_v12  ;;  %v3495_v12 = vld [vmem:[%s4149_s23 + $0xd4] sm:$0xf]  ;;  %v2487_v19 = vor.u32 %v3479_v10, %v2484_v11  ;;  %v2644_v10 = vld [vmem:[%s4149_s23 + $0x198] sm:$0xf0] }
  0xb9   : > { %2050 = vmatpush.bf16.msrb.mxu2 %v3355_v13  ;;  %v2687_v13 = vor.u32 %v3529_v63, %v2684_v0  ;;  %v2551_v20 = vor.u32 %v3495_v12, %v2548_v14  ;;  %v3471_v63 = vld [vmem:[%s4149_s23 + $0x14] sm:$0xf]  ;;  %v2452_v0 = vld [vmem:[%s4149_s23 + $0x18] sm:$0xf0]  ;;  %v3469_v12 = vld [vmem:[%s4149_s23 + $0x4] sm:$0xf] }
  0xba   : > { %2063 = vmatpush.bf16.msrb.mxu3 %v3419_v17  ;;  %v3527_v17 = vld [vmem:[%s4149_s23 + $0x1d4] sm:$0xf]  ;;  %v2455_v11 = vor.u32 %v3471_v63, %v2452_v0  ;;  %v2932_v63 = vld [vmem:[%s4149_s23 + $0x3d8] sm:$0xf0] }
  0xbb   : > { %2025 = vmatpush.bf16.msrb.mxu0 %v3219_v26  ;;  %v2476_v26 = vld [vmem:[%s4149_s23 + $0x48] sm:$0xf0]  ;;  %v2679_v29 = vor.u32 %v3527_v17, %v2676_v18  ;;  %v3501_v18 = vld [vmem:[%s4149_s23 + $0x104] sm:$0xf] }
  0xbc   : > { %2038 = vmatpush.bf16.msrb.mxu1 %v3283_v30  ;;  %v2540_v30 = vld [vmem:[%s4149_s23 + $0xc8] sm:$0xf0] }
  0xbd   : > { %2051 = vmatpush.bf16.msrb.mxu2 %v3347_v31  ;;  %v3509_v31 = vld [vmem:[%s4149_s23 + $0x144] sm:$0xf]  ;;  %v2543_v36 = vor.u32 %v3493_v28, %v2540_v30  ;;  %v2508_v17 = vld [vmem:[%s4149_s23 + $0x88] sm:$0xf0]  ;;  %v2756_v28 = vld [vmem:[%s4149_s23 + $0x278] sm:$0xf0] }
  0xbe   : > { %2064 = vmatpush.bf16.msrb.mxu3 %v3411_v35  ;;  %v2479_v35 = vor.u32 %v3477_v25, %v2476_v26  ;;  %v2607_v37 = vor.u32 %v3509_v31, %v2604_v32  ;;  %v2636_v25 = vld [vmem:[%s4149_s23 + $0x188] sm:$0xf0]  ;;  %v3547_v26 = vld [vmem:[%s4149_s23 + $0x274] sm:$0xf]  ;;  %v2820_v31 = vld [vmem:[%s4149_s23 + $0x2f8] sm:$0xf0]  ;;  %v2511_v34 = vor.u32 %v3485_v16, %v2508_v17 }
  0xbf   : > { %2026 = vmatpush.bf16.msrb.mxu0 %v3211_v42  ;;  %v2532_v42 = vld [vmem:[%s4149_s23 + $0xb8] sm:$0xf0]  ;;  %v3579_v32 = vld [vmem:[%s4149_s23 + $0x374] sm:$0xf] }
  0xc0   : > { %2039 = vmatpush.bf16.msrb.mxu1 %v3275_v46  ;;  %v2660_v46 = vld [vmem:[%s4149_s23 + $0x1b8] sm:$0xf0]  ;;  %v2535_v48 = vor.u32 %v3491_v40, %v2532_v42  ;;  %v3545_v42 = vld [vmem:[%s4149_s23 + $0x264] sm:$0xf]  ;;  %v3555_v16 = vld [vmem:[%s4149_s23 + $0x2b4] sm:$0xf] }
  0xc1   : > { %2052 = vmatpush.bf16.msrb.mxu2 %v3339_v47  ;;  %v2471_v47 = vor.u32 %v3475_v38, %v2468_v39  ;;  %v2759_v39 = vor.u32 %v3547_v26, %v2756_v28 }
  0xc2   : > { %2065 = vmatpush.bf16.msrb.mxu3 %v3403_v50  ;;  %2027 = vmatmul.bf16.vlgmr.msrb.gmra.mxu0 %v563_v62  ;;  %v3473_v50 = vld [vmem:[%s4149_s23 + $0x24] sm:$0xf]  ;;  %v2591_v62 = vor.u32 %v3505_v55, %v2588_v56  ;;  %v2740_v55 = vld [vmem:[%s4149_s23 + $0x258] sm:$0xf0]  ;;  %v3559_v56 = vld [vmem:[%s4149_s23 + $0x2d4] sm:$0xf] }
  0xc3   : > { %2071 = vmatpush.bf16.msra.mxu0 %v2503_v51  ;;  %2040 = vmatmul.bf16.vlgmr.msrb.gmra.mxu1 %v564_v5  ;;  %v2460_v51 = vld [vmem:[%s4149_s23 + $0x28] sm:$0xf0] }
  0xc4   : > { %2084 = vmatpush.bf16.msra.mxu1 %v2567_v52  ;;  %2053 = vmatmul.bf16.vlgmr.msrb.gmra.mxu2 %v565_v4  ;;  %v3489_v52 = vld [vmem:[%s4149_s23 + $0xa4] sm:$0xf]  ;;  %v2463_v59 = vor.u32 %v3473_v50, %v2460_v51  ;;  %v3487_v4 = vld [vmem:[%s4149_s23 + $0x94] sm:$0xf]  ;;  %v2940_v50 = vld [vmem:[%s4149_s23 + $0x3e8] sm:$0xf0]  ;;  %v2751_v51 = vor.u32 %v3545_v42, %v2748_v43 }
  0xc5   : > { %2097 = vmatpush.bf16.msra.mxu2 %v2631_v53  ;;  %2066 = vmatmul.bf16.vlgmr.msrb.gmra.mxu3 %v566_v6  ;;  %v2663_v53 = vor.u32 %v3523_v45, %v2660_v46  ;;  %v2527_v60 = vor.u32 %v3489_v52, %v2524_v54  ;;  %v2516_v6 = vld [vmem:[%s4149_s23 + $0x98] sm:$0xf0]  ;;  %v2812_v46 = vld [vmem:[%s4149_s23 + $0x2e8] sm:$0xf0]  ;;  %v3543_v54 = vld [vmem:[%s4149_s23 + $0x254] sm:$0xf] }
  0xc6   : > { %2110 = vmatpush.bf16.msra.mxu3 %v2695_v57  ;;  %v3521_v57 = vld [vmem:[%s4149_s23 + $0x1a4] sm:$0xf]  ;;  %v2519_v14 = vor.u32 %v3487_v4, %v2516_v6  ;;  %v2815_v52 = vor.u32 %v3561_v44, %v2812_v46  ;;  %v2743_v0 = vor.u32 %v3543_v54, %v2740_v55  ;;  %v2732_v6 = vld [vmem:[%s4149_s23 + $0x248] sm:$0xf0]  ;;  %v3535_v43 = vld [vmem:[%s4149_s23 + $0x214] sm:$0xf] }
  0xc7   : > { %2072 = vmatpush.bf16.msra.mxu0 %v2495_v7  ;;  %v2655_v5 = vor.u32 %v3521_v57, %v2652_v58  ;;  %v3503_v7 = vld [vmem:[%s4149_s23 + $0x114] sm:$0xf]  ;;  %v2804_v58 = vld [vmem:[%s4149_s23 + $0x2d8] sm:$0xf0]  ;;  %v3533_v55 = vld [vmem:[%s4149_s23 + $0x204] sm:$0xf] }
  0xc8   : > { %2085 = vmatpush.bf16.msra.mxu1 %v2559_v8  ;;  %v2580_v8 = vld [vmem:[%s4149_s23 + $0x118] sm:$0xf0]  ;;  %v2807_v4 = vor.u32 %v3559_v56, %v2804_v58  ;;  %v2700_v56 = vld [vmem:[%s4149_s23 + $0x208] sm:$0xf0] }
  0xc9   : > { %2098 = vmatpush.bf16.msra.mxu2 %v2623_v9  ;;  %v3519_v9 = vld [vmem:[%s4149_s23 + $0x194] sm:$0xf]  ;;  %v2583_v15 = vor.u32 %v3503_v7, %v2580_v8  ;;  %v3557_v7 = vld [vmem:[%s4149_s23 + $0x2c4] sm:$0xf]  ;;  %v2796_v8 = vld [vmem:[%s4149_s23 + $0x2c8] sm:$0xf0] }
  0xca   : > { %2111 = vmatpush.bf16.msra.mxu3 %v2687_v13  ;;  %v2444_v13 = vld [vmem:[%s4149_s23 + $0x8] sm:$0xf0]  ;;  %v2708_v44 = vld [vmem:[%s4149_s23 + $0x218] sm:$0xf0] }
  0xcb   : > { %2073 = vmatpush.bf16.msra.mxu0 %v2487_v19  ;;  %v2647_v19 = vor.u32 %v3519_v9, %v2644_v10  ;;  %v2447_v30 = vor.u32 %v3469_v12, %v2444_v13  ;;  %v2860_v9 = vld [vmem:[%s4149_s23 + $0x348] sm:$0xf0]  ;;  %v3589_v10 = vld [vmem:[%s4149_s23 + $0x3c4] sm:$0xf]  ;;  %v2799_v12 = vor.u32 %v3557_v7, %v2796_v8  ;;  %v2711_v54 = vor.u32 %v3535_v43, %v2708_v44  ;;  %v3012_v8 = vld [vmem:[%s4149_s23 + $0x478] sm:$0xf0] }
  0xcc   : > { %2086 = vmatpush.bf16.msra.mxu1 %v2551_v20  ;;  %v2572_v20 = vld [vmem:[%s4149_s23 + $0x108] sm:$0xf0]  ;;  %v3623_v43 = vld [vmem:[%s4149_s23 + $0x4d4] sm:$0xf] }
  0xcd   : > { %2099 = vmatpush.bf16.msra.mxu2 %v2615_v24  ;;  %v3517_v24 = vld [vmem:[%s4149_s23 + $0x184] sm:$0xf] }
  0xce   : > { %2112 = vmatpush.bf16.msra.mxu3 %v2679_v29  ;;  %v3563_v29 = vld [vmem:[%s4149_s23 + $0x2f4] sm:$0xf]  ;;  %v2639_v38 = vor.u32 %v3517_v24, %v2636_v25  ;;  %v2916_v25 = vld [vmem:[%s4149_s23 + $0x3b8] sm:$0xf0] }
  0xcf   : > { %2074 = vmatpush.bf16.msra.mxu0 %v2479_v35  ;;  %v2575_v35 = vor.u32 %v3501_v18, %v2572_v20  ;;  %v2823_v40 = vor.u32 %v3563_v29, %v2820_v31  ;;  %v2788_v18 = vld [vmem:[%s4149_s23 + $0x2b8] sm:$0xf0]  ;;  %v3587_v24 = vld [vmem:[%s4149_s23 + $0x3b4] sm:$0xf]  ;;  %v2716_v31 = vld [vmem:[%s4149_s23 + $0x228] sm:$0xf0] }
  0xd0   : > { %2087 = vmatpush.bf16.msra.mxu1 %v2543_v36  ;;  %v3595_v36 = vld [vmem:[%s4149_s23 + $0x3f4] sm:$0xf]  ;;  %v2852_v20 = vld [vmem:[%s4149_s23 + $0x338] sm:$0xf0]  ;;  %v2791_v28 = vor.u32 %v3555_v16, %v2788_v18 }
  0xd1   : > { %2100 = vmatpush.bf16.msra.mxu2 %v2607_v37  ;;  %v2948_v37 = vld [vmem:[%s4149_s23 + $0x3f8] sm:$0xf0]  ;;  %v3659_v16 = vld [vmem:[%s4149_s23 + $0x5f4] sm:$0xf] }
  0xd2   : > { %2113 = vmatpush.bf16.msra.mxu3 %v2671_v41  ;;  %v2887_v41 = vor.u32 %v3579_v32, %v2884_v33  ;;  %v2951_v45 = vor.u32 %v3595_v36, %v2948_v37  ;;  %v3553_v32 = vld [vmem:[%s4149_s23 + $0x2a4] sm:$0xf]  ;;  %v2919_v33 = vor.u32 %v3587_v24, %v2916_v25  ;;  %v2844_v36 = vld [vmem:[%s4149_s23 + $0x328] sm:$0xf0] }
  0xd3   : > { %2075 = vmatpush.bf16.msra.mxu0 %v2471_v47  ;;  %v3577_v47 = vld [vmem:[%s4149_s23 + $0x364] sm:$0xf] }
  0xd4   : > { %2088 = vmatpush.bf16.msra.mxu1 %v2535_v48  ;;  %v2876_v48 = vld [vmem:[%s4149_s23 + $0x368] sm:$0xf0]  ;;  %v3585_v37 = vld [vmem:[%s4149_s23 + $0x3a4] sm:$0xf] }
  0xd5   : > { %2101 = vmatpush.bf16.msra.mxu2 %v2599_v49  ;;  %v3593_v49 = vld [vmem:[%s4149_s23 + $0x3e4] sm:$0xf] }
  0xd6   : > { %2114 = vmatpush.bf16.msra.mxu3 %v2663_v53  ;;  %v2879_v53 = vor.u32 %v3577_v47, %v2876_v48  ;;  %v2943_v57 = vor.u32 %v3593_v49, %v2940_v50  ;;  %v2772_v48 = vld [vmem:[%s4149_s23 + $0x298] sm:$0xf0]  ;;  %v3567_v49 = vld [vmem:[%s4149_s23 + $0x314] sm:$0xf] }
  0xd7   : > { %2076 = vmatpush.bf16.msra.mxu0 %v2463_v59  ;;  %v3575_v59 = vld [vmem:[%s4149_s23 + $0x354] sm:$0xf]  ;;  %v2836_v50 = vld [vmem:[%s4149_s23 + $0x318] sm:$0xf0] }
  0xd8   : > { %2089 = vmatpush.bf16.msra.mxu1 %v2527_v60  ;;  %v2868_v60 = vld [vmem:[%s4149_s23 + $0x358] sm:$0xf0]  ;;  %v2839_v58 = vor.u32 %v3567_v49, %v2836_v50 }
  0xd9   : > { %2102 = vmatpush.bf16.msra.mxu2 %v2591_v62  ;;  %v3591_v62 = vld [vmem:[%s4149_s23 + $0x3d4] sm:$0xf]  ;;  %v3188_v49 = vld [vmem:[%s4149_s23 + $0x5d8] sm:$0xf0] }
  0xda   : > { %2115 = vmatpush.bf16.msra.mxu3 %v2655_v5  ;;  %v2871_v5 = vor.u32 %v3575_v59, %v2868_v60  ;;  %v3549_v59 = vld [vmem:[%s4149_s23 + $0x284] sm:$0xf]  ;;  %v2764_v60 = vld [vmem:[%s4149_s23 + $0x288] sm:$0xf0] }
  0xdb   : > { %2077 = vmatpush.bf16.msra.mxu0 %v2455_v11 }
  0xdc   : > { %2090 = vmatpush.bf16.msra.mxu1 %v2519_v14  ;;  %v3539_v14 = vld [vmem:[%s4149_s23 + $0x234] sm:$0xf] }
  0xdd   : > { %2103 = vmatpush.bf16.msra.mxu2 %v2583_v15  ;;  %v2724_v15 = vld [vmem:[%s4149_s23 + $0x238] sm:$0xf0] }
  0xde   : > { %2116 = vmatpush.bf16.msra.mxu3 %v2647_v19  ;;  %v3571_v19 = vld [vmem:[%s4149_s23 + $0x334] sm:$0xf]  ;;  %v2727_v26 = vor.u32 %v3539_v14, %v2724_v15  ;;  %v2767_v14 = vor.u32 %v3549_v59, %v2764_v60 }
  0xdf   : > { %2078 = vmatpush.bf16.msra.mxu0 %v2447_v30  ;;  %v2855_v29 = vor.u32 %v3571_v19, %v2852_v20  ;;  %v3537_v30 = vld [vmem:[%s4149_s23 + $0x224] sm:$0xf] }
  0xe0   : > { %2091 = vmatpush.bf16.msra.mxu1 %v2511_v34  ;;  %v2780_v34 = vld [vmem:[%s4149_s23 + $0x2a8] sm:$0xf0] }
  0xe1   : > { %2104 = vmatpush.bf16.msra.mxu2 %v2575_v35  ;;  %v3569_v35 = vld [vmem:[%s4149_s23 + $0x324] sm:$0xf] }
  0xe2   : > { %2117 = vmatpush.bf16.msra.mxu3 %v2639_v38  ;;  %2079 = vmatmul.bf16.vlgmr.msra.gmra.mxu0 %v4281_v22  ;;  %v2935_v22 = vor.u32 %v3591_v62, %v2932_v63  ;;  %v2908_v38 = vld [vmem:[%s4149_s23 + $0x3a8] sm:$0xf0]  ;;  %v2847_v42 = vor.u32 %v3569_v35, %v2844_v36  ;;  %v3565_v62 = vld [vmem:[%s4149_s23 + $0x304] sm:$0xf] }
  0xe3   : > { %2123 = vmatpush.bf16.msrb.mxu0 %v2759_v39  ;;  %2092 = vmatmul.bf16.vlgmr.msra.gmra.mxu1 %v4288_v27  ;;  %v2924_v27 = vld [vmem:[%s4149_s23 + $0x3c8] sm:$0xf0]  ;;  %v2719_v39 = vor.u32 %v3537_v30, %v2716_v31  ;;  %v2911_v47 = vor.u32 %v3585_v37, %v2908_v38 }
  0xe4   : > { %2136 = vmatpush.bf16.msrb.mxu1 %v2823_v40  ;;  %2105 = vmatmul.bf16.vlgmr.msra.gmra.mxu2 %v4279_v21  ;;  %v3541_v21 = vld [vmem:[%s4149_s23 + $0x244] sm:$0xf]  ;;  %v2927_v17 = vor.u32 %v3589_v10, %v2924_v27  ;;  %v1872_v40 = vpop.f32.mrf.mxu0  ;;  %v3076_v10 = vld [vmem:[%s4149_s23 + $0x4f8] sm:$0xf0]  ;;  %v3643_v27 = vld [vmem:[%s4149_s23 + $0x574] sm:$0xf] }
  0xe5   : > { %2149 = vmatpush.bf16.msrb.mxu2 %v2887_v41  ;;  %2118 = vmatmul.bf16.vlgmr.msra.gmra.mxu3 %v4283_v23  ;;  %v3573_v23 = vld [vmem:[%s4149_s23 + $0x344] sm:$0xf]  ;;  %v2735_v11 = vor.u32 %v3541_v21, %v2732_v6  ;;  %v2783_v41 = vor.u32 %v3553_v32, %v2780_v34  ;;  %v2892_v21 = vld [vmem:[%s4149_s23 + $0x388] sm:$0xf0] }
  0xe6   : > { %2162 = vmatpush.bf16.msrb.mxu3 %v2951_v45  ;;  %v2863_v13 = vor.u32 %v3573_v23, %v2860_v9  ;;  %v3551_v45 = vld [vmem:[%s4149_s23 + $0x294] sm:$0xf]  ;;  %v1885_v46 = vpop.f32.mrf.mxu1  ;;  %v2703_v9 = vor.u32 %v3533_v55, %v2700_v56  ;;  %v3068_v31 = vld [vmem:[%s4149_s23 + $0x4e8] sm:$0xf0]  ;;  %v3641_v32 = vld [vmem:[%s4149_s23 + $0x564] sm:$0xf] }
  0xe7   : > { %2124 = vmatpush.bf16.msrb.mxu0 %v2751_v51  ;;  %v1886_v51 = vadd.f32 %v1885_v46, %v1872_v40  ;;  %v3627_v23 = vld [vmem:[%s4149_s23 + $0x4f4] sm:$0xf]  ;;  %v3657_v34 = vld [vmem:[%s4149_s23 + $0x5e4] sm:$0xf]  ;;  %v3196_v35 = vld [vmem:[%s4149_s23 + $0x5e8] sm:$0xf0] }
  0xe8   : > { %2137 = vmatpush.bf16.msrb.mxu1 %v2815_v52  ;;  %v3583_v52 = vld [vmem:[%s4149_s23 + $0x394] sm:$0xf]  ;;  %v3079_v24 = vor.u32 %v3627_v23, %v3076_v10  ;;  %v3199_v44 = vor.u32 %v3657_v34, %v3196_v35  ;;  %v3637_v55 = vld [vmem:[%s4149_s23 + $0x544] sm:$0xf]  ;;  %v3116_v56 = vld [vmem:[%s4149_s23 + $0x548] sm:$0xf0] }
  0xe9   : > { %2150 = vmatpush.bf16.msrb.mxu2 %v2879_v53  ;;  %v2900_v53 = vld [vmem:[%s4149_s23 + $0x398] sm:$0xf0]  ;;  %v1898_v63 = vpop.f32.mrf.mxu2  ;;  %v3639_v46 = vld [vmem:[%s4149_s23 + $0x554] sm:$0xf] }
  0xea   : > { %2163 = vmatpush.bf16.msrb.mxu3 %v2943_v57  ;;  %v2775_v57 = vor.u32 %v3551_v45, %v2772_v48  ;;  %v1899_v6 = vadd.f32 %v1898_v63, %v1886_v51  ;;  %v1911_v7 = vpop.f32.mrf.mxu3  ;;  %v3060_v45 = vld [vmem:[%s4149_s23 + $0x4d8] sm:$0xf0]  ;;  %v3655_v48 = vld [vmem:[%s4149_s23 + $0x5d4] sm:$0xf] }
  0xeb   : > { %2125 = vmatpush.bf16.msrb.mxu0 %v2743_v0  ;;  %v2903_v0 = vor.u32 %v3583_v52, %v2900_v53  ;;  %v3605_v52 = vld [vmem:[%s4149_s23 + $0x444] sm:$0xf]  ;;  %v2988_v53 = vld [vmem:[%s4149_s23 + $0x448] sm:$0xf0]  ;;  %v3603_v63 = vld [vmem:[%s4149_s23 + $0x434] sm:$0xf] }
  0xec   : > { %2138 = vmatpush.bf16.msrb.mxu1 %v2807_v4  ;;  %v2828_v4 = vld [vmem:[%s4149_s23 + $0x308] sm:$0xf0]  ;;  %v3651_v23 = vld [vmem:[%s4149_s23 + $0x5b4] sm:$0xf]  ;;  %v2964_v35 = vld [vmem:[%s4149_s23 + $0x418] sm:$0xf0] }
  0xed   : > { %2151 = vmatpush.bf16.msrb.mxu2 %v2871_v5  ;;  %v3581_v5 = vld [vmem:[%s4149_s23 + $0x384] sm:$0xf]  ;;  %v2831_v15 = vor.u32 %v3565_v62, %v2828_v4  ;;  %v3119_v62 = vor.u32 %v3637_v55, %v3116_v56  ;;  %v3619_v4 = vld [vmem:[%s4149_s23 + $0x4b4] sm:$0xf]  ;;  %v3268_v56 = vld [vmem:[%s4149_s23 + $0x678] sm:$0xf0] }
  0xee   : > { %2164 = vmatpush.bf16.msrb.mxu3 %v2935_v22  ;;  %v3611_v22 = vld [vmem:[%s4149_s23 + $0x474] sm:$0xf]  ;;  %v1887_v18 = vpop.f32.mrf.mxu1  ;;  %v2895_v19 = vor.u32 %v3581_v5, %v2892_v21 }
  0xef   : > { %2126 = vmatpush.bf16.msrb.mxu0 %v2735_v11  ;;  %v3140_v11 = vld [vmem:[%s4149_s23 + $0x578] sm:$0xf0]  ;;  %v3015_v20 = vor.u32 %v3611_v22, %v3012_v8  ;;  %v3635_v22 = vld [vmem:[%s4149_s23 + $0x534] sm:$0xf]  ;;  %v3036_v18 = vld [vmem:[%s4149_s23 + $0x4a8] sm:$0xf0] }
  0xf0   : > { %2139 = vmatpush.bf16.msrb.mxu1 %v2799_v12  ;;  %v4598_v12 = vadd.f32 %v1911_v7, %v1899_v6  ;;  %v3143_v25 = vor.u32 %v3643_v27, %v3140_v11  ;;  %v3044_v7 = vld [vmem:[%s4149_s23 + $0x4b8] sm:$0xf0]  ;;  %v3599_v34 = vld [vmem:[%s4149_s23 + $0x414] sm:$0xf] }
  0xf1   : > { %2152 = vmatpush.bf16.msrb.mxu2 %v2863_v13  ;;  %v1874_v13 = vpop.f32.mrf.mxu0  ;;  %v1900_v36 = vpop.f32.mrf.mxu2  ;;  %v3108_v8 = vld [vmem:[%s4149_s23 + $0x538] sm:$0xf0]  ;;  %v3047_v11 = vor.u32 %v3619_v4, %v3044_v7  ;;  %v3675_v55 = vld [vmem:[%s4149_s23 + $0x674] sm:$0xf] }
  0xf2   : > { %2165 = vmatpush.bf16.msrb.mxu3 %v2927_v17  ;;  %v3204_v17 = vld [vmem:[%s4149_s23 + $0x5f8] sm:$0xf0]  ;;  %v1913_v38 = vpop.f32.mrf.mxu3  ;;  %v3601_v13 = vld [vmem:[%s4149_s23 + $0x424] sm:$0xf]  ;;  %v3615_v36 = vld [vmem:[%s4149_s23 + $0x494] sm:$0xf] }
  0xf3   : > { %2127 = vmatpush.bf16.msrb.mxu0 %v2727_v26  ;;  %v3609_v26 = vld [vmem:[%s4149_s23 + $0x464] sm:$0xf]  ;;  %v3207_v30 = vor.u32 %v3659_v16, %v3204_v17  ;;  %v3460_v4 = vld [vmem:[%s4149_s23 + $0x7f8] sm:$0xf0] }
  0xf4   : > { %2140 = vmatpush.bf16.msrb.mxu1 %v2791_v28  ;;  %v3004_v28 = vld [vmem:[%s4149_s23 + $0x468] sm:$0xf0] }
  0xf5   : > { %2153 = vmatpush.bf16.msrb.mxu2 %v2855_v29  ;;  %v3625_v29 = vld [vmem:[%s4149_s23 + $0x4e4] sm:$0xf]  ;;  %v3007_v37 = vor.u32 %v3609_v26, %v3004_v28  ;;  %v3164_v28 = vld [vmem:[%s4149_s23 + $0x5a8] sm:$0xf0] }
  0xf6   : > { %2166 = vmatpush.bf16.msrb.mxu3 %v2919_v33  ;;  %v3132_v33 = vld [vmem:[%s4149_s23 + $0x568] sm:$0xf0]  ;;  %v3649_v26 = vld [vmem:[%s4149_s23 + $0x5a4] sm:$0xf] }
  0xf7   : > { %2128 = vmatpush.bf16.msrb.mxu0 %v2719_v39  ;;  %v3071_v39 = vor.u32 %v3625_v29, %v3068_v31  ;;  %v3135_v40 = vor.u32 %v3641_v32, %v3132_v33  ;;  %v3167_v38 = vor.u32 %v3649_v26, %v3164_v28  ;;  %v3703_v26 = vld [vmem:[%s4149_s23 + $0x754] sm:$0xf]  ;;  %v3380_v28 = vld [vmem:[%s4149_s23 + $0x758] sm:$0xf0] }
  0xf8   : > { %2141 = vmatpush.bf16.msrb.mxu1 %v2783_v41  ;;  %v3607_v41 = vld [vmem:[%s4149_s23 + $0x454] sm:$0xf] }
  0xf9   : > { %2154 = vmatpush.bf16.msrb.mxu2 %v2847_v42  ;;  %v2996_v42 = vld [vmem:[%s4149_s23 + $0x458] sm:$0xf0] }
  0xfa   : > { %2167 = vmatpush.bf16.msrb.mxu3 %v2911_v47  ;;  %v3124_v47 = vld [vmem:[%s4149_s23 + $0x558] sm:$0xf0]  ;;  %v2999_v50 = vor.u32 %v3607_v41, %v2996_v42  ;;  %v3647_v42 = vld [vmem:[%s4149_s23 + $0x594] sm:$0xf] }
  0xfb   : > { %2129 = vmatpush.bf16.msrb.mxu0 %v2711_v54  ;;  %v3127_v51 = vor.u32 %v3639_v46, %v3124_v47  ;;  %v3052_v54 = vld [vmem:[%s4149_s23 + $0x4c8] sm:$0xf0]  ;;  %v3092_v41 = vld [vmem:[%s4149_s23 + $0x518] sm:$0xf0] }
  0xfc   : > { %2142 = vmatpush.bf16.msrb.mxu1 %v2775_v57  ;;  %v3653_v57 = vld [vmem:[%s4149_s23 + $0x5c4] sm:$0xf]  ;;  %v2956_v46 = vld [vmem:[%s4149_s23 + $0x408] sm:$0xf0] }
  0xfd   : > { %2155 = vmatpush.bf16.msrb.mxu2 %v2839_v58  ;;  %v3180_v58 = vld [vmem:[%s4149_s23 + $0x5c8] sm:$0xf0] }
  0xfe   : > { %2168 = vmatpush.bf16.msrb.mxu3 %v2903_v0  ;;  %v2980_v0 = vld [vmem:[%s4149_s23 + $0x438] sm:$0xf0]  ;;  %v3183_v6 = vor.u32 %v3653_v57, %v3180_v58  ;;  %v3691_v57 = vld [vmem:[%s4149_s23 + $0x6f4] sm:$0xf] }
  0xff   : > { %2130 = vmatpush.bf16.msrb.mxu0 %v2703_v9  ;;  %v1924_v59 = vpop.f32.mrf.mxu0  ;;  %v3172_v9 = vld [vmem:[%s4149_s23 + $0x5b8] sm:$0xf0]  ;;  %v2983_v27 = vor.u32 %v3603_v63, %v2980_v0  ;;  %v3723_v0 = vld [vmem:[%s4149_s23 + $0x7f4] sm:$0xf] }
 0x100   : > { %2143 = vmatpush.bf16.msrb.mxu1 %v2767_v14  ;;  %v1925_v5 = vadd.f32 %v1924_v59, %v4598_v12  ;;  %v1937_v21 = vpop.f32.mrf.mxu1  ;;  %v3111_v12 = vor.u32 %v3635_v22, %v3108_v8  ;;  %v2972_v14 = vld [vmem:[%s4149_s23 + $0x428] sm:$0xf0]  ;;  %v3175_v17 = vor.u32 %v3651_v23, %v3172_v9  ;;  %v3707_v59 = vld [vmem:[%s4149_s23 + $0x774] sm:$0xf]  ;;  %v3673_v22 = vld [vmem:[%s4149_s23 + $0x664] sm:$0xf]  ;;  %v3463_v9 = vor.u32 %v3723_v0, %v3460_v4 }
 0x101   : > { %2156 = vmatpush.bf16.msrb.mxu2 %v2831_v15  ;;  %v3617_v15 = vld [vmem:[%s4149_s23 + $0x4a4] sm:$0xf]  ;;  %v2975_v29 = vor.u32 %v3601_v13, %v2972_v14  ;;  %v3260_v8 = vld [vmem:[%s4149_s23 + $0x668] sm:$0xf0] }
 0x102   : > { %2169 = vmatpush.bf16.msrb.mxu3 %v2895_v19  ;;  %2131 = vmatmul.bf16.vlgmr.msrb.gmra.mxu0 %v4320_v1  ;;  %v3621_v1 = vld [vmem:[%s4149_s23 + $0x4c4] sm:$0xf]  ;;  %v1938_v10 = vadd.f32 %v1937_v21, %v1925_v5  ;;  %v3039_v32 = vor.u32 %v3617_v15, %v3036_v18  ;;  %v3271_v21 = vor.u32 %v3675_v55, %v3268_v56  ;;  %v3452_v13 = vld [vmem:[%s4149_s23 + $0x7e8] sm:$0xf0]  ;;  %v3252_v18 = vld [vmem:[%s4149_s23 + $0x658] sm:$0xf0] }
 0x103   : > { %2175 = vmatpush.bf16.msra.mxu0 %v3015_v20  ;;  %2144 = vmatmul.bf16.vlgmr.msrb.gmra.mxu1 %v4324_v3  ;;  %v2991_v3 = vor.u32 %v3605_v52, %v2988_v53  ;;  %v3055_v60 = vor.u32 %v3621_v1, %v3052_v54  ;;  %v3633_v19 = vld [vmem:[%s4149_s23 + $0x524] sm:$0xf]  ;;  %v3100_v20 = vld [vmem:[%s4149_s23 + $0x528] sm:$0xf0]  ;;  %v3263_v14 = vor.u32 %v3673_v22, %v3260_v8  ;;  %v3300_v55 = vld [vmem:[%s4149_s23 + $0x6b8] sm:$0xf0] }
 0x104   : > { %2188 = vmatpush.bf16.msra.mxu1 %v3079_v24  ;;  %2157 = vmatmul.bf16.vlgmr.msrb.gmra.mxu2 %v4317_v61  ;;  %v3063_v61 = vor.u32 %v3623_v43, %v3060_v45  ;;  %v3103_v33 = vor.u32 %v3633_v19, %v3100_v20  ;;  %v3156_v43 = vld [vmem:[%s4149_s23 + $0x598] sm:$0xf0]  ;;  %v3597_v45 = vld [vmem:[%s4149_s23 + $0x404] sm:$0xf]  ;;  %v3084_v53 = vld [vmem:[%s4149_s23 + $0x508] sm:$0xf0] }
 0x105   : > { %2201 = vmatpush.bf16.msra.mxu2 %v3143_v25  ;;  %2170 = vmatmul.bf16.vlgmr.msrb.gmra.mxu3 %v4322_v2  ;;  %v3191_v2 = vor.u32 %v3655_v48, %v3188_v49  ;;  %v3613_v49 = vld [vmem:[%s4149_s23 + $0x484] sm:$0xf]  ;;  %v3159_v52 = vor.u32 %v3647_v42, %v3156_v43  ;;  %v2959_v58 = vor.u32 %v3597_v45, %v2956_v46  ;;  %v3687_v19 = vld [vmem:[%s4149_s23 + $0x6d4] sm:$0xf]  ;;  %v3828_v20 = vld [vmem:[#allocation1] sm:$0xff] }
 0x106   : > { %2214 = vmatpush.bf16.msra.mxu3 %v3207_v30  ;;  %v3645_v1 = vld [vmem:[%s4149_s23 + $0x584] sm:$0xf]  ;;  %v3308_v42 = vld [vmem:[%s4149_s23 + $0x6c8] sm:$0xf0]  ;;  %v3699_v56 = vld [vmem:[%s4149_s23 + $0x734] sm:$0xf] }
 0x107   : > { %2176 = vmatpush.bf16.msra.mxu0 %v3007_v37  ;;  %v1950_v16 = vpop.f32.mrf.mxu2  ;;  %v1926_v31 = vpop.f32.mrf.mxu0  ;;  %v3689_v23 = vld [vmem:[%s4149_s23 + $0x6e4] sm:$0xf] }
 0x108   : > { %2189 = vmatpush.bf16.msra.mxu1 %v3071_v39  ;;  %v1951_v24 = vadd.f32 %v1950_v16, %v1938_v10  ;;  %v1963_v25 = vpop.f32.mrf.mxu3  ;;  %v1939_v37 = vpop.f32.mrf.mxu1  ;;  %v3028_v39 = vld [vmem:[%s4149_s23 + $0x498] sm:$0xf0]  ;;  %v3324_v10 = vld [vmem:[%s4149_s23 + $0x6e8] sm:$0xf0]  ;;  %v3830_v31 = vld [vmem:[#allocation1 + $0x9] sm:$0xff] }
 0x109   : > { %2202 = vmatpush.bf16.msra.mxu2 %v3135_v40  ;;  %v3631_v40 = vld [vmem:[%s4149_s23 + $0x514] sm:$0xf]  ;;  %v3031_v47 = vor.u32 %v3615_v36, %v3028_v39  ;;  %v3327_v15 = vor.u32 %v3689_v23, %v3324_v10  ;;  %v3383_v37 = vor.u32 %v3703_v26, %v3380_v28  ;;  %v3244_v39 = vld [vmem:[%s4149_s23 + $0x648] sm:$0xf0]  ;;  %v3701_v43 = vld [vmem:[%s4149_s23 + $0x744] sm:$0xf] }
 0x10a   : > { %2215 = vmatpush.bf16.msra.mxu3 %v3199_v44  ;;  %v4647_v30 = vadd.f32 %v1963_v25, %v1951_v24  ;;  %v2967_v44 = vor.u32 %v3599_v34, %v2964_v35  ;;  %v3095_v48 = vor.u32 %v3631_v40, %v3092_v41  ;;  %v3316_v25 = vld [vmem:[%s4149_s23 + $0x6d8] sm:$0xf0]  ;;  %v3831_v34 = vld [vmem:[#allocation1 + $0x1b] sm:$0xff]  ;;  %v3685_v40 = vld [vmem:[%s4149_s23 + $0x6c4] sm:$0xf] }
 0x10b   : > { %2177 = vmatpush.bf16.msra.mxu0 %v2999_v50  ;;  %v3020_v50 = vld [vmem:[%s4149_s23 + $0x488] sm:$0xf0]  ;;  %v3319_v36 = vor.u32 %v3687_v19, %v3316_v25  ;;  %v3717_v46 = vld [vmem:[%s4149_s23 + $0x7c4] sm:$0xf]  ;;  %v3284_v19 = vld [vmem:[%s4149_s23 + $0x698] sm:$0xf0] }
 0x10c   : > { %2190 = vmatpush.bf16.msra.mxu1 %v3063_v61  ;;  %v3629_v61 = vld [vmem:[%s4149_s23 + $0x504] sm:$0xf]  ;;  %v3711_v25 = vld [vmem:[%s4149_s23 + $0x794] sm:$0xf]  ;;  %v3412_v26 = vld [vmem:[%s4149_s23 + $0x798] sm:$0xf0] }
 0x10d   : > { %2203 = vmatpush.bf16.msra.mxu2 %v3127_v51  ;;  %v3087_v63 = vor.u32 %v3629_v61, %v3084_v53  ;;  %v3311_v61 = vor.u32 %v3685_v40, %v3308_v42  ;;  %v3236_v53 = vld [vmem:[%s4149_s23 + $0x638] sm:$0xf0]  ;;  %v3681_v0 = vld [vmem:[%s4149_s23 + $0x6a4] sm:$0xf] }
 0x10e   : > { %2216 = vmatpush.bf16.msra.mxu3 %v3191_v2  ;;  %v3148_v2 = vld [vmem:[%s4149_s23 + $0x588] sm:$0xf0]  ;;  %v3713_v23 = vld [vmem:[%s4149_s23 + $0x7a4] sm:$0xf] }
 0x10f   : > { %2178 = vmatpush.bf16.msra.mxu0 %v2991_v3  ;;  %v1952_v51 = vpop.f32.mrf.mxu2  ;;  %v3332_v3 = vld [vmem:[%s4149_s23 + $0x6f8] sm:$0xf0]  ;;  %v3151_v5 = vor.u32 %v3645_v1, %v3148_v2  ;;  %v3683_v1 = vld [vmem:[%s4149_s23 + $0x6b4] sm:$0xf]  ;;  %v3709_v40 = vld [vmem:[%s4149_s23 + $0x784] sm:$0xf] }
 0x110   : > { %2191 = vmatpush.bf16.msra.mxu1 %v3055_v60  ;;  %v1965_v54 = vpop.f32.mrf.mxu3  ;;  %v3396_v60 = vld [vmem:[%s4149_s23 + $0x778] sm:$0xf0] }
 0x111   : > { %2204 = vmatpush.bf16.msra.mxu2 %v3119_v62  ;;  %v3023_v62 = vor.u32 %v3613_v49, %v3020_v50  ;;  %v3399_v7 = vor.u32 %v3707_v59, %v3396_v60  ;;  %v3303_v59 = vor.u32 %v3683_v1, %v3300_v55 }
 0x112   : > { %2217 = vmatpush.bf16.msra.mxu3 %v3183_v6  ;;  %v3335_v6 = vor.u32 %v3691_v57, %v3332_v3  ;;  %v3715_v57 = vld [vmem:[%s4149_s23 + $0x7b4] sm:$0xf] }
 0x113   : > { %2179 = vmatpush.bf16.msra.mxu0 %v2983_v27  ;;  %v3705_v27 = vld [vmem:[%s4149_s23 + $0x764] sm:$0xf] }
 0x114   : > { %2192 = vmatpush.bf16.msra.mxu1 %v3047_v11  ;;  %v3388_v11 = vld [vmem:[%s4149_s23 + $0x768] sm:$0xf0] }
 0x115   : > { %2205 = vmatpush.bf16.msra.mxu2 %v3111_v12  ;;  %v3721_v12 = vld [vmem:[%s4149_s23 + $0x7e4] sm:$0xf]  ;;  %v3391_v16 = vor.u32 %v3705_v27, %v3388_v11 }
 0x116   : > { %2218 = vmatpush.bf16.msra.mxu3 %v3175_v17  ;;  %v3671_v17 = vld [vmem:[%s4149_s23 + $0x654] sm:$0xf]  ;;  %v3455_v24 = vor.u32 %v3721_v12, %v3452_v13 }
 0x117   : > { %2180 = vmatpush.bf16.msra.mxu0 %v2975_v29  ;;  %v3829_v29 = vld [vmem:[#allocation1 + $0x12] sm:$0xff]  ;;  %v3255_v35 = vor.u32 %v3671_v17, %v3252_v18  ;;  %v3679_v17 = vld [vmem:[%s4149_s23 + $0x694] sm:$0xf] }
 0x118   : > { %2193 = vmatpush.bf16.msra.mxu1 %v3039_v32  ;;  %v3719_v32 = vld [vmem:[%s4149_s23 + $0x7d4] sm:$0xf] }
 0x119   : > { %2206 = vmatpush.bf16.msra.mxu2 %v3103_v33  ;;  %v3444_v33 = vld [vmem:[%s4149_s23 + $0x7d8] sm:$0xf0] }
 0x11a   : > { %2219 = vmatpush.bf16.msra.mxu3 %v3167_v38  ;;  %v3669_v38 = vld [vmem:[%s4149_s23 + $0x644] sm:$0xf]  ;;  %v3447_v41 = vor.u32 %v3719_v32, %v3444_v33  ;;  %v3212_v33 = vld [vmem:[%s4149_s23 + $0x608] sm:$0xf0] }
 0x11b   : > { %2181 = vmatpush.bf16.msra.mxu0 %v2967_v44  ;;  %v3372_v44 = vld [vmem:[%s4149_s23 + $0x748] sm:$0xf0]  ;;  %v3247_v49 = vor.u32 %v3669_v38, %v3244_v39  ;;  %v3661_v32 = vld [vmem:[%s4149_s23 + $0x604] sm:$0xf] }
 0x11c   : > { %2194 = vmatpush.bf16.msra.mxu1 %v3031_v47  ;;  %v3436_v47 = vld [vmem:[%s4149_s23 + $0x7c8] sm:$0xf0]  ;;  %v3375_v51 = vor.u32 %v3701_v43, %v3372_v44  ;;  %v3215_v43 = vor.u32 %v3661_v32, %v3212_v33 }
 0x11d   : > { %2207 = vmatpush.bf16.msra.mxu2 %v3095_v48  ;;  %v3439_v2 = vor.u32 %v3717_v46, %v3436_v47  ;;  %v3340_v38 = vld [vmem:[%s4149_s23 + $0x708] sm:$0xf0]  ;;  %v3832_v47 = vld [vmem:[#allocation1 + $0x24] sm:$0xff] }
 0x11e   : > { %2220 = vmatpush.bf16.msra.mxu3 %v3159_v52  ;;  %v3667_v52 = vld [vmem:[%s4149_s23 + $0x634] sm:$0xf] }
 0x11f   : > { %2182 = vmatpush.bf16.msra.mxu0 %v2959_v58  ;;  %v1976_v45 = vpop.f32.mrf.mxu0  ;;  %v3428_v58 = vld [vmem:[%s4149_s23 + $0x7b8] sm:$0xf0]  ;;  %v3239_v3 = vor.u32 %v3667_v52, %v3236_v53 }
 0x120   : > { %2195 = vmatpush.bf16.msra.mxu1 %v3023_v62  ;;  %v1977_v48 = vadd.f32 %v1976_v45, %v4647_v30  ;;  %v1989_v50 = vpop.f32.mrf.mxu1  ;;  %v3364_v30 = vld [vmem:[%s4149_s23 + $0x738] sm:$0xf0]  ;;  %v3665_v62 = vld [vmem:[%s4149_s23 + $0x624] sm:$0xf]  ;;  %v3431_v4 = vor.u32 %v3715_v57, %v3428_v58 }
 0x121   : > { %2208 = vmatpush.bf16.msra.mxu2 %v3087_v63  ;;  %v3367_v60 = vor.u32 %v3699_v56, %v3364_v30  ;;  %v3228_v63 = vld [vmem:[%s4149_s23 + $0x628] sm:$0xf0] }
 0x122   : > { %2221 = vmatpush.bf16.msra.mxu3 %v3151_v5  ;;  %2183 = vmatmul.bf16.vlgmr.msra.gmra.mxu0 %v3828_v20  ;;  %v1990_v54 = vadd.f32 %v1989_v50, %v1977_v48  ;;  %v3231_v27 = vor.u32 %v3665_v62, %v3228_v63  ;;  %v3695_v20 = vld [vmem:[%s4149_s23 + $0x714] sm:$0xf]  ;;  %v3833_v48 = vld [vmem:[#allocation1 + $0x2d] sm:$0xff] }
 0x123   : > { %2227 = vmatpush.bf16.msrb.mxu0 %v3271_v21  ;;  %2196 = vmatmul.bf16.vlgmr.msra.gmra.mxu1 %v3830_v31  ;;  %v3292_v21 = vld [vmem:[%s4149_s23 + $0x6a8] sm:$0xf0]  ;;  %v3835_v50 = vld [vmem:[#allocation1 + $0x3f] sm:$0xff] }
 0x124   : > { %2240 = vmatpush.bf16.msrb.mxu1 %v3335_v6  ;;  %2209 = vmatmul.bf16.vlgmr.msra.gmra.mxu2 %v3829_v29  ;;  %v3697_v6 = vld [vmem:[%s4149_s23 + $0x724] sm:$0xf]  ;;  %v3295_v13 = vor.u32 %v3681_v0, %v3292_v21  ;;  %v3287_v29 = vor.u32 %v3679_v17, %v3284_v19 }
 0x125   : > { %2253 = vmatpush.bf16.msrb.mxu2 %v3399_v7  ;;  %2222 = vmatmul.bf16.vlgmr.msra.gmra.mxu3 %v3831_v34  ;;  %v3356_v7 = vld [vmem:[%s4149_s23 + $0x728] sm:$0xf0]  ;;  %v3677_v34 = vld [vmem:[%s4149_s23 + $0x684] sm:$0xf] }
 0x126   : > { %2266 = vmatpush.bf16.msrb.mxu3 %v3463_v9  ;;  %v3420_v9 = vld [vmem:[%s4149_s23 + $0x7a8] sm:$0xf0] }
 0x127   : > { %2228 = vmatpush.bf16.msrb.mxu0 %v3263_v14  ;;  %v2002_v5 = vpop.f32.mrf.mxu2  ;;  %v1978_v10 = vpop.f32.mrf.mxu0  ;;  %v3359_v14 = vor.u32 %v3697_v6, %v3356_v7  ;;  %v3423_v18 = vor.u32 %v3713_v23, %v3420_v9 }
 0x128   : > { %2241 = vmatpush.bf16.msrb.mxu1 %v3327_v15  ;;  %v2003_v22 = vadd.f32 %v2002_v5, %v1990_v54  ;;  %v2015_v8 = vpop.f32.mrf.mxu3  ;;  %v1991_v11 = vpop.f32.mrf.mxu1  ;;  %v3663_v15 = vld [vmem:[%s4149_s23 + $0x614] sm:$0xf] }
 0x129   : > { %2254 = vmatpush.bf16.msrb.mxu2 %v3391_v16  ;;  %v3220_v16 = vld [vmem:[%s4149_s23 + $0x618] sm:$0xf0] }
 0x12a   : > { %2267 = vmatpush.bf16.msrb.mxu3 %v3455_v24  ;;  %v2016_v12 = vadd.f32 %v2015_v8, %v2003_v22  ;;  %v3348_v24 = vld [vmem:[%s4149_s23 + $0x718] sm:$0xf0]  ;;  %v3223_v28 = vor.u32 %v3663_v15, %v3220_v16 }
 0x12b   : > { %2229 = vmatpush.bf16.msrb.mxu0 %v3255_v35  ;;  %v3351_v31 = vor.u32 %v3695_v20, %v3348_v24  ;;  %v3415_v35 = vor.u32 %v3711_v25, %v3412_v26 }
 0x12c   : > { %2242 = vmatpush.bf16.msrb.mxu1 %v3319_v36  ;;  %v3276_v36 = vld [vmem:[%s4149_s23 + $0x688] sm:$0xf0] }
 0x12d   : > { %2255 = vmatpush.bf16.msrb.mxu2 %v3383_v37  ;;  %v3693_v37 = vld [vmem:[%s4149_s23 + $0x704] sm:$0xf]  ;;  %v3279_v44 = vor.u32 %v3677_v34, %v3276_v36 }
 0x12e   : > { %2268 = vmatpush.bf16.msrb.mxu3 %v3447_v41  ;;  %v3404_v41 = vld [vmem:[%s4149_s23 + $0x788] sm:$0xf0]  ;;  %v3343_v45 = vor.u32 %v3693_v37, %v3340_v38 }
 0x12f   : > { %2230 = vmatpush.bf16.msrb.mxu0 %v3247_v49  ;;  %v2004_v39 = vpop.f32.mrf.mxu2  ;;  %v3407_v46 = vor.u32 %v3709_v40, %v3404_v41  ;;  %v3834_v49 = vld [vmem:[#allocation1 + $0x36] sm:$0xff] }
 0x130   : > { %2243 = vmatpush.bf16.msrb.mxu1 %v3311_v61  ;;  %v2017_v42 = vpop.f32.mrf.mxu3 }
 0x131   : > { %2256 = vmatpush.bf16.msrb.mxu2 %v3375_v51 }
 0x132   : > { %2269 = vmatpush.bf16.msrb.mxu3 %v3439_v2 }
 0x133   : > { %2231 = vmatpush.bf16.msrb.mxu0 %v3239_v3 }
 0x134   : > { %2244 = vmatpush.bf16.msrb.mxu1 %v3303_v59 }
 0x135   : > { %2257 = vmatpush.bf16.msrb.mxu2 %v3367_v60 }
 0x136   : > { %2270 = vmatpush.bf16.msrb.mxu3 %v3431_v4 }
 0x137   : > { %2232 = vmatpush.bf16.msrb.mxu0 %v3231_v27 }
 0x138   : > { %2245 = vmatpush.bf16.msrb.mxu1 %v3295_v13 }
 0x139   : > { %2258 = vmatpush.bf16.msrb.mxu2 %v3359_v14 }
 0x13a   : > { %2271 = vmatpush.bf16.msrb.mxu3 %v3423_v18 }
 0x13b   : > { %2233 = vmatpush.bf16.msrb.mxu0 %v3223_v28 }
 0x13c   : > { %2246 = vmatpush.bf16.msrb.mxu1 %v3287_v29 }
 0x13d   : > { %2259 = vmatpush.bf16.msrb.mxu2 %v3351_v31 }
 0x13e   : > { %2272 = vmatpush.bf16.msrb.mxu3 %v3415_v35 }
 0x13f   : > { %2234 = vmatpush.bf16.msrb.mxu0 %v3215_v43  ;;  %v2028_v61 = vpop.f32.mrf.mxu0 }
 0x140   : > { %2247 = vmatpush.bf16.msrb.mxu1 %v3279_v44  ;;  %v2029_v51 = vadd.f32 %v2028_v61, %v2016_v12  ;;  %v2041_v52 = vpop.f32.mrf.mxu1  ;;  %v288_v44 = vld [vmem:[%s4169_s6] sm:$0xf] }
 0x141   : > { %2260 = vmatpush.bf16.msrb.mxu2 %v3343_v45 }
 0x142   : > { %2273 = vmatpush.bf16.msrb.mxu3 %v3407_v46  ;;  %2235 = vmatmul.bf16.vlgmr.msrb.gmra.mxu0 %v3832_v47  ;;  %v2042_v53 = vadd.f32 %v2041_v52, %v2029_v51 }
 0x143   : > { %2248 = vmatmul.bf16.vlgmr.msrb.gmra.mxu1 %v3833_v48 }
 0x144   : > { %2261 = vmatmul.bf16.vlgmr.msrb.gmra.mxu2 %v3834_v49 }
 0x145   : > { %2274 = vmatmul.bf16.vlgmr.msrb.gmra.mxu3 %v3835_v50 }
 0x147   : > { %v2054_v1 = vpop.f32.mrf.mxu2  ;;  %v2030_v55 = vpop.f32.mrf.mxu0 }
 0x148   : > { %v2055_v2 = vadd.f32 %v2054_v1, %v2042_v53  ;;  %v2067_v54 = vpop.f32.mrf.mxu3  ;;  %v2043_v56 = vpop.f32.mrf.mxu1 }
 0x14a   : > { %v2068_v30 = vadd.f32 %v2067_v54, %v2055_v2 }
 0x14f   : > { %v2056_v57 = vpop.f32.mrf.mxu2 }
 0x150   : > { %v2069_v58 = vpop.f32.mrf.mxu3 }
 0x15f   : > { %v2080_v3 = vpop.f32.mrf.mxu0 }
 0x160   : > { %v2093_v59 = vpop.f32.mrf.mxu1 }
 0x161   : > { %v2094_v60 = vadd.f32 %v2093_v59, %v2080_v3 }
 0x167   : > { %v2106_v62 = vpop.f32.mrf.mxu2  ;;  %v2082_v5 = vpop.f32.mrf.mxu0 }
 0x168   : > { %v2107_v63 = vadd.f32 %v2106_v62, %v2094_v60  ;;  %v2119_v0 = vpop.f32.mrf.mxu3  ;;  %v2095_v21 = vpop.f32.mrf.mxu1 }
 0x16a   : > { %v2120_v4 = vadd.f32 %v2119_v0, %v2107_v63 }
 0x16f   : > { %v2108_v6 = vpop.f32.mrf.mxu2 }
 0x170   : > { %v2121_v7 = vpop.f32.mrf.mxu3 }
 0x17f   : > { %v2132_v22 = vpop.f32.mrf.mxu0 }
 0x180   : > { %v2145_v8 = vpop.f32.mrf.mxu1  ;;  %v2133_v15 = vadd.f32 %v2132_v22, %v2120_v4 }
 0x182   : > { %v2146_v19 = vadd.f32 %v2145_v8, %v2133_v15 }
 0x187   : > { %v2158_v23 = vpop.f32.mrf.mxu2  ;;  %v2134_v10 = vpop.f32.mrf.mxu0 }
 0x188   : > { %v2171_v9 = vpop.f32.mrf.mxu3  ;;  %v2147_v27 = vpop.f32.mrf.mxu1  ;;  %v2159_v24 = vadd.f32 %v2158_v23, %v2146_v19 }
 0x18a   : > { %v2172_v28 = vadd.f32 %v2171_v9, %v2159_v24 }
 0x18f   : > { %v2160_v11 = vpop.f32.mrf.mxu2 }
 0x190   : > { %v2173_v12 = vpop.f32.mrf.mxu3 }
 0x19f   : > { %v2184_v13 = vpop.f32.mrf.mxu0 }
 0x1a0   : > { %v2197_v14 = vpop.f32.mrf.mxu1  ;;  %v2185_v29 = vadd.f32 %v2184_v13, %v2172_v28 }
 0x1a2   : > { %v2198_v31 = vadd.f32 %v2197_v14, %v2185_v29 }
 0x1a7   : > { %v2210_v16 = vpop.f32.mrf.mxu2  ;;  %v2186_v18 = vpop.f32.mrf.mxu0 }
 0x1a8   : > { %v2223_v17 = vpop.f32.mrf.mxu3  ;;  %v2199_v20 = vpop.f32.mrf.mxu1  ;;  %v2211_v32 = vadd.f32 %v2210_v16, %v2198_v31 }
 0x1aa   : > { %v2224_v33 = vadd.f32 %v2223_v17, %v2211_v32 }
 0x1af   : > { %v2212_v25 = vpop.f32.mrf.mxu2 }
 0x1b0   : > { %v2225_v26 = vpop.f32.mrf.mxu3 }
 0x1bf   : > { %v2236_v34 = vpop.f32.mrf.mxu0 }
 0x1c0   : > { %v2249_v35 = vpop.f32.mrf.mxu1  ;;  %v2237_v36 = vadd.f32 %v2236_v34, %v2224_v33 }
 0x1c2   : > { %v2250_v37 = vadd.f32 %v2249_v35, %v2237_v36 }
 0x1c7   : > { %v2262_v38 = vpop.f32.mrf.mxu2  ;;  %v2238_v41 = vpop.f32.mrf.mxu0 }
 0x1c8   : > { %v2263_v39 = vadd.f32 %v2262_v38, %v2250_v37  ;;  %v2275_v40 = vpop.f32.mrf.mxu3  ;;  %v2251_v42 = vpop.f32.mrf.mxu1 }
 0x1ca   : > { %v2276_v43 = vadd.f32 %v2275_v40, %v2263_v39 }
 0x1cc   : > { %v2281_v45 = vrot.slane %v2276_v43, 6 }
 0x1cd   : > { %2290 = sbr.rel (%p3464_p9) target bundleno = 478 (0x1de), region = 48 }
 0x1ce   : > { %v2283_v46 = vsel %vm2282_vm0, %v2068_v30, %v2281_v45 }
 0x1cf   : > { %v2285_v47 = vadd.f32 %v2283_v46, %v288_v44  ;;  %v2264_v48 = vpop.f32.mrf.mxu2 }
 0x1d0   : > { %v2277_v49 = vpop.f32.mrf.mxu3 }
 0x1d1   : > { %2286 = vst [vmem:[%s4169_s6] sm:$0xf] %v2285_v47 }
 0x1d2   : > { %v2292_v50 = vld [vmem:[%s231_s30] sm:$0x3] }
 0x1d3   : > { %v2294_v61 = vperm.slane %v2292_v50, 0  ;;  %v2295_v51 = vperm.slane %v2292_v50, 1 }
 0x1d5   : > { %v2296_v53 = vrot.slane %v2295_v51, 6 }
 0x1d7   : > { %v2297_v1 = vsel %vm2282_vm0, %v2294_v61, %v2296_v53 }
 0x1d8   : > { %v2291_v52 = vld [vmem:[%s4169_s6] sm:$0xf] }
 0x1d9   : > { %v2299_v2 = vadd.f32 %v2297_v1, %v2291_v52 }
 0x1db   : > { %v2300_v54 = vmax.f32 %v2299_v2, 0.0 }
 0x1dd   : > { %2301 = vst [vmem:[%s4169_s6] sm:$0xf] %v2300_v54 }
 0x1de PF: > { %s19_s22 = sadd.s32 1, %s3990_s22   ;;  %s4784_s23 = sld [smem:[#allocation8_spill]] }
 0x1df   : > { %p16_p10 = scmp.ge.s32.totalorder %s19_s22, 6   ;;  %s4785_s11 = sld [smem:[#allocation9_spill]] }
 0x1e0   : > { %s4786_s12 = smov %s3954_s13  ;;  %s4787_s13 = smov %s3958_s14 }
 0x1e1   : > { %s4788_s14 = smov %s4131_s26  ;;  %s4789_s15 = smov %s3966_s16 }
 0x1e2   : > { %s4790_s16 = smov %s3970_s17  ;;  %s4791_s17 = smov %s4101_s9 }
 0x1e3   : > { %s4792_s18 = smov %s3982_s20  ;;  %s4793_s19 = smov %s3986_s21 }
 0x1e4   : > { %s4794_s20 = smov %s4784_s23  ;;  %18 = sbr.rel (!%p16_p10) target bundleno = 11 (0xb), region = 96 }
 0x1e5   : > { %s4795_s21 = smov %s4785_s11 }
 0x1e9   :  { %2323 = vsyncpa [#allocation3], 1 }
 0x1ea   :  { %2325 = vsyncpa [#allocation3 + $0x1], 1 }
 0x1eb   :  { %2326 = vsyncpa [#allocation5], 1 }
 0x1ec   :  { %2328 = vsyncpa [#allocation5 + $0x1], 1 }

// kernel: _actor_critic_forward.3
= control target key start
LH: loop header
LB: loop body
LE: loop exit
PB: predicated region body
PF: predicated region fallthrough
CT: control target
= control target key end

     0   :  { %10 = vsyncpa [#allocation5], 0  ;;  %s5208_s0 = inlined_call_operand.vmem [shape: f32[2,2,8,8,1], index: 0, kind: input, shape index: {}]   ;;  %s5209_s1 = inlined_call_operand.vmem [shape: f32[2,9,32], index: 1, kind: input, shape index: {}]   ;;  %s5210_s2 = inlined_call_operand.hbm [shape: f32[2,1,32], index: 2, kind: input, shape index: {}]   ;;  %s5211_s3 = inlined_call_operand.hbm [shape: f32[2,9,32,64], index: 3, kind: input, shape index: {}]   ;;  %s5212_s4 = inlined_call_operand.hbm [shape: f32[2,1,64], index: 4, kind: input, shape index: {}]   ;;  %s5213_s5 = inlined_call_operand.vmem [shape: bf16[2,128,64], index: 5, kind: output, shape index: {}]  }
   0x1   :  { %12 = vsyncpa [#allocation5 + $0x1], 0 }
   0x2   :  { %13 = vsyncpa [#allocation7], 0 }
   0x3   :  { %15 = vsyncpa [#allocation7 + $0x1], 0  ;;  %s3651_s18 = smov 0   ;;  %s3653_s19 = smov 0  }
   0x4   :  { %s3655_s20 = smov 0   ;;  %s3657_s21 = smov 0  }
   0x5 LB: > { %s3670_s22 = sadd.s32 4294967295, %s3615_s21   ;;  %s3673_s23 = sadd.s32 1, %s3615_s21   ;;  %s3615_s21 = sphi %s3657_s21, %s5244_s21   ;;  %s3611_s20 = sphi %s3655_s20, %s5243_s20   ;;  %s3607_s19 = sphi %s3653_s19, %s5242_s19   ;;  %s3603_s18 = sphi %s3651_s18, %s5241_s18  }
   0x6   : > { %s77_s24 = ssub.s32 %s3615_s21, %s3673_s23  ;;  %s80_s25 = sadd.s32 1, %s3611_s20 }
   0x7   : > { %p78_p0 = scmp.eq.s32.totalorder %s77_s24, 0  ;;  %p87_p1 = scmp.ne.s32.totalorder %s3611_s20, %s3607_s19 }
   0x8   : > { %p88_p2 = scmp.eq.s32.totalorder %s3615_s21, 0  ;;  %p93_p3 = scmp.ne.s32.totalorder %s3607_s19, %s3603_s18 }
   0x9   : > { %s3683_s26 = scalar_select %p78_p0, %s3611_s20, %s80_s25  }
   0xa   : > { %p89_p4 = por %p88_p2, %p87_p1  ;;  %p94_p5 = scmp.eq.s32.totalorder %s3670_s22, 0 }
   0xb   : > { %p3436_p6 = scmp.lt.s32.totalorder %s3615_s21, 2  ;;  %s3692_s28 = sand.u32 1, %s3611_s20  }
   0xc   : > { %p3687_p7 = por %p94_p5, %p93_p3  ;;  %s228_s30 = sand.u32 1, %s3615_s21  }
   0xd   : > { %p3694_p8 = pnand %p3436_p6, %p89_p4  ;;  %s3417_s6 = smul.u32 288, %s3692_s28 }
   0xe   : > { %s3418_s7 = smul.u32 288, %s3615_s21  ;;  %s3704_s14 = scalar_lea.sflag [#allocation7], %s228_s30 }
   0xf   : > { %s232_s11 = scalar_lea.vmem [#allocation6], %s3417_s6  ;;  %p3491_p10 = pneg %p3694_p8 }
  0x10   : > { %s237_s10 = scalar_lea.hbm %s5211_s3, %s3418_s7  ;;  %s240_s12 = sshll.u32 %s232_s11, 4  ;;  %s241_s12 = int_to_ptr.vmem [resolvable:$true] %s240_s12 }
  0x11   : > { %s238_s13 = sshll.u32 %s237_s10, 4  ;;  %s3494_s24 = scalar_lea.hbm %s5211_s3, 576  ;;  %s239_s13 = int_to_ptr.hbm [resolvable:$true] %s238_s13 }
  0x12   : > { %s3487_s15 = sshra.s32 %s239_s13, 4  ;;  %s3488_s15 = int_to_ptr.hbm [resolvable:$true] %s3487_s15 }
  0x13   : > { %s3489_s16 = scalar_lea.hbm %s3488_s15, 288  ;;  %p3495_p13 = scmp.lt.s32.totalorder %s3488_s15, %s5211_s3 }
  0x14   : > { %p3490_p9 = scmp.ne.s32.totalorder %s3488_s15, %s3489_s16  ;;  %p3496_p0 = scmp.lt.s32.totalorder %s3494_s24, %s3489_s16 }
  0x16   : > { %p3492_p11 = pnand %p3491_p10, %p3490_p9  ;;  %p3497_p1 = por %p3496_p0, %p3495_p13 }
  0x18   : > { %p3493_p12 = pneg %p3492_p11 }
  0x1a   : > { %p3498_p2 = pnand %p3497_p1, %p3493_p12 }
  0x1c   : > { %3501 = shalt.err (!%p3498_p2)
}
  0x1d   : > { %s3617_s30 = smov 128   ;;  %s3618_s7 = smov 8  }
  0x1e   : > { %3432 = dma.hbm_to_vmem [thread:$0]  (!%p3694_p8), %s239_s13, 4608, %s241_s12, %s3704_s14, %s3617_s30, %s3617_s30, %s3618_s7  }
  0x1f   : > { %p3217_p3 = scmp.ge.s32.totalorder %s3615_s21, 1  ;;  %p265_p4 = scmp.lt.s32.totalorder %s3615_s21, 3 }
  0x20   : > { %s217_s11 = scalar_lea.hbm %s5210_s2, %s3615_s21  ;;  %s214_s16 = scalar_lea.vmem [#allocation4], %s3692_s28 }
  0x21   : > { %p3722_p5 = pnand %p3217_p3, %p265_p4  ;;  %s219_s15 = sshll.u32 %s217_s11, 4  ;;  %s220_s15 = int_to_ptr.hbm [resolvable:$true] %s219_s15 }
  0x22   : > { %s221_s17 = sshll.u32 %s214_s16, 4  ;;  %s212_s18 = scalar_lea.sflag [#allocation5], %s3692_s28  ;;  %s222_s17 = int_to_ptr.vmem [resolvable:$true] %s221_s17 }
  0x23   : > { %s3517_s24 = sshra.s32 %s220_s15, 4  ;;  %s3524_s6 = scalar_lea.hbm %s5210_s2, 2  ;;  %s3518_s24 = int_to_ptr.hbm [resolvable:$true] %s3517_s24 }
  0x24   : > { %s3519_s25 = scalar_lea.hbm %s3518_s24, 1  ;;  %p3525_p12 = scmp.lt.s32.totalorder %s3518_s24, %s5210_s2 }
  0x25   : > { %p3520_p6 = scmp.ne.s32.totalorder %s3518_s24, %s3519_s25  ;;  %p3526_p13 = scmp.lt.s32.totalorder %s3524_s6, %s3519_s25 }
  0x27   : > { %p3522_p9 = pnand %p3520_p6, %p3491_p10  ;;  %p3527_p0 = por %p3526_p13, %p3525_p12 }
  0x29   : > { %p3523_p11 = pneg %p3522_p9 }
  0x2b   : > { %p3528_p1 = pnand %p3527_p0, %p3523_p11 }
  0x2d   : > { %3531 = shalt.err (!%p3528_p1)
}
  0x2e   : > { %3429 = dma.hbm_to_vmem [thread:$0]  (!%p3694_p8), %s220_s15, 16, %s222_s17, %s212_s18  }
  0x2f   : > { %s256_s11 = scalar_lea.hbm %s5212_s4, %s3615_s21  ;;  %s253_s12 = scalar_lea.vmem [#allocation8], %s3692_s28 }
  0x30   : > { %s258_s16 = sshll.u32 %s256_s11, 4  ;;  %s260_s13 = sshll.u32 %s253_s12, 4  ;;  %s259_s16 = int_to_ptr.hbm [resolvable:$true] %s258_s16  ;;  %s261_s13 = int_to_ptr.vmem [resolvable:$true] %s260_s13 }
  0x31   : > { %s3547_s24 = sshra.s32 %s259_s16, 4  ;;  %s3554_s15 = scalar_lea.hbm %s5212_s4, 2  ;;  %s3548_s24 = int_to_ptr.hbm [resolvable:$true] %s3547_s24 }
  0x32   : > { %s3549_s25 = scalar_lea.hbm %s3548_s24, 1  ;;  %p3555_p6 = scmp.lt.s32.totalorder %s3548_s24, %s5212_s4 }
  0x33   : > { %p3550_p2 = scmp.ne.s32.totalorder %s3548_s24, %s3549_s25  ;;  %p3556_p9 = scmp.lt.s32.totalorder %s3554_s15, %s3549_s25 }
  0x35   : > { %p3552_p3 = pnand %p3550_p2, %p3491_p10  ;;  %p3557_p11 = por %p3556_p9, %p3555_p6 }
  0x37   : > { %p3553_p4 = pneg %p3552_p3 }
  0x39   : > { %p3558_p12 = pnand %p3557_p11, %p3553_p4 }
  0x3b   : > { %3561 = shalt.err (!%p3558_p12)
}
  0x3c   : > { %3435 = dma.hbm_to_vmem [thread:$0]  (!%p3694_p8), %s259_s16, 16, %s261_s13, %s3704_s14  }
  0x3d   : > { %269 = sbr.rel (%p3722_p5) target bundleno = 994 (0x3e2), region = 40 }
  0x42   : > { %s3763_s21 = sand.u32 1, %s3607_s19  }
  0x43   : > { %s272_s28 = scalar_lea.sflag [#allocation5], %s3763_s21  ;;  %s274_s7 = scalar_lea.vmem [#allocation4], %s3763_s21 }
  0x44   : > { %3594 = dma.done.wait (%p3687_p7), %s272_s28, 16  }
  0x45   : > { %3596 = vsyncadd (%p3687_p7), %s272_s28, 4294967280  ;;  %s280_s29 = sand.u32 1, %s3670_s22   ;;  %s3419_s14 = smul.u32 288, %s3763_s21 }
  0x46   : > { %s281_s8 = scalar_lea.sflag [#allocation7], %s280_s29 }
  0x47   : > { %s3773_s9 = scalar_lea.vmem [#allocation6], %s3419_s14 }
  0x48   : > { %3598 = dma.done.wait (%p3687_p7), %s281_s8, 4624  }
  0x49   : > { %3600 = vsyncadd (%p3687_p7), %s281_s8, 4294962672  ;;  %vm354_vm0 = vcmask 7168   ;;  %vm365_vm1 = vcmask 0   ;;  %p339_p8 = scmp.lt.s32.totalorder %s3670_s22, 1  ;;  %v3619_v0 = vmov 0   ;;  %v5214_v1 = vmov 0.0  }
  0x4a   : > { %3474 = vset.pattern.permute.xlu2 %v3619_v0  ;;  %3473 = vset.pattern.permute.xlu0 %v3619_v0  ;;  %358 = vst.msk [vmem:[#allocation2 + $0xa0] sm:$0xff] %vm354_vm0, %v5214_v1  ;;  %vm356_vm2 = vcmask 1024   ;;  %vm1631_vm3 = vcmask 261120   ;;  %vm1642_vm4 = vcmask 253952   ;;  %vm1633_vm5 = vcmask 254976   ;;  %s293_s6 = scalar_lea.vmem [#allocation8], %s3763_s21 }
  0x4b   : > { %376 = vst.msk [vmem:[#allocation2 + $0xa0] sm:$0x1] %vm365_vm1, %v5214_v1  ;;  %3475 = vset.pattern.permute.xlu1 %v3619_v0  ;;  %s5246_s22 = smov (!%p339_p8, %s3670_s22), 1  ;;  %vm3070_vm6 = vcmask 519168  }
  0x4c   : > { %355 = vst.msk [vmem:[#allocation2] sm:$0xff] %vm354_vm0, %v5214_v1  ;;  %s3403_s27 = sshll.u32 %s5246_s22, 4  ;;  %s3402_s12 = sshll.u32 %s5246_s22, 7 }
  0x4d   : > { %361 = vst.msk [vmem:[#allocation2 + $0x90] sm:$0xff] %vm354_vm0, %v5214_v1  ;;  %s3801_s16 = scalar_lea.vmem %s5209_s1, %s3403_s27  ;;  %s3863_s25 = scalar_lea.vmem %s5208_s0, %s3402_s12 }
  0x4e   : > { %363 = vst.msk [vmem:[#allocation2 + $0x130] sm:$0xff] %vm354_vm0, %v5214_v1  ;;  %v407_v3 = vld [vmem:[%s3863_s25 + $0x8] sm:$0xff]  ;;  %v409_v4 = vld [vmem:[%s3863_s25 + $0x18] sm:$0xff]  ;;  %v406_v5 = vld [vmem:[%s3863_s25] sm:$0xff]  ;;  %s3404_s30 = sshll.u32 %s5246_s22, 6 }
  0x4f   : > { %367 = vst.msk [vmem:[#allocation2 + $0x10] sm:$0x1] %vm365_vm1, %v5214_v1  ;;  %v408_v6 = vld [vmem:[%s3863_s25 + $0x10] sm:$0xff]  ;;  %v410_v7 = vld [vmem:[%s3863_s25 + $0x20] sm:$0xff]  ;;  %v411_v8 = vld [vmem:[%s3863_s25 + $0x28] sm:$0xff]  ;;  %s5126_s18 = scalar_lea.vmem %s5213_s5, %s3404_s30 }
  0x50   : > { %368 = vst.msk [vmem:[#allocation2 + $0x20] sm:$0x1] %vm365_vm1, %v5214_v1  ;;  %v412_v9 = vld [vmem:[%s3863_s25 + $0x30] sm:$0xff]  ;;  %v414_v12 = vld [vmem:[%s3863_s25 + $0x40] sm:$0xff]  ;;  %v415_v13 = vld [vmem:[%s3863_s25 + $0x48] sm:$0xff] }
  0x51   : > { %369 = vst.msk [vmem:[#allocation2 + $0x30] sm:$0x1] %vm365_vm1, %v5214_v1  ;;  %v416_v11 = vld [vmem:[%s3863_s25 + $0x50] sm:$0xff]  ;;  %v419_v15 = vld [vmem:[%s3863_s25 + $0x68] sm:$0xff]  ;;  %v417_v17 = vld [vmem:[%s3863_s25 + $0x58] sm:$0xff] }
  0x52   : > { %v452_v2 = vld [vmem:[#allocation2 + $0xa0] sm:$0xff]  ;;  %370 = vst.msk [vmem:[#allocation2 + $0x40] sm:$0x1] %vm365_vm1, %v5214_v1  ;;  %v420_v20 = vld [vmem:[%s3863_s25 + $0x70] sm:$0xff]  ;;  %v413_v63 = vld [vmem:[%s3863_s25 + $0x38] sm:$0xff] }
  0x53   : > { %503 = vperm.xlu2 %3474, %v452_v2   ;;  %371 = vst.msk [vmem:[#allocation2 + $0x50] sm:$0x1] %vm365_vm1, %v5214_v1  ;;  %v418_v18 = vld [vmem:[%s3863_s25 + $0x60] sm:$0xff] }
  0x54   : > { %372 = vst.msk [vmem:[#allocation2 + $0x60] sm:$0x1] %vm365_vm1, %v5214_v1 }
  0x55   : > { %373 = vst.msk [vmem:[#allocation2 + $0x70] sm:$0x1] %vm365_vm1, %v5214_v1 }
  0x56   : > { %374 = vst.msk [vmem:[#allocation2 + $0x80] sm:$0x1] %vm365_vm1, %v5214_v1 }
  0x57   : > { %377 = vst.msk [vmem:[#allocation2 + $0xb0] sm:$0x1] %vm365_vm1, %v5214_v1 }
  0x58   : > { %378 = vst.msk [vmem:[#allocation2 + $0xc0] sm:$0x1] %vm365_vm1, %v5214_v1 }
  0x59   : > { %379 = vst.msk [vmem:[#allocation2 + $0xd0] sm:$0x1] %vm365_vm1, %v5214_v1 }
  0x5a   : > { %380 = vst.msk [vmem:[#allocation2 + $0xe0] sm:$0x1] %vm365_vm1, %v5214_v1 }
  0x5b   : > { %381 = vst.msk [vmem:[#allocation2 + $0xf0] sm:$0x1] %vm365_vm1, %v5214_v1 }
  0x5c   : > { %382 = vst.msk [vmem:[#allocation2 + $0x100] sm:$0x1] %vm365_vm1, %v5214_v1 }
  0x5d   : > { %383 = vst.msk [vmem:[#allocation2 + $0x110] sm:$0x1] %vm365_vm1, %v5214_v1 }
  0x5e   : > { %384 = vst.msk [vmem:[#allocation2 + $0x120] sm:$0x1] %vm365_vm1, %v5214_v1 }
  0x5f   : > { %387 = vst.msk [vmem:[#allocation2 + $0x19] sm:$0x1] %vm365_vm1, %v5214_v1 }
  0x60   : > { %388 = vst.msk [vmem:[#allocation2 + $0x29] sm:$0x1] %vm365_vm1, %v5214_v1 }
  0x61   : > { %389 = vst.msk [vmem:[#allocation2 + $0x39] sm:$0x1] %vm365_vm1, %v5214_v1 }
  0x62   : > { %390 = vst.msk [vmem:[#allocation2 + $0x49] sm:$0x1] %vm365_vm1, %v5214_v1 }
  0x63   : > { %391 = vst.msk [vmem:[#allocation2 + $0x59] sm:$0x1] %vm365_vm1, %v5214_v1 }
  0x64   : > { %392 = vst.msk [vmem:[#allocation2 + $0x69] sm:$0x1] %vm365_vm1, %v5214_v1 }
  0x65   : > { %393 = vst.msk [vmem:[#allocation2 + $0x79] sm:$0x1] %vm365_vm1, %v5214_v1 }
  0x66   : > { %394 = vst.msk [vmem:[#allocation2 + $0x89] sm:$0x1] %vm365_vm1, %v5214_v1 }
  0x67   : > { %397 = vst.msk [vmem:[#allocation2 + $0xb9] sm:$0x1] %vm365_vm1, %v5214_v1 }
  0x68   : > { %398 = vst.msk [vmem:[#allocation2 + $0xc9] sm:$0x1] %vm365_vm1, %v5214_v1 }
  0x69   : > { %399 = vst.msk [vmem:[#allocation2 + $0xd9] sm:$0x1] %vm365_vm1, %v5214_v1 }
  0x6a   : > { %400 = vst.msk [vmem:[#allocation2 + $0xe9] sm:$0x1] %vm365_vm1, %v5214_v1 }
  0x6b   : > { %401 = vst.msk [vmem:[#allocation2 + $0xf9] sm:$0x1] %vm365_vm1, %v5214_v1 }
  0x6c   : > { %402 = vst.msk [vmem:[#allocation2 + $0x109] sm:$0x1] %vm365_vm1, %v5214_v1 }
  0x6d   : > { %403 = vst.msk [vmem:[#allocation2 + $0x119] sm:$0x1] %vm365_vm1, %v5214_v1 }
  0x6e   : > { %404 = vst.msk [vmem:[#allocation2 + $0x129] sm:$0x1] %vm365_vm1, %v5214_v1 }
  0x6f   : > { %366 = vst.msk [vmem:[#allocation2] sm:$0x1] %vm365_vm1, %v5214_v1 }
  0x70   : > { %375 = vst.msk [vmem:[#allocation2 + $0x90] sm:$0x1] %vm365_vm1, %v5214_v1 }
  0x71   : > { %385 = vst.msk [vmem:[#allocation2 + $0x130] sm:$0x1] %vm365_vm1, %v5214_v1 }
  0x72   : > { %424 = vst.msk [vmem:[#allocation2 + $0x21] sm:$0xff] %vm354_vm0, %v407_v3 }
  0x73   : > { %426 = vst.msk [vmem:[#allocation2 + $0x41] sm:$0xff] %vm354_vm0, %v409_v4 }
  0x74   : > { %423 = vst.msk [vmem:[#allocation2 + $0x11] sm:$0xff] %vm354_vm0, %v406_v5 }
  0x75   : > { %425 = vst.msk [vmem:[#allocation2 + $0x31] sm:$0xff] %vm354_vm0, %v408_v6 }
  0x76   : > { %v444_v10 = vld [vmem:[#allocation2] sm:$0xff]  ;;  %427 = vst.msk [vmem:[#allocation2 + $0x51] sm:$0xff] %vm354_vm0, %v410_v7 }
  0x77   : > { %463 = vperm.xlu0 %3473, %v444_v10   ;;  %428 = vst.msk [vmem:[#allocation2 + $0x61] sm:$0xff] %vm354_vm0, %v411_v8 }
  0x78   : > { %429 = vst.msk [vmem:[#allocation2 + $0x71] sm:$0xff] %vm354_vm0, %v412_v9  ;;  %v4051_v9 = vld [vmem:[%s3801_s16] ss:$0 sm:$0xff] }
  0x79   : > { %v3892_v14 = vld [vmem:[#allocation2 + $0x20] sm:$0xff]  ;;  %433 = vst.msk [vmem:[#allocation2 + $0xd1] sm:$0xff] %vm354_vm0, %v416_v11 }
  0x7a   : > { %473 = vperm.xlu1 %3475, %v3892_v14   ;;  %v3897_v16 = vld [vmem:[#allocation2 + $0x40] sm:$0xff]  ;;  %431 = vst.msk [vmem:[#allocation2 + $0xb1] sm:$0xff] %vm354_vm0, %v414_v12 }
  0x7b   : > { %483 = vperm.xlu2 %3474, %v3897_v16   ;;  %432 = vst.msk [vmem:[#allocation2 + $0xc1] sm:$0xff] %vm354_vm0, %v415_v13  ;;  %v3904_v19 = vld [vmem:[#allocation2 + $0x10] sm:$0xff]  ;;  %v3960_v34 = vld [vmem:[#allocation2 + $0x41] sm:$0xff]  ;;  %v4061_v13 = vld [vmem:[%s274_s7] ss:$0 sm:$0xff] }
  0x7c   : > { %436 = vst.msk [vmem:[#allocation2 + $0x101] sm:$0xff] %vm354_vm0, %v419_v15  ;;  %v3911_v21 = vld [vmem:[#allocation2 + $0x30] sm:$0xff]  ;;  %v3963_v35 = vld [vmem:[#allocation2 + $0x21] sm:$0xff] }
  0x7d   : > { %434 = vst.msk [vmem:[#allocation2 + $0xe1] sm:$0xff] %vm354_vm0, %v417_v17  ;;  %v3914_v22 = vld [vmem:[#allocation2 + $0x50] sm:$0xff]  ;;  %v4007_v52 = vld [vmem:[#allocation2 + $0x22] sm:$0xff]  ;;  %v4056_v12 = vld [vmem:[%s3801_s16 + $0x1] ss:$0 sm:$0xff] }
  0x7e   : > { %435 = vst.msk [vmem:[#allocation2 + $0xf1] sm:$0xff] %vm354_vm0, %v418_v18  ;;  %v3922_v23 = vld [vmem:[#allocation2 + $0x60] sm:$0xff]  ;;  %v3953_v31 = vld [vmem:[#allocation2 + $0x11] sm:$0xff] }
  0x7f   : > { %468 = vperm.xlu0 %3473, %v3904_v19   ;;  %437 = vst.msk [vmem:[#allocation2 + $0x111] sm:$0xff] %vm354_vm0, %v420_v20  ;;  %v3931_v24 = vld [vmem:[#allocation2 + $0x70] sm:$0xff]  ;;  %v3975_v39 = vld [vmem:[#allocation2 + $0x61] sm:$0xff] }
  0x80   : > { %357 = vst.msk [vmem:[#allocation2 + $0x8] sm:$0x3] %vm356_vm2, %v5214_v1  ;;  %v3935_v25 = vld [vmem:[#allocation2 + $0xd0] sm:$0xff]  ;;  %v4009_v53 = vld [vmem:[#allocation2 + $0x62] sm:$0xff] }
  0x81   : > { %359 = vst.msk [vmem:[#allocation2 + $0xa8] sm:$0x3] %vm356_vm2, %v5214_v1  ;;  %v3939_v26 = vld [vmem:[#allocation2 + $0xb0] sm:$0xff]  ;;  %v4013_v54 = vld [vmem:[#allocation2 + $0x42] sm:$0xff] }
  0x82   : > { %478 = vperm.xlu1 %3475, %v3911_v21   ;;  %362 = vst.msk [vmem:[#allocation2 + $0x98] sm:$0x3] %vm356_vm2, %v5214_v1  ;;  %v3942_v27 = vld [vmem:[#allocation2 + $0xc0] sm:$0xff]  ;;  %v3966_v36 = vld [vmem:[#allocation2 + $0x31] sm:$0xff] }
  0x83   : > { %488 = vperm.xlu2 %3474, %v3914_v22   ;;  %364 = vst.msk [vmem:[#allocation2 + $0x138] sm:$0x3] %vm356_vm2, %v5214_v1  ;;  %v3944_v28 = vld [vmem:[#allocation2 + $0x100] sm:$0xff]  ;;  %v3968_v37 = vld [vmem:[#allocation2 + $0x71] sm:$0xff] }
  0x84   : > { %386 = vst.msk [vmem:[#allocation2 + $0x9] sm:$0x1] %vm365_vm1, %v5214_v1  ;;  %v3948_v29 = vld [vmem:[#allocation2 + $0xe0] sm:$0xff]  ;;  %v3972_v38 = vld [vmem:[#allocation2 + $0x51] sm:$0xff] }
  0x85   : > { %395 = vst.msk [vmem:[#allocation2 + $0x99] sm:$0x1] %vm365_vm1, %v5214_v1  ;;  %v3951_v30 = vld [vmem:[#allocation2 + $0xf0] sm:$0xff]  ;;  %v3977_v40 = vld [vmem:[#allocation2 + $0xc1] sm:$0xff] }
  0x86   : > { %396 = vst.msk [vmem:[#allocation2 + $0xa9] sm:$0x1] %vm365_vm1, %v5214_v1  ;;  %v3957_v32 = vld [vmem:[#allocation2 + $0x110] sm:$0xff]  ;;  %v3990_v45 = vld [vmem:[#allocation2 + $0xe1] sm:$0xff] }
  0x87   : > { %493 = vperm.xlu0 %3473, %v3922_v23   ;;  %405 = vst.msk [vmem:[#allocation2 + $0x139] sm:$0x1] %vm365_vm1, %v5214_v1  ;;  %v574_v33 = vld [vmem:[#allocation2 + $0x1] sm:$0xff]  ;;  %v3981_v42 = vld [vmem:[#allocation2 + $0xb1] sm:$0xff] }
  0x88   : > { %5228 = vst [vmem:[#allocation11_spill] sm:$0xff] %v3948_v29  ;;  %v582_v41 = vld [vmem:[#allocation2 + $0xa1] sm:$0xff]  ;;  %v3983_v43 = vld [vmem:[#allocation2 + $0xf1] sm:$0xff] }
  0x89   : > { %5229 = vst [vmem:[#allocation12_spill] sm:$0xff] %v3966_v36  ;;  %v3987_v44 = vld [vmem:[#allocation2 + $0xd1] sm:$0xff]  ;;  %v3993_v47 = vld [vmem:[#allocation2 + $0x101] sm:$0xff] }
  0x8a   : > { %498 = vperm.xlu1 %3475, %v3931_v24   ;;  %v3996_v48 = vld [vmem:[#allocation2 + $0x111] sm:$0xff]  ;;  %v4027_v61 = vld [vmem:[#allocation2 + $0xe2] sm:$0xff]  ;;  %430 = vst.msk [vmem:[#allocation2 + $0x81] sm:$0xff] %vm354_vm0, %v413_v63 }
  0x8b   : > { %518 = vperm.xlu2 %3474, %v3935_v25   ;;  %v704_v46 = vld [vmem:[#allocation2 + $0x2] sm:$0xff]  ;;  %v3998_v49 = vld [vmem:[#allocation2 + $0x32] sm:$0xff] }
  0x8c   : > { %5230 = vst [vmem:[#allocation13_spill] sm:$0xff] %v3998_v49  ;;  %v4004_v51 = vld [vmem:[#allocation2 + $0x12] sm:$0xff]  ;;  %v4030_v62 = vld [vmem:[#allocation2 + $0xc2] sm:$0xff] }
  0x8d   : > { %v4016_v56 = vld [vmem:[#allocation2 + $0x52] sm:$0xff]  ;;  %v712_v60 = vld [vmem:[#allocation2 + $0xa2] sm:$0xff] }
  0x8e   : > { %v4018_v57 = vld [vmem:[#allocation2 + $0xb2] sm:$0xff]  ;;  %v4048_v8 = vld [vmem:[#allocation2 + $0x102] sm:$0xff] }
  0x8f   : > { %508 = vperm.xlu0 %3473, %v3939_v26   ;;  %v4022_v58 = vld [vmem:[#allocation2 + $0x72] sm:$0xff] }
  0x90   : > { %5231 = vst [vmem:[#allocation14_spill] sm:$0xff] %v4022_v58  ;;  %v4037_v2 = vld [vmem:[#allocation2 + $0xd2] sm:$0xff] }
  0x91   : > { %v4039_v3 = vld [vmem:[#allocation2 + $0x112] sm:$0xff] }
  0x92   : > { %513 = vperm.xlu1 %3475, %v3942_v27   ;;  %5232 = vst [vmem:[#allocation15_spill] sm:$0xff] %v4039_v3  ;;  %v4043_v6 = vld [vmem:[#allocation2 + $0xf2] sm:$0xff] }
  0x93   : > { %533 = vperm.xlu2 %3474, %v3944_v28  }
  0x97   : > { %523 = vperm.xlu0 %3473, %v3948_v29  }
  0x9a   : > { %528 = vperm.xlu1 %3475, %v3951_v30  }
  0x9b   : > { %598 = vperm.xlu2 %3474, %v3953_v31  }
  0x9f   : > { %538 = vperm.xlu0 %3473, %v3957_v32  }
  0xa2   : > { %593 = vperm.xlu1 %3475, %v574_v33   ;;  %v421_v33 = vld [vmem:[%s3863_s25 + $0x78] sm:$0xff] }
  0xa3   : > { %613 = vperm.xlu2 %3474, %v3960_v34   ;;  %438 = vst.msk [vmem:[#allocation2 + $0x121] sm:$0xff] %vm354_vm0, %v421_v33 }
  0xa7   : > { %603 = vperm.xlu0 %3473, %v3963_v35  }
  0xaa   : > { %608 = vperm.xlu1 %3475, %v3966_v36  }
  0xab   : > { %628 = vperm.xlu2 %3474, %v3968_v37  }
  0xad   : > { %v4002_v50 = vpop.permute.xlu2 %503 }
  0xaf   : > { %618 = vperm.xlu0 %3473, %v3972_v38  }
  0xb2   : > { %623 = vperm.xlu1 %3475, %v3975_v39  }
  0xb3   : > { %643 = vperm.xlu2 %3474, %v3977_v40  }
  0xb7   : > { %633 = vperm.xlu0 %3473, %v582_v41  }
  0xba   : > { %638 = vperm.xlu1 %3475, %v3981_v42  }
  0xbb   : > { %658 = vperm.xlu2 %3474, %v3983_v43  }
  0xbf   : > { %648 = vperm.xlu0 %3473, %v3987_v44  }
  0xc2   : > { %653 = vperm.xlu1 %3475, %v3990_v45  }
  0xc3   : > { %723 = vperm.xlu2 %3474, %v704_v46  }
  0xc7   : > { %663 = vperm.xlu0 %3473, %v3993_v47  }
  0xca   : > { %668 = vperm.xlu1 %3475, %v3996_v48  }
  0xcb   : > { %738 = vperm.xlu2 %3474, %v3998_v49  }
  0xcf   : > { %728 = vperm.xlu0 %3473, %v4004_v51  }
  0xd2   : > { %733 = vperm.xlu1 %3475, %v4007_v52  }
  0xd3   : > { %753 = vperm.xlu2 %3474, %v4009_v53  }
  0xd5   : > { %v484_v55 = vpop.permute.xlu2 %483 }
  0xd7   : > { %743 = vperm.xlu0 %3473, %v4013_v54  }
  0xda   : > { %748 = vperm.xlu1 %3475, %v4016_v56  }
  0xdb   : > { %768 = vperm.xlu2 %3474, %v4018_v57  }
  0xdd   : > { %v4024_v59 = vpop.permute.xlu2 %488 }
  0xdf   : > { %758 = vperm.xlu0 %3473, %v4022_v58  }
  0xe2   : > { %763 = vperm.xlu1 %3475, %v712_v60  }
  0xe3   : > { %783 = vperm.xlu2 %3474, %v4027_v61  }
  0xe5   : > { %v4033_v0 = vpop.permute.xlu2 %518 }
  0xe7   : > { %773 = vperm.xlu0 %3473, %v4030_v62  }
  0xe9   : > { %v464_v4 = vpop.permute.xlu0 %463 }
  0xea   : > { %778 = vperm.xlu1 %3475, %v4037_v2  }
  0xeb   : > { %798 = vperm.xlu2 %3474, %v4039_v3  }
  0xec   : > { %v474_v5 = vpop.permute.xlu1 %473 }
  0xed   : > { %v4045_v7 = vpop.permute.xlu2 %533 }
  0xef   : > { %788 = vperm.xlu0 %3473, %v4043_v6  }
  0xf1   : > { %v469_v10 = vpop.permute.xlu0 %468 }
  0xf2   : > { %v543_v11 = vmul.f32 %v4051_v9, %v469_v10  ;;  %793 = vperm.xlu1 %3475, %v4048_v8  }
  0xf3   : > { %863 = vperm.xlu2 %3474, %v3911_v21   ;;  %v546_v21 = vmul.f32 %v4051_v9, %v484_v55 }
  0xf4   : > { %v479_v15 = vpop.permute.xlu1 %478  ;;  %v559_v18 = vadd.f32 %v4061_v13, %v543_v11 }
  0xf5   : > { %v599_v17 = vpop.permute.xlu2 %598  ;;  %v562_v10 = vadd.f32 %v4061_v13, %v546_v21 }
  0xf6   : > { %v673_v20 = vmul.f32 %v4056_v12, %v599_v17 }
  0xf7   : > { %853 = vperm.xlu0 %3473, %v3904_v19  }
  0xf8   : > { %v4068_v41 = vadd.f32 %v673_v20, %v559_v18 }
  0xf9   : > { %v4070_v46 = vpop.permute.xlu0 %493 }
  0xfa   : > { %858 = vperm.xlu1 %3475, %v3892_v14  }
  0xfb   : > { %878 = vperm.xlu2 %3474, %v3922_v23  }
  0xfc   : > { %v499_v60 = vpop.permute.xlu1 %498 }
  0xfd   : > { %v614_v63 = vpop.permute.xlu2 %613  ;;  %v549_v18 = vmul.f32 %v4051_v9, %v499_v60 }
  0xfe   : > { %v676_v11 = vmul.f32 %v4056_v12, %v614_v63  ;;  %v4088_v63 = vld [vmem:[#allocation2 + $0x80] sm:$0xff] }
  0xff   : > { %868 = vperm.xlu0 %3473, %v3897_v16   ;;  %v565_v33 = vadd.f32 %v4061_v13, %v549_v18  ;;  %5233 = vst [vmem:[#allocation16_spill] sm:$0xff] %v4088_v63 }
 0x100   : > { %v4078_v19 = vadd.f32 %v676_v11, %v562_v10 }
 0x101   : > { %v4080_v17 = vpop.permute.xlu0 %508 }
 0x102   : > { %873 = vperm.xlu1 %3475, %v3914_v22  }
 0x103   : > { %893 = vperm.xlu2 %3474, %v3939_v26  }
 0x104   : > { %v514_v55 = vpop.permute.xlu1 %513 }
 0x105   : > { %v629_v20 = vpop.permute.xlu2 %628  ;;  %v552_v60 = vmul.f32 %v4051_v9, %v514_v55 }
 0x106   : > { %v679_v21 = vmul.f32 %v4056_v12, %v629_v20 }
 0x107   : > { %883 = vperm.xlu0 %3473, %v3931_v24   ;;  %v568_v18 = vadd.f32 %v4061_v13, %v552_v60 }
 0x108   : > { %v4090_v16 = vadd.f32 %v679_v21, %v565_v33  ;;  %v542_v33 = vmul.f32 %v4051_v9, %v464_v4 }
 0x109   : > { %v4092_v10 = vpop.permute.xlu0 %523 }
 0x10a   : > { %888 = vperm.xlu1 %3475, %v4088_v63   ;;  %v558_v60 = vadd.f32 %v4061_v13, %v542_v33 }
 0x10b   : > { %908 = vperm.xlu2 %3474, %v3948_v29   ;;  %v545_v29 = vmul.f32 %v4051_v9, %v479_v15 }
 0x10c   : > { %v529_v26 = vpop.permute.xlu1 %528 }
 0x10d   : > { %v644_v11 = vpop.permute.xlu2 %643  ;;  %v555_v55 = vmul.f32 %v4051_v9, %v529_v26 }
 0x10e   : > { %v682_v20 = vmul.f32 %v4056_v12, %v644_v11 }
 0x10f   : > { %898 = vperm.xlu0 %3473, %v3942_v27  }
 0x110   : > { %v4100_v1 = vadd.f32 %v682_v20, %v568_v18  ;;  %v544_v18 = vmul.f32 %v4051_v9, %v474_v5  ;;  %v571_v20 = vadd.f32 %v4061_v13, %v555_v55  ;;  %v4126_v55 = vld [vmem:[#allocation2 + $0x120] sm:$0xff] }
 0x111   : > { %v4103_v21 = vpop.permute.xlu0 %538 }
 0x112   : > { %903 = vperm.xlu1 %3475, %v3935_v25   ;;  %v560_v3 = vadd.f32 %v4061_v13, %v544_v18  ;;  %v547_v18 = vmul.f32 %v4051_v9, %v4024_v59 }
 0x113   : > { %923 = vperm.xlu2 %3474, %v3957_v32  }
 0x114   : > { %v594_v49 = vpop.permute.xlu1 %593 }
 0x115   : > { %v672_v11 = vmul.f32 %v4056_v12, %v594_v49  ;;  %v659_v63 = vpop.permute.xlu2 %658  ;;  %v4121_v49 = vld [vmem:[%s3801_s16 + $0x2] ss:$0 sm:$0xff] }
 0x116   : > { %v685_v4 = vmul.f32 %v4056_v12, %v659_v63 }
 0x117   : > { %v688_v36 = vadd.f32 %v672_v11, %v558_v60  ;;  %913 = vperm.xlu0 %3473, %v3951_v30   ;;  %v561_v60 = vadd.f32 %v4061_v13, %v545_v29 }
 0x118   : > { %v4114_v26 = vadd.f32 %v685_v4, %v571_v20 }
 0x119   : > { %v604_v58 = vpop.permute.xlu0 %603 }
 0x11a   : > { %v674_v33 = vmul.f32 %v4056_v12, %v604_v58  ;;  %918 = vperm.xlu1 %3475, %v3944_v28  }
 0x11b   : > { %998 = vperm.xlu2 %3474, %v3960_v34   ;;  %v548_v34 = vmul.f32 %v4051_v9, %v4070_v46  ;;  %v550_v46 = vmul.f32 %v4051_v9, %v4002_v50 }
 0x11c   : > { %v4124_v5 = vadd.f32 %v674_v33, %v560_v3  ;;  %v609_v63 = vpop.permute.xlu1 %608  ;;  %v563_v33 = vadd.f32 %v4061_v13, %v547_v18 }
 0x11d   : > { %v675_v15 = vmul.f32 %v4056_v12, %v609_v63  ;;  %v724_v11 = vpop.permute.xlu2 %723 }
 0x11e   : > { %v802_v58 = vmul.f32 %v4121_v49, %v724_v11 }
 0x11f   : > { %v691_v20 = vadd.f32 %v675_v15, %v561_v60  ;;  %928 = vperm.xlu0 %3473, %v4126_v55   ;;  %v564_v60 = vadd.f32 %v4061_v13, %v548_v34 }
 0x120   : > { %v4134_v4 = vadd.f32 %v802_v58, %v688_v36 }
 0x121   : > { %v619_v3 = vpop.permute.xlu0 %618 }
 0x122   : > { %v677_v29 = vmul.f32 %v4056_v12, %v619_v3  ;;  %1038 = vperm.xlu1 %3475, %v3990_v45  }
 0x123   : > { %1299 = vperm.xlu2 %3474, %v3951_v30   ;;  %v551_v30 = vmul.f32 %v4051_v9, %v4080_v17  ;;  %v553_v17 = vmul.f32 %v4051_v9, %v4033_v0 }
 0x124   : > { %v4142_v59 = vadd.f32 %v677_v29, %v563_v33  ;;  %v624_v63 = vpop.permute.xlu1 %623  ;;  %v566_v33 = vadd.f32 %v4061_v13, %v550_v46 }
 0x125   : > { %v678_v36 = vmul.f32 %v4056_v12, %v624_v63  ;;  %v739_v15 = vpop.permute.xlu2 %738  ;;  %v567_v63 = vadd.f32 %v4061_v13, %v551_v30 }
 0x126   : > { %v805_v11 = vmul.f32 %v4121_v49, %v739_v15 }
 0x127   : > { %v694_v18 = vadd.f32 %v678_v36, %v564_v60  ;;  %1168 = vperm.xlu0 %3473, %v4027_v61  }
 0x128   : > { %v4150_v58 = vadd.f32 %v805_v11, %v691_v20 }
 0x129   : > { %v634_v3 = vpop.permute.xlu0 %633 }
 0x12a   : > { %v680_v34 = vmul.f32 %v4056_v12, %v634_v3  ;;  %1128 = vperm.xlu1 %3475, %v4013_v54   ;;  %v554_v54 = vmul.f32 %v4051_v9, %v4092_v10  ;;  %v569_v3 = vadd.f32 %v4061_v13, %v553_v17  ;;  %v556_v10 = vmul.f32 %v4051_v9, %v4045_v7 }
 0x12b   : > { %1429 = vperm.xlu2 %3474, %v3983_v43  }
 0x12c   : > { %v4158_v50 = vadd.f32 %v680_v34, %v566_v33  ;;  %v639_v29 = vpop.permute.xlu1 %638  ;;  %v570_v34 = vadd.f32 %v4061_v13, %v554_v54  ;;  %v572_v17 = vadd.f32 %v4061_v13, %v556_v10 }
 0x12d   : > { %v681_v20 = vmul.f32 %v4056_v12, %v639_v29  ;;  %v754_v60 = vpop.permute.xlu2 %753 }
 0x12e   : > { %v808_v36 = vmul.f32 %v4121_v49, %v754_v60 }
 0x12f   : > { %v697_v15 = vadd.f32 %v681_v20, %v567_v63  ;;  %1023 = vperm.xlu0 %3473, %v3981_v42  }
 0x130   : > { %v4166_v46 = vadd.f32 %v808_v36, %v694_v18 }
 0x131   : > { %v649_v11 = vpop.permute.xlu0 %648 }
 0x132   : > { %v683_v30 = vmul.f32 %v4056_v12, %v649_v11  ;;  %1259 = vperm.xlu1 %3475, %v3914_v22   ;;  %v557_v22 = vmul.f32 %v4051_v9, %v4103_v21 }
 0x133   : > { %1389 = vperm.xlu2 %3474, %v3972_v38  }
 0x134   : > { %v4174_v0 = vadd.f32 %v683_v30, %v569_v3  ;;  %v654_v33 = vpop.permute.xlu1 %653  ;;  %v573_v11 = vadd.f32 %v4061_v13, %v557_v22 }
 0x135   : > { %v684_v42 = vmul.f32 %v4056_v12, %v654_v33  ;;  %v769_v18 = vpop.permute.xlu2 %768 }
 0x136   : > { %v811_v29 = vmul.f32 %v4121_v49, %v769_v18 }
 0x137   : > { %v700_v63 = vadd.f32 %v684_v42, %v570_v34  ;;  %1043 = vperm.xlu0 %3473, %v3983_v43  }
 0x138   : > { %v4182_v20 = vadd.f32 %v811_v29, %v697_v15  ;;  %v4213_v29 = vld [vmem:[%s3801_s16 + $0x3] ss:$0 sm:$0xff] }
 0x139   : > { %v664_v60 = vpop.permute.xlu0 %663 }
 0x13a   : > { %v686_v36 = vmul.f32 %v4056_v12, %v664_v60  ;;  %1153 = vperm.xlu1 %3475, %v4018_v57  }
 0x13b   : > { %1173 = vperm.xlu2 %3474, %v4043_v6  }
 0x13c   : > { %v4190_v7 = vadd.f32 %v686_v36, %v572_v17  ;;  %v669_v54 = vpop.permute.xlu1 %668 }
 0x13d   : > { %v687_v43 = vmul.f32 %v4056_v12, %v669_v54  ;;  %v784_v15 = vpop.permute.xlu2 %783 }
 0x13e   : > { %v814_v3 = vmul.f32 %v4121_v49, %v784_v15 }
 0x13f   : > { %v703_v9 = vadd.f32 %v687_v43, %v573_v11  ;;  %1559 = vperm.xlu0 %3473, %v4043_v6  }
 0x140   : > { %v4196_v21 = vadd.f32 %v814_v3, %v700_v63 }
 0x141   : > { %v729_v30 = vpop.permute.xlu0 %728 }
 0x142   : > { %v803_v57 = vmul.f32 %v4121_v49, %v729_v30  ;;  %1003 = vperm.xlu1 %3475, %v3972_v38  }
 0x143   : > { %1133 = vperm.xlu2 %3474, %v4016_v56  }
 0x144   : > { %v4202_v13 = vadd.f32 %v803_v57, %v4068_v41  ;;  %v734_v12 = vpop.permute.xlu1 %733 }
 0x145   : > { %v804_v33 = vmul.f32 %v4121_v49, %v734_v12  ;;  %v799_v34 = vpop.permute.xlu2 %798 }
 0x146   : > { %v817_v42 = vmul.f32 %v4121_v49, %v799_v34 }
 0x147   : > { %v820_v6 = vadd.f32 %v804_v33, %v4124_v5  ;;  %1284 = vperm.xlu0 %3473, %v3942_v27  }
 0x148   : > { %v4208_v18 = vadd.f32 %v817_v42, %v703_v9 }
 0x149   : > { %v744_v10 = vpop.permute.xlu0 %743 }
 0x14a   : > { %v806_v38 = vmul.f32 %v4121_v49, %v744_v10  ;;  %1519 = vperm.xlu1 %3475, %v4016_v56  }
 0x14b   : > { %1028 = vperm.xlu2 %3474, %v3977_v40  }
 0x14c   : > { %v822_v41 = vadd.f32 %v806_v38, %v4078_v19  ;;  %v749_v63 = vpop.permute.xlu1 %748 }
 0x14d   : > { %v807_v22 = vmul.f32 %v4121_v49, %v749_v63  ;;  %v864_v60 = vpop.permute.xlu2 %863 }
 0x14e   : > { %v934_v5 = vmul.f32 %v4213_v29, %v864_v60 }
 0x14f   : > { %v823_v27 = vadd.f32 %v807_v22, %v4142_v59  ;;  %1304 = vperm.xlu0 %3473, %v3944_v28  }
 0x150   : > { %v4221_v17 = vadd.f32 %v934_v5, %v820_v6 }
 0x151   : > { %v759_v36 = vpop.permute.xlu0 %758 }
 0x152   : > { %v809_v56 = vmul.f32 %v4121_v49, %v759_v36  ;;  %1414 = vperm.xlu1 %3475, %v3977_v40  }
 0x153   : > { %1544 = vperm.xlu2 %3474, %v4030_v62  }
 0x154   : > { %v825_v19 = vadd.f32 %v809_v56, %v4090_v16  ;;  %v764_v54 = vpop.permute.xlu1 %763 }
 0x155   : > { %v810_v11 = vmul.f32 %v4121_v49, %v764_v54  ;;  %v879_v43 = vpop.permute.xlu2 %878 }
 0x156   : > { %v937_v15 = vmul.f32 %v4213_v29, %v879_v43 }
 0x157   : > { %v826_v59 = vadd.f32 %v810_v11, %v4158_v50  ;;  %1264 = vperm.xlu0 %3473, %v3922_v23  }
 0x158   : > { %v4231_v28 = vadd.f32 %v937_v15, %v823_v27 }
 0x159   : > { %v774_v3 = vpop.permute.xlu0 %773 }
 0x15a   : > { %v812_v9 = vmul.f32 %v4121_v49, %v774_v3  ;;  %1434 = vperm.xlu1 %3475, %v3993_v47  }
 0x15b   : > { %1158 = vperm.xlu2 %3474, %v4030_v62  }
 0x15c   : > { %v828_v40 = vadd.f32 %v812_v9, %v4100_v1  ;;  %v779_v16 = vpop.permute.xlu1 %778 }
 0x15d   : > { %v813_v30 = vmul.f32 %v4121_v49, %v779_v16  ;;  %v894_v57 = vpop.permute.xlu2 %893 }
 0x15e   : > { %v940_v12 = vmul.f32 %v4213_v29, %v894_v57 }
 0x15f   : > { %v4240_v50 = vadd.f32 %v813_v30, %v4174_v0  ;;  %983 = vperm.xlu0 %3473, %v3953_v31  }
 0x160   : > { %v4243_v23 = vadd.f32 %v940_v12, %v826_v59 }
 0x161   : > { %v789_v33 = vpop.permute.xlu0 %788 }
 0x162   : > { %v815_v34 = vmul.f32 %v4121_v49, %v789_v33  ;;  %1048 = vperm.xlu1 %3475, %v3993_v47   ;;  %v3225_v33 = vld [vmem:[%s3773_s9 + $0x28] sm:$0xff] }
 0x163   : > { %1008 = vperm.xlu2 %3474, %v3975_v39  }
 0x164   : > { %v831_v1 = vadd.f32 %v815_v34, %v4114_v26  ;;  %v794_v62 = vpop.permute.xlu1 %793  ;;  %v3224_v34 = vld [vmem:[%s3773_s9 + $0x20] sm:$0xff] }
 0x165   : > { %v816_v42 = vmul.f32 %v4121_v49, %v794_v62  ;;  %v4250_v6 = vpop.permute.xlu2 %908 }
 0x166   : > { %v943_v62 = vmul.f32 %v4213_v29, %v4250_v6 }
 0x167   : > { %v832_v0 = vadd.f32 %v816_v42, %v4190_v7  ;;  %1394 = vperm.xlu0 %3473, %v3975_v39   ;;  %v4363_v42 = vld [vmem:[%s3801_s16 + $0x4] ss:$0 sm:$0xff] }
 0x168   : > { %v959_v6 = vadd.f32 %v943_v62, %v4240_v50  ;;  %v4394_v50 = vld [vmem:[%s3801_s16 + $0x6] ss:$0 sm:$0xff] }
 0x169   : > { %v854_v31 = vpop.permute.xlu0 %853 }
 0x16a   : > { %v932_v10 = vmul.f32 %v4213_v29, %v854_v31  ;;  %1564 = vperm.xlu1 %3475, %v4048_v8  }
 0x16b   : > { %1289 = vperm.xlu2 %3474, %v3935_v25  }
 0x16c   : > { %v4258_v47 = vadd.f32 %v932_v10, %v4134_v4  ;;  %v859_v26 = vpop.permute.xlu1 %858  ;;  %v4373_v10 = vld [vmem:[%s3801_s16 + $0x5] ss:$0 sm:$0xff] }
 0x16d   : > { %v933_v38 = vmul.f32 %v4213_v29, %v859_v26  ;;  %v924_v49 = vpop.permute.xlu2 %923 }
 0x16e   : > { %v946_v63 = vmul.f32 %v4213_v29, %v924_v49 }
 0x16f   : > { %v4263_v7 = vadd.f32 %v933_v38, %v4202_v13  ;;  %1113 = vperm.xlu0 %3473, %v4004_v51  }
 0x170   : > { %v4266_v39 = vadd.f32 %v946_v63, %v832_v0 }
 0x171   : > { %v869_v22 = vpop.permute.xlu0 %868 }
 0x172   : > { %v935_v60 = vmul.f32 %v4213_v29, %v869_v22  ;;  %1178 = vperm.xlu1 %3475, %v4048_v8  }
 0x173   : > { %1244 = vperm.xlu2 %3474, %v3892_v14  }
 0x174   : > { %v4272_v25 = vadd.f32 %v935_v60, %v4150_v58  ;;  %v874_v4 = vpop.permute.xlu1 %873 }
 0x175   : > { %v936_v5 = vmul.f32 %v4213_v29, %v874_v4  ;;  %v4275_v27 = vpop.permute.xlu2 %998 }
 0x177   : > { %v4277_v13 = vadd.f32 %v936_v5, %v822_v41  ;;  %1524 = vperm.xlu0 %3473, %v4009_v53   ;;  %v5237_v5 = vld [vmem:[#allocation11_spill] sm:$0xff] }
 0x179   : > { %v884_v51 = vpop.permute.xlu0 %883 }
 0x17a   : > { %v938_v36 = vmul.f32 %v4213_v29, %v884_v51  ;;  %1138 = vperm.xlu1 %3475, %v4009_v53  }
 0x17b   : > { %1033 = vperm.xlu2 %3474, %v3987_v44  }
 0x17c   : > { %v4284_v14 = vadd.f32 %v938_v36, %v4166_v46  ;;  %v889_v8 = vpop.permute.xlu1 %888  ;;  %v4410_v36 = vld [vmem:[%s3801_s16 + $0x7] ss:$0 sm:$0xff] }
 0x17d   : > { %v939_v58 = vmul.f32 %v4213_v29, %v889_v8  ;;  %v4287_v56 = vpop.permute.xlu2 %1299 }
 0x17e   : > { %v1334_v51 = vmul.f32 %v4394_v50, %v4287_v56 }
 0x17f   : > { %v4289_v54 = vadd.f32 %v939_v58, %v825_v19  ;;  %1309 = vperm.xlu0 %3473, %v3957_v32  }
 0x181   : > { %v899_v41 = vpop.permute.xlu0 %898 }
 0x182   : > { %v941_v11 = vmul.f32 %v4213_v29, %v899_v41  ;;  %1419 = vperm.xlu1 %3475, %v3987_v44  }
 0x183   : > { %1439 = vperm.xlu2 %3474, %v3996_v48  }
 0x184   : > { %v4296_v53 = vadd.f32 %v941_v11, %v4182_v20  ;;  %v904_v46 = vpop.permute.xlu1 %903  ;;  %v4419_v11 = vld [vmem:[%s3801_s16 + $0x8] ss:$0 sm:$0xff] }
 0x185   : > { %v942_v43 = vmul.f32 %v4213_v29, %v904_v46  ;;  %v4299_v15 = vpop.permute.xlu2 %1429  ;;  %v1065_v46 = vmul.f32 %v4363_v42, %v4275_v27 }
 0x187   : > { %v4301_v59 = vadd.f32 %v942_v43, %v828_v40  ;;  %1269 = vperm.xlu0 %3473, %v3931_v24   ;;  %v5234_v24 = vmov 0.0  }
 0x188   : > { %1632 = vst.msk [vmem:[#allocation3] sm:$0xff] %vm1631_vm3, %v5234_v24 }
 0x189   : > { %v914_v32 = vpop.permute.xlu0 %913  ;;  %1635 = vst.msk [vmem:[#allocation3 + $0xa0] sm:$0xff] %vm1631_vm3, %v5234_v24 }
 0x18a   : > { %v944_v19 = vmul.f32 %v4213_v29, %v914_v32  ;;  %1374 = vperm.xlu1 %3475, %v3963_v35   ;;  %1638 = vst.msk [vmem:[#allocation3 + $0x90] sm:$0xff] %vm1631_vm3, %v5234_v24 }
 0x18b   : > { %1053 = vperm.xlu2 %3474, %v3996_v48   ;;  %1640 = vst.msk [vmem:[#allocation3 + $0x130] sm:$0xff] %vm1631_vm3, %v5234_v24 }
 0x18c   : > { %v4308_v44 = vadd.f32 %v944_v19, %v4196_v21  ;;  %v919_v20 = vpop.permute.xlu1 %918  ;;  %1644 = vst.msk [vmem:[#allocation3 + $0x10] sm:$0x1] %vm1642_vm4, %v5234_v24 }
 0x18d   : > { %v945_v3 = vmul.f32 %v4213_v29, %v919_v20  ;;  %v4311_v9 = vpop.permute.xlu2 %1389  ;;  %1643 = vst.msk [vmem:[#allocation3] sm:$0x1] %vm1642_vm4, %v5234_v24  ;;  %v5238_v20 = vld [vmem:[#allocation12_spill] sm:$0xff] }
 0x18e   : > { %1645 = vst.msk [vmem:[#allocation3 + $0x20] sm:$0x1] %vm1642_vm4, %v5234_v24 }
 0x18f   : > { %v4313_v16 = vadd.f32 %v945_v3, %v831_v1  ;;  %1549 = vperm.xlu0 %3473, %v4037_v2   ;;  %1646 = vst.msk [vmem:[#allocation3 + $0x30] sm:$0x1] %vm1642_vm4, %v5234_v24 }
 0x190   : > { %1647 = vst.msk [vmem:[#allocation3 + $0x40] sm:$0x1] %vm1642_vm4, %v5234_v24 }
 0x191   : > { %v929_v40 = vpop.permute.xlu0 %928  ;;  %1648 = vst.msk [vmem:[#allocation3 + $0x50] sm:$0x1] %vm1642_vm4, %v5234_v24 }
 0x192   : > { %v947_v48 = vmul.f32 %v4213_v29, %v929_v40  ;;  %988 = vperm.xlu1 %3475, %v3963_v35   ;;  %v3227_v35 = vld [vmem:[%s3773_s9 + $0x38] sm:$0xff]  ;;  %1649 = vst.msk [vmem:[#allocation3 + $0x60] sm:$0x1] %vm1642_vm4, %v5234_v24  ;;  %v1081_v40 = vadd.f32 %v1065_v46, %v4272_v25 }
 0x193   : > { %1504 = vperm.xlu2 %3474, %v4007_v52   ;;  %3407 = vmatpush.msra.mxu3 %v3227_v35  ;;  %1650 = vst.msk [vmem:[#allocation3 + $0x70] sm:$0x1] %vm1642_vm4, %v5234_v24  ;;  %v5236_v29 = vld [vmem:[#allocation14_spill] sm:$0xff] }
 0x194   : > { %v4328_v21 = vadd.f32 %v947_v48, %v4208_v18  ;;  %v1039_v30 = vpop.permute.xlu1 %1038  ;;  %3405 = vmatpush.msra.mxu1 %v3227_v35  ;;  %v3226_v18 = vld [vmem:[%s3773_s9 + $0x30] sm:$0xff]  ;;  %3406 = vmatpush.msra.mxu2 %v3227_v35  ;;  %1651 = vst.msk [vmem:[#allocation3 + $0x80] sm:$0x1] %vm1642_vm4, %v5234_v24 }
 0x195   : > { %v4330_v57 = vpop.permute.xlu2 %1173  ;;  %3410 = vmatpush.msra.mxu3 %v3226_v18  ;;  %1801 = vmatpush.msra.mxu0 %v3227_v35  ;;  %1652 = vst.msk [vmem:[#allocation3 + $0x90] sm:$0x1] %vm1642_vm4, %v5234_v24  ;;  %v1073_v31 = vmul.f32 %v4363_v42, %v1039_v30 }
 0x196   : > { %3408 = vmatpush.msra.mxu1 %v3226_v18  ;;  %3409 = vmatpush.msra.mxu2 %v3226_v18  ;;  %1653 = vst.msk [vmem:[#allocation3 + $0xa0] sm:$0x1] %vm1642_vm4, %v5234_v24 }
 0x197   : > { %1163 = vperm.xlu0 %3473, %v4037_v2   ;;  %3413 = vmatpush.msra.mxu3 %v3225_v33  ;;  %1654 = vst.msk [vmem:[#allocation3 + $0xb0] sm:$0x1] %vm1642_vm4, %v5234_v24 }
 0x198   : > { %3411 = vmatpush.msra.mxu1 %v3225_v33  ;;  %3412 = vmatpush.msra.mxu2 %v3225_v33  ;;  %1655 = vst.msk [vmem:[#allocation3 + $0xc0] sm:$0x1] %vm1642_vm4, %v5234_v24 }
 0x199   : > { %v1169_v12 = vpop.permute.xlu0 %1168  ;;  %3416 = vmatpush.msra.mxu3 %v3224_v34  ;;  %1802 = vmatpush.msra.mxu0 %v3226_v18  ;;  %1656 = vst.msk [vmem:[#allocation3 + $0xd0] sm:$0x1] %vm1642_vm4, %v5234_v24 }
 0x19a   : > { %1399 = vperm.xlu1 %3475, %v3968_v37   ;;  %3414 = vmatpush.msra.mxu1 %v3224_v34  ;;  %v1203_v49 = vmul.f32 %v4373_v10, %v1169_v12  ;;  %1657 = vst.msk [vmem:[#allocation3 + $0xe0] sm:$0x1] %vm1642_vm4, %v5234_v24 }
 0x19b   : > { %1118 = vperm.xlu2 %3474, %v4007_v52   ;;  %v5235_v52 = vld [vmem:[#allocation15_spill] sm:$0xff]  ;;  %3415 = vmatpush.msra.mxu2 %v3224_v34  ;;  %1658 = vst.msk [vmem:[#allocation3 + $0xf0] sm:$0x1] %vm1642_vm4, %v5234_v24 }
 0x19c   : > { %v4345_v2 = vpop.permute.xlu1 %1128  ;;  %1803 = vmatpush.msra.mxu0 %v3225_v33  ;;  %1636 = vst.msk [vmem:[#allocation3 + $0xa8] sm:$0x3] %vm1633_vm5, %v5234_v24  ;;  %v1456_v33 = vmul.f32 %v4410_v36, %v4311_v9 }
 0x19d   : > { %v4351_v1 = vpop.permute.xlu2 %1133  ;;  %1634 = vst.msk [vmem:[#allocation3 + $0x8] sm:$0x3] %vm1633_vm5, %v5234_v24 }
 0x19e   : > { %1804 = vmatpush.msra.mxu0 %v3224_v34  ;;  %1639 = vst.msk [vmem:[#allocation3 + $0x98] sm:$0x3] %vm1633_vm5, %v5234_v24  ;;  %v4469_v34 = vld [vmem:[#allocation2 + $0x121] sm:$0xff] }
 0x19f   : > { %1569 = vperm.xlu0 %3473, %v5235_v52   ;;  %1641 = vst.msk [vmem:[#allocation3 + $0x138] sm:$0x3] %vm1633_vm5, %v5234_v24 }
 0x1a0   : > { %1659 = vst.msk [vmem:[#allocation3 + $0x100] sm:$0x1] %vm1642_vm4, %v5234_v24 }
 0x1a1   : > { %v4367_v0 = vpop.permute.xlu0 %1023  ;;  %1660 = vst.msk [vmem:[#allocation3 + $0x110] sm:$0x1] %vm1642_vm4, %v5234_v24 }
 0x1a2   : > { %1013 = vperm.xlu1 %3475, %v3968_v37   ;;  %v1089_v37 = vadd.f32 %v1073_v31, %v959_v6  ;;  %1661 = vst.msk [vmem:[#allocation3 + $0x120] sm:$0x1] %vm1642_vm4, %v5234_v24 }
 0x1a3   : > { %1529 = vperm.xlu2 %3474, %v5236_v29   ;;  %v1728_v56 = vld [vmem:[#allocation3 + $0xa1] sm:$0xff]  ;;  %1662 = vst.msk [vmem:[#allocation3 + $0x130] sm:$0x1] %vm1642_vm4, %v5234_v24 }
 0x1a4   : > { %v1260_v26 = vpop.permute.xlu1 %1259  ;;  %v1219_v4 = vadd.f32 %v1203_v49, %v1089_v37  ;;  %3236 = vmatmul.msk.f32.vlgmr.msra.gmra.mxu2 %vm1631_vm3, %v1728_v56  ;;  %1663 = vst.msk [vmem:[#allocation3 + $0x9] sm:$0x1] %vm1642_vm4, %v5234_v24  ;;  %v1227_v56 = vld [vmem:[#allocation2 + $0x40] sm:$0xff] }
 0x1a5   : > { %v1029_v38 = vpop.permute.xlu2 %1028  ;;  %1664 = vst.msk [vmem:[#allocation3 + $0x19] sm:$0x1] %vm1642_vm4, %v5234_v24  ;;  %v1326_v48 = vmul.f32 %v4394_v50, %v1260_v26 }
 0x1a6   : > { %v1071_v63 = vmul.f32 %v4363_v42, %v1029_v38  ;;  %v1350_v41 = vadd.f32 %v1334_v51, %v1219_v4  ;;  %1665 = vst.msk [vmem:[#allocation3 + $0x29] sm:$0x1] %vm1642_vm4, %v5234_v24  ;;  %v1361_v51 = vld [vmem:[#allocation2 + $0x81] sm:$0xff] }
 0x1a7   : > { %1183 = vperm.xlu0 %3473, %v5235_v52   ;;  %1666 = vst.msk [vmem:[#allocation3 + $0x39] sm:$0x1] %vm1642_vm4, %v5234_v24  ;;  %v1070_v52 = vmul.f32 %v4363_v42, %v4367_v0  ;;  %v4487_v0 = vld [vmem:[#allocation2 + $0x122] sm:$0xff] }
 0x1a8   : > { %v4397_v22 = vadd.f32 %v1071_v63, %v4296_v53  ;;  %v1464_v53 = vmul.f32 %v4410_v36, %v4299_v15  ;;  %v1195_v15 = vmul.f32 %v4373_v10, %v4345_v2  ;;  %1667 = vst.msk [vmem:[#allocation3 + $0x49] sm:$0x1] %vm1642_vm4, %v5234_v24  ;;  %v5239_v2 = vld [vmem:[#allocation16_spill] sm:$0xff] }
 0x1a9   : > { %v4400_v60 = vpop.permute.xlu0 %1043  ;;  %1668 = vst.msk [vmem:[#allocation3 + $0x59] sm:$0x1] %vm1642_vm4, %v5234_v24  ;;  %v1086_v38 = vadd.f32 %v1070_v52, %v4243_v23 }
 0x1aa   : > { %1294 = vperm.xlu1 %3475, %v5237_v5   ;;  %v1480_v32 = vadd.f32 %v1464_v53, %v1350_v41  ;;  %1669 = vst.msk [vmem:[#allocation3 + $0x69] sm:$0x1] %vm1642_vm4, %v5234_v24  ;;  %v1211_v12 = vadd.f32 %v1195_v15, %v1081_v40 }
 0x1ab   : > { %1314 = vperm.xlu2 %3474, %v4126_v55   ;;  %v1226_v55 = vld [vmem:[#allocation2 + $0x30] sm:$0xff]  ;;  %1670 = vst.msk [vmem:[#allocation3 + $0x79] sm:$0x1] %vm1642_vm4, %v5234_v24 }
 0x1ac   : > { %v1154_v8 = vpop.permute.xlu1 %1153  ;;  %v1342_v25 = vadd.f32 %v1326_v48, %v1211_v12  ;;  %1671 = vst.msk [vmem:[#allocation3 + $0x89] sm:$0x1] %vm1642_vm4, %v5234_v24 }
 0x1ad   : > { %v4414_v58 = vpop.permute.xlu2 %1544  ;;  %1672 = vst.msk [vmem:[#allocation3 + $0x99] sm:$0x1] %vm1642_vm4, %v5234_v24  ;;  %v1200_v9 = vmul.f32 %v4373_v10, %v1154_v8 }
 0x1ae   : > { %1673 = vst.msk [vmem:[#allocation3 + $0xa9] sm:$0x1] %vm1642_vm4, %v5234_v24  ;;  %v1472_v62 = vadd.f32 %v1456_v33, %v1342_v25 }
 0x1af   : > { %1143 = vperm.xlu0 %3473, %v5236_v29   ;;  %1674 = vst.msk [vmem:[#allocation3 + $0xb9] sm:$0x1] %vm1642_vm4, %v5234_v24  ;;  %v1216_v4 = vadd.f32 %v1200_v9, %v1086_v38 }
 0x1b0   : > { %1675 = vst.msk [vmem:[#allocation3 + $0xc9] sm:$0x1] %vm1642_vm4, %v5234_v24 }
 0x1b1   : > { %v1560_v43 = vpop.permute.xlu0 %1559  ;;  %1676 = vst.msk [vmem:[#allocation3 + $0xd9] sm:$0x1] %vm1642_vm4, %v5234_v24 }
 0x1b2   : > { %v1594_v19 = vmul.f32 %v4419_v11, %v1560_v43  ;;  %1249 = vperm.xlu1 %3475, %v1226_v55   ;;  %1677 = vst.msk [vmem:[#allocation3 + $0xe9] sm:$0x1] %vm1642_vm4, %v5234_v24  ;;  %v5240_v43 = vld [vmem:[#allocation13_spill] sm:$0xff] }
 0x1b3   : > { %1379 = vperm.xlu2 %3474, %v5238_v20   ;;  %1678 = vst.msk [vmem:[#allocation3 + $0xf9] sm:$0x1] %vm1642_vm4, %v5234_v24 }
 0x1b4   : > { %v1610_v27 = vadd.f32 %v1594_v19, %v1480_v32  ;;  %v4443_v3 = vpop.permute.xlu1 %1003  ;;  %1679 = vst.msk [vmem:[#allocation3 + $0x109] sm:$0x1] %vm1642_vm4, %v5234_v24 }
 0x1b5   : > { %v4449_v30 = vpop.permute.xlu2 %1158  ;;  %1680 = vst.msk [vmem:[#allocation3 + $0x119] sm:$0x1] %vm1642_vm4, %v5234_v24 }
 0x1b6   : > { %v1626_v35 = vmax.f32 %v1610_v27, 0.0  ;;  %1681 = vst.msk [vmem:[#allocation3 + $0x129] sm:$0x1] %vm1642_vm4, %v5234_v24  ;;  %v1074_v27 = vmul.f32 %v4363_v42, %v4400_v60  ;;  %v1204_v60 = vmul.f32 %v4373_v10, %v4330_v57  ;;  %v1066_v57 = vmul.f32 %v4363_v42, %v4443_v3 }
 0x1b7   : > { %1424 = vperm.xlu0 %3473, %v3990_v45   ;;  %1682 = vst.msk [vmem:[#allocation3 + $0x139] sm:$0x1] %vm1642_vm4, %v5234_v24 }
 0x1b8   : > { %1695 = vst.msk [vmem:[#allocation3 + $0xe1] sm:$0xff] %vm1631_vm3, %v1626_v35  ;;  %v1357_v35 = vld [vmem:[#allocation2 + $0x41] sm:$0xff]  ;;  %v1090_v25 = vadd.f32 %v1074_v27, %v4308_v44  ;;  %v1240_v27 = vld [vmem:[#allocation2 + $0x130] sm:$0xff] }
 0x1b9   : > { %v1285_v18 = vpop.permute.xlu0 %1284 }
 0x1ba   : > { %1274 = vperm.xlu1 %3475, %v5239_v2   ;;  %v1331_v37 = vmul.f32 %v4394_v50, %v1285_v18 }
 0x1bb   : > { %993 = vperm.xlu2 %3474, %v5238_v20   ;;  %v1096_v20 = vld [vmem:[#allocation2 + $0x32] sm:$0xff] }
 0x1bc   : > { %v1520_v45 = vpop.permute.xlu1 %1519  ;;  %v1347_v23 = vadd.f32 %v1331_v37, %v1216_v4 }
 0x1bd   : > { %v1586_v31 = vmul.f32 %v4419_v11, %v1520_v45  ;;  %v4476_v29 = vpop.permute.xlu2 %1008  ;;  %v1487_v45 = vld [vmem:[#allocation2 + $0x42] sm:$0xff] }
 0x1bf   : > { %v1602_v6 = vadd.f32 %v1586_v31, %v1472_v62  ;;  %1444 = vperm.xlu0 %3473, %v4469_v34   ;;  %v1732_v26 = vld [vmem:[#allocation3 + $0xe1] sm:$0xff]  ;;  %v1362_v62 = vld [vmem:[#allocation2 + $0x91] sm:$0xff]  ;;  %v1220_v31 = vadd.f32 %v1204_v60, %v1090_v25 }
 0x1c0   : > { %3240 = vmatmul.msk.f32.vlgmr.msra.gmra.mxu3 %vm1631_vm3, %v1732_v26  ;;  %v1370_v25 = vld [vmem:[#allocation2 + $0x131] sm:$0xff] }
 0x1c1   : > { %v1618_v49 = vmax.f32 %v1602_v6, 0.0  ;;  %v1305_v63 = vpop.permute.xlu0 %1304 }
 0x1c2   : > { %1554 = vperm.xlu1 %3475, %v4027_v61   ;;  %v1591_v61 = vmul.f32 %v4419_v11, %v4414_v58  ;;  %v1491_v58 = vld [vmem:[#allocation2 + $0x82] sm:$0xff]  ;;  %v1335_v33 = vmul.f32 %v4394_v50, %v1305_v63  ;;  %v1232_v63 = vld [vmem:[#allocation2 + $0x90] sm:$0xff] }
 0x1c3   : > { %1687 = vst.msk [vmem:[#allocation3 + $0x41] sm:$0xff] %vm1631_vm3, %v1618_v49  ;;  %1574 = vperm.xlu2 %3474, %v4487_v0  }
 0x1c4   : > { %v1415_v5 = vpop.permute.xlu1 %1414  ;;  %v1351_v6 = vadd.f32 %v1335_v33, %v1220_v31 }
 0x1c5   : > { %v1461_v8 = vmul.f32 %v4410_v36, %v1415_v5  ;;  %v4503_v41 = vpop.permute.xlu2 %1289 }
 0x1c7   : > { %v1477_v55 = vadd.f32 %v1461_v8, %v1347_v23  ;;  %1404 = vperm.xlu0 %3473, %v1361_v51   ;;  %v1196_v23 = vmul.f32 %v4373_v10, %v4351_v1 }
 0x1c9   : > { %v1607_v53 = vadd.f32 %v1591_v61, %v1477_v55  ;;  %v1265_v46 = vpop.permute.xlu0 %1264  ;;  %v1492_v61 = vld [vmem:[#allocation2 + $0x92] sm:$0xff] }
 0x1ca   : > { %1509 = vperm.xlu1 %3475, %v5240_v43   ;;  %v4510_v32 = vld [vmem:[#allocation3 + $0x41] sm:$0xff]  ;;  %v1327_v8 = vmul.f32 %v4394_v50, %v1265_v46 }
 0x1cb   : > { %v1623_v19 = vmax.f32 %v1607_v53, 0.0  ;;  %3232 = vmatmul.msk.f32.vlgmr.msra.gmra.mxu1 %vm1631_vm3, %v4510_v32  ;;  %1254 = vperm.xlu2 %3474, %v1227_v56   ;;  %v1720_v53 = vld [vmem:[#allocation3 + $0x1] sm:$0xff] }
 0x1cc   : > { %v1435_v15 = vpop.permute.xlu1 %1434  ;;  %3228 = vmatmul.msk.f32.vlgmr.msra.gmra.mxu0 %vm1631_vm3, %v1720_v53 }
 0x1cd   : > { %1692 = vst.msk [vmem:[#allocation3 + $0xb1] sm:$0xff] %vm1631_vm3, %v1623_v19  ;;  %v4515_v24 = vpop.permute.xlu2 %1244  ;;  %v1465_v44 = vmul.f32 %v4410_v36, %v1435_v15  ;;  %v1500_v19 = vld [vmem:[#allocation2 + $0x132] sm:$0xff] }
 0x1cf   : > { %1123 = vperm.xlu0 %3473, %v1096_v20   ;;  %v1481_v38 = vadd.f32 %v1465_v44, %v1351_v6  ;;  %v1323_v6 = vmul.f32 %v4394_v50, %v4515_v24 }
 0x1d1   : > { %v4519_v40 = vpop.permute.xlu0 %983 }
 0x1d2   : > { %1534 = vperm.xlu1 %3475, %v1491_v58  }
 0x1d3   : > { %1018 = vperm.xlu2 %3474, %v1361_v51   ;;  %v1082_v51 = vadd.f32 %v1066_v57, %v4277_v13 }
 0x1d4   : > { %v4521_v48 = vpop.permute.xlu1 %1048  ;;  %v4523_v12 = vld [vmem:[#allocation3 + $0xb1] sm:$0xff] }
 0x1d5   : > { %3237 = vmatmul.msk.f32.gmra.mxu2 %vm1631_vm3, %v4523_v12  ;;  %v1034_v18 = vpop.permute.xlu2 %1033  ;;  %v1212_v55 = vadd.f32 %v1196_v23, %v1082_v51 }
 0x1d6   : > { %v1072_v2 = vmul.f32 %v4363_v42, %v1034_v18 }
 0x1d7   : > { %1384 = vperm.xlu0 %3473, %v1357_v35   ;;  %v1343_v43 = vadd.f32 %v1327_v8, %v1212_v55  ;;  %v1075_v55 = vmul.f32 %v4363_v42, %v4521_v48 }
 0x1d8   : > { %v4533_v52 = vadd.f32 %v1072_v2, %v4301_v59 }
 0x1d9   : > { %v1395_v9 = vpop.permute.xlu0 %1394 }
 0x1da   : > { %1514 = vperm.xlu1 %3475, %v1487_v45   ;;  %v1457_v56 = vmul.f32 %v4410_v36, %v1395_v9  ;;  %v1201_v9 = vmul.f32 %v4373_v10, %v4449_v30 }
 0x1db   : > { %1409 = vperm.xlu2 %3474, %v1362_v62  }
 0x1dc   : > { %v1565_v26 = vpop.permute.xlu1 %1564  ;;  %v1473_v15 = vadd.f32 %v1457_v56, %v1343_v43 }
 0x1dd   : > { %v1595_v37 = vmul.f32 %v4419_v11, %v1565_v26  ;;  %v4539_v4 = vpop.permute.xlu2 %1439 }
 0x1df   : > { %v1611_v49 = vadd.f32 %v1595_v37, %v1481_v38  ;;  %1148 = vperm.xlu0 %3473, %v1491_v58   ;;  %v1217_v37 = vadd.f32 %v1201_v9, %v4397_v22  ;;  %v1067_v22 = vmul.f32 %v4363_v42, %v4476_v29  ;;  %v1091_v29 = vadd.f32 %v1075_v55, %v4313_v16 }
 0x1e0   : > { %v1466_v16 = vmul.f32 %v4410_v36, %v4539_v4 }
 0x1e1   : > { %v1627_v59 = vmax.f32 %v1611_v49, 0.0  ;;  %v1114_v5 = vpop.permute.xlu0 %1113 }
 0x1e2   : > { %1279 = vperm.xlu1 %3475, %v1232_v63   ;;  %v1192_v60 = vmul.f32 %v4373_v10, %v1114_v5 }
 0x1e3   : > { %1696 = vst.msk [vmem:[#allocation3 + $0xf1] sm:$0xff] %vm1631_vm3, %v1627_v59  ;;  %1188 = vperm.xlu2 %3474, %v4487_v0  }
 0x1e4   : > { %v1179_v3 = vpop.permute.xlu1 %1178 }
 0x1e5   : > { %v4553_v46 = vpop.permute.xlu2 %1053  ;;  %v1205_v43 = vmul.f32 %v4373_v10, %v1179_v3 }
 0x1e6   : > { %v1076_v55 = vmul.f32 %v4363_v42, %v4553_v46 }
 0x1e7   : > { %1539 = vperm.xlu0 %3473, %v1492_v61  }
 0x1e9   : > { %v1525_v13 = vpop.permute.xlu0 %1524 }
 0x1ea   : > { %v1587_v0 = vmul.f32 %v4419_v11, %v1525_v13  ;;  %1058 = vperm.xlu1 %3475, %v4469_v34   ;;  %v4551_v1 = vld [vmem:[#allocation3 + $0xf1] sm:$0xff]  ;;  %v1062_v34 = vmul.f32 %v4363_v42, %v4519_v40  ;;  %v1332_v40 = vmul.f32 %v4394_v50, %v4503_v41 }
 0x1eb   : > { %3241 = vmatmul.msk.f32.gmra.mxu3 %vm1631_vm3, %v4551_v1  ;;  %1579 = vperm.xlu2 %3474, %v1500_v19   ;;  %v1083_v19 = vadd.f32 %v1067_v22, %v4231_v28 }
 0x1ec   : > { %v1603_v20 = vadd.f32 %v1587_v0, %v1473_v15  ;;  %v1139_v58 = vpop.permute.xlu1 %1138  ;;  %v1078_v45 = vadd.f32 %v1062_v34, %v4258_v47  ;;  %v1348_v30 = vadd.f32 %v1332_v40, %v1217_v37  ;;  %v3263_v37 = vld [vmem:[%s3773_s9 + $0x58] sm:$0xff] }
 0x1ed   : > { %v1505_v33 = vpop.permute.xlu2 %1504  ;;  %v1197_v53 = vmul.f32 %v4373_v10, %v1139_v58  ;;  %2048 = vmatpush.msrb.mxu2 %v3263_v37 }
 0x1ee   : > { %v1619_v35 = vmax.f32 %v1603_v20, 0.0  ;;  %v1208_v31 = vadd.f32 %v1192_v60, %v1078_v45  ;;  %v1583_v49 = vmul.f32 %v4419_v11, %v1505_v33 }
 0x1ef   : > { %1319 = vperm.xlu0 %3473, %v1240_v27   ;;  %v1213_v27 = vadd.f32 %v1197_v53, %v1083_v19  ;;  %v1718_v19 = vld [vmem:[%s3773_s9 + $0x10] sm:$0xff] }
 0x1f0   : > { %1688 = vst.msk [vmem:[#allocation3 + $0x51] sm:$0xff] %vm1631_vm3, %v1619_v35  ;;  %v1339_v38 = vadd.f32 %v1323_v6, %v1208_v31  ;;  %v1221_v35 = vadd.f32 %v1205_v43, %v1091_v29  ;;  %v3261_v29 = vld [vmem:[%s3773_s9 + $0x48] sm:$0xff] }
 0x1f1   : > { %v1310_v18 = vpop.permute.xlu0 %1309 }
 0x1f2   : > { %1449 = vperm.xlu1 %3475, %v1370_v25   ;;  %v1336_v20 = vmul.f32 %v4394_v50, %v1310_v18 }
 0x1f4   : > { %v1420_v2 = vpop.permute.xlu1 %1419  ;;  %v1352_v28 = vadd.f32 %v1336_v20, %v1221_v35  ;;  %v3260_v20 = vld [vmem:[%s3773_s9 + $0x40] sm:$0xff]  ;;  %v3302_v35 = vld [vmem:[%s3773_s9 + $0x90] sm:$0xff] }
 0x1f5   : > { %v1462_v57 = vmul.f32 %v4410_v36, %v1420_v2  ;;  %v4576_v63 = vpop.permute.xlu2 %1118 }
 0x1f6   : > { %v1482_v45 = vadd.f32 %v1466_v16, %v1352_v28 }
 0x1f7   : > { %v4562_v62 = vld [vmem:[#allocation3 + $0x51] sm:$0xff]  ;;  %v1478_v24 = vadd.f32 %v1462_v57, %v1348_v30  ;;  %v3283_v57 = vld [vmem:[%s3773_s9 + $0x78] sm:$0xff] }
 0x1f8   : > { %3233 = vmatmul.msk.f32.gmra.mxu1 %vm1631_vm3, %v4562_v62  ;;  %2198 = vmatpush.msrb.mxu3 %v3283_v57  ;;  %v1716_v57 = vld [vmem:[%s3773_s9] sm:$0xff] }
 0x1f9   : > { %v1270_v44 = vpop.permute.xlu0 %1269 }
 0x1fa   : > { %v1328_v13 = vmul.f32 %v4394_v50, %v1270_v44 }
 0x1fc   : > { %v1375_v26 = vpop.permute.xlu1 %1374  ;;  %v1344_v58 = vadd.f32 %v1328_v13, %v1213_v27  ;;  %v1092_v13 = vadd.f32 %v1076_v55, %v4266_v39 }
 0x1fd   : > { %v1453_v47 = vmul.f32 %v4410_v36, %v1375_v26  ;;  %v1530_v15 = vpop.permute.xlu2 %1529 }
 0x1fe   : > { %v1588_v34 = vmul.f32 %v4419_v11, %v1530_v15 }
 0x1ff   : > { %v1469_v59 = vadd.f32 %v1453_v47, %v1339_v38 }
 0x201   : > { %v1599_v5 = vadd.f32 %v1583_v49, %v1469_v59  ;;  %v1550_v51 = vpop.permute.xlu0 %1549 }
 0x202   : > { %v1592_v23 = vmul.f32 %v4419_v11, %v1550_v51 }
 0x203   : > { %v1615_v41 = vmax.f32 %v1599_v5, 0.0  ;;  %v1719_v5 = vld [vmem:[%s3773_s9 + $0x18] sm:$0xff] }
 0x204   : > { %v1608_v8 = vadd.f32 %v1592_v23, %v1478_v24  ;;  %v4579_v61 = vpop.permute.xlu1 %988  ;;  %1914 = vmatpush.msrb.mxu1 %v1719_v5  ;;  %v3262_v24 = vld [vmem:[%s3773_s9 + $0x50] sm:$0xff] }
 0x205   : > { %1684 = vst.msk [vmem:[#allocation3 + $0x11] sm:$0xff] %vm1631_vm3, %v1615_v41  ;;  %v1315_v44 = vpop.permute.xlu2 %1314  ;;  %v3282_v23 = vld [vmem:[%s3773_s9 + $0x70] sm:$0xff]  ;;  %v3303_v41 = vld [vmem:[%s3773_s9 + $0x98] sm:$0xff]  ;;  %2049 = vmatpush.msrb.mxu2 %v3262_v24  ;;  %v1063_v46 = vmul.f32 %v4363_v42, %v4579_v61  ;;  %v1717_v61 = vld [vmem:[%s3773_s9 + $0x8] sm:$0xff] }
 0x206   : > { %v1624_v56 = vmax.f32 %v1608_v8, 0.0  ;;  %2199 = vmatpush.msrb.mxu3 %v3282_v23  ;;  %v3281_v8 = vld [vmem:[%s3773_s9 + $0x68] sm:$0xff]  ;;  %2348 = vmatpush.msrb.mxu0 %v3303_v41  ;;  %v1337_v39 = vmul.f32 %v4394_v50, %v1315_v44 }
 0x207   : > { %1915 = vmatpush.msrb.mxu1 %v1718_v19  ;;  %2050 = vmatpush.msrb.mxu2 %v3261_v29  ;;  %v3301_v44 = vld [vmem:[%s3773_s9 + $0x88] sm:$0xff]  ;;  %v3343_v29 = vld [vmem:[%s3773_s9 + $0xd8] sm:$0xff] }
 0x208   : > { %1693 = vst.msk [vmem:[#allocation3 + $0xc1] sm:$0xff] %vm1631_vm3, %v1624_v56  ;;  %2200 = vmatpush.msrb.mxu3 %v3281_v8  ;;  %v3280_v56 = vld [vmem:[%s3773_s9 + $0x60] sm:$0xff]  ;;  %2349 = vmatpush.msrb.mxu0 %v3302_v35 }
 0x209   : > { %v1164_v0 = vpop.permute.xlu0 %1163  ;;  %2051 = vmatpush.msrb.mxu2 %v3260_v20  ;;  %1916 = vmatpush.msrb.mxu1 %v1717_v61  ;;  %v3300_v20 = vld [vmem:[%s3773_s9 + $0x80] sm:$0xff] }
 0x20a   : > { %2201 = vmatpush.msrb.mxu3 %v3280_v56  ;;  %v1202_v27 = vmul.f32 %v4373_v10, %v1164_v0  ;;  %2350 = vmatpush.msrb.mxu0 %v3301_v44  ;;  %v1967_v61 = vld [vmem:[#allocation3 + $0x2] sm:$0xff] }
 0x20b   : > { %1917 = vmatpush.msrb.mxu1 %v1716_v57  ;;  %2649 = vmatpush.msra.mxu2 %v3343_v29 }
 0x20c   : > { %v1400_v48 = vpop.permute.xlu1 %1399  ;;  %v4593_v25 = vld [vmem:[#allocation3 + $0x11] sm:$0xff]  ;;  %2351 = vmatpush.msrb.mxu0 %v3300_v20 }
 0x20d   : > { %v1458_v3 = vmul.f32 %v4410_v36, %v1400_v48  ;;  %3229 = vmatmul.msk.f32.gmra.mxu0 %vm1631_vm3, %v4593_v25  ;;  %v4614_v49 = vpop.permute.xlu2 %1379  ;;  %v2117_v44 = vld [vmem:[#allocation3 + $0x10] sm:$0xff] }
 0x20f   : > { %v1474_v2 = vadd.f32 %v1458_v3, %v1344_v58  ;;  %v4599_v60 = vld [vmem:[#allocation3 + $0xc1] sm:$0xff]  ;;  %v1218_v3 = vadd.f32 %v1202_v27, %v4533_v52  ;;  %v1193_v52 = vmul.f32 %v4373_v10, %v4576_v63  ;;  %v1454_v63 = vmul.f32 %v4410_v36, %v4614_v49 }
 0x210   : > { %3238 = vmatmul.msk.f32.gmra.mxu2 %vm1631_vm3, %v4599_v60 }
 0x211   : > { %v1604_v18 = vadd.f32 %v1588_v34, %v1474_v2  ;;  %v1570_v33 = vpop.permute.xlu0 %1569 }
 0x212   : > { %v1596_v31 = vmul.f32 %v4419_v11, %v1570_v33 }
 0x213   : > { %v1620_v9 = vmax.f32 %v1604_v18, 0.0  ;;  %v1079_v18 = vadd.f32 %v1063_v46, %v4263_v7 }
 0x214   : > { %v1612_v6 = vadd.f32 %v1596_v31, %v1482_v45  ;;  %v4606_v40 = vpop.permute.xlu1 %1013 }
 0x215   : > { %1689 = vst.msk [vmem:[#allocation3 + $0x61] sm:$0xff] %vm1631_vm3, %v1620_v9  ;;  %v4629_v22 = vpop.permute.xlu2 %993  ;;  %v1209_v7 = vadd.f32 %v1193_v52, %v1079_v18 }
 0x216   : > { %v1628_v26 = vmax.f32 %v1612_v6, 0.0 }
 0x218   : > { %1697 = vst.msk [vmem:[#allocation3 + $0x101] sm:$0xff] %vm1631_vm3, %v1628_v26 }
 0x219   : > { %v1184_v4 = vpop.permute.xlu0 %1183 }
 0x21a   : > { %v1206_v43 = vmul.f32 %v4373_v10, %v1184_v4 }
 0x21c   : > { %v1295_v38 = vpop.permute.xlu1 %1294  ;;  %v4610_v47 = vld [vmem:[#allocation3 + $0x61] sm:$0xff]  ;;  %v1222_v48 = vadd.f32 %v1206_v43, %v1092_v13 }
 0x21d   : > { %3234 = vmatmul.msk.f32.gmra.mxu1 %vm1631_vm3, %v4610_v47  ;;  %v1333_v58 = vmul.f32 %v4394_v50, %v1295_v38  ;;  %v1575_v28 = vpop.permute.xlu2 %1574 }
 0x21e   : > { %v1353_v2 = vadd.f32 %v1337_v39, %v1222_v48  ;;  %v1597_v45 = vmul.f32 %v4419_v11, %v1575_v28  ;;  %v3383_v28 = vld [vmem:[%s3773_s9 + $0x118] sm:$0xff] }
 0x21f   : > { %v4618_v59 = vld [vmem:[#allocation3 + $0x101] sm:$0xff]  ;;  %v1349_v33 = vadd.f32 %v1333_v58, %v1218_v3  ;;  %2949 = vmatpush.msra.mxu0 %v3383_v28 }
 0x220   : > { %3242 = vmatmul.msk.f32.gmra.mxu3 %vm1631_vm3, %v4618_v59  ;;  %v3363_v58 = vld [vmem:[%s3773_s9 + $0xf8] sm:$0xff] }
 0x221   : > { %v4622_v30 = vpop.permute.xlu0 %1143  ;;  %2799 = vmatpush.msra.mxu3 %v3363_v58 }
 0x222   : > { %v1198_v56 = vmul.f32 %v4373_v10, %v4622_v30 }
 0x224   : > { %v1250_v51 = vpop.permute.xlu1 %1249 }
 0x225   : > { %v1324_v6 = vmul.f32 %v4394_v50, %v1250_v51  ;;  %v1068_v51 = vmul.f32 %v4363_v42, %v4606_v40  ;;  %v1255_v8 = vpop.permute.xlu2 %1254  ;;  %v1064_v40 = vmul.f32 %v4363_v42, %v4629_v22 }
 0x227   : > { %v1340_v24 = vadd.f32 %v1324_v6, %v1209_v7  ;;  %v1084_v19 = vadd.f32 %v1068_v51, %v4284_v14  ;;  %v3323_v14 = vld [vmem:[%s3773_s9 + $0xb8] sm:$0xff]  ;;  %v4706_v51 = vld [vmem:[#allocation3 + $0x12] sm:$0xff] }
 0x228   : > { %2498 = vmatpush.msra.mxu1 %v3323_v14  ;;  %v3362_v14 = vld [vmem:[%s3773_s9 + $0xf0] sm:$0xff] }
 0x229   : > { %v1425_v53 = vpop.permute.xlu0 %1424  ;;  %v1214_v27 = vadd.f32 %v1198_v56, %v1084_v19  ;;  %2800 = vmatpush.msra.mxu3 %v3362_v14  ;;  %v4869_v14 = vld [vmem:[#allocation3 + $0xf2] sm:$0xff] }
 0x22a   : > { %v1463_v34 = vmul.f32 %v4410_v36, %v1425_v53  ;;  %v1470_v53 = vadd.f32 %v1454_v63, %v1340_v24 }
 0x22c   : > { %v1275_v15 = vpop.permute.xlu1 %1274  ;;  %v1479_v26 = vadd.f32 %v1463_v34, %v1349_v33  ;;  %v1080_v34 = vadd.f32 %v1064_v40, %v4221_v17 }
 0x22d   : > { %v1329_v13 = vmul.f32 %v4394_v50, %v1275_v15 }
 0x22f   : > { %v1345_v39 = vadd.f32 %v1329_v13, %v1214_v27 }
 0x231   : > { %v1445_v0 = vpop.permute.xlu0 %1444 }
 0x232   : > { %v1467_v16 = vmul.f32 %v4410_v36, %v1445_v0 }
 0x234   : > { %v1483_v31 = vadd.f32 %v1467_v16, %v1353_v2  ;;  %v1555_v9 = vpop.permute.xlu1 %1554  ;;  %v1019_v16 = vpop.permute.xlu2 %1018 }
 0x235   : > { %v1593_v4 = vmul.f32 %v4419_v11, %v1555_v9  ;;  %v1069_v7 = vmul.f32 %v4363_v42, %v1019_v16 }
 0x236   : > { %v1613_v38 = vadd.f32 %v1597_v45, %v1483_v31  ;;  %v1325_v45 = vmul.f32 %v4394_v50, %v1255_v8 }
 0x237   : > { %v1609_v37 = vadd.f32 %v1593_v4, %v1479_v26  ;;  %v1085_v8 = vadd.f32 %v1069_v7, %v4289_v54  ;;  %v1700_v54 = vld [vmem:[#allocation3] sm:$0xff]  ;;  %v3321_v7 = vld [vmem:[%s3773_s9 + $0xa8] sm:$0xff] }
 0x238   : > { %v1629_v5 = vmax.f32 %v1613_v38, 0.0 }
 0x239   : > { %v1625_v23 = vmax.f32 %v1609_v37, 0.0  ;;  %v1405_v41 = vpop.permute.xlu0 %1404 }
 0x23a   : > { %1698 = vst.msk [vmem:[#allocation3 + $0x111] sm:$0xff] %vm1631_vm3, %v1629_v5  ;;  %v1459_v35 = vmul.f32 %v4410_v36, %v1405_v41 }
 0x23b   : > { %1694 = vst.msk [vmem:[#allocation3 + $0xd1] sm:$0xff] %vm1631_vm3, %v1625_v23 }
 0x23c   : > { %v1510_v55 = vpop.permute.xlu1 %1509  ;;  %v1475_v0 = vadd.f32 %v1459_v35, %v1345_v39  ;;  %v1410_v57 = vpop.permute.xlu2 %1409  ;;  %v3322_v39 = vld [vmem:[%s3773_s9 + $0xb0] sm:$0xff] }
 0x23d   : > { %v1584_v43 = vmul.f32 %v4419_v11, %v1510_v55  ;;  %v1460_v19 = vmul.f32 %v4410_v36, %v1410_v57  ;;  %2499 = vmatpush.msra.mxu1 %v3322_v39  ;;  %v4871_v39 = vld [vmem:[#allocation3 + $0x100] sm:$0xff] }
 0x23f   : > { %v1600_v49 = vadd.f32 %v1584_v43, %v1470_v53  ;;  %v3342_v43 = vld [vmem:[%s3773_s9 + $0xd0] sm:$0xff]  ;;  %2500 = vmatpush.msra.mxu1 %v3321_v7 }
 0x240   : > { %2650 = vmatpush.msra.mxu2 %v3342_v43  ;;  %v4827_v43 = vld [vmem:[#allocation3 + $0xc2] sm:$0xff] }
 0x241   : > { %v1616_v48 = vmax.f32 %v1600_v49, 0.0  ;;  %v1124_v30 = vpop.permute.xlu0 %1123  ;;  %v4673_v46 = vld [vmem:[#allocation3 + $0x111] sm:$0xff] }
 0x242   : > { %3243 = vmatmul.msk.f32.gmra.mxu3 %vm1631_vm3, %v4673_v46  ;;  %v4679_v15 = vld [vmem:[#allocation3 + $0xd1] sm:$0xff]  ;;  %v1194_v22 = vmul.f32 %v4373_v10, %v1124_v30 }
 0x243   : > { %1685 = vst.msk [vmem:[#allocation3 + $0x21] sm:$0xff] %vm1631_vm3, %v1616_v48  ;;  %3239 = vmatmul.msk.f32.gmra.mxu2 %vm1631_vm3, %v4679_v15 }
 0x244   : > { %v1535_v3 = vpop.permute.xlu1 %1534  ;;  %v1210_v18 = vadd.f32 %v1194_v22, %v1080_v34  ;;  %v1189_v20 = vpop.permute.xlu2 %1188 }
 0x245   : > { %v1589_v2 = vmul.f32 %v4419_v11, %v1535_v3  ;;  %v1207_v28 = vmul.f32 %v4373_v10, %v1189_v20  ;;  %v3380_v20 = vld [vmem:[%s3773_s9 + $0x100] sm:$0xff] }
 0x246   : > { %v1341_v17 = vadd.f32 %v1325_v45, %v1210_v18 }
 0x247   : > { %v1605_v33 = vadd.f32 %v1589_v2, %v1475_v0 }
 0x249   : > { %v1621_v31 = vmax.f32 %v1605_v33, 0.0  ;;  %v1385_v9 = vpop.permute.xlu0 %1384  ;;  %v4741_v33 = vld [vmem:[#allocation3 + $0x40] sm:$0xff] }
 0x24a   : > { %v1455_v52 = vmul.f32 %v4410_v36, %v1385_v9  ;;  %3284 = vmatmul.msk.f32.vlgmr.msrb.gmra.mxu3 %vm1631_vm3, %v2117_v44  ;;  %v4691_v6 = vld [vmem:[#allocation3 + $0x21] sm:$0xff] }
 0x24b   : > { %1690 = vst.msk [vmem:[#allocation3 + $0x71] sm:$0xff] %vm1631_vm3, %v1621_v31  ;;  %3230 = vmatmul.msk.f32.gmra.mxu0 %vm1631_vm3, %v4691_v6  ;;  %3264 = vmatmul.msk.f32.vlgmr.msrb.gmra.mxu2 %vm1631_vm3, %v1967_v61  ;;  %v4699_v23 = vld [vmem:[#allocation3 + $0x20] sm:$0xff] }
 0x24c   : > { %v1515_v26 = vpop.permute.xlu1 %1514  ;;  %v1471_v4 = vadd.f32 %v1455_v52, %v1341_v17  ;;  %v4725_v48 = vld [vmem:[#allocation3 + $0x22] sm:$0xff]  ;;  %v4756_v52 = vld [vmem:[#allocation3 + $0x50] sm:$0xff] }
 0x24d   : > { %v1585_v38 = vmul.f32 %v4419_v11, %v1515_v26  ;;  %v3341_v17 = vld [vmem:[%s3773_s9 + $0xc8] sm:$0xff]  ;;  %v4780_v26 = vld [vmem:[#allocation3 + $0x62] sm:$0xff] }
 0x24e   : > { %2651 = vmatpush.msra.mxu2 %v3341_v17 }
 0x24f   : > { %v1601_v37 = vadd.f32 %v1585_v38, %v1471_v4  ;;  %v3361_v38 = vld [vmem:[%s3773_s9 + $0xe8] sm:$0xff] }
 0x250   : > { %2801 = vmatpush.msra.mxu3 %v3361_v38 }
 0x251   : > { %v1617_v5 = vmax.f32 %v1601_v37, 0.0  ;;  %v1149_v24 = vpop.permute.xlu0 %1148 }
 0x252   : > { %v1199_v41 = vmul.f32 %v4373_v10, %v1149_v24  ;;  %3285 = vmatmul.msk.f32.gmra.mxu3 %vm1631_vm3, %v4699_v23  ;;  %v4704_v63 = vld [vmem:[#allocation3 + $0x71] sm:$0xff] }
 0x253   : > { %1686 = vst.msk [vmem:[#allocation3 + $0x31] sm:$0xff] %vm1631_vm3, %v1617_v5  ;;  %3235 = vmatmul.msk.f32.gmra.mxu1 %vm1631_vm3, %v4704_v63  ;;  %3265 = vmatmul.msk.f32.gmra.mxu2 %vm1631_vm3, %v4706_v51  ;;  %v3382_v10 = vld [vmem:[%s3773_s9 + $0x110] sm:$0xff]  ;;  %v1975_v5 = vld [vmem:[#allocation3 + $0xa2] sm:$0xff] }
 0x254   : > { %v1280_v55 = vpop.permute.xlu1 %1279  ;;  %v1215_v56 = vadd.f32 %v1199_v41, %v1085_v8  ;;  %2950 = vmatpush.msra.mxu0 %v3382_v10  ;;  %v4782_v4 = vld [vmem:[#allocation3 + $0x70] sm:$0xff]  ;;  %v4815_v8 = vld [vmem:[#allocation3 + $0xc0] sm:$0xff] }
 0x255   : > { %v1330_v53 = vmul.f32 %v4394_v50, %v1280_v55  ;;  %v4794_v37 = vld [vmem:[#allocation3 + $0x72] sm:$0xff]  ;;  %v3340_v55 = vld [vmem:[%s3773_s9 + $0xc0] sm:$0xff] }
 0x256   : > { %v2125_v24 = vld [vmem:[#allocation3 + $0xb0] sm:$0xff]  ;;  %2652 = vmatpush.msra.mxu2 %v3340_v55 }
 0x257   : > { %v1346_v13 = vadd.f32 %v1330_v53, %v1215_v56  ;;  %v4813_v41 = vld [vmem:[#allocation3 + $0xb2] sm:$0xff]  ;;  %v1708_v56 = vld [vmem:[#allocation3 + $0xa0] sm:$0xff] }
 0x259   : > { %v1476_v49 = vadd.f32 %v1460_v19, %v1346_v13  ;;  %v1540_v29 = vpop.permute.xlu0 %1539  ;;  %v4829_v19 = vld [vmem:[#allocation3 + $0xd0] sm:$0xff]  ;;  %v3360_v13 = vld [vmem:[%s3773_s9 + $0xe0] sm:$0xff] }
 0x25a   : > { %v1590_v40 = vmul.f32 %v4419_v11, %v1540_v29  ;;  %v4718_v27 = vld [vmem:[#allocation3 + $0x31] sm:$0xff]  ;;  %2802 = vmatpush.msra.mxu3 %v3360_v13  ;;  %v4842_v29 = vld [vmem:[#allocation3 + $0xe0] sm:$0xff] }
 0x25b   : > { %v4720_v35 = vld [vmem:[#allocation3 + $0x30] sm:$0xff]  ;;  %3231 = vmatmul.msk.f32.gmra.mxu0 %vm1631_vm3, %v4718_v27  ;;  %3244 = vmatmul.msk.f32.vlgmr.msrb.gmra.mxu1 %vm1631_vm3, %v1700_v54  ;;  %v3320_v54 = vld [vmem:[%s3773_s9 + $0xa0] sm:$0xff] }
 0x25c   : > { %v1606_v30 = vadd.f32 %v1590_v40, %v1476_v49  ;;  %3266 = vmatmul.msk.f32.gmra.mxu2 %vm1631_vm3, %v4725_v48  ;;  %3286 = vmatmul.msk.f32.gmra.mxu3 %vm1631_vm3, %v4720_v35  ;;  %v1059_v58 = vpop.permute.xlu1 %1058  ;;  %v4739_v18 = vld [vmem:[#allocation3 + $0x32] sm:$0xff]  ;;  %v4853_v40 = vld [vmem:[#allocation3 + $0xe2] sm:$0xff] }
 0x25d   : > { %v1077_v22 = vmul.f32 %v4363_v42, %v1059_v58  ;;  %v1580_v42 = vpop.permute.xlu2 %1579  ;;  %2501 = vmatpush.msra.mxu1 %v3320_v54  ;;  %v4840_v49 = vld [vmem:[#allocation3 + $0xd2] sm:$0xff]  ;;  %v4859_v58 = vpop.f32.mrf.mxu2 }
 0x25e   : > { %v1622_v3 = vmax.f32 %v1606_v30, 0.0  ;;  %v1598_v45 = vmul.f32 %v4419_v11, %v1580_v42  ;;  %v4769_v11 = vld [vmem:[#allocation3 + $0x60] sm:$0xff]  ;;  %v4855_v30 = vld [vmem:[#allocation3 + $0xf0] sm:$0xff]  ;;  %v1806_v42 = vpop.f32.mrf.mxu0 }
 0x25f   : > { %v1093_v34 = vadd.f32 %v1077_v22, %v4328_v21 }
 0x260   : > { %1691 = vst.msk [vmem:[#allocation3 + $0x81] sm:$0xff] %vm1631_vm3, %v1622_v3 }
 0x261   : > { %v1223_v0 = vadd.f32 %v1207_v28, %v1093_v34  ;;  %v1320_v2 = vpop.permute.xlu0 %1319  ;;  %v4883_v28 = vpop.f32.mrf.mxu1  ;;  %v4885_v34 = vld [vmem:[#allocation3 + $0xe1] sm:$0xff] }
 0x262   : > { %v1338_v16 = vmul.f32 %v4394_v50, %v1320_v2  ;;  %v4891_v2 = vld [vmem:[#allocation3 + $0x110] sm:$0xff] }
 0x263   : > { %3245 = vmatmul.msk.f32.gmra.mxu1 %vm1631_vm3, %v2117_v44  ;;  %3304 = vmatmul.msk.f32.vlgmr.msrb.gmra.mxu0 %vm1631_vm3, %v4593_v25  ;;  %v4754_v25 = vld [vmem:[#allocation3 + $0x42] sm:$0xff] }
 0x264   : > { %3267 = vmatmul.msk.f32.gmra.mxu2 %vm1631_vm3, %v4739_v18  ;;  %3287 = vmatmul.msk.f32.gmra.mxu3 %vm1631_vm3, %v4741_v33  ;;  %v1450_v21 = vpop.permute.xlu1 %1449  ;;  %v1354_v61 = vadd.f32 %v1338_v16, %v1223_v0  ;;  %v4889_v0 = vld [vmem:[#allocation3 + $0x102] sm:$0xff] }
 0x265   : > { %v1468_v50 = vmul.f32 %v4410_v36, %v1450_v21  ;;  %v4767_v36 = vld [vmem:[#allocation3 + $0x52] sm:$0xff]  ;;  %v4881_v3 = vpop.f32.mrf.mxu2 }
 0x267   : > { %v1484_v31 = vadd.f32 %v1468_v50, %v1354_v61  ;;  %v4796_v57 = vld [vmem:[#allocation3 + $0x80] sm:$0xff]  ;;  %v4907_v61 = vld [vmem:[#allocation3 + $0x112] sm:$0xff] }
 0x268   : > { %v4824_v53 = vld [vmem:[#allocation3 + $0x81] sm:$0xff] }
 0x269   : > { %v1614_v9 = vadd.f32 %v1598_v45, %v1484_v31 }
 0x26b   : > { %v1630_v44 = vmax.f32 %v1614_v9, 0.0  ;;  %3246 = vmatmul.msk.f32.gmra.mxu1 %vm1631_vm3, %v4699_v23  ;;  %3305 = vmatmul.msk.f32.gmra.mxu0 %vm1631_vm3, %v4691_v6 }
 0x26c   : > { %3268 = vmatmul.msk.f32.gmra.mxu2 %vm1631_vm3, %v4754_v25  ;;  %3288 = vmatmul.msk.f32.gmra.mxu3 %vm1631_vm3, %v4756_v52 }
 0x26d   : > { %1699 = vst.msk [vmem:[#allocation3 + $0x121] sm:$0xff] %vm1631_vm3, %v1630_v44 }
 0x273   : > { %3247 = vmatmul.msk.f32.gmra.mxu1 %vm1631_vm3, %v4720_v35  ;;  %3306 = vmatmul.msk.f32.gmra.mxu0 %vm1631_vm3, %v4718_v27 }
 0x274   : > { %3269 = vmatmul.msk.f32.gmra.mxu2 %vm1631_vm3, %v4767_v36  ;;  %3289 = vmatmul.msk.f32.gmra.mxu3 %vm1631_vm3, %v4769_v11  ;;  %v4909_v50 = vld [vmem:[#allocation3 + $0x120] sm:$0xff] }
 0x275   : > { %v4903_v10 = vpop.f32.mrf.mxu1 }
 0x27b   : > { %3248 = vmatmul.msk.f32.gmra.mxu1 %vm1631_vm3, %v4741_v33  ;;  %3307 = vmatmul.msk.f32.gmra.mxu0 %vm1631_vm3, %v4510_v32  ;;  %v3381_v32 = vld [vmem:[%s3773_s9 + $0x108] sm:$0xff] }
 0x27c   : > { %3270 = vmatmul.msk.f32.gmra.mxu2 %vm1631_vm3, %v4780_v26  ;;  %3290 = vmatmul.msk.f32.gmra.mxu3 %vm1631_vm3, %v4782_v4 }
 0x27d   : > { %2951 = vmatpush.msra.mxu0 %v3381_v32 }
 0x27f   : > { %2952 = vmatpush.msra.mxu0 %v3380_v20 }
 0x283   : > { %3249 = vmatmul.msk.f32.gmra.mxu1 %vm1631_vm3, %v4756_v52  ;;  %3308 = vmatmul.msk.f32.gmra.mxu0 %vm1631_vm3, %v4562_v62 }
 0x284   : > { %3271 = vmatmul.msk.f32.gmra.mxu2 %vm1631_vm3, %v4794_v37  ;;  %3291 = vmatmul.msk.f32.gmra.mxu3 %vm1631_vm3, %v4796_v57 }
 0x28a   : > { %v1809_v9 = vpop.f32.mrf.mxu0 }
 0x28b   : > { %3250 = vmatmul.msk.f32.gmra.mxu1 %vm1631_vm3, %v4769_v11  ;;  %3309 = vmatmul.msk.f32.gmra.mxu0 %vm1631_vm3, %v4610_v47 }
 0x28c   : > { %3272 = vmatmul.msk.f32.gmra.mxu2 %vm1631_vm3, %v1975_v5  ;;  %3292 = vmatmul.msk.f32.gmra.mxu3 %vm1631_vm3, %v2125_v24 }
 0x293   : > { %3251 = vmatmul.msk.f32.gmra.mxu1 %vm1631_vm3, %v4782_v4  ;;  %3310 = vmatmul.msk.f32.gmra.mxu0 %vm1631_vm3, %v4704_v63  ;;  %v4901_v21 = vpop.f32.mrf.mxu2 }
 0x294   : > { %3273 = vmatmul.msk.f32.gmra.mxu2 %vm1631_vm3, %v4813_v41  ;;  %3293 = vmatmul.msk.f32.gmra.mxu3 %vm1631_vm3, %v4815_v8 }
 0x29a   : > { %v4921_v44 = vpop.f32.mrf.mxu1 }
 0x29b   : > { %3252 = vmatmul.msk.f32.gmra.mxu1 %vm1631_vm3, %v1708_v56  ;;  %3311 = vmatmul.msk.f32.gmra.mxu0 %vm1631_vm3, %v4824_v53  ;;  %v2720_v56 = vld [vmem:[#allocation3 + $0x41] sm:$0xff] }
 0x29c   : > { %3274 = vmatmul.msk.f32.gmra.mxu2 %vm1631_vm3, %v4827_v43  ;;  %3294 = vmatmul.msk.f32.gmra.mxu3 %vm1631_vm3, %v4829_v19 }
 0x2a3   : > { %3253 = vmatmul.msk.f32.gmra.mxu1 %vm1631_vm3, %v2125_v24  ;;  %3312 = vmatmul.msk.f32.gmra.mxu0 %vm1631_vm3, %v4523_v12  ;;  %v4865_v12 = vpop.f32.mrf.mxu3  ;;  %v4941_v24 = vld [vmem:[#allocation3 + $0x121] sm:$0xff] }
 0x2a4   : > { %3275 = vmatmul.msk.f32.gmra.mxu2 %vm1631_vm3, %v4840_v49  ;;  %3295 = vmatmul.msk.f32.gmra.mxu3 %vm1631_vm3, %v4842_v29 }
 0x2ab   : > { %3254 = vmatmul.msk.f32.gmra.mxu1 %vm1631_vm3, %v4815_v8  ;;  %3313 = vmatmul.msk.f32.gmra.mxu0 %vm1631_vm3, %v4599_v60  ;;  %v4879_v22 = vpop.f32.mrf.mxu3 }
 0x2ac   : > { %3276 = vmatmul.msk.f32.gmra.mxu2 %vm1631_vm3, %v4853_v40  ;;  %3296 = vmatmul.msk.f32.gmra.mxu3 %vm1631_vm3, %v4855_v30 }
 0x2b3   : > { %3255 = vmatmul.msk.f32.gmra.mxu1 %vm1631_vm3, %v4829_v19  ;;  %3314 = vmatmul.msk.f32.gmra.mxu0 %vm1631_vm3, %v4679_v15  ;;  %v4899_v16 = vpop.f32.mrf.mxu3 }
 0x2b4   : > { %3277 = vmatmul.msk.f32.gmra.mxu2 %vm1631_vm3, %v4869_v14  ;;  %3297 = vmatmul.msk.f32.gmra.mxu3 %vm1631_vm3, %v4871_v39 }
 0x2bb   : > { %3256 = vmatmul.msk.f32.gmra.mxu1 %vm1631_vm3, %v4842_v29  ;;  %3315 = vmatmul.msk.f32.gmra.mxu0 %vm1631_vm3, %v4885_v34 }
 0x2bc   : > { %3278 = vmatmul.msk.f32.gmra.mxu2 %vm1631_vm3, %v4889_v0  ;;  %3298 = vmatmul.msk.f32.gmra.mxu3 %vm1631_vm3, %v4891_v2 }
 0x2c3   : > { %3257 = vmatmul.msk.f32.gmra.mxu1 %vm1631_vm3, %v4855_v30  ;;  %3316 = vmatmul.msk.f32.gmra.mxu0 %vm1631_vm3, %v4551_v1 }
 0x2c4   : > { %3279 = vmatmul.msk.f32.gmra.mxu2 %vm1631_vm3, %v4907_v61  ;;  %3299 = vmatmul.msk.f32.gmra.mxu3 %vm1631_vm3, %v4909_v50 }
 0x2c5   : > { %v4917_v45 = vpop.f32.mrf.mxu3 }
 0x2c6   : > { %v4919_v31 = vpop.f32.mrf.mxu2 }
 0x2c8   : > { %v1812_v38 = vpop.f32.mrf.mxu0 }
 0x2cb   : > { %3258 = vmatmul.msk.f32.gmra.mxu1 %vm1631_vm3, %v4871_v39  ;;  %3317 = vmatmul.msk.f32.gmra.mxu0 %vm1631_vm3, %v4618_v59 }
 0x2cc   : > { %3344 = vmatmul.msk.f32.vlgmr.msra.gmra.mxu2 %vm1631_vm3, %v4699_v23  ;;  %3364 = vmatmul.msk.f32.vlgmr.msra.gmra.mxu3 %vm1631_vm3, %v4691_v6 }
 0x2cd   : > { %v2203_v1 = vpop.f32.mrf.mxu3 }
 0x2ce   : > { %v2053_v17 = vpop.f32.mrf.mxu2 }
 0x2d0   : > { %v4931_v7 = vpop.f32.mrf.mxu1 }
 0x2d3   : > { %3259 = vmatmul.msk.f32.gmra.mxu1 %vm1631_vm3, %v4891_v2  ;;  %3318 = vmatmul.msk.f32.gmra.mxu0 %vm1631_vm3, %v4673_v46 }
 0x2d4   : > { %3345 = vmatmul.msk.f32.gmra.mxu2 %vm1631_vm3, %v4720_v35  ;;  %3365 = vmatmul.msk.f32.gmra.mxu3 %vm1631_vm3, %v4718_v27 }
 0x2d5   : > { %v2206_v23 = vpop.f32.mrf.mxu3 }
 0x2d6   : > { %v2056_v59 = vpop.f32.mrf.mxu2 }
 0x2d8   : > { %v1815_v6 = vpop.f32.mrf.mxu0  ;;  %v1919_v32 = vpop.f32.mrf.mxu1 }
 0x2d9   : > { %v1920_v5 = vadd.f32 %v1919_v32, %v1806_v42 }
 0x2db   : > { %v2101_v55 = vadd.f32 %v2053_v17, %v1920_v5  ;;  %3319 = vmatmul.msk.f32.gmra.mxu0 %vm1631_vm3, %v4941_v24  ;;  %3324 = vmatmul.msk.f32.vlgmr.msra.gmra.mxu1 %vm1631_vm3, %v4706_v51 }
 0x2dc   : > { %3346 = vmatmul.msk.f32.gmra.mxu2 %vm1631_vm3, %v4741_v33  ;;  %3366 = vmatmul.msk.f32.gmra.mxu3 %vm1631_vm3, %v2720_v56 }
 0x2dd   : > { %v4950_v27 = vadd.f32 %v2203_v1, %v2101_v55 }
 0x2df   : > { %v2059_v35 = vpop.f32.mrf.mxu2  ;;  %v2209_v13 = vpop.f32.mrf.mxu3 }
 0x2e0   : > { %v1922_v54 = vpop.f32.mrf.mxu1  ;;  %v4952_v20 = vpop.f32.mrf.mxu0 }
 0x2e1   : > { %v1923_v42 = vadd.f32 %v1922_v54, %v1809_v9 }
 0x2e3   : > { %v2102_v17 = vadd.f32 %v2056_v59, %v1923_v42  ;;  %3325 = vmatmul.msk.f32.gmra.mxu1 %vm1631_vm3, %v4725_v48  ;;  %3384 = vmatmul.msk.f32.vlgmr.msra.gmra.mxu0 %vm1631_vm3, %v4725_v48 }
 0x2e4   : > { %3347 = vmatmul.msk.f32.gmra.mxu2 %vm1631_vm3, %v4756_v52  ;;  %3367 = vmatmul.msk.f32.gmra.mxu3 %vm1631_vm3, %v4562_v62 }
 0x2e5   : > { %v4963_v51 = vadd.f32 %v2206_v23, %v2102_v17 }
 0x2e7   : > { %v2062_v33 = vpop.f32.mrf.mxu2  ;;  %v2212_v1 = vpop.f32.mrf.mxu3 }
 0x2e8   : > { %v1925_v32 = vpop.f32.mrf.mxu1  ;;  %v4965_v9 = vpop.f32.mrf.mxu0 }
 0x2e9   : > { %v1926_v59 = vadd.f32 %v1925_v32, %v1812_v38 }
 0x2eb   : > { %v2103_v5 = vadd.f32 %v2059_v35, %v1926_v59  ;;  %3326 = vmatmul.msk.f32.gmra.mxu1 %vm1631_vm3, %v4739_v18  ;;  %3385 = vmatmul.msk.f32.gmra.mxu0 %vm1631_vm3, %v4739_v18 }
 0x2ec   : > { %3348 = vmatmul.msk.f32.gmra.mxu2 %vm1631_vm3, %v4769_v11  ;;  %3368 = vmatmul.msk.f32.gmra.mxu3 %vm1631_vm3, %v4610_v47 }
 0x2ed   : > { %v4975_v62 = vadd.f32 %v2209_v13, %v2103_v5 }
 0x2ef   : > { %v2065_v48 = vpop.f32.mrf.mxu2  ;;  %v2215_v52 = vpop.f32.mrf.mxu3 }
 0x2f0   : > { %v1928_v23 = vpop.f32.mrf.mxu1  ;;  %v4977_v55 = vpop.f32.mrf.mxu0 }
 0x2f1   : > { %v1929_v38 = vadd.f32 %v1928_v23, %v1815_v6 }
 0x2f3   : > { %v2104_v56 = vadd.f32 %v2062_v33, %v1929_v38  ;;  %3327 = vmatmul.msk.f32.gmra.mxu1 %vm1631_vm3, %v4754_v25  ;;  %3386 = vmatmul.msk.f32.gmra.mxu0 %vm1631_vm3, %v4754_v25  ;;  %v2575_v33 = vld [vmem:[#allocation3 + $0x90] sm:$0xff] }
 0x2f4   : > { %3349 = vmatmul.msk.f32.gmra.mxu2 %vm1631_vm3, %v4782_v4  ;;  %3369 = vmatmul.msk.f32.gmra.mxu3 %vm1631_vm3, %v4704_v63 }
 0x2f5   : > { %v4987_v47 = vadd.f32 %v2212_v1, %v2104_v56  ;;  %v2725_v1 = vld [vmem:[#allocation3 + $0x91] sm:$0xff] }
 0x2f7   : > { %v2068_v18 = vpop.f32.mrf.mxu2  ;;  %v2218_v11 = vpop.f32.mrf.mxu3 }
 0x2f8   : > { %v1931_v35 = vpop.f32.mrf.mxu1  ;;  %v4989_v13 = vpop.f32.mrf.mxu0 }
 0x2f9   : > { %v1932_v6 = vadd.f32 %v1931_v35, %v4883_v28 }
 0x2fb   : > { %v2105_v54 = vadd.f32 %v2065_v48, %v1932_v6  ;;  %3328 = vmatmul.msk.f32.gmra.mxu1 %vm1631_vm3, %v4767_v36  ;;  %3387 = vmatmul.msk.f32.gmra.mxu0 %vm1631_vm3, %v4767_v36 }
 0x2fc   : > { %3350 = vmatmul.msk.f32.gmra.mxu2 %vm1631_vm3, %v4796_v57  ;;  %3370 = vmatmul.msk.f32.gmra.mxu3 %vm1631_vm3, %v4824_v53 }
 0x2fd   : > { %v5000_v63 = vadd.f32 %v2215_v52, %v2105_v54 }
 0x2ff   : > { %v2071_v25 = vpop.f32.mrf.mxu2  ;;  %v2221_v4 = vpop.f32.mrf.mxu3 }
 0x300   : > { %v1934_v42 = vpop.f32.mrf.mxu1  ;;  %v5002_v17 = vpop.f32.mrf.mxu0 }
 0x301   : > { %v1935_v28 = vadd.f32 %v1934_v42, %v4903_v10 }
 0x303   : > { %v2106_v32 = vadd.f32 %v2068_v18, %v1935_v28  ;;  %3329 = vmatmul.msk.f32.gmra.mxu1 %vm1631_vm3, %v4780_v26  ;;  %3388 = vmatmul.msk.f32.gmra.mxu0 %vm1631_vm3, %v4780_v26  ;;  %v2424_v18 = vld [vmem:[#allocation3 + $0x82] sm:$0xff] }
 0x304   : > { %3351 = vmatmul.msk.f32.gmra.mxu2 %vm1631_vm3, %v2575_v33  ;;  %3371 = vmatmul.msk.f32.gmra.mxu3 %vm1631_vm3, %v2725_v1 }
 0x305   : > { %v5011_v36 = vadd.f32 %v2218_v11, %v2106_v32 }
 0x307   : > { %v2074_v57 = vpop.f32.mrf.mxu2  ;;  %v2224_v53 = vpop.f32.mrf.mxu3 }
 0x308   : > { %v1937_v59 = vpop.f32.mrf.mxu1  ;;  %v5013_v5 = vpop.f32.mrf.mxu0 }
 0x309   : > { %v1938_v10 = vadd.f32 %v1937_v59, %v4921_v44 }
 0x30b   : > { %v2107_v48 = vadd.f32 %v2071_v25, %v1938_v10  ;;  %3330 = vmatmul.msk.f32.gmra.mxu1 %vm1631_vm3, %v4794_v37  ;;  %3389 = vmatmul.msk.f32.gmra.mxu0 %vm1631_vm3, %v4794_v37 }
 0x30c   : > { %3352 = vmatmul.msk.f32.gmra.mxu2 %vm1631_vm3, %v4815_v8  ;;  %3372 = vmatmul.msk.f32.gmra.mxu3 %vm1631_vm3, %v4599_v60 }
 0x30d   : > { %v5024_v26 = vadd.f32 %v2221_v4, %v2107_v48  ;;  %v2730_v48 = vld [vmem:[#allocation3 + $0x101] sm:$0xff] }
 0x30f   : > { %v2077_v52 = vpop.f32.mrf.mxu2  ;;  %v2227_v23 = vpop.f32.mrf.mxu3 }
 0x310   : > { %v1940_v38 = vpop.f32.mrf.mxu1  ;;  %v5026_v56 = vpop.f32.mrf.mxu0 }
 0x311   : > { %v1941_v44 = vadd.f32 %v1940_v38, %v4931_v7  ;;  %v2875_v7 = vld [vmem:[#allocation3 + $0x92] sm:$0xff] }
 0x313   : > { %v2108_v11 = vadd.f32 %v2074_v57, %v1941_v44  ;;  %3331 = vmatmul.msk.f32.gmra.mxu1 %vm1631_vm3, %v2424_v18  ;;  %3390 = vmatmul.msk.f32.gmra.mxu0 %vm1631_vm3, %v2424_v18 }
 0x314   : > { %3353 = vmatmul.msk.f32.gmra.mxu2 %vm1631_vm3, %v4829_v19  ;;  %3373 = vmatmul.msk.f32.gmra.mxu3 %vm1631_vm3, %v4679_v15 }
 0x315   : > { %v5035_v60 = vadd.f32 %v2224_v53, %v2108_v11 }
 0x317   : > { %v2080_v37 = vpop.f32.mrf.mxu2  ;;  %v2230_v8 = vpop.f32.mrf.mxu3 }
 0x318   : > { %v1943_v35 = vpop.f32.mrf.mxu1  ;;  %v5037_v6 = vpop.f32.mrf.mxu0 }
 0x319   : > { %v1944_v54 = vadd.f32 %v1943_v35, %v4859_v58 }
 0x31b   : > { %v2109_v25 = vadd.f32 %v2077_v52, %v1944_v54  ;;  %3332 = vmatmul.msk.f32.gmra.mxu1 %vm1631_vm3, %v4813_v41  ;;  %3391 = vmatmul.msk.f32.gmra.mxu0 %vm1631_vm3, %v2875_v7  ;;  %v2729_v41 = vld [vmem:[#allocation3 + $0xf1] sm:$0xff] }
 0x31c   : > { %3354 = vmatmul.msk.f32.gmra.mxu2 %vm1631_vm3, %v4842_v29  ;;  %3374 = vmatmul.msk.f32.gmra.mxu3 %vm1631_vm3, %v4885_v34 }
 0x31d   : > { %v2259_v15 = vadd.f32 %v2227_v23, %v2109_v25 }
 0x31f   : > { %v2083_v19 = vpop.f32.mrf.mxu2  ;;  %v2233_v4 = vpop.f32.mrf.mxu3 }
 0x320   : > { %v1946_v42 = vpop.f32.mrf.mxu1  ;;  %v2377_v28 = vpop.f32.mrf.mxu0 }
 0x321   : > { %v1947_v33 = vadd.f32 %v1946_v42, %v4881_v3  ;;  %v5048_v58 = vadd.f32 %v2377_v28, %v2259_v15 }
 0x323   : > { %v2110_v1 = vadd.f32 %v2080_v37, %v1947_v33  ;;  %3333 = vmatmul.msk.f32.gmra.mxu1 %vm1631_vm3, %v4827_v43  ;;  %3392 = vmatmul.msk.f32.gmra.mxu0 %vm1631_vm3, %v4827_v43 }
 0x324   : > { %3355 = vmatmul.msk.f32.gmra.mxu2 %vm1631_vm3, %v4855_v30  ;;  %3375 = vmatmul.msk.f32.gmra.mxu3 %vm1631_vm3, %v2729_v41 }
 0x325   : > { %v2260_v29 = vadd.f32 %v2230_v8, %v2110_v1 }
 0x327   : > { %v2086_v34 = vpop.f32.mrf.mxu2  ;;  %v2236_v32 = vpop.f32.mrf.mxu3 }
 0x328   : > { %v1949_v57 = vpop.f32.mrf.mxu1  ;;  %v2380_v3 = vpop.f32.mrf.mxu0 }
 0x329   : > { %v1950_v53 = vadd.f32 %v1949_v57, %v4901_v21  ;;  %v5058_v59 = vadd.f32 %v2380_v3, %v2260_v29 }
 0x32b   : > { %v2111_v10 = vadd.f32 %v2083_v19, %v1950_v53  ;;  %3334 = vmatmul.msk.f32.gmra.mxu1 %vm1631_vm3, %v4840_v49  ;;  %3393 = vmatmul.msk.f32.gmra.mxu0 %vm1631_vm3, %v4840_v49  ;;  %v2583_v19 = vld [vmem:[#allocation3 + $0x130] sm:$0xff] }
 0x32c   : > { %3356 = vmatmul.msk.f32.gmra.mxu2 %vm1631_vm3, %v4871_v39  ;;  %3376 = vmatmul.msk.f32.gmra.mxu3 %vm1631_vm3, %v2730_v48 }
 0x32d   : > { %v2261_v43 = vadd.f32 %v2233_v4, %v2111_v10  ;;  %v2733_v4 = vld [vmem:[#allocation3 + $0x131] sm:$0xff]  ;;  %v2432_v10 = vld [vmem:[#allocation3 + $0x122] sm:$0xff] }
 0x32f   : > { %v2089_v30 = vpop.f32.mrf.mxu2  ;;  %v2239_v52 = vpop.f32.mrf.mxu3 }
 0x330   : > { %v1952_v23 = vpop.f32.mrf.mxu1  ;;  %v2383_v21 = vpop.f32.mrf.mxu0 }
 0x331   : > { %v1953_v38 = vadd.f32 %v1952_v23, %v4919_v31  ;;  %v5068_v44 = vadd.f32 %v2383_v21, %v2261_v43  ;;  %v2883_v21 = vld [vmem:[#allocation3 + $0x132] sm:$0xff] }
 0x333   : > { %v2112_v18 = vadd.f32 %v2086_v34, %v1953_v38  ;;  %3335 = vmatmul.msk.f32.gmra.mxu1 %vm1631_vm3, %v4853_v40  ;;  %3394 = vmatmul.msk.f32.gmra.mxu0 %vm1631_vm3, %v4853_v40 }
 0x334   : > { %3357 = vmatmul.msk.f32.gmra.mxu2 %vm1631_vm3, %v4891_v2  ;;  %3377 = vmatmul.msk.f32.gmra.mxu3 %vm1631_vm3, %v4673_v46 }
 0x335   : > { %v2262_v49 = vadd.f32 %v2236_v32, %v2112_v18 }
 0x337   : > { %v2092_v39 = vpop.f32.mrf.mxu2  ;;  %v2242_v11 = vpop.f32.mrf.mxu3 }
 0x338   : > { %v1955_v37 = vpop.f32.mrf.mxu1  ;;  %v2386_v31 = vpop.f32.mrf.mxu0 }
 0x339   : > { %v1956_v8 = vadd.f32 %v1955_v37, %v4865_v12  ;;  %v5079_v35 = vadd.f32 %v2386_v31, %v2262_v49  ;;  %v2402_v49 = vadd.f32 %v4965_v9, %v4963_v51  ;;  %v2403_v51 = vadd.f32 %v4977_v55, %v4975_v62 }
 0x33b   : > { %v2113_v7 = vadd.f32 %v2089_v30, %v1956_v8  ;;  %3336 = vmatmul.msk.f32.gmra.mxu1 %vm1631_vm3, %v4869_v14  ;;  %3395 = vmatmul.msk.f32.gmra.mxu0 %vm1631_vm3, %v4869_v14 }
 0x33c   : > { %3358 = vmatmul.msk.f32.gmra.mxu2 %vm1631_vm3, %v4909_v50  ;;  %3378 = vmatmul.msk.f32.gmra.mxu3 %vm1631_vm3, %v4941_v24 }
 0x33d   : > { %v2263_v46 = vadd.f32 %v2239_v52, %v2113_v7 }
 0x33f   : > { %v2095_v40 = vpop.f32.mrf.mxu2  ;;  %v2245_v2 = vpop.f32.mrf.mxu3 }
 0x340   : > { %v1958_v54 = vpop.f32.mrf.mxu1  ;;  %v2389_v12 = vpop.f32.mrf.mxu0 }
 0x341   : > { %v1959_v25 = vadd.f32 %v1958_v54, %v4879_v22  ;;  %v5090_v15 = vadd.f32 %v2389_v12, %v2263_v46 }
 0x343   : > { %v2114_v42 = vadd.f32 %v2092_v39, %v1959_v25  ;;  %3337 = vmatmul.msk.f32.gmra.mxu1 %vm1631_vm3, %v4889_v0  ;;  %3396 = vmatmul.msk.f32.gmra.mxu0 %vm1631_vm3, %v4889_v0 }
 0x344   : > { %3359 = vmatmul.msk.f32.gmra.mxu2 %vm1631_vm3, %v2583_v19  ;;  %3379 = vmatmul.msk.f32.gmra.mxu3 %vm1631_vm3, %v2733_v4 }
 0x345   : > { %v2264_v14 = vadd.f32 %v2242_v11, %v2114_v42 }
 0x347   : > { %v2098_v50 = vpop.f32.mrf.mxu2  ;;  %v2248_v24 = vpop.f32.mrf.mxu3 }
 0x348   : > { %v1961_v28 = vpop.f32.mrf.mxu1  ;;  %v2392_v22 = vpop.f32.mrf.mxu0 }
 0x349   : > { %v1962_v33 = vadd.f32 %v1961_v28, %v4899_v16  ;;  %v5099_v1 = vadd.f32 %v2392_v22, %v2264_v14  ;;  %v2404_v22 = vadd.f32 %v4989_v13, %v4987_v47 }
 0x34b   : > { %v2115_v41 = vadd.f32 %v2095_v40, %v1962_v33  ;;  %3338 = vmatmul.msk.f32.gmra.mxu1 %vm1631_vm3, %v4907_v61  ;;  %3397 = vmatmul.msk.f32.gmra.mxu0 %vm1631_vm3, %v4907_v61  ;;  %v2401_v61 = vadd.f32 %v4952_v20, %v4950_v27  ;;  %v5119_v27 = vld [vmem:[%s293_s6] ss:$0 sm:$0xff] }
 0x34d   : > { %v2265_v0 = vadd.f32 %v2245_v2, %v2115_v41 }
 0x34f   : > { %v2654_v29 = vpop.f32.mrf.mxu2  ;;  %v2804_v34 = vpop.f32.mrf.mxu3 }
 0x350   : > { %v1964_v32 = vpop.f32.mrf.mxu1  ;;  %v2395_v57 = vpop.f32.mrf.mxu0 }
 0x351   : > { %v1965_v3 = vadd.f32 %v1964_v32, %v4917_v45  ;;  %v5106_v53 = vadd.f32 %v2395_v57, %v2265_v0 }
 0x353   : > { %v2116_v16 = vadd.f32 %v2098_v50, %v1965_v3  ;;  %3339 = vmatmul.msk.f32.gmra.mxu1 %vm1631_vm3, %v2432_v10  ;;  %3398 = vmatmul.msk.f32.gmra.mxu0 %vm1631_vm3, %v2432_v10 }
 0x355   : > { %v2266_v48 = vadd.f32 %v2248_v24, %v2116_v16  ;;  %v2405_v16 = vadd.f32 %v5002_v17, %v5000_v63 }
 0x357   : > { %v2657_v43 = vpop.f32.mrf.mxu2  ;;  %v2807_v30 = vpop.f32.mrf.mxu3 }
 0x358   : > { %v2398_v52 = vpop.f32.mrf.mxu0  ;;  %v2503_v23 = vpop.f32.mrf.mxu1 }
 0x359   : > { %v5112_v45 = vadd.f32 %v2398_v52, %v2266_v48  ;;  %v2551_v38 = vadd.f32 %v2503_v23, %v2401_v61 }
 0x35b   : > { %v2702_v18 = vadd.f32 %v2654_v29, %v2551_v38  ;;  %3399 = vmatmul.msk.f32.gmra.mxu0 %vm1631_vm3, %v2883_v21 }
 0x35d   : > { %v2852_v37 = vadd.f32 %v2804_v34, %v2702_v18 }
 0x35f   : > { %v2660_v39 = vpop.f32.mrf.mxu2  ;;  %v2810_v11 = vpop.f32.mrf.mxu3 }
 0x360   : > { %v2506_v20 = vpop.f32.mrf.mxu1  ;;  %v2954_v31 = vpop.f32.mrf.mxu0 }
 0x361   : > { %v2552_v8 = vadd.f32 %v2506_v20, %v2402_v49  ;;  %v3002_v7 = vadd.f32 %v2954_v31, %v2852_v37  ;;  %v2406_v49 = vadd.f32 %v5013_v5, %v5011_v36 }
 0x363   : > { %v2703_v46 = vadd.f32 %v2657_v43, %v2552_v8  ;;  %v3022_v40 = vadd.f32 %v5119_v27, %v3002_v7 }
 0x365   : > { %v3038_v2 = vmax.f32 %v3022_v40, 0.0  ;;  %v2853_v25 = vadd.f32 %v2807_v30, %v2703_v46 }
 0x367   : > { %v3054_v9 = vpack.c.bf16 %v3038_v2, %v3038_v2  ;;  %v2663_v54 = vpop.f32.mrf.mxu2  ;;  %v2813_v12 = vpop.f32.mrf.mxu3  ;;  %v2407_v2 = vadd.f32 %v5026_v56, %v5024_v26 }
 0x368   : > { %v2509_v19 = vpop.f32.mrf.mxu1  ;;  %v2957_v4 = vpop.f32.mrf.mxu0 }
 0x369   : > { %3071 = vst.msk [vmem:[%s5126_s18] sm:$0xf] %vm3070_vm6, %v3054_v9  ;;  %v2553_v42 = vadd.f32 %v2509_v19, %v2403_v51  ;;  %v3003_v14 = vadd.f32 %v2957_v4, %v2853_v25 }
 0x36b   : > { %v2704_v50 = vadd.f32 %v2660_v39, %v2553_v42  ;;  %v3023_v24 = vadd.f32 %v5119_v27, %v3003_v14 }
 0x36d   : > { %v3039_v28 = vmax.f32 %v3023_v24, 0.0  ;;  %v2854_v41 = vadd.f32 %v2810_v11, %v2704_v50  ;;  %v2408_v50 = vadd.f32 %v5037_v6, %v5035_v60 }
 0x36f   : > { %v3055_v33 = vpack.c.bf16 %v3039_v28, %v3039_v28  ;;  %v2666_v62 = vpop.f32.mrf.mxu2  ;;  %v2816_v55 = vpop.f32.mrf.mxu3 }
 0x370   : > { %v2512_v0 = vpop.f32.mrf.mxu1  ;;  %v2960_v29 = vpop.f32.mrf.mxu0 }
 0x371   : > { %3072 = vst.msk [vmem:[%s5126_s18 + $0x4] sm:$0xf] %vm3070_vm6, %v3055_v33  ;;  %v2554_v34 = vadd.f32 %v2512_v0, %v2404_v22  ;;  %v3004_v32 = vadd.f32 %v2960_v29, %v2854_v41 }
 0x373   : > { %v2705_v57 = vadd.f32 %v2663_v54, %v2554_v34  ;;  %v3024_v3 = vadd.f32 %v5119_v27, %v3004_v32 }
 0x375   : > { %v3040_v10 = vmax.f32 %v3024_v3, 0.0  ;;  %v2855_v61 = vadd.f32 %v2813_v12, %v2705_v57 }
 0x377   : > { %v3056_v48 = vpack.c.bf16 %v3040_v10, %v3040_v10  ;;  %v2669_v47 = vpop.f32.mrf.mxu2  ;;  %v2819_v13 = vpop.f32.mrf.mxu3 }
 0x378   : > { %v2515_v43 = vpop.f32.mrf.mxu1  ;;  %v2963_v30 = vpop.f32.mrf.mxu0 }
 0x379   : > { %3073 = vst.msk [vmem:[%s5126_s18 + $0x8] sm:$0xf] %vm3070_vm6, %v3056_v48  ;;  %v2555_v52 = vadd.f32 %v2515_v43, %v2405_v16  ;;  %v3005_v23 = vadd.f32 %v2963_v30, %v2855_v61 }
 0x37b   : > { %v2706_v21 = vadd.f32 %v2666_v62, %v2555_v52  ;;  %v3025_v38 = vadd.f32 %v5119_v27, %v3005_v23 }
 0x37d   : > { %v3041_v18 = vmax.f32 %v3025_v38, 0.0  ;;  %v2856_v11 = vadd.f32 %v2816_v55, %v2706_v21 }
 0x37f   : > { %v3057_v39 = vpack.c.bf16 %v3041_v18, %v3041_v18  ;;  %v2672_v63 = vpop.f32.mrf.mxu2  ;;  %v2822_v17 = vpop.f32.mrf.mxu3 }
 0x380   : > { %v2518_v37 = vpop.f32.mrf.mxu1  ;;  %v2966_v20 = vpop.f32.mrf.mxu0 }
 0x381   : > { %3074 = vst.msk [vmem:[%s5126_s18 + $0xc] sm:$0xf] %vm3070_vm6, %v3057_v39  ;;  %v2556_v31 = vadd.f32 %v2518_v37, %v2406_v49  ;;  %v3006_v8 = vadd.f32 %v2966_v20, %v2856_v11 }
 0x383   : > { %v2707_v7 = vadd.f32 %v2669_v47, %v2556_v31  ;;  %v3026_v46 = vadd.f32 %v5119_v27, %v3006_v8 }
 0x385   : > { %v3042_v40 = vmax.f32 %v3026_v46, 0.0  ;;  %v2857_v9 = vadd.f32 %v2819_v13, %v2707_v7 }
 0x387   : > { %v3058_v51 = vpack.c.bf16 %v3042_v40, %v3042_v40  ;;  %v2675_v36 = vpop.f32.mrf.mxu2  ;;  %v2825_v5 = vpop.f32.mrf.mxu3 }
 0x388   : > { %v2521_v54 = vpop.f32.mrf.mxu1  ;;  %v2969_v12 = vpop.f32.mrf.mxu0 }
 0x389   : > { %3075 = vst.msk [vmem:[%s5126_s18 + $0x10] sm:$0xf] %vm3070_vm6, %v3058_v51  ;;  %v2557_v25 = vadd.f32 %v2521_v54, %v2407_v2  ;;  %v3007_v19 = vadd.f32 %v2969_v12, %v2857_v9 }
 0x38b   : > { %v2708_v4 = vadd.f32 %v2672_v63, %v2557_v25  ;;  %v3027_v42 = vadd.f32 %v5119_v27, %v3007_v19 }
 0x38d   : > { %v3043_v14 = vmax.f32 %v3027_v42, 0.0  ;;  %v2858_v28 = vadd.f32 %v2822_v17, %v2708_v4 }
 0x38f   : > { %v3059_v24 = vpack.c.bf16 %v3043_v14, %v3043_v14  ;;  %v2678_v26 = vpop.f32.mrf.mxu2  ;;  %v2828_v56 = vpop.f32.mrf.mxu3 }
 0x390   : > { %v2524_v22 = vpop.f32.mrf.mxu1  ;;  %v2972_v33 = vpop.f32.mrf.mxu0 }
 0x391   : > { %3076 = vst.msk [vmem:[%s5126_s18 + $0x14] sm:$0xf] %vm3070_vm6, %v3059_v24  ;;  %v2558_v62 = vadd.f32 %v2524_v22, %v2408_v50  ;;  %v3008_v55 = vadd.f32 %v2972_v33, %v2858_v28 }
 0x393   : > { %v2709_v41 = vadd.f32 %v2675_v36, %v2558_v62  ;;  %v3028_v0 = vadd.f32 %v5119_v27, %v3008_v55 }
 0x395   : > { %v3044_v29 = vmax.f32 %v3028_v0, 0.0  ;;  %v2859_v57 = vadd.f32 %v2825_v5, %v2709_v41 }
 0x397   : > { %v3060_v34 = vpack.c.bf16 %v3044_v29, %v3044_v29  ;;  %v2681_v32 = vpop.f32.mrf.mxu2  ;;  %v2831_v3 = vpop.f32.mrf.mxu3 }
 0x398   : > { %v2527_v60 = vpop.f32.mrf.mxu1  ;;  %v2975_v6 = vpop.f32.mrf.mxu0 }
 0x399   : > { %3077 = vst.msk [vmem:[%s5126_s18 + $0x18] sm:$0xf] %vm3070_vm6, %v3060_v34  ;;  %v2559_v10 = vadd.f32 %v2527_v60, %v5048_v58  ;;  %v3009_v16 = vadd.f32 %v2975_v6, %v2859_v57 }
 0x39b   : > { %v2710_v48 = vadd.f32 %v2678_v26, %v2559_v10  ;;  %v3029_v47 = vadd.f32 %v5119_v27, %v3009_v16 }
 0x39d   : > { %v3045_v13 = vmax.f32 %v3029_v47, 0.0  ;;  %v2860_v30 = vadd.f32 %v2828_v56, %v2710_v48 }
 0x39f   : > { %v3061_v61 = vpack.c.bf16 %v3045_v13, %v3045_v13  ;;  %v2684_v43 = vpop.f32.mrf.mxu2  ;;  %v2834_v18 = vpop.f32.mrf.mxu3 }
 0x3a0   : > { %v2530_v52 = vpop.f32.mrf.mxu1  ;;  %v2978_v23 = vpop.f32.mrf.mxu0 }
 0x3a1   : > { %3078 = vst.msk [vmem:[%s5126_s18 + $0x1c] sm:$0xf] %vm3070_vm6, %v3061_v61  ;;  %v2560_v21 = vadd.f32 %v2530_v52, %v5058_v59  ;;  %v3010_v38 = vadd.f32 %v2978_v23, %v2860_v30 }
 0x3a3   : > { %v2711_v49 = vadd.f32 %v2681_v32, %v2560_v21  ;;  %v3030_v58 = vadd.f32 %v5119_v27, %v3010_v38 }
 0x3a5   : > { %v3046_v39 = vmax.f32 %v3030_v58, 0.0  ;;  %v2861_v17 = vadd.f32 %v2831_v3, %v2711_v49 }
 0x3a7   : > { %v3062_v63 = vpack.c.bf16 %v3046_v39, %v3046_v39  ;;  %v2687_v20 = vpop.f32.mrf.mxu2  ;;  %v2837_v46 = vpop.f32.mrf.mxu3 }
 0x3a8   : > { %v2533_v11 = vpop.f32.mrf.mxu1  ;;  %v2981_v37 = vpop.f32.mrf.mxu0 }
 0x3a9   : > { %3079 = vst.msk [vmem:[%s5126_s18 + $0x20] sm:$0xf] %vm3070_vm6, %v3062_v63  ;;  %v2561_v31 = vadd.f32 %v2533_v11, %v5068_v44  ;;  %v3011_v8 = vadd.f32 %v2981_v37, %v2861_v17 }
 0x3ab   : > { %v2712_v7 = vadd.f32 %v2684_v43, %v2561_v31  ;;  %v3031_v59 = vadd.f32 %v5119_v27, %v3011_v8 }
 0x3ad   : > { %v3047_v40 = vmax.f32 %v3031_v59, 0.0  ;;  %v2862_v51 = vadd.f32 %v2834_v18, %v2712_v7 }
 0x3af   : > { %v3063_v2 = vpack.c.bf16 %v3047_v40, %v3047_v40  ;;  %v2690_v12 = vpop.f32.mrf.mxu2  ;;  %v2840_v4 = vpop.f32.mrf.mxu3 }
 0x3b0   : > { %v2536_v36 = vpop.f32.mrf.mxu1  ;;  %v2984_v5 = vpop.f32.mrf.mxu0 }
 0x3b1   : > { %3080 = vst.msk [vmem:[%s5126_s18 + $0x24] sm:$0xf] %vm3070_vm6, %v3063_v2  ;;  %v2562_v9 = vadd.f32 %v2536_v36, %v5079_v35  ;;  %v3012_v54 = vadd.f32 %v2984_v5, %v2862_v51 }
 0x3b3   : > { %v2713_v25 = vadd.f32 %v2687_v20, %v2562_v9  ;;  %v3032_v44 = vadd.f32 %v5119_v27, %v3012_v54 }
 0x3b5   : > { %v3048_v19 = vmax.f32 %v3032_v44, 0.0  ;;  %v2863_v14 = vadd.f32 %v2837_v46, %v2713_v25 }
 0x3b7   : > { %v3064_v42 = vpack.c.bf16 %v3048_v19, %v3048_v19  ;;  %v2693_v22 = vpop.f32.mrf.mxu2  ;;  %v2843_v32 = vpop.f32.mrf.mxu3 }
 0x3b8   : > { %v2539_v50 = vpop.f32.mrf.mxu1  ;;  %v2987_v24 = vpop.f32.mrf.mxu0 }
 0x3b9   : > { %3081 = vst.msk [vmem:[%s5126_s18 + $0x28] sm:$0xf] %vm3070_vm6, %v3064_v42  ;;  %v2563_v26 = vadd.f32 %v2539_v50, %v5090_v15  ;;  %v3013_v56 = vadd.f32 %v2987_v24, %v2863_v14 }
 0x3bb   : > { %v2714_v28 = vadd.f32 %v2690_v12, %v2563_v26  ;;  %v3033_v35 = vadd.f32 %v5119_v27, %v3013_v56 }
 0x3bd   : > { %v3049_v33 = vmax.f32 %v3033_v35, 0.0  ;;  %v2864_v55 = vadd.f32 %v2840_v4, %v2714_v28 }
 0x3bf   : > { %v3065_v62 = vpack.c.bf16 %v3049_v33, %v3049_v33  ;;  %v2696_v6 = vpop.f32.mrf.mxu2  ;;  %v2846_v43 = vpop.f32.mrf.mxu3 }
 0x3c0   : > { %v2542_v41 = vpop.f32.mrf.mxu1  ;;  %v2990_v0 = vpop.f32.mrf.mxu0 }
 0x3c1   : > { %3082 = vst.msk [vmem:[%s5126_s18 + $0x2c] sm:$0xf] %vm3070_vm6, %v3065_v62  ;;  %v2564_v29 = vadd.f32 %v2542_v41, %v5099_v1  ;;  %v3014_v34 = vadd.f32 %v2990_v0, %v2864_v55 }
 0x3c3   : > { %v2715_v57 = vadd.f32 %v2693_v22, %v2564_v29  ;;  %v3034_v15 = vadd.f32 %v5119_v27, %v3014_v34 }
 0x3c5   : > { %v3050_v60 = vmax.f32 %v3034_v15, 0.0  ;;  %v2865_v10 = vadd.f32 %v2843_v32, %v2715_v57 }
 0x3c7   : > { %v3066_v3 = vpack.c.bf16 %v3050_v60, %v3050_v60  ;;  %v2699_v21 = vpop.f32.mrf.mxu2  ;;  %v2849_v63 = vpop.f32.mrf.mxu3 }
 0x3c8   : > { %v2545_v16 = vpop.f32.mrf.mxu1  ;;  %v2993_v48 = vpop.f32.mrf.mxu0 }
 0x3c9   : > { %3083 = vst.msk [vmem:[%s5126_s18 + $0x30] sm:$0xf] %vm3070_vm6, %v3066_v3  ;;  %v2565_v47 = vadd.f32 %v2545_v16, %v5106_v53  ;;  %v3015_v13 = vadd.f32 %v2993_v48, %v2865_v10 }
 0x3cb   : > { %v2716_v61 = vadd.f32 %v2696_v6, %v2565_v47  ;;  %v3035_v1 = vadd.f32 %v5119_v27, %v3015_v13 }
 0x3cd   : > { %v3051_v30 = vmax.f32 %v3035_v1, 0.0  ;;  %v2866_v23 = vadd.f32 %v2846_v43, %v2716_v61 }
 0x3cf   : > { %v3067_v52 = vpack.c.bf16 %v3051_v30, %v3051_v30 }
 0x3d0   : > { %v2548_v38 = vpop.f32.mrf.mxu1  ;;  %v2996_v18 = vpop.f32.mrf.mxu0 }
 0x3d1   : > { %3084 = vst.msk [vmem:[%s5126_s18 + $0x34] sm:$0xf] %vm3070_vm6, %v3067_v52  ;;  %v2566_v49 = vadd.f32 %v2548_v38, %v5112_v45  ;;  %v3016_v58 = vadd.f32 %v2996_v18, %v2866_v23 }
 0x3d3   : > { %v3036_v53 = vadd.f32 %v5119_v27, %v3016_v58  ;;  %v2717_v39 = vadd.f32 %v2699_v21, %v2566_v49 }
 0x3d5   : > { %v3052_v17 = vmax.f32 %v3036_v53, 0.0  ;;  %v2867_v37 = vadd.f32 %v2849_v63, %v2717_v39 }
 0x3d7   : > { %v3068_v11 = vpack.c.bf16 %v3052_v17, %v3052_v17 }
 0x3d8   : > { %v2999_v20 = vpop.f32.mrf.mxu0 }
 0x3d9   : > { %3085 = vst.msk [vmem:[%s5126_s18 + $0x38] sm:$0xf] %vm3070_vm6, %v3068_v11  ;;  %v3017_v31 = vadd.f32 %v2999_v20, %v2867_v37 }
 0x3db   : > { %v3037_v8 = vadd.f32 %v5119_v27, %v3017_v31 }
 0x3dd   : > { %v3053_v7 = vmax.f32 %v3037_v8, 0.0 }
 0x3df   : > { %v3069_v59 = vpack.c.bf16 %v3053_v7, %v3053_v7 }
 0x3e1   : > { %3086 = vst.msk [vmem:[%s5126_s18 + $0x3c] sm:$0xf] %vm3070_vm6, %v3069_v59 }
 0x3e2 PF: > { %p18_p7 = scmp.ge.s32.totalorder %s3673_s23, 4   ;;  %s5241_s18 = smov %s3607_s19 }
 0x3e3   : > { %s5242_s19 = smov %s3611_s20  ;;  %s5243_s20 = smov %s3683_s26 }
 0x3e4   : > { %s5244_s21 = smov %s3673_s23  ;;  %20 = sbr.rel (!%p18_p7) target bundleno = 5 (0x5), region = 124 }
 0x3e9   :  { %3108 = vsyncpa [#allocation5], 1 }
 0x3ea   :  { %3110 = vsyncpa [#allocation5 + $0x1], 1 }
 0x3eb   :  { %3111 = vsyncpa [#allocation7], 1 }
 0x3ec   :  { %3113 = vsyncpa [#allocation7 + $0x1], 1 }

</bundles_post_ra>
